<compile_context>
chip_gen: v5e
topology: v5e:2x2
jax: 0.10.0
libtpu: 0.0.40
codegen_flags: <defaults>
</compile_context>

<pallas_src>
import functools
import math

import jax
import jax.numpy as jnp
from jax.experimental import pallas as pl
from jax.experimental.pallas import tpu as pltpu

# ----------------------------- config (small) --------------------------------
OUT_SIZE = 16
LOG_SIZE = 4                      # log2(out_size)
STYLE_DIM = 64                    # num_style_feat (512 in full model)
N_LATENT = 2 * LOG_SIZE - 2       # 6 W+ vectors (18 in full model)
CHANNELS = {4: 32, 8: 32, 16: 16}

_VMEM_LIMIT = 32 * 1024 * 1024    # safe on v5e/v6e/v7x

# StyleGAN2 resample kernel (1,3,3,1) -> normalized 4x4 FIR; *4 for up-factor 2
_k1 = jnp.array([1.0, 3.0, 3.0, 1.0], jnp.float32)
FIR_BASE = jnp.outer(_k1, _k1)
FIR_BASE = FIR_BASE / jnp.sum(FIR_BASE)
FIR_X4 = FIR_BASE * 4.0


def _round_up(x, m):
    return ((x + m - 1) // m) * m


# ----------------------------- the fused Pallas kernel -----------------------
def _conv_mm_kernel(*refs, kk, offs, lout, has_s, has_cs, has_bias, has_row,
                    has_dense, act, neg_slope, act_scale):
    """One fused conv-as-matmul step (per sub-pixel phase grid point):

        acc = sum_t (A[p,t] * s) @ B[:, offs[t] : offs[t]+lout]     (MXU, f32)
        out = act(acc * col_scale + bias + row[p] + dense)          (epilogue)

    A: (P, kk, OC, KA) bf16 static weights; B: (KB, LB) bf16 flattened padded
    input (resident); s: (1, KA) per-input-channel modulation; col_scale /
    bias: (OC, 1); row: (P, 1, lout) noise / fc row; dense: (OC, lout) skip.
    """
    it = iter(refs)
    a_ref = next(it)
    b_ref = next(it)
    s_ref = next(it) if has_s else None
    cs_ref = next(it) if has_cs else None
    bias_ref = next(it) if has_bias else None
    row_ref = next(it) if has_row else None
    dense_ref = next(it) if has_dense else None
    o_ref = next(it)

    acc = None
    for t in range(kk):
        a_t = a_ref[0, t]                                   # (OC, KA) bf16
        if has_s:                                           # style modulation
            a_t = (a_t.astype(jnp.float32) * s_ref[...]).astype(jnp.bfloat16)
        b_t = b_ref[:, offs[t]:offs[t] + lout]              # shifted tap window
        part = jnp.dot(a_t, b_t, preferred_element_type=jnp.float32)
        acc = part if acc is None else acc + part
    if has_cs:
        acc = acc * cs_ref[...]                             # demodulation
    if has_bias:
        acc = acc + bias_ref[...]                           # per-OC bias
    if has_row:
        acc = acc + row_ref[0]                              # noise / row bias
    if has_dense:
        acc = acc + dense_ref[...]                          # ToRGB dense skip
    if act == "lrelu":
        acc = jnp.where(acc >= 0.0, acc, acc * neg_slope) * act_scale
    o_ref[0] = acc.astype(o_ref.dtype)


def fused_matmul(a4, b2, *, offs, lout, s=None, col_scale=None, bias=None,
                 row=None, dense=None, act="none", neg_slope=0.2,
                 act_scale=1.0, out_dtype=jnp.bfloat16):
    """Dispatch one fused conv/matmul; grid axis = sub-pixel phase P."""
    P, KK, OC, KA = a4.shape
    KB, LB = b2.shape
    assert lout % 128 == 0 and max(offs) + lout <= LB and len(offs) == KK

    operands = [a4, b2]
    in_specs = [pl.BlockSpec((1, KK, OC, KA), lambda p: (p, 0, 0, 0)),
                pl.BlockSpec((KB, LB), lambda p: (0, 0))]      # resident
    if s is not None:
        operands.append(jnp.asarray(s, jnp.float32).reshape(1, KA))
        in_specs.append(pl.BlockSpec((1, KA), lambda p: (0, 0)))
    if col_scale is not None:
        operands.append(jnp.asarray(col_scale, jnp.float32).reshape(OC, 1))
        in_specs.append(pl.BlockSpec((OC, 1), lambda p: (0, 0)))
    if bias is not None:
        operands.append(jnp.asarray(bias, jnp.float32).reshape(OC, 1))
        in_specs.append(pl.BlockSpec((OC, 1), lambda p: (0, 0)))
    if row is not None:
        operands.append(jnp.asarray(row, jnp.float32).reshape(P, 1, lout))
        in_specs.append(pl.BlockSpec((1, 1, lout), lambda p: (p, 0, 0)))
    if dense is not None:
        operands.append(jnp.asarray(dense, jnp.float32).reshape(OC, lout))
        in_specs.append(pl.BlockSpec((OC, lout), lambda p: (0, 0)))

    kern = functools.partial(
        _conv_mm_kernel, kk=KK, offs=tuple(int(o) for o in offs), lout=lout,
        has_s=s is not None, has_cs=col_scale is not None,
        has_bias=bias is not None, has_row=row is not None,
        has_dense=dense is not None, act=act, neg_slope=neg_slope,
        act_scale=act_scale)

    return pl.pallas_call(
        kern,
        out_shape=jax.ShapeDtypeStruct((P, OC, lout), out_dtype),
        grid=(P,),
        in_specs=in_specs,
        out_specs=pl.BlockSpec((1, OC, lout), lambda p: (p, 0, 0)),
        compiler_params=pltpu.CompilerParams(
            dimension_semantics=("parallel",),
            vmem_limit_bytes=_VMEM_LIMIT),
    )(*operands)


# ----------------------- stride-1 conv without im2col ------------------------
def conv_same_fused(x3, a4, k, *, s=None, col_scale=None, bias=None,
                    row_flat=None, dense_hw=None, act="none", neg_slope=0.2,
                    act_scale=1.0, out_dtype=jnp.bfloat16):
    """Stride-1 'same' conv on a (C,H,W) activation as ONE fused Pallas kernel.

    The k*k taps are read inside the kernel as statically shifted windows of
    the flattened zero-padded input (length H*(W+2p) per tap); the garbage
    columns produced at the horizontal wrap positions are dropped afterwards.
    """
    C, H, W = x3.shape
    P, KK, OC, KA = a4.shape
    assert KK == k * k and KA == C
    pad = k // 2
    Hp, Wp = H + 2 * pad, W + 2 * pad
    lout = _round_up(H * Wp, 128)
    offs = tuple(i * Wp + j for i in range(k) for j in range(k))
    lanes = _round_up(offs[-1] + lout, 128)
    xp = jnp.pad(x3, ((0, 0), (pad, pad), (pad, pad))).reshape(C, Hp * Wp)
    b2 = jnp.pad(xp, ((0, 0), (0, lanes - Hp * Wp)))
    dense = None
    if dense_hw is not None:
        assert k == 1 and dense_hw.shape[0] == OC
        dense = jnp.pad(dense_hw.reshape(OC, H * W), ((0, 0), (0, lout - H * W)))
    if row_flat is not None:
        assert row_flat.shape == (P, lout)
    out = fused_matmul(a4, b2, offs=offs, lout=lout, s=s, col_scale=col_scale,
                       bias=bias, row=row_flat, dense=dense, act=act,
                       neg_slope=neg_slope, act_scale=act_scale,
                       out_dtype=out_dtype)                         # (P,OC,lout)
    out = out[:, :, :H * Wp].reshape(P, OC, H, Wp)[:, :, :, :W]
    return out                                                      # (P,OC,H,W)


# --------------------- folded upsample (conv_transpose + FIR) ----------------
def upsample_phase_weights(w, fir):
    """Fold conv_transpose2d(stride=2, k=3) + 4x4 FIR smooth into 4 stride-1
    3x3 sub-pixel phase kernels -> (4, OC, IC, 3, 3). Runs once at prepare."""
    OC, IC, k, _ = w.shape
    kf = fir.shape[0]
    G = jnp.zeros((OC, IC, k + kf - 1, k + kf - 1), jnp.float32)
    for a in range(kf):
        for b in range(kf):
            G = G.at[:, :, a:a + k, b:b + k].add(fir[a, b] * w)
    phases = []
    for r in (0, 1):
        for c in (0, 1):
            # taps G[(4+r)-2t, (4+c)-2s] for t,s in 0..2
            phases.append(G[:, :, r::2, c::2][:, :, ::-1, ::-1])
    return jnp.stack(phases, axis=0)


def upsample2_fir(x, fir):
    """UpFirDnUpsample(factor=2) on (C,H,W) via 4-phase shifted adds (3-ch skip)."""
    C, H, W = x.shape
    xp = jnp.pad(x, ((0, 0), (1, 1), (1, 1)))

    def sh(dr, dc):
        return xp[:, 1 + dr:1 + dr + H, 1 + dc:1 + dc + W]

    taps = {0: ((3, -1), (1, 0)), 1: ((2, 0), (0, 1))}   # (fir index, x offset)
    phases = []
    for r in (0, 1):
        for c in (0, 1):
            acc = jnp.zeros_like(x)
            for (ui, dr) in taps[r]:
                for (vi, dc) in taps[c]:
                    acc = acc + fir[ui, vi] * sh(dr, dc)
            phases.append(acc)
    out = jnp.stack(phases, axis=1)                       # (C, 4(r,c), H, W)
    out = out.reshape(C, 2, 2, H, W).transpose(0, 3, 1, 4, 2)
    return out.reshape(C, 2 * H, 2 * W)


# ----------------------------- StyleGAN2 decoder pieces ----------------------
def mod_style(prep_c, style):
    # EqualLinear modulation: tiny (STYLE_DIM x IC) -> stays in plain XLA.
    return prep_c["mod_w_s"] @ style + prep_c["mod_b"]     # (IC,)


def style_conv_fused(x3, sc, style):
    """ModulatedConv2d(+demod) + noise + bias + FusedLeakyReLU, fully fused.

    Modulation is a per-IC scale applied to the static weight inside the
    kernel; demodulation is a per-OC column scale computed from the
    precomputed W^2 table (exactly rsqrt(sum((scale*w*s)^2)+1e-8))."""
    s = mod_style(sc, style)                               # (IC,)
    demod = jax.lax.rsqrt(sc["w2"] @ (s * s) + 1e-8)       # (OC,)
    out = conv_same_fused(x3, sc["a4"], 3, s=s, col_scale=demod,
                          bias=sc["act_b"], row_flat=sc["noise_row"],
                          act="lrelu", act_scale=math.sqrt(2.0))
    P, OC, H, W = out.shape
    if P == 4:                                             # folded upsample conv
        out = out.reshape(2, 2, OC, H, W).transpose(2, 3, 0, 4, 1)
        return out.reshape(OC, 2 * H, 2 * W)               # pixel shuffle (bf16)
    return out[0]


def to_rgb_fused(x3, tr, style, skip=None):
    s = mod_style(tr, style)                               # (IC,)
    dense = None
    if skip is not None:
        up = upsample2_fir(skip, FIR_X4)                   # (3, H, W) f32
        oc_pad = tr["a4"].shape[2]
        dense = jnp.pad(up, ((0, oc_pad - 3), (0, 0), (0, 0)))
    out = conv_same_fused(x3, tr["a4"], 1, s=s, bias=tr["bias"],
                          dense_hw=dense, act="none", out_dtype=jnp.float32)
    return out[0, :3]                                      # (3, H, W) f32


def decoder_forward(dec, lat):
    """StyleGAN2Generator forward (input_is_latent=True, randomize_noise=False,
    batch 1 to match the reference's latent_codes[0].unsqueeze(0))."""
    out = dec["constant"]                                  # (32, 4, 4) bf16
    out = style_conv_fused(out, dec["conv1"], lat[0])
    skip = to_rgb_fused(out, dec["to_rgb1"], lat[1])
    i = 1
    for layer in dec["layers"]:
        out = style_conv_fused(out, layer["conv_up"], lat[i])
        out = style_conv_fused(out, layer["conv"], lat[i + 1])
        skip = to_rgb_fused(out, layer["to_rgb"], lat[i + 2], skip)
        i += 2
    return skip                                            # (3, H, W) f32


# ----------------------------- encoder (pSp stand-in) ------------------------
def im2col(x, k, stride, pad):
    # (N,C,H,W) -> (C*k*k, N*Ho*Wo), dtype preserved (bf16 activations).
    N, C, H, W = x.shape
    xp = jnp.pad(x, ((0, 0), (0, 0), (pad, pad), (pad, pad)))
    Ho = (H + 2 * pad - k) // stride + 1
    Wo = (W + 2 * pad - k) // stride + 1
    cols = [xp[:, :, i:i + stride * Ho:stride, j:j + stride * Wo:stride]
            for i in range(k) for j in range(k)]
    patches = jnp.stack(cols, axis=0).transpose(2, 0, 1, 3, 4)  # (C,kk,N,Ho,Wo)
    return patches.reshape(C * k * k, N * Ho * Wo), Ho, Wo


def enc_conv(h, a4, bias, stride):
    N = h.shape[0]
    OC = a4.shape[2]
    patches, Ho, Wo = im2col(h, 3, stride, 1)
    L = N * Ho * Wo
    Lp = _round_up(L, 128)
    b2 = jnp.pad(patches, ((0, 0), (0, Lp - L)))
    out = fused_matmul(a4, b2, offs=(0,), lout=Lp, bias=bias,
                       act="lrelu", act_scale=1.0, out_dtype=jnp.bfloat16)
    return out[0, :, :L].reshape(OC, N, Ho, Wo).transpose(1, 0, 2, 3)


def encoder_forward(prep, x):
    e = prep["enc"]
    h = x.astype(jnp.bfloat16)
    h = enc_conv(h, e["c1_a"], e["c1_b"], 1)
    h = enc_conv(h, e["c2_a"], e["c2_b"], 2)
    h = enc_conv(h, e["c3_a"], e["c3_b"], 2)
    B = h.shape[0]
    hf = h.reshape(B, -1).T                                # (F, B) bf16
    Bp = _round_up(B, 128)
    b2 = jnp.pad(hf, ((0, 0), (0, Bp - B)))
    out = fused_matmul(e["fc_a"], b2, offs=(0,), lout=Bp, bias=e["fc_b"],
                       act="none", out_dtype=jnp.float32)
    codes = out[0, :, :B].T                                # (B, N_LATENT*STYLE)
    return codes.reshape(B, N_LATENT, STYLE_DIM)


def gfpgan_forward(prep, x):
    """GFPGANv1.forward: get_latents (encoder + latent_avg) -> StyleGAN2
    decoder on sample 0 only -> returns (imgs, latents)."""
    codes = encoder_forward(prep, x)
    latent = codes + prep["latent_avg"][None]              # start_from_latent_avg
    img = decoder_forward(prep["dec"], latent[0])
    return img[None], latent[0:1]


# ------------------- one-time static operand preparation ---------------------
def prepare(params):
    """Hoist ALL static prep (fold/pad/cast) out of the per-call path: runs once."""
    lin_scale = 1.0 / math.sqrt(STYLE_DIM)

    def conv_a4(w):                      # (OC,IC,k,k) -> (1, k*k, OC, IC) bf16
        OC, IC, k, _ = w.shape
        return (w.transpose(2, 3, 0, 1).reshape(1, k * k, OC, IC)
                .astype(jnp.bfloat16))

    def enc_a4(w):                       # (OC,IC,3,3) -> (1, 1, OC, IC*9) bf16
        OC = w.shape[0]
        return w.reshape(1, 1, OC, -1).astype(jnp.bfloat16)

    p = {}
    e = params["enc"]
    p["enc"] = {"c1_a": enc_a4(e["c1_w"]), "c1_b": e["c1_b"],
                "c2_a": enc_a4(e["c2_w"]), "c2_b": e["c2_b"],
                "c3_a": enc_a4(e["c3_w"]), "c3_b": e["c3_b"],
                "fc_a": e["fc_w"].reshape((1, 1) + e["fc_w"].shape)
                .astype(jnp.bfloat16),
                "fc_b": e["fc_b"]}
    p["latent_avg"] = params["latent_avg"]

    dec = params["dec"]
    noises = dec["noises"]

    def style_conv_prep(sc, noise, upsample, in_hw):
        w = sc["mc"]["weight"][0]                          # (OC, IC, k, k)
        OC, IC, k, _ = w.shape
        scale = 1.0 / math.sqrt(IC * k * k)
        wb = scale * w                                     # scale folded -> static
        w2 = jnp.sum(wb * wb, axis=(2, 3))                 # (OC, IC) demod table
        H, W = in_hw
        Wp = W + 2 * (k // 2)
        lout = _round_up(H * Wp, 128)
        if upsample:
            a4 = upsample_phase_weights(wb, FIR_X4)        # (4, OC, IC, 3, 3)
            a4 = (a4.transpose(0, 3, 4, 1, 2).reshape(4, 9, OC, IC)
                  .astype(jnp.bfloat16))
            nz = sc["noise_w"] * noise[0, 0]               # (2H, 2W)
            rows = jnp.stack([nz[r::2, c::2] for r in (0, 1) for c in (0, 1)])
        else:
            a4 = conv_a4(wb)                               # (1, 9, OC, IC)
            rows = (sc["noise_w"] * noise[0, 0])[None]     # (1, H, W)
        rows = jnp.pad(rows, ((0, 0), (0, 0), (0, Wp - W))).reshape(-1, H * Wp)
        rows = jnp.pad(rows, ((0, 0), (0, lout - H * Wp)))
        return {"a4": a4, "w2": w2,
                "mod_w_s": sc["mc"]["mod_w"] * lin_scale,
                "mod_b": sc["mc"]["mod_b"],
                "act_b": sc["act_b"], "noise_row": rows}

    def to_rgb_prep(tr):
        w = tr["mc"]["weight"][0]                          # (3, IC, 1, 1)
        OC, IC = w.shape[0], w.shape[1]
        OCp = _round_up(OC, 8)                             # pad OC=3 -> 8 rows
        a4 = conv_a4((1.0 / math.sqrt(IC)) * w)
        a4 = jnp.pad(a4, ((0, 0), (0, 0), (0, OCp - OC), (0, 0)))
        bias = jnp.pad(tr["bias"].reshape(-1), (0, OCp - OC))
        return {"a4": a4, "bias": bias,
                "mod_w_s": tr["mc"]["mod_w"] * lin_scale,
                "mod_b": tr["mc"]["mod_b"]}

    d = {"constant": dec["constant"][0].astype(jnp.bfloat16)}
    d["conv1"] = style_conv_prep(dec["conv1"], noises[0], False, (4, 4))
    d["to_rgb1"] = to_rgb_prep(dec["to_rgb1"])
    layers = []
    ni, res = 1, 8
    for layer in dec["layers"]:
        layers.append({
            "conv_up": style_conv_prep(layer["conv_up"], noises[ni], True,
                                       (res // 2, res // 2)),
            "conv": style_conv_prep(layer["conv"], noises[ni + 1], False,
                                    (res, res)),
            "to_rgb": to_rgb_prep(layer["to_rgb"]),
        })
        ni += 2
        res *= 2
    d["layers"] = layers
    p["dec"] = d
    return p


# ----------------------------- deterministic params --------------------------
def init_params(key):
    keys = iter(jax.random.split(key, 256))

    def nrm(shape, std=1.0):
        return std * jax.random.normal(next(keys), shape, jnp.float32)

    def mod_conv_p(oc, ic, k):
        return {"weight": nrm((1, oc, ic, k, k)),
                "mod_w": nrm((ic, STYLE_DIM)),
                "mod_b": jnp.ones((ic,), jnp.float32)}

    p = {}
    p["enc"] = {
        "c1_w": nrm((16, 3, 3, 3), 0.1), "c1_b": nrm((16,), 0.01),
        "c2_w": nrm((32, 16, 3, 3), 0.1), "c2_b": nrm((32,), 0.01),
        "c3_w": nrm((64, 32, 3, 3), 0.1), "c3_b": nrm((64,), 0.01),
        "fc_w": nrm((N_LATENT * STYLE_DIM, 64 * 4 * 4), 0.05),
        "fc_b": nrm((N_LATENT * STYLE_DIM,), 0.01),
    }
    p["latent_avg"] = nrm((N_LATENT, STYLE_DIM), 0.1)

    dec = {"constant": nrm((1, CHANNELS[4], 4, 4)),
           "conv1": {"mc": mod_conv_p(CHANNELS[4], CHANNELS[4], 3),
                     "noise_w": nrm((), 0.1), "act_b": nrm((CHANNELS[4],), 0.01)},
           "to_rgb1": {"mc": mod_conv_p(3, CHANNELS[4], 1),
                       "bias": nrm((1, 3, 1, 1), 0.01)},
           "layers": []}
    in_ch = CHANNELS[4]
    for res_log in range(3, LOG_SIZE + 1):
        out_ch = CHANNELS[2 ** res_log]
        dec["layers"].append({
            "conv_up": {"mc": mod_conv_p(out_ch, in_ch, 3),
                        "noise_w": nrm((), 0.1), "act_b": nrm((out_ch,), 0.01)},
            "conv": {"mc": mod_conv_p(out_ch, out_ch, 3),
                     "noise_w": nrm((), 0.1), "act_b": nrm((out_ch,), 0.01)},
            "to_rgb": {"mc": mod_conv_p(3, out_ch, 1),
                       "bias": nrm((1, 3, 1, 1), 0.01)},
        })
        in_ch = out_ch
    noises = [nrm((1, 1, 4, 4))]
    for res_log in range(3, LOG_SIZE + 1):
        for _ in range(2):
            noises.append(nrm((1, 1, 2 ** res_log, 2 ** res_log)))
    dec["noises"] = noises
    p["dec"] = dec
    return p


# ----------------------------- main -------------------------------------------
if __name__ == "__main__":
    key = jax.random.PRNGKey(0)
    kp, kx = jax.random.split(key)
    params = init_params(kp)
    prep = prepare(params)        # one-time: fold/pad/bf16-cast static operands
    x = jax.random.normal(kx, (2, 3, OUT_SIZE, OUT_SIZE), jnp.float32)

    fwd = jax.jit(gfpgan_forward)
    imgs, latents = fwd(prep, x)
    jax.block_until_ready((imgs, latents))

    assert imgs.shape == (1, 3, OUT_SIZE, OUT_SIZE), imgs.shape
    assert latents.shape == (1, N_LATENT, STYLE_DIM), latents.shape
    assert bool(jnp.all(jnp.isfinite(imgs)))
    print("KERNEL_OK")
</pallas_src>

<mosaic_0001>
module attributes {stable_mosaic.version = 11 : i64} {
  func.func @_conv_mm_kernel(%arg0: i32, %arg1: memref<1x1x16x27xbf16, #tpu.memory_space<vmem>>, %arg2: memref<27x512xbf16, #tpu.memory_space<vmem>>, %arg3: memref<16x1xf32, #tpu.memory_space<vmem>>, %arg4: memref<1x16x512xbf16, #tpu.memory_space<vmem>>) attributes {dimension_semantics = [#tpu.dimension_semantics<parallel>], iteration_bounds = array<i64: 1>, scalar_prefetch = 0 : i64, scratch_operands = 0 : i64, tpu.core_type = #tpu.core_type<tc>, window_params = [{transform_indices = @transform_0, window_bounds = array<i64: 1, 1, 16, 27>}, {pipeline_mode = #tpu.pipeline_mode<synchronous>, transform_indices = @transform_1, window_bounds = array<i64: 27, 512>}, {pipeline_mode = #tpu.pipeline_mode<synchronous>, transform_indices = @transform_2, window_bounds = array<i64: 16, 1>}, {transform_indices = @transform_3, window_bounds = array<i64: 1, 16, 512>}]} {
    %c0 = arith.constant 0 : index
    %c0_0 = arith.constant 0 : index
    %c0_1 = arith.constant 0 : index
    %c0_2 = arith.constant 0 : index
    %0 = vector.load %arg1[%c0, %c0_0, %c0_1, %c0_2] : memref<1x1x16x27xbf16, #tpu.memory_space<vmem>>, vector<1x1x16x27xbf16>
    %1 = vector.shape_cast %0 : vector<1x1x16x27xbf16> to vector<16x27xbf16>
    %c0_3 = arith.constant 0 : index
    %c0_4 = arith.constant 0 : index
    %2 = vector.load %arg2[%c0_3, %c0_4] : memref<27x512xbf16, #tpu.memory_space<vmem>>, vector<27x512xbf16>
    %cst = arith.constant dense<0.000000e+00> : vector<16x512xf32>
    %3 = tpu.matmul %1, %2, %cst {dimension_numbers = #tpu.dot_dimension_numbers<[1], [0], [0], [1], [0, 0, 1, 1], [], []>} : vector<16x27xbf16>, vector<27x512xbf16>, vector<16x512xf32> -> vector<16x512xf32>
    %c0_5 = arith.constant 0 : index
    %c0_6 = arith.constant 0 : index
    %4 = vector.load %arg3[%c0_5, %c0_6] : memref<16x1xf32, #tpu.memory_space<vmem>>, vector<16x1xf32>
    %5 = vector.broadcast %4 : vector<16x1xf32> to vector<16x512xf32>
    %6 = arith.addf %3, %5 : vector<16x512xf32>
    %cst_7 = arith.constant 0.000000e+00 : f32
    %7 = vector.broadcast %cst_7 : f32 to vector<16x512xf32>
    %8 = arith.cmpf oge, %6, %7 : vector<16x512xf32>
    %cst_8 = arith.constant 2.000000e-01 : f32
    %9 = vector.broadcast %cst_8 : f32 to vector<16x512xf32>
    %10 = arith.mulf %6, %9 : vector<16x512xf32>
    %11 = arith.select %8, %6, %10 : vector<16x512xi1>, vector<16x512xf32>
    %cst_9 = arith.constant 1.000000e+00 : f32
    %12 = vector.broadcast %cst_9 : f32 to vector<16x512xf32>
    %13 = arith.mulf %11, %12 : vector<16x512xf32>
    %14 = arith.truncf %13 : vector<16x512xf32> to vector<16x512xbf16>
    %c0_10 = arith.constant 0 : index
    %c0_11 = arith.constant 0 : index
    %c0_12 = arith.constant 0 : index
    %15 = vector.load %arg4[%c0_10, %c0_11, %c0_12] : memref<1x16x512xbf16, #tpu.memory_space<vmem>>, vector<1x16x512xbf16>
    %16 = vector.shape_cast %15 : vector<1x16x512xbf16> to vector<16x512xbf16>
    %17 = vector.shape_cast %14 : vector<16x512xbf16> to vector<1x16x512xbf16>
    tpu.vector_store %arg4[%c0_10, %c0_11, %c0_12], %17 {strides = array<i32>} : memref<1x16x512xbf16, #tpu.memory_space<vmem>>, vector<1x16x512xbf16>,
    return
  }
  func.func @transform_0(%arg0: i32) -> (i32, i32, i32, i32) {
    %c0_i32 = arith.constant 0 : i32
    %c0_i32_0 = arith.constant 0 : i32
    %c0_i32_1 = arith.constant 0 : i32
    %c0_i32_2 = arith.constant 0 : i32
    return %arg0, %c0_i32, %c0_i32_0, %c0_i32_1 : i32, i32, i32, i32
  }
  func.func @transform_1(%arg0: i32) -> (i32, i32) {
    %c0_i32 = arith.constant 0 : i32
    %c0_i32_0 = arith.constant 0 : i32
    %c0_i32_1 = arith.constant 0 : i32
    return %c0_i32, %c0_i32_0 : i32, i32
  }
  func.func @transform_2(%arg0: i32) -> (i32, i32) {
    %c0_i32 = arith.constant 0 : i32
    %c0_i32_0 = arith.constant 0 : i32
    %c0_i32_1 = arith.constant 0 : i32
    return %c0_i32, %c0_i32_0 : i32, i32
  }
  func.func @transform_3(%arg0: i32) -> (i32, i32, i32) {
    %c0_i32 = arith.constant 0 : i32
    %c0_i32_0 = arith.constant 0 : i32
    %c0_i32_1 = arith.constant 0 : i32
    return %arg0, %c0_i32, %c0_i32_0 : i32, i32, i32
  }
}

module attributes {stable_mosaic.version = 11 : i64} {
  func.func @_conv_mm_kernel(%arg0: i32, %arg1: memref<1x1x32x144xbf16, #tpu.memory_space<vmem>>, %arg2: memref<144x128xbf16, #tpu.memory_space<vmem>>, %arg3: memref<32x1xf32, #tpu.memory_space<vmem>>, %arg4: memref<1x32x128xbf16, #tpu.memory_space<vmem>>) attributes {dimension_semantics = [#tpu.dimension_semantics<parallel>], iteration_bounds = array<i64: 1>, scalar_prefetch = 0 : i64, scratch_operands = 0 : i64, tpu.core_type = #tpu.core_type<tc>, window_params = [{transform_indices = @transform_0, window_bounds = array<i64: 1, 1, 32, 144>}, {pipeline_mode = #tpu.pipeline_mode<synchronous>, transform_indices = @transform_1, window_bounds = array<i64: 144, 128>}, {pipeline_mode = #tpu.pipeline_mode<synchronous>, transform_indices = @transform_2, window_bounds = array<i64: 32, 1>}, {transform_indices = @transform_3, window_bounds = array<i64: 1, 32, 128>}]} {
    %c0 = arith.constant 0 : index
    %c0_0 = arith.constant 0 : index
    %c0_1 = arith.constant 0 : index
    %c0_2 = arith.constant 0 : index
    %0 = vector.load %arg1[%c0, %c0_0, %c0_1, %c0_2] : memref<1x1x32x144xbf16, #tpu.memory_space<vmem>>, vector<1x1x32x144xbf16>
    %1 = vector.shape_cast %0 : vector<1x1x32x144xbf16> to vector<32x144xbf16>
    %c0_3 = arith.constant 0 : index
    %c0_4 = arith.constant 0 : index
    %2 = vector.load %arg2[%c0_3, %c0_4] : memref<144x128xbf16, #tpu.memory_space<vmem>>, vector<144x128xbf16>
    %cst = arith.constant dense<0.000000e+00> : vector<32x128xf32>
    %3 = tpu.matmul %1, %2, %cst {dimension_numbers = #tpu.dot_dimension_numbers<[1], [0], [0], [1], [0, 0, 1, 1], [], []>} : vector<32x144xbf16>, vector<144x128xbf16>, vector<32x128xf32> -> vector<32x128xf32>
    %c0_5 = arith.constant 0 : index
    %c0_6 = arith.constant 0 : index
    %4 = vector.load %arg3[%c0_5, %c0_6] : memref<32x1xf32, #tpu.memory_space<vmem>>, vector<32x1xf32>
    %5 = vector.broadcast %4 : vector<32x1xf32> to vector<32x128xf32>
    %6 = arith.addf %3, %5 : vector<32x128xf32>
    %cst_7 = arith.constant 0.000000e+00 : f32
    %7 = vector.broadcast %cst_7 : f32 to vector<32x128xf32>
    %8 = arith.cmpf oge, %6, %7 : vector<32x128xf32>
    %cst_8 = arith.constant 2.000000e-01 : f32
    %9 = vector.broadcast %cst_8 : f32 to vector<32x128xf32>
    %10 = arith.mulf %6, %9 : vector<32x128xf32>
    %11 = arith.select %8, %6, %10 : vector<32x128xi1>, vector<32x128xf32>
    %cst_9 = arith.constant 1.000000e+00 : f32
    %12 = vector.broadcast %cst_9 : f32 to vector<32x128xf32>
    %13 = arith.mulf %11, %12 : vector<32x128xf32>
    %14 = arith.truncf %13 : vector<32x128xf32> to vector<32x128xbf16>
    %c0_10 = arith.constant 0 : index
    %c0_11 = arith.constant 0 : index
    %c0_12 = arith.constant 0 : index
    %15 = vector.load %arg4[%c0_10, %c0_11, %c0_12] : memref<1x32x128xbf16, #tpu.memory_space<vmem>>, vector<1x32x128xbf16>
    %16 = vector.shape_cast %15 : vector<1x32x128xbf16> to vector<32x128xbf16>
    %17 = vector.shape_cast %14 : vector<32x128xbf16> to vector<1x32x128xbf16>
    tpu.vector_store %arg4[%c0_10, %c0_11, %c0_12], %17 {strides = array<i32>} : memref<1x32x128xbf16, #tpu.memory_space<vmem>>, vector<1x32x128xbf16>,
    return
  }
  func.func @transform_0(%arg0: i32) -> (i32, i32, i32, i32) {
    %c0_i32 = arith.constant 0 : i32
    %c0_i32_0 = arith.constant 0 : i32
    %c0_i32_1 = arith.constant 0 : i32
    %c0_i32_2 = arith.constant 0 : i32
    return %arg0, %c0_i32, %c0_i32_0, %c0_i32_1 : i32, i32, i32, i32
  }
  func.func @transform_1(%arg0: i32) -> (i32, i32) {
    %c0_i32 = arith.constant 0 : i32
    %c0_i32_0 = arith.constant 0 : i32
    %c0_i32_1 = arith.constant 0 : i32
    return %c0_i32, %c0_i32_0 : i32, i32
  }
  func.func @transform_2(%arg0: i32) -> (i32, i32) {
    %c0_i32 = arith.constant 0 : i32
    %c0_i32_0 = arith.constant 0 : i32
    %c0_i32_1 = arith.constant 0 : i32
    return %c0_i32, %c0_i32_0 : i32, i32
  }
  func.func @transform_3(%arg0: i32) -> (i32, i32, i32) {
    %c0_i32 = arith.constant 0 : i32
    %c0_i32_0 = arith.constant 0 : i32
    %c0_i32_1 = arith.constant 0 : i32
    return %arg0, %c0_i32, %c0_i32_0 : i32, i32, i32
  }
}

module attributes {stable_mosaic.version = 11 : i64} {
  func.func @_conv_mm_kernel(%arg0: i32, %arg1: memref<1x1x64x288xbf16, #tpu.memory_space<vmem>>, %arg2: memref<288x128xbf16, #tpu.memory_space<vmem>>, %arg3: memref<64x1xf32, #tpu.memory_space<vmem>>, %arg4: memref<1x64x128xbf16, #tpu.memory_space<vmem>>) attributes {dimension_semantics = [#tpu.dimension_semantics<parallel>], iteration_bounds = array<i64: 1>, scalar_prefetch = 0 : i64, scratch_operands = 0 : i64, tpu.core_type = #tpu.core_type<tc>, window_params = [{transform_indices = @transform_0, window_bounds = array<i64: 1, 1, 64, 288>}, {pipeline_mode = #tpu.pipeline_mode<synchronous>, transform_indices = @transform_1, window_bounds = array<i64: 288, 128>}, {pipeline_mode = #tpu.pipeline_mode<synchronous>, transform_indices = @transform_2, window_bounds = array<i64: 64, 1>}, {transform_indices = @transform_3, window_bounds = array<i64: 1, 64, 128>}]} {
    %c0 = arith.constant 0 : index
    %c0_0 = arith.constant 0 : index
    %c0_1 = arith.constant 0 : index
    %c0_2 = arith.constant 0 : index
    %0 = vector.load %arg1[%c0, %c0_0, %c0_1, %c0_2] : memref<1x1x64x288xbf16, #tpu.memory_space<vmem>>, vector<1x1x64x288xbf16>
    %1 = vector.shape_cast %0 : vector<1x1x64x288xbf16> to vector<64x288xbf16>
    %c0_3 = arith.constant 0 : index
    %c0_4 = arith.constant 0 : index
    %2 = vector.load %arg2[%c0_3, %c0_4] : memref<288x128xbf16, #tpu.memory_space<vmem>>, vector<288x128xbf16>
    %cst = arith.constant dense<0.000000e+00> : vector<64x128xf32>
    %3 = tpu.matmul %1, %2, %cst {dimension_numbers = #tpu.dot_dimension_numbers<[1], [0], [0], [1], [0, 0, 1, 1], [], []>} : vector<64x288xbf16>, vector<288x128xbf16>, vector<64x128xf32> -> vector<64x128xf32>
    %c0_5 = arith.constant 0 : index
    %c0_6 = arith.constant 0 : index
    %4 = vector.load %arg3[%c0_5, %c0_6] : memref<64x1xf32, #tpu.memory_space<vmem>>, vector<64x1xf32>
    %5 = vector.broadcast %4 : vector<64x1xf32> to vector<64x128xf32>
    %6 = arith.addf %3, %5 : vector<64x128xf32>
    %cst_7 = arith.constant 0.000000e+00 : f32
    %7 = vector.broadcast %cst_7 : f32 to vector<64x128xf32>
    %8 = arith.cmpf oge, %6, %7 : vector<64x128xf32>
    %cst_8 = arith.constant 2.000000e-01 : f32
    %9 = vector.broadcast %cst_8 : f32 to vector<64x128xf32>
    %10 = arith.mulf %6, %9 : vector<64x128xf32>
    %11 = arith.select %8, %6, %10 : vector<64x128xi1>, vector<64x128xf32>
    %cst_9 = arith.constant 1.000000e+00 : f32
    %12 = vector.broadcast %cst_9 : f32 to vector<64x128xf32>
    %13 = arith.mulf %11, %12 : vector<64x128xf32>
    %14 = arith.truncf %13 : vector<64x128xf32> to vector<64x128xbf16>
    %c0_10 = arith.constant 0 : index
    %c0_11 = arith.constant 0 : index
    %c0_12 = arith.constant 0 : index
    %15 = vector.load %arg4[%c0_10, %c0_11, %c0_12] : memref<1x64x128xbf16, #tpu.memory_space<vmem>>, vector<1x64x128xbf16>
    %16 = vector.shape_cast %15 : vector<1x64x128xbf16> to vector<64x128xbf16>
    %17 = vector.shape_cast %14 : vector<64x128xbf16> to vector<1x64x128xbf16>
    tpu.vector_store %arg4[%c0_10, %c0_11, %c0_12], %17 {strides = array<i32>} : memref<1x64x128xbf16, #tpu.memory_space<vmem>>, vector<1x64x128xbf16>,
    return
  }
  func.func @transform_0(%arg0: i32) -> (i32, i32, i32, i32) {
    %c0_i32 = arith.constant 0 : i32
    %c0_i32_0 = arith.constant 0 : i32
    %c0_i32_1 = arith.constant 0 : i32
    %c0_i32_2 = arith.constant 0 : i32
    return %arg0, %c0_i32, %c0_i32_0, %c0_i32_1 : i32, i32, i32, i32
  }
  func.func @transform_1(%arg0: i32) -> (i32, i32) {
    %c0_i32 = arith.constant 0 : i32
    %c0_i32_0 = arith.constant 0 : i32
    %c0_i32_1 = arith.constant 0 : i32
    return %c0_i32, %c0_i32_0 : i32, i32
  }
  func.func @transform_2(%arg0: i32) -> (i32, i32) {
    %c0_i32 = arith.constant 0 : i32
    %c0_i32_0 = arith.constant 0 : i32
    %c0_i32_1 = arith.constant 0 : i32
    return %c0_i32, %c0_i32_0 : i32, i32
  }
  func.func @transform_3(%arg0: i32) -> (i32, i32, i32) {
    %c0_i32 = arith.constant 0 : i32
    %c0_i32_0 = arith.constant 0 : i32
    %c0_i32_1 = arith.constant 0 : i32
    return %arg0, %c0_i32, %c0_i32_0 : i32, i32, i32
  }
}

module attributes {stable_mosaic.version = 11 : i64} {
  func.func @_conv_mm_kernel(%arg0: i32, %arg1: memref<1x1x384x1024xbf16, #tpu.memory_space<vmem>>, %arg2: memref<1024x128xbf16, #tpu.memory_space<vmem>>, %arg3: memref<384x1xf32, #tpu.memory_space<vmem>>, %arg4: memref<1x384x128xf32, #tpu.memory_space<vmem>>) attributes {dimension_semantics = [#tpu.dimension_semantics<parallel>], iteration_bounds = array<i64: 1>, scalar_prefetch = 0 : i64, scratch_operands = 0 : i64, tpu.core_type = #tpu.core_type<tc>, window_params = [{transform_indices = @transform_0, window_bounds = array<i64: 1, 1, 384, 1024>}, {pipeline_mode = #tpu.pipeline_mode<synchronous>, transform_indices = @transform_1, window_bounds = array<i64: 1024, 128>}, {pipeline_mode = #tpu.pipeline_mode<synchronous>, transform_indices = @transform_2, window_bounds = array<i64: 384, 1>}, {transform_indices = @transform_3, window_bounds = array<i64: 1, 384, 128>}]} {
    %c0 = arith.constant 0 : index
    %c0_0 = arith.constant 0 : index
    %c0_1 = arith.constant 0 : index
    %c0_2 = arith.constant 0 : index
    %0 = vector.load %arg1[%c0, %c0_0, %c0_1, %c0_2] : memref<1x1x384x1024xbf16, #tpu.memory_space<vmem>>, vector<1x1x384x1024xbf16>
    %1 = vector.shape_cast %0 : vector<1x1x384x1024xbf16> to vector<384x1024xbf16>
    %c0_3 = arith.constant 0 : index
    %c0_4 = arith.constant 0 : index
    %2 = vector.load %arg2[%c0_3, %c0_4] : memref<1024x128xbf16, #tpu.memory_space<vmem>>, vector<1024x128xbf16>
    %cst = arith.constant dense<0.000000e+00> : vector<384x128xf32>
    %3 = tpu.matmul %1, %2, %cst {dimension_numbers = #tpu.dot_dimension_numbers<[1], [0], [0], [1], [0, 0, 1, 1], [], []>} : vector<384x1024xbf16>, vector<1024x128xbf16>, vector<384x128xf32> -> vector<384x128xf32>
    %c0_5 = arith.constant 0 : index
    %c0_6 = arith.constant 0 : index
    %4 = vector.load %arg3[%c0_5, %c0_6] : memref<384x1xf32, #tpu.memory_space<vmem>>, vector<384x1xf32>
    %5 = vector.broadcast %4 : vector<384x1xf32> to vector<384x128xf32>
    %6 = arith.addf %3, %5 : vector<384x128xf32>
    %c0_7 = arith.constant 0 : index
    %c0_8 = arith.constant 0 : index
    %c0_9 = arith.constant 0 : index
    %7 = vector.load %arg4[%c0_7, %c0_8, %c0_9] : memref<1x384x128xf32, #tpu.memory_space<vmem>>, vector<1x384x128xf32>
    %8 = vector.shape_cast %7 : vector<1x384x128xf32> to vector<384x128xf32>
    %9 = vector.shape_cast %6 : vector<384x128xf32> to vector<1x384x128xf32>
    tpu.vector_store %arg4[%c0_7, %c0_8, %c0_9], %9 {strides = array<i32>} : memref<1x384x128xf32, #tpu.memory_space<vmem>>, vector<1x384x128xf32>,
    return
  }
  func.func @transform_0(%arg0: i32) -> (i32, i32, i32, i32) {
    %c0_i32 = arith.constant 0 : i32
    %c0_i32_0 = arith.constant 0 : i32
    %c0_i32_1 = arith.constant 0 : i32
    %c0_i32_2 = arith.constant 0 : i32
    return %arg0, %c0_i32, %c0_i32_0, %c0_i32_1 : i32, i32, i32, i32
  }
  func.func @transform_1(%arg0: i32) -> (i32, i32) {
    %c0_i32 = arith.constant 0 : i32
    %c0_i32_0 = arith.constant 0 : i32
    %c0_i32_1 = arith.constant 0 : i32
    return %c0_i32, %c0_i32_0 : i32, i32
  }
  func.func @transform_2(%arg0: i32) -> (i32, i32) {
    %c0_i32 = arith.constant 0 : i32
    %c0_i32_0 = arith.constant 0 : i32
    %c0_i32_1 = arith.constant 0 : i32
    return %c0_i32, %c0_i32_0 : i32, i32
  }
  func.func @transform_3(%arg0: i32) -> (i32, i32, i32) {
    %c0_i32 = arith.constant 0 : i32
    %c0_i32_0 = arith.constant 0 : i32
    %c0_i32_1 = arith.constant 0 : i32
    return %arg0, %c0_i32, %c0_i32_0 : i32, i32, i32
  }
}

module attributes {stable_mosaic.version = 11 : i64} {
  func.func @_conv_mm_kernel(%arg0: i32, %arg1: memref<1x9x32x32xbf16, #tpu.memory_space<vmem>>, %arg2: memref<32x256xbf16, #tpu.memory_space<vmem>>, %arg3: memref<1x32xf32, #tpu.memory_space<vmem>>, %arg4: memref<32x1xf32, #tpu.memory_space<vmem>>, %arg5: memref<32x1xf32, #tpu.memory_space<vmem>>, %arg6: memref<1x1x128xf32, #tpu.memory_space<vmem>>, %arg7: memref<1x32x128xbf16, #tpu.memory_space<vmem>>) attributes {dimension_semantics = [#tpu.dimension_semantics<parallel>], iteration_bounds = array<i64: 1>, scalar_prefetch = 0 : i64, scratch_operands = 0 : i64, tpu.core_type = #tpu.core_type<tc>, window_params = [{transform_indices = @transform_0, window_bounds = array<i64: 1, 9, 32, 32>}, {pipeline_mode = #tpu.pipeline_mode<synchronous>, transform_indices = @transform_1, window_bounds = array<i64: 32, 256>}, {pipeline_mode = #tpu.pipeline_mode<synchronous>, transform_indices = @transform_2, window_bounds = array<i64: 1, 32>}, {pipeline_mode = #tpu.pipeline_mode<synchronous>, transform_indices = @transform_3, window_bounds = array<i64: 32, 1>}, {pipeline_mode = #tpu.pipeline_mode<synchronous>, transform_indices = @transform_4, window_bounds = array<i64: 32, 1>}, {transform_indices = @transform_5, window_bounds = array<i64: 1, 1, 128>}, {transform_indices = @transform_6, window_bounds = array<i64: 1, 32, 128>}]} {
    %c0 = arith.constant 0 : index
    %c0_0 = arith.constant 0 : index
    %c0_1 = arith.constant 0 : index
    %c0_2 = arith.constant 0 : index
    %0 = vector.load %arg1[%c0, %c0_0, %c0_1, %c0_2] : memref<1x9x32x32xbf16, #tpu.memory_space<vmem>>, vector<1x1x32x32xbf16>
    %1 = vector.shape_cast %0 : vector<1x1x32x32xbf16> to vector<32x32xbf16>
    %2 = arith.extf %1 : vector<32x32xbf16> to vector<32x32xf32>
    %c0_3 = arith.constant 0 : index
    %c0_4 = arith.constant 0 : index
    %3 = vector.load %arg3[%c0_3, %c0_4] : memref<1x32xf32, #tpu.memory_space<vmem>>, vector<1x32xf32>
    %4 = vector.broadcast %3 : vector<1x32xf32> to vector<32x32xf32>
    %5 = arith.mulf %2, %4 : vector<32x32xf32>
    %6 = arith.truncf %5 : vector<32x32xf32> to vector<32x32xbf16>
    %c0_5 = arith.constant 0 : index
    %c0_6 = arith.constant 0 : index
    %7 = vector.load %arg2[%c0_5, %c0_6] : memref<32x256xbf16, #tpu.memory_space<vmem>>, vector<32x128xbf16>
    %cst = arith.constant dense<0.000000e+00> : vector<32x128xf32>
    %8 = tpu.matmul %6, %7, %cst {dimension_numbers = #tpu.dot_dimension_numbers<[1], [0], [0], [1], [0, 0, 1, 1], [], []>} : vector<32x32xbf16>, vector<32x128xbf16>, vector<32x128xf32> -> vector<32x128xf32>
    %c0_7 = arith.constant 0 : index
    %c1 = arith.constant 1 : index
    %c0_8 = arith.constant 0 : index
    %c0_9 = arith.constant 0 : index
    %9 = vector.load %arg1[%c0_7, %c1, %c0_8, %c0_9] : memref<1x9x32x32xbf16, #tpu.memory_space<vmem>>, vector<1x1x32x32xbf16>
    %10 = vector.shape_cast %9 : vector<1x1x32x32xbf16> to vector<32x32xbf16>
    %11 = arith.extf %10 : vector<32x32xbf16> to vector<32x32xf32>
    %c0_10 = arith.constant 0 : index
    %c0_11 = arith.constant 0 : index
    %12 = vector.load %arg3[%c0_10, %c0_11] : memref<1x32xf32, #tpu.memory_space<vmem>>, vector<1x32xf32>
    %13 = vector.broadcast %12 : vector<1x32xf32> to vector<32x32xf32>
    %14 = arith.mulf %11, %13 : vector<32x32xf32>
    %15 = arith.truncf %14 : vector<32x32xf32> to vector<32x32xbf16>
    %c0_12 = arith.constant 0 : index
    %c1_13 = arith.constant 1 : index
    %16 = vector.load %arg2[%c0_12, %c1_13] : memref<32x256xbf16, #tpu.memory_space<vmem>>, vector<32x128xbf16>
    %cst_14 = arith.constant dense<0.000000e+00> : vector<32x128xf32>
    %17 = tpu.matmul %15, %16, %cst_14 {dimension_numbers = #tpu.dot_dimension_numbers<[1], [0], [0], [1], [0, 0, 1, 1], [], []>} : vector<32x32xbf16>, vector<32x128xbf16>, vector<32x128xf32> -> vector<32x128xf32>
    %18 = arith.addf %8, %17 : vector<32x128xf32>
    %c0_15 = arith.constant 0 : index
    %c2 = arith.constant 2 : index
    %c0_16 = arith.constant 0 : index
    %c0_17 = arith.constant 0 : index
    %19 = vector.load %arg1[%c0_15, %c2, %c0_16, %c0_17] : memref<1x9x32x32xbf16, #tpu.memory_space<vmem>>, vector<1x1x32x32xbf16>
    %20 = vector.shape_cast %19 : vector<1x1x32x32xbf16> to vector<32x32xbf16>
    %21 = arith.extf %20 : vector<32x32xbf16> to vector<32x32xf32>
    %c0_18 = arith.constant 0 : index
    %c0_19 = arith.constant 0 : index
    %22 = vector.load %arg3[%c0_18, %c0_19] : memref<1x32xf32, #tpu.memory_space<vmem>>, vector<1x32xf32>
    %23 = vector.broadcast %22 : vector<1x32xf32> to vector<32x32xf32>
    %24 = arith.mulf %21, %23 : vector<32x32xf32>
    %25 = arith.truncf %24 : vector<32x32xf32> to vector<32x32xbf16>
    %c0_20 = arith.constant 0 : index
    %c2_21 = arith.constant 2 : index
    %26 = vector.load %arg2[%c0_20, %c2_21] : memref<32x256xbf16, #tpu.memory_space<vmem>>, vector<32x128xbf16>
    %cst_22 = arith.constant dense<0.000000e+00> : vector<32x128xf32>
    %27 = tpu.matmul %25, %26, %cst_22 {dimension_numbers = #tpu.dot_dimension_numbers<[1], [0], [0], [1], [0, 0, 1, 1], [], []>} : vector<32x32xbf16>, vector<32x128xbf16>, vector<32x128xf32> -> vector<32x128xf32>
    %28 = arith.addf %18, %27 : vector<32x128xf32>
    %c0_23 = arith.constant 0 : index
    %c3 = arith.constant 3 : index
    %c0_24 = arith.constant 0 : index
    %c0_25 = arith.constant 0 : index
    %29 = vector.load %arg1[%c0_23, %c3, %c0_24, %c0_25] : memref<1x9x32x32xbf16, #tpu.memory_space<vmem>>, vector<1x1x32x32xbf16>
    %30 = vector.shape_cast %29 : vector<1x1x32x32xbf16> to vector<32x32xbf16>
    %31 = arith.extf %30 : vector<32x32xbf16> to vector<32x32xf32>
    %c0_26 = arith.constant 0 : index
    %c0_27 = arith.constant 0 : index
    %32 = vector.load %arg3[%c0_26, %c0_27] : memref<1x32xf32, #tpu.memory_space<vmem>>, vector<1x32xf32>
    %33 = vector.broadcast %32 : vector<1x32xf32> to vector<32x32xf32>
    %34 = arith.mulf %31, %33 : vector<32x32xf32>
    %35 = arith.truncf %34 : vector<32x32xf32> to vector<32x32xbf16>
    %c0_28 = arith.constant 0 : index
    %c6 = arith.constant 6 : index
    %36 = vector.load %arg2[%c0_28, %c6] : memref<32x256xbf16, #tpu.memory_space<vmem>>, vector<32x128xbf16>
    %cst_29 = arith.constant dense<0.000000e+00> : vector<32x128xf32>
    %37 = tpu.matmul %35, %36, %cst_29 {dimension_numbers = #tpu.dot_dimension_numbers<[1], [0], [0], [1], [0, 0, 1, 1], [], []>} : vector<32x32xbf16>, vector<32x128xbf16>, vector<32x128xf32> -> vector<32x128xf32>
    %38 = arith.addf %28, %37 : vector<32x128xf32>
    %c0_30 = arith.constant 0 : index
    %c4 = arith.constant 4 : index
    %c0_31 = arith.constant 0 : index
    %c0_32 = arith.constant 0 : index
    %39 = vector.load %arg1[%c0_30, %c4, %c0_31, %c0_32] : memref<1x9x32x32xbf16, #tpu.memory_space<vmem>>, vector<1x1x32x32xbf16>
    %40 = vector.shape_cast %39 : vector<1x1x32x32xbf16> to vector<32x32xbf16>
    %41 = arith.extf %40 : vector<32x32xbf16> to vector<32x32xf32>
    %c0_33 = arith.constant 0 : index
    %c0_34 = arith.constant 0 : index
    %42 = vector.load %arg3[%c0_33, %c0_34] : memref<1x32xf32, #tpu.memory_space<vmem>>, vector<1x32xf32>
    %43 = vector.broadcast %42 : vector<1x32xf32> to vector<32x32xf32>
    %44 = arith.mulf %41, %43 : vector<32x32xf32>
    %45 = arith.truncf %44 : vector<32x32xf32> to vector<32x32xbf16>
    %c0_35 = arith.constant 0 : index
    %c7 = arith.constant 7 : index
    %46 = vector.load %arg2[%c0_35, %c7] : memref<32x256xbf16, #tpu.memory_space<vmem>>, vector<32x128xbf16>
    %cst_36 = arith.constant dense<0.000000e+00> : vector<32x128xf32>
    %47 = tpu.matmul %45, %46, %cst_36 {dimension_numbers = #tpu.dot_dimension_numbers<[1], [0], [0], [1], [0, 0, 1, 1], [], []>} : vector<32x32xbf16>, vector<32x128xbf16>, vector<32x128xf32> -> vector<32x128xf32>
    %48 = arith.addf %38, %47 : vector<32x128xf32>
    %c0_37 = arith.constant 0 : index
    %c5 = arith.constant 5 : index
    %c0_38 = arith.constant 0 : index
    %c0_39 = arith.constant 0 : index
    %49 = vector.load %arg1[%c0_37, %c5, %c0_38, %c0_39] : memref<1x9x32x32xbf16, #tpu.memory_space<vmem>>, vector<1x1x32x32xbf16>
    %50 = vector.shape_cast %49 : vector<1x1x32x32xbf16> to vector<32x32xbf16>
    %51 = arith.extf %50 : vector<32x32xbf16> to vector<32x32xf32>
    %c0_40 = arith.constant 0 : index
    %c0_41 = arith.constant 0 : index
    %52 = vector.load %arg3[%c0_40, %c0_41] : memref<1x32xf32, #tpu.memory_space<vmem>>, vector<1x32xf32>
    %53 = vector.broadcast %52 : vector<1x32xf32> to vector<32x32xf32>
    %54 = arith.mulf %51, %53 : vector<32x32xf32>
    %55 = arith.truncf %54 : vector<32x32xf32> to vector<32x32xbf16>
    %c0_42 = arith.constant 0 : index
    %c8 = arith.constant 8 : index
    %56 = vector.load %arg2[%c0_42, %c8] : memref<32x256xbf16, #tpu.memory_space<vmem>>, vector<32x128xbf16>
    %cst_43 = arith.constant dense<0.000000e+00> : vector<32x128xf32>
    %57 = tpu.matmul %55, %56, %cst_43 {dimension_numbers = #tpu.dot_dimension_numbers<[1], [0], [0], [1], [0, 0, 1, 1], [], []>} : vector<32x32xbf16>, vector<32x128xbf16>, vector<32x128xf32> -> vector<32x128xf32>
    %58 = arith.addf %48, %57 : vector<32x128xf32>
    %c0_44 = arith.constant 0 : index
    %c6_45 = arith.constant 6 : index
    %c0_46 = arith.constant 0 : index
    %c0_47 = arith.constant 0 : index
    %59 = vector.load %arg1[%c0_44, %c6_45, %c0_46, %c0_47] : memref<1x9x32x32xbf16, #tpu.memory_space<vmem>>, vector<1x1x32x32xbf16>
    %60 = vector.shape_cast %59 : vector<1x1x32x32xbf16> to vector<32x32xbf16>
    %61 = arith.extf %60 : vector<32x32xbf16> to vector<32x32xf32>
    %c0_48 = arith.constant 0 : index
    %c0_49 = arith.constant 0 : index
    %62 = vector.load %arg3[%c0_48, %c0_49] : memref<1x32xf32, #tpu.memory_space<vmem>>, vector<1x32xf32>
    %63 = vector.broadcast %62 : vector<1x32xf32> to vector<32x32xf32>
    %64 = arith.mulf %61, %63 : vector<32x32xf32>
    %65 = arith.truncf %64 : vector<32x32xf32> to vector<32x32xbf16>
    %c0_50 = arith.constant 0 : index
    %c12 = arith.constant 12 : index
    %66 = vector.load %arg2[%c0_50, %c12] : memref<32x256xbf16, #tpu.memory_space<vmem>>, vector<32x128xbf16>
    %cst_51 = arith.constant dense<0.000000e+00> : vector<32x128xf32>
    %67 = tpu.matmul %65, %66, %cst_51 {dimension_numbers = #tpu.dot_dimension_numbers<[1], [0], [0], [1], [0, 0, 1, 1], [], []>} : vector<32x32xbf16>, vector<32x128xbf16>, vector<32x128xf32> -> vector<32x128xf32>
    %68 = arith.addf %58, %67 : vector<32x128xf32>
    %c0_52 = arith.constant 0 : index
    %c7_53 = arith.constant 7 : index
    %c0_54 = arith.constant 0 : index
    %c0_55 = arith.constant 0 : index
    %69 = vector.load %arg1[%c0_52, %c7_53, %c0_54, %c0_55] : memref<1x9x32x32xbf16, #tpu.memory_space<vmem>>, vector<1x1x32x32xbf16>
    %70 = vector.shape_cast %69 : vector<1x1x32x32xbf16> to vector<32x32xbf16>
    %71 = arith.extf %70 : vector<32x32xbf16> to vector<32x32xf32>
    %c0_56 = arith.constant 0 : index
    %c0_57 = arith.constant 0 : index
    %72 = vector.load %arg3[%c0_56, %c0_57] : memref<1x32xf32, #tpu.memory_space<vmem>>, vector<1x32xf32>
    %73 = vector.broadcast %72 : vector<1x32xf32> to vector<32x32xf32>
    %74 = arith.mulf %71, %73 : vector<32x32xf32>
    %75 = arith.truncf %74 : vector<32x32xf32> to vector<32x32xbf16>
    %c0_58 = arith.constant 0 : index
    %c13 = arith.constant 13 : index
    %76 = vector.load %arg2[%c0_58, %c13] : memref<32x256xbf16, #tpu.memory_space<vmem>>, vector<32x128xbf16>
    %cst_59 = arith.constant dense<0.000000e+00> : vector<32x128xf32>
    %77 = tpu.matmul %75, %76, %cst_59 {dimension_numbers = #tpu.dot_dimension_numbers<[1], [0], [0], [1], [0, 0, 1, 1], [], []>} : vector<32x32xbf16>, vector<32x128xbf16>, vector<32x128xf32> -> vector<32x128xf32>
    %78 = arith.addf %68, %77 : vector<32x128xf32>
    %c0_60 = arith.constant 0 : index
    %c8_61 = arith.constant 8 : index
    %c0_62 = arith.constant 0 : index
    %c0_63 = arith.constant 0 : index
    %79 = vector.load %arg1[%c0_60, %c8_61, %c0_62, %c0_63] : memref<1x9x32x32xbf16, #tpu.memory_space<vmem>>, vector<1x1x32x32xbf16>
    %80 = vector.shape_cast %79 : vector<1x1x32x32xbf16> to vector<32x32xbf16>
    %81 = arith.extf %80 : vector<32x32xbf16> to vector<32x32xf32>
    %c0_64 = arith.constant 0 : index
    %c0_65 = arith.constant 0 : index
    %82 = vector.load %arg3[%c0_64, %c0_65] : memref<1x32xf32, #tpu.memory_space<vmem>>, vector<1x32xf32>
    %83 = vector.broadcast %82 : vector<1x32xf32> to vector<32x32xf32>
    %84 = arith.mulf %81, %83 : vector<32x32xf32>
    %85 = arith.truncf %84 : vector<32x32xf32> to vector<32x32xbf16>
    %c0_66 = arith.constant 0 : index
    %c14 = arith.constant 14 : index
    %86 = vector.load %arg2[%c0_66, %c14] : memref<32x256xbf16, #tpu.memory_space<vmem>>, vector<32x128xbf16>
    %cst_67 = arith.constant dense<0.000000e+00> : vector<32x128xf32>
    %87 = tpu.matmul %85, %86, %cst_67 {dimension_numbers = #tpu.dot_dimension_numbers<[1], [0], [0], [1], [0, 0, 1, 1], [], []>} : vector<32x32xbf16>, vector<32x128xbf16>, vector<32x128xf32> -> vector<32x128xf32>
    %88 = arith.addf %78, %87 : vector<32x128xf32>
    %c0_68 = arith.constant 0 : index
    %c0_69 = arith.constant 0 : index
    %89 = vector.load %arg4[%c0_68, %c0_69] : memref<32x1xf32, #tpu.memory_space<vmem>>, vector<32x1xf32>
    %90 = vector.broadcast %89 : vector<32x1xf32> to vector<32x128xf32>
    %91 = arith.mulf %88, %90 : vector<32x128xf32>
    %c0_70 = arith.constant 0 : index
    %c0_71 = arith.constant 0 : index
    %92 = vector.load %arg5[%c0_70, %c0_71] : memref<32x1xf32, #tpu.memory_space<vmem>>, vector<32x1xf32>
    %93 = vector.broadcast %92 : vector<32x1xf32> to vector<32x128xf32>
    %94 = arith.addf %91, %93 : vector<32x128xf32>
    %c0_72 = arith.constant 0 : index
    %c0_73 = arith.constant 0 : index
    %c0_74 = arith.constant 0 : index
    %95 = vector.load %arg6[%c0_72, %c0_73, %c0_74] : memref<1x1x128xf32, #tpu.memory_space<vmem>>, vector<1x1x128xf32>
    %96 = vector.shape_cast %95 : vector<1x1x128xf32> to vector<1x128xf32>
    %97 = vector.broadcast %96 : vector<1x128xf32> to vector<32x128xf32>
    %98 = arith.addf %94, %97 : vector<32x128xf32>
    %cst_75 = arith.constant 0.000000e+00 : f32
    %99 = vector.broadcast %cst_75 : f32 to vector<32x128xf32>
    %100 = arith.cmpf oge, %98, %99 : vector<32x128xf32>
    %cst_76 = arith.constant 2.000000e-01 : f32
    %101 = vector.broadcast %cst_76 : f32 to vector<32x128xf32>
    %102 = arith.mulf %98, %101 : vector<32x128xf32>
    %103 = arith.select %100, %98, %102 : vector<32x128xi1>, vector<32x128xf32>
    %cst_77 = arith.constant 1.41421354 : f32
    %104 = vector.broadcast %cst_77 : f32 to vector<32x128xf32>
    %105 = arith.mulf %103, %104 : vector<32x128xf32>
    %106 = arith.truncf %105 : vector<32x128xf32> to vector<32x128xbf16>
    %c0_78 = arith.constant 0 : index
    %c0_79 = arith.constant 0 : index
    %c0_80 = arith.constant 0 : index
    %107 = vector.load %arg7[%c0_78, %c0_79, %c0_80] : memref<1x32x128xbf16, #tpu.memory_space<vmem>>, vector<1x32x128xbf16>
    %108 = vector.shape_cast %107 : vector<1x32x128xbf16> to vector<32x128xbf16>
    %109 = vector.shape_cast %106 : vector<32x128xbf16> to vector<1x32x128xbf16>
    tpu.vector_store %arg7[%c0_78, %c0_79, %c0_80], %109 {strides = array<i32>} : memref<1x32x128xbf16, #tpu.memory_space<vmem>>, vector<1x32x128xbf16>,
    return
  }
  func.func @transform_0(%arg0: i32) -> (i32, i32, i32, i32) {
    %c0_i32 = arith.constant 0 : i32
    %c0_i32_0 = arith.constant 0 : i32
    %c0_i32_1 = arith.constant 0 : i32
    %c0_i32_2 = arith.constant 0 : i32
    return %arg0, %c0_i32, %c0_i32_0, %c0_i32_1 : i32, i32, i32, i32
  }
  func.func @transform_1(%arg0: i32) -> (i32, i32) {
    %c0_i32 = arith.constant 0 : i32
    %c0_i32_0 = arith.constant 0 : i32
    %c0_i32_1 = arith.constant 0 : i32
    return %c0_i32, %c0_i32_0 : i32, i32
  }
  func.func @transform_2(%arg0: i32) -> (i32, i32) {
    %c0_i32 = arith.constant 0 : i32
    %c0_i32_0 = arith.constant 0 : i32
    %c0_i32_1 = arith.constant 0 : i32
    return %c0_i32, %c0_i32_0 : i32, i32
  }
  func.func @transform_3(%arg0: i32) -> (i32, i32) {
    %c0_i32 = arith.constant 0 : i32
    %c0_i32_0 = arith.constant 0 : i32
    %c0_i32_1 = arith.constant 0 : i32
    return %c0_i32, %c0_i32_0 : i32, i32
  }
  func.func @transform_4(%arg0: i32) -> (i32, i32) {
    %c0_i32 = arith.constant 0 : i32
    %c0_i32_0 = arith.constant 0 : i32
    %c0_i32_1 = arith.constant 0 : i32
    return %c0_i32, %c0_i32_0 : i32, i32
  }
  func.func @transform_5(%arg0: i32) -> (i32, i32, i32) {
    %c0_i32 = arith.constant 0 : i32
    %c0_i32_0 = arith.constant 0 : i32
    %c0_i32_1 = arith.constant 0 : i32
    return %arg0, %c0_i32, %c0_i32_0 : i32, i32, i32
  }
  func.func @transform_6(%arg0: i32) -> (i32, i32, i32) {
    %c0_i32 = arith.constant 0 : i32
    %c0_i32_0 = arith.constant 0 : i32
    %c0_i32_1 = arith.constant 0 : i32
    return %arg0, %c0_i32, %c0_i32_0 : i32, i32, i32
  }
}

module attributes {stable_mosaic.version = 11 : i64} {
  func.func @_conv_mm_kernel(%arg0: i32, %arg1: memref<1x1x8x32xbf16, #tpu.memory_space<vmem>>, %arg2: memref<32x128xbf16, #tpu.memory_space<vmem>>, %arg3: memref<1x32xf32, #tpu.memory_space<vmem>>, %arg4: memref<8x1xf32, #tpu.memory_space<vmem>>, %arg5: memref<1x8x128xf32, #tpu.memory_space<vmem>>) attributes {dimension_semantics = [#tpu.dimension_semantics<parallel>], iteration_bounds = array<i64: 1>, scalar_prefetch = 0 : i64, scratch_operands = 0 : i64, tpu.core_type = #tpu.core_type<tc>, window_params = [{transform_indices = @transform_0, window_bounds = array<i64: 1, 1, 8, 32>}, {pipeline_mode = #tpu.pipeline_mode<synchronous>, transform_indices = @transform_1, window_bounds = array<i64: 32, 128>}, {pipeline_mode = #tpu.pipeline_mode<synchronous>, transform_indices = @transform_2, window_bounds = array<i64: 1, 32>}, {pipeline_mode = #tpu.pipeline_mode<synchronous>, transform_indices = @transform_3, window_bounds = array<i64: 8, 1>}, {transform_indices = @transform_4, window_bounds = array<i64: 1, 8, 128>}]} {
    %c0 = arith.constant 0 : index
    %c0_0 = arith.constant 0 : index
    %c0_1 = arith.constant 0 : index
    %c0_2 = arith.constant 0 : index
    %0 = vector.load %arg1[%c0, %c0_0, %c0_1, %c0_2] : memref<1x1x8x32xbf16, #tpu.memory_space<vmem>>, vector<1x1x8x32xbf16>
    %1 = vector.shape_cast %0 : vector<1x1x8x32xbf16> to vector<8x32xbf16>
    %2 = arith.extf %1 : vector<8x32xbf16> to vector<8x32xf32>
    %c0_3 = arith.constant 0 : index
    %c0_4 = arith.constant 0 : index
    %3 = vector.load %arg3[%c0_3, %c0_4] : memref<1x32xf32, #tpu.memory_space<vmem>>, vector<1x32xf32>
    %4 = vector.broadcast %3 : vector<1x32xf32> to vector<8x32xf32>
    %5 = arith.mulf %2, %4 : vector<8x32xf32>
    %6 = arith.truncf %5 : vector<8x32xf32> to vector<8x32xbf16>
    %c0_5 = arith.constant 0 : index
    %c0_6 = arith.constant 0 : index
    %7 = vector.load %arg2[%c0_5, %c0_6] : memref<32x128xbf16, #tpu.memory_space<vmem>>, vector<32x128xbf16>
    %cst = arith.constant dense<0.000000e+00> : vector<8x128xf32>
    %8 = tpu.matmul %6, %7, %cst {dimension_numbers = #tpu.dot_dimension_numbers<[1], [0], [0], [1], [0, 0, 1, 1], [], []>} : vector<8x32xbf16>, vector<32x128xbf16>, vector<8x128xf32> -> vector<8x128xf32>
    %c0_7 = arith.constant 0 : index
    %c0_8 = arith.constant 0 : index
    %9 = vector.load %arg4[%c0_7, %c0_8] : memref<8x1xf32, #tpu.memory_space<vmem>>, vector<8x1xf32>
    %10 = vector.broadcast %9 : vector<8x1xf32> to vector<8x128xf32>
    %11 = arith.addf %8, %10 : vector<8x128xf32>
    %c0_9 = arith.constant 0 : index
    %c0_10 = arith.constant 0 : index
    %c0_11 = arith.constant 0 : index
    %12 = vector.load %arg5[%c0_9, %c0_10, %c0_11] : memref<1x8x128xf32, #tpu.memory_space<vmem>>, vector<1x8x128xf32>
    %13 = vector.shape_cast %12 : vector<1x8x128xf32> to vector<8x128xf32>
    %14 = vector.shape_cast %11 : vector<8x128xf32> to vector<1x8x128xf32>
    tpu.vector_store %arg5[%c0_9, %c0_10, %c0_11], %14 {strides = array<i32>} : memref<1x8x128xf32, #tpu.memory_space<vmem>>, vector<1x8x128xf32>,
    return
  }
  func.func @transform_0(%arg0: i32) -> (i32, i32, i32, i32) {
    %c0_i32 = arith.constant 0 : i32
    %c0_i32_0 = arith.constant 0 : i32
    %c0_i32_1 = arith.constant 0 : i32
    %c0_i32_2 = arith.constant 0 : i32
    return %arg0, %c0_i32, %c0_i32_0, %c0_i32_1 : i32, i32, i32, i32
  }
  func.func @transform_1(%arg0: i32) -> (i32, i32) {
    %c0_i32 = arith.constant 0 : i32
    %c0_i32_0 = arith.constant 0 : i32
    %c0_i32_1 = arith.constant 0 : i32
    return %c0_i32, %c0_i32_0 : i32, i32
  }
  func.func @transform_2(%arg0: i32) -> (i32, i32) {
    %c0_i32 = arith.constant 0 : i32
    %c0_i32_0 = arith.constant 0 : i32
    %c0_i32_1 = arith.constant 0 : i32
    return %c0_i32, %c0_i32_0 : i32, i32
  }
  func.func @transform_3(%arg0: i32) -> (i32, i32) {
    %c0_i32 = arith.constant 0 : i32
    %c0_i32_0 = arith.constant 0 : i32
    %c0_i32_1 = arith.constant 0 : i32
    return %c0_i32, %c0_i32_0 : i32, i32
  }
  func.func @transform_4(%arg0: i32) -> (i32, i32, i32) {
    %c0_i32 = arith.constant 0 : i32
    %c0_i32_0 = arith.constant 0 : i32
    %c0_i32_1 = arith.constant 0 : i32
    return %arg0, %c0_i32, %c0_i32_0 : i32, i32, i32
  }
}

module attributes {stable_mosaic.version = 11 : i64} {
  func.func @_conv_mm_kernel(%arg0: i32, %arg1: memref<1x9x32x32xbf16, #tpu.memory_space<vmem>>, %arg2: memref<32x256xbf16, #tpu.memory_space<vmem>>, %arg3: memref<1x32xf32, #tpu.memory_space<vmem>>, %arg4: memref<32x1xf32, #tpu.memory_space<vmem>>, %arg5: memref<32x1xf32, #tpu.memory_space<vmem>>, %arg6: memref<1x1x128xf32, #tpu.memory_space<vmem>>, %arg7: memref<1x32x128xbf16, #tpu.memory_space<vmem>>) attributes {dimension_semantics = [#tpu.dimension_semantics<parallel>], iteration_bounds = array<i64: 4>, scalar_prefetch = 0 : i64, scratch_operands = 0 : i64, tpu.core_type = #tpu.core_type<tc>, window_params = [{transform_indices = @transform_0, window_bounds = array<i64: 1, 9, 32, 32>}, {pipeline_mode = #tpu.pipeline_mode<synchronous>, transform_indices = @transform_1, window_bounds = array<i64: 32, 256>}, {pipeline_mode = #tpu.pipeline_mode<synchronous>, transform_indices = @transform_2, window_bounds = array<i64: 1, 32>}, {pipeline_mode = #tpu.pipeline_mode<synchronous>, transform_indices = @transform_3, window_bounds = array<i64: 32, 1>}, {pipeline_mode = #tpu.pipeline_mode<synchronous>, transform_indices = @transform_4, window_bounds = array<i64: 32, 1>}, {transform_indices = @transform_5, window_bounds = array<i64: 1, 1, 128>}, {transform_indices = @transform_6, window_bounds = array<i64: 1, 32, 128>}]} {
    %c0 = arith.constant 0 : index
    %c0_0 = arith.constant 0 : index
    %c0_1 = arith.constant 0 : index
    %c0_2 = arith.constant 0 : index
    %0 = vector.load %arg1[%c0, %c0_0, %c0_1, %c0_2] : memref<1x9x32x32xbf16, #tpu.memory_space<vmem>>, vector<1x1x32x32xbf16>
    %1 = vector.shape_cast %0 : vector<1x1x32x32xbf16> to vector<32x32xbf16>
    %2 = arith.extf %1 : vector<32x32xbf16> to vector<32x32xf32>
    %c0_3 = arith.constant 0 : index
    %c0_4 = arith.constant 0 : index
    %3 = vector.load %arg3[%c0_3, %c0_4] : memref<1x32xf32, #tpu.memory_space<vmem>>, vector<1x32xf32>
    %4 = vector.broadcast %3 : vector<1x32xf32> to vector<32x32xf32>
    %5 = arith.mulf %2, %4 : vector<32x32xf32>
    %6 = arith.truncf %5 : vector<32x32xf32> to vector<32x32xbf16>
    %c0_5 = arith.constant 0 : index
    %c0_6 = arith.constant 0 : index
    %7 = vector.load %arg2[%c0_5, %c0_6] : memref<32x256xbf16, #tpu.memory_space<vmem>>, vector<32x128xbf16>
    %cst = arith.constant dense<0.000000e+00> : vector<32x128xf32>
    %8 = tpu.matmul %6, %7, %cst {dimension_numbers = #tpu.dot_dimension_numbers<[1], [0], [0], [1], [0, 0, 1, 1], [], []>} : vector<32x32xbf16>, vector<32x128xbf16>, vector<32x128xf32> -> vector<32x128xf32>
    %c0_7 = arith.constant 0 : index
    %c1 = arith.constant 1 : index
    %c0_8 = arith.constant 0 : index
    %c0_9 = arith.constant 0 : index
    %9 = vector.load %arg1[%c0_7, %c1, %c0_8, %c0_9] : memref<1x9x32x32xbf16, #tpu.memory_space<vmem>>, vector<1x1x32x32xbf16>
    %10 = vector.shape_cast %9 : vector<1x1x32x32xbf16> to vector<32x32xbf16>
    %11 = arith.extf %10 : vector<32x32xbf16> to vector<32x32xf32>
    %c0_10 = arith.constant 0 : index
    %c0_11 = arith.constant 0 : index
    %12 = vector.load %arg3[%c0_10, %c0_11] : memref<1x32xf32, #tpu.memory_space<vmem>>, vector<1x32xf32>
    %13 = vector.broadcast %12 : vector<1x32xf32> to vector<32x32xf32>
    %14 = arith.mulf %11, %13 : vector<32x32xf32>
    %15 = arith.truncf %14 : vector<32x32xf32> to vector<32x32xbf16>
    %c0_12 = arith.constant 0 : index
    %c1_13 = arith.constant 1 : index
    %16 = vector.load %arg2[%c0_12, %c1_13] : memref<32x256xbf16, #tpu.memory_space<vmem>>, vector<32x128xbf16>
    %cst_14 = arith.constant dense<0.000000e+00> : vector<32x128xf32>
    %17 = tpu.matmul %15, %16, %cst_14 {dimension_numbers = #tpu.dot_dimension_numbers<[1], [0], [0], [1], [0, 0, 1, 1], [], []>} : vector<32x32xbf16>, vector<32x128xbf16>, vector<32x128xf32> -> vector<32x128xf32>
    %18 = arith.addf %8, %17 : vector<32x128xf32>
    %c0_15 = arith.constant 0 : index
    %c2 = arith.constant 2 : index
    %c0_16 = arith.constant 0 : index
    %c0_17 = arith.constant 0 : index
    %19 = vector.load %arg1[%c0_15, %c2, %c0_16, %c0_17] : memref<1x9x32x32xbf16, #tpu.memory_space<vmem>>, vector<1x1x32x32xbf16>
    %20 = vector.shape_cast %19 : vector<1x1x32x32xbf16> to vector<32x32xbf16>
    %21 = arith.extf %20 : vector<32x32xbf16> to vector<32x32xf32>
    %c0_18 = arith.constant 0 : index
    %c0_19 = arith.constant 0 : index
    %22 = vector.load %arg3[%c0_18, %c0_19] : memref<1x32xf32, #tpu.memory_space<vmem>>, vector<1x32xf32>
    %23 = vector.broadcast %22 : vector<1x32xf32> to vector<32x32xf32>
    %24 = arith.mulf %21, %23 : vector<32x32xf32>
    %25 = arith.truncf %24 : vector<32x32xf32> to vector<32x32xbf16>
    %c0_20 = arith.constant 0 : index
    %c2_21 = arith.constant 2 : index
    %26 = vector.load %arg2[%c0_20, %c2_21] : memref<32x256xbf16, #tpu.memory_space<vmem>>, vector<32x128xbf16>
    %cst_22 = arith.constant dense<0.000000e+00> : vector<32x128xf32>
    %27 = tpu.matmul %25, %26, %cst_22 {dimension_numbers = #tpu.dot_dimension_numbers<[1], [0], [0], [1], [0, 0, 1, 1], [], []>} : vector<32x32xbf16>, vector<32x128xbf16>, vector<32x128xf32> -> vector<32x128xf32>
    %28 = arith.addf %18, %27 : vector<32x128xf32>
    %c0_23 = arith.constant 0 : index
    %c3 = arith.constant 3 : index
    %c0_24 = arith.constant 0 : index
    %c0_25 = arith.constant 0 : index
    %29 = vector.load %arg1[%c0_23, %c3, %c0_24, %c0_25] : memref<1x9x32x32xbf16, #tpu.memory_space<vmem>>, vector<1x1x32x32xbf16>
    %30 = vector.shape_cast %29 : vector<1x1x32x32xbf16> to vector<32x32xbf16>
    %31 = arith.extf %30 : vector<32x32xbf16> to vector<32x32xf32>
    %c0_26 = arith.constant 0 : index
    %c0_27 = arith.constant 0 : index
    %32 = vector.load %arg3[%c0_26, %c0_27] : memref<1x32xf32, #tpu.memory_space<vmem>>, vector<1x32xf32>
    %33 = vector.broadcast %32 : vector<1x32xf32> to vector<32x32xf32>
    %34 = arith.mulf %31, %33 : vector<32x32xf32>
    %35 = arith.truncf %34 : vector<32x32xf32> to vector<32x32xbf16>
    %c0_28 = arith.constant 0 : index
    %c6 = arith.constant 6 : index
    %36 = vector.load %arg2[%c0_28, %c6] : memref<32x256xbf16, #tpu.memory_space<vmem>>, vector<32x128xbf16>
    %cst_29 = arith.constant dense<0.000000e+00> : vector<32x128xf32>
    %37 = tpu.matmul %35, %36, %cst_29 {dimension_numbers = #tpu.dot_dimension_numbers<[1], [0], [0], [1], [0, 0, 1, 1], [], []>} : vector<32x32xbf16>, vector<32x128xbf16>, vector<32x128xf32> -> vector<32x128xf32>
    %38 = arith.addf %28, %37 : vector<32x128xf32>
    %c0_30 = arith.constant 0 : index
    %c4 = arith.constant 4 : index
    %c0_31 = arith.constant 0 : index
    %c0_32 = arith.constant 0 : index
    %39 = vector.load %arg1[%c0_30, %c4, %c0_31, %c0_32] : memref<1x9x32x32xbf16, #tpu.memory_space<vmem>>, vector<1x1x32x32xbf16>
    %40 = vector.shape_cast %39 : vector<1x1x32x32xbf16> to vector<32x32xbf16>
    %41 = arith.extf %40 : vector<32x32xbf16> to vector<32x32xf32>
    %c0_33 = arith.constant 0 : index
    %c0_34 = arith.constant 0 : index
    %42 = vector.load %arg3[%c0_33, %c0_34] : memref<1x32xf32, #tpu.memory_space<vmem>>, vector<1x32xf32>
    %43 = vector.broadcast %42 : vector<1x32xf32> to vector<32x32xf32>
    %44 = arith.mulf %41, %43 : vector<32x32xf32>
    %45 = arith.truncf %44 : vector<32x32xf32> to vector<32x32xbf16>
    %c0_35 = arith.constant 0 : index
    %c7 = arith.constant 7 : index
    %46 = vector.load %arg2[%c0_35, %c7] : memref<32x256xbf16, #tpu.memory_space<vmem>>, vector<32x128xbf16>
    %cst_36 = arith.constant dense<0.000000e+00> : vector<32x128xf32>
    %47 = tpu.matmul %45, %46, %cst_36 {dimension_numbers = #tpu.dot_dimension_numbers<[1], [0], [0], [1], [0, 0, 1, 1], [], []>} : vector<32x32xbf16>, vector<32x128xbf16>, vector<32x128xf32> -> vector<32x128xf32>
    %48 = arith.addf %38, %47 : vector<32x128xf32>
    %c0_37 = arith.constant 0 : index
    %c5 = arith.constant 5 : index
    %c0_38 = arith.constant 0 : index
    %c0_39 = arith.constant 0 : index
    %49 = vector.load %arg1[%c0_37, %c5, %c0_38, %c0_39] : memref<1x9x32x32xbf16, #tpu.memory_space<vmem>>, vector<1x1x32x32xbf16>
    %50 = vector.shape_cast %49 : vector<1x1x32x32xbf16> to vector<32x32xbf16>
    %51 = arith.extf %50 : vector<32x32xbf16> to vector<32x32xf32>
    %c0_40 = arith.constant 0 : index
    %c0_41 = arith.constant 0 : index
    %52 = vector.load %arg3[%c0_40, %c0_41] : memref<1x32xf32, #tpu.memory_space<vmem>>, vector<1x32xf32>
    %53 = vector.broadcast %52 : vector<1x32xf32> to vector<32x32xf32>
    %54 = arith.mulf %51, %53 : vector<32x32xf32>
    %55 = arith.truncf %54 : vector<32x32xf32> to vector<32x32xbf16>
    %c0_42 = arith.constant 0 : index
    %c8 = arith.constant 8 : index
    %56 = vector.load %arg2[%c0_42, %c8] : memref<32x256xbf16, #tpu.memory_space<vmem>>, vector<32x128xbf16>
    %cst_43 = arith.constant dense<0.000000e+00> : vector<32x128xf32>
    %57 = tpu.matmul %55, %56, %cst_43 {dimension_numbers = #tpu.dot_dimension_numbers<[1], [0], [0], [1], [0, 0, 1, 1], [], []>} : vector<32x32xbf16>, vector<32x128xbf16>, vector<32x128xf32> -> vector<32x128xf32>
    %58 = arith.addf %48, %57 : vector<32x128xf32>
    %c0_44 = arith.constant 0 : index
    %c6_45 = arith.constant 6 : index
    %c0_46 = arith.constant 0 : index
    %c0_47 = arith.constant 0 : index
    %59 = vector.load %arg1[%c0_44, %c6_45, %c0_46, %c0_47] : memref<1x9x32x32xbf16, #tpu.memory_space<vmem>>, vector<1x1x32x32xbf16>
    %60 = vector.shape_cast %59 : vector<1x1x32x32xbf16> to vector<32x32xbf16>
    %61 = arith.extf %60 : vector<32x32xbf16> to vector<32x32xf32>
    %c0_48 = arith.constant 0 : index
    %c0_49 = arith.constant 0 : index
    %62 = vector.load %arg3[%c0_48, %c0_49] : memref<1x32xf32, #tpu.memory_space<vmem>>, vector<1x32xf32>
    %63 = vector.broadcast %62 : vector<1x32xf32> to vector<32x32xf32>
    %64 = arith.mulf %61, %63 : vector<32x32xf32>
    %65 = arith.truncf %64 : vector<32x32xf32> to vector<32x32xbf16>
    %c0_50 = arith.constant 0 : index
    %c12 = arith.constant 12 : index
    %66 = vector.load %arg2[%c0_50, %c12] : memref<32x256xbf16, #tpu.memory_space<vmem>>, vector<32x128xbf16>
    %cst_51 = arith.constant dense<0.000000e+00> : vector<32x128xf32>
    %67 = tpu.matmul %65, %66, %cst_51 {dimension_numbers = #tpu.dot_dimension_numbers<[1], [0], [0], [1], [0, 0, 1, 1], [], []>} : vector<32x32xbf16>, vector<32x128xbf16>, vector<32x128xf32> -> vector<32x128xf32>
    %68 = arith.addf %58, %67 : vector<32x128xf32>
    %c0_52 = arith.constant 0 : index
    %c7_53 = arith.constant 7 : index
    %c0_54 = arith.constant 0 : index
    %c0_55 = arith.constant 0 : index
    %69 = vector.load %arg1[%c0_52, %c7_53, %c0_54, %c0_55] : memref<1x9x32x32xbf16, #tpu.memory_space<vmem>>, vector<1x1x32x32xbf16>
    %70 = vector.shape_cast %69 : vector<1x1x32x32xbf16> to vector<32x32xbf16>
    %71 = arith.extf %70 : vector<32x32xbf16> to vector<32x32xf32>
    %c0_56 = arith.constant 0 : index
    %c0_57 = arith.constant 0 : index
    %72 = vector.load %arg3[%c0_56, %c0_57] : memref<1x32xf32, #tpu.memory_space<vmem>>, vector<1x32xf32>
    %73 = vector.broadcast %72 : vector<1x32xf32> to vector<32x32xf32>
    %74 = arith.mulf %71, %73 : vector<32x32xf32>
    %75 = arith.truncf %74 : vector<32x32xf32> to vector<32x32xbf16>
    %c0_58 = arith.constant 0 : index
    %c13 = arith.constant 13 : index
    %76 = vector.load %arg2[%c0_58, %c13] : memref<32x256xbf16, #tpu.memory_space<vmem>>, vector<32x128xbf16>
    %cst_59 = arith.constant dense<0.000000e+00> : vector<32x128xf32>
    %77 = tpu.matmul %75, %76, %cst_59 {dimension_numbers = #tpu.dot_dimension_numbers<[1], [0], [0], [1], [0, 0, 1, 1], [], []>} : vector<32x32xbf16>, vector<32x128xbf16>, vector<32x128xf32> -> vector<32x128xf32>
    %78 = arith.addf %68, %77 : vector<32x128xf32>
    %c0_60 = arith.constant 0 : index
    %c8_61 = arith.constant 8 : index
    %c0_62 = arith.constant 0 : index
    %c0_63 = arith.constant 0 : index
    %79 = vector.load %arg1[%c0_60, %c8_61, %c0_62, %c0_63] : memref<1x9x32x32xbf16, #tpu.memory_space<vmem>>, vector<1x1x32x32xbf16>
    %80 = vector.shape_cast %79 : vector<1x1x32x32xbf16> to vector<32x32xbf16>
    %81 = arith.extf %80 : vector<32x32xbf16> to vector<32x32xf32>
    %c0_64 = arith.constant 0 : index
    %c0_65 = arith.constant 0 : index
    %82 = vector.load %arg3[%c0_64, %c0_65] : memref<1x32xf32, #tpu.memory_space<vmem>>, vector<1x32xf32>
    %83 = vector.broadcast %82 : vector<1x32xf32> to vector<32x32xf32>
    %84 = arith.mulf %81, %83 : vector<32x32xf32>
    %85 = arith.truncf %84 : vector<32x32xf32> to vector<32x32xbf16>
    %c0_66 = arith.constant 0 : index
    %c14 = arith.constant 14 : index
    %86 = vector.load %arg2[%c0_66, %c14] : memref<32x256xbf16, #tpu.memory_space<vmem>>, vector<32x128xbf16>
    %cst_67 = arith.constant dense<0.000000e+00> : vector<32x128xf32>
    %87 = tpu.matmul %85, %86, %cst_67 {dimension_numbers = #tpu.dot_dimension_numbers<[1], [0], [0], [1], [0, 0, 1, 1], [], []>} : vector<32x32xbf16>, vector<32x128xbf16>, vector<32x128xf32> -> vector<32x128xf32>
    %88 = arith.addf %78, %87 : vector<32x128xf32>
    %c0_68 = arith.constant 0 : index
    %c0_69 = arith.constant 0 : index
    %89 = vector.load %arg4[%c0_68, %c0_69] : memref<32x1xf32, #tpu.memory_space<vmem>>, vector<32x1xf32>
    %90 = vector.broadcast %89 : vector<32x1xf32> to vector<32x128xf32>
    %91 = arith.mulf %88, %90 : vector<32x128xf32>
    %c0_70 = arith.constant 0 : index
    %c0_71 = arith.constant 0 : index
    %92 = vector.load %arg5[%c0_70, %c0_71] : memref<32x1xf32, #tpu.memory_space<vmem>>, vector<32x1xf32>
    %93 = vector.broadcast %92 : vector<32x1xf32> to vector<32x128xf32>
    %94 = arith.addf %91, %93 : vector<32x128xf32>
    %c0_72 = arith.constant 0 : index
    %c0_73 = arith.constant 0 : index
    %c0_74 = arith.constant 0 : index
    %95 = vector.load %arg6[%c0_72, %c0_73, %c0_74] : memref<1x1x128xf32, #tpu.memory_space<vmem>>, vector<1x1x128xf32>
    %96 = vector.shape_cast %95 : vector<1x1x128xf32> to vector<1x128xf32>
    %97 = vector.broadcast %96 : vector<1x128xf32> to vector<32x128xf32>
    %98 = arith.addf %94, %97 : vector<32x128xf32>
    %cst_75 = arith.constant 0.000000e+00 : f32
    %99 = vector.broadcast %cst_75 : f32 to vector<32x128xf32>
    %100 = arith.cmpf oge, %98, %99 : vector<32x128xf32>
    %cst_76 = arith.constant 2.000000e-01 : f32
    %101 = vector.broadcast %cst_76 : f32 to vector<32x128xf32>
    %102 = arith.mulf %98, %101 : vector<32x128xf32>
    %103 = arith.select %100, %98, %102 : vector<32x128xi1>, vector<32x128xf32>
    %cst_77 = arith.constant 1.41421354 : f32
    %104 = vector.broadcast %cst_77 : f32 to vector<32x128xf32>
    %105 = arith.mulf %103, %104 : vector<32x128xf32>
    %106 = arith.truncf %105 : vector<32x128xf32> to vector<32x128xbf16>
    %c0_78 = arith.constant 0 : index
    %c0_79 = arith.constant 0 : index
    %c0_80 = arith.constant 0 : index
    %107 = vector.load %arg7[%c0_78, %c0_79, %c0_80] : memref<1x32x128xbf16, #tpu.memory_space<vmem>>, vector<1x32x128xbf16>
    %108 = vector.shape_cast %107 : vector<1x32x128xbf16> to vector<32x128xbf16>
    %109 = vector.shape_cast %106 : vector<32x128xbf16> to vector<1x32x128xbf16>
    tpu.vector_store %arg7[%c0_78, %c0_79, %c0_80], %109 {strides = array<i32>} : memref<1x32x128xbf16, #tpu.memory_space<vmem>>, vector<1x32x128xbf16>,
    return
  }
  func.func @transform_0(%arg0: i32) -> (i32, i32, i32, i32) {
    %c0_i32 = arith.constant 0 : i32
    %c0_i32_0 = arith.constant 0 : i32
    %c0_i32_1 = arith.constant 0 : i32
    %c0_i32_2 = arith.constant 0 : i32
    return %arg0, %c0_i32, %c0_i32_0, %c0_i32_1 : i32, i32, i32, i32
  }
  func.func @transform_1(%arg0: i32) -> (i32, i32) {
    %c0_i32 = arith.constant 0 : i32
    %c0_i32_0 = arith.constant 0 : i32
    %c0_i32_1 = arith.constant 0 : i32
    return %c0_i32, %c0_i32_0 : i32, i32
  }
  func.func @transform_2(%arg0: i32) -> (i32, i32) {
    %c0_i32 = arith.constant 0 : i32
    %c0_i32_0 = arith.constant 0 : i32
    %c0_i32_1 = arith.constant 0 : i32
    return %c0_i32, %c0_i32_0 : i32, i32
  }
  func.func @transform_3(%arg0: i32) -> (i32, i32) {
    %c0_i32 = arith.constant 0 : i32
    %c0_i32_0 = arith.constant 0 : i32
    %c0_i32_1 = arith.constant 0 : i32
    return %c0_i32, %c0_i32_0 : i32, i32
  }
  func.func @transform_4(%arg0: i32) -> (i32, i32) {
    %c0_i32 = arith.constant 0 : i32
    %c0_i32_0 = arith.constant 0 : i32
    %c0_i32_1 = arith.constant 0 : i32
    return %c0_i32, %c0_i32_0 : i32, i32
  }
  func.func @transform_5(%arg0: i32) -> (i32, i32, i32) {
    %c0_i32 = arith.constant 0 : i32
    %c0_i32_0 = arith.constant 0 : i32
    %c0_i32_1 = arith.constant 0 : i32
    return %arg0, %c0_i32, %c0_i32_0 : i32, i32, i32
  }
  func.func @transform_6(%arg0: i32) -> (i32, i32, i32) {
    %c0_i32 = arith.constant 0 : i32
    %c0_i32_0 = arith.constant 0 : i32
    %c0_i32_1 = arith.constant 0 : i32
    return %arg0, %c0_i32, %c0_i32_0 : i32, i32, i32
  }
}

module attributes {stable_mosaic.version = 11 : i64} {
  func.func @_conv_mm_kernel(%arg0: i32, %arg1: memref<1x9x32x32xbf16, #tpu.memory_space<vmem>>, %arg2: memref<32x256xbf16, #tpu.memory_space<vmem>>, %arg3: memref<1x32xf32, #tpu.memory_space<vmem>>, %arg4: memref<32x1xf32, #tpu.memory_space<vmem>>, %arg5: memref<32x1xf32, #tpu.memory_space<vmem>>, %arg6: memref<1x1x128xf32, #tpu.memory_space<vmem>>, %arg7: memref<1x32x128xbf16, #tpu.memory_space<vmem>>) attributes {dimension_semantics = [#tpu.dimension_semantics<parallel>], iteration_bounds = array<i64: 1>, scalar_prefetch = 0 : i64, scratch_operands = 0 : i64, tpu.core_type = #tpu.core_type<tc>, window_params = [{transform_indices = @transform_0, window_bounds = array<i64: 1, 9, 32, 32>}, {pipeline_mode = #tpu.pipeline_mode<synchronous>, transform_indices = @transform_1, window_bounds = array<i64: 32, 256>}, {pipeline_mode = #tpu.pipeline_mode<synchronous>, transform_indices = @transform_2, window_bounds = array<i64: 1, 32>}, {pipeline_mode = #tpu.pipeline_mode<synchronous>, transform_indices = @transform_3, window_bounds = array<i64: 32, 1>}, {pipeline_mode = #tpu.pipeline_mode<synchronous>, transform_indices = @transform_4, window_bounds = array<i64: 32, 1>}, {transform_indices = @transform_5, window_bounds = array<i64: 1, 1, 128>}, {transform_indices = @transform_6, window_bounds = array<i64: 1, 32, 128>}]} {
    %c0 = arith.constant 0 : index
    %c0_0 = arith.constant 0 : index
    %c0_1 = arith.constant 0 : index
    %c0_2 = arith.constant 0 : index
    %0 = vector.load %arg1[%c0, %c0_0, %c0_1, %c0_2] : memref<1x9x32x32xbf16, #tpu.memory_space<vmem>>, vector<1x1x32x32xbf16>
    %1 = vector.shape_cast %0 : vector<1x1x32x32xbf16> to vector<32x32xbf16>
    %2 = arith.extf %1 : vector<32x32xbf16> to vector<32x32xf32>
    %c0_3 = arith.constant 0 : index
    %c0_4 = arith.constant 0 : index
    %3 = vector.load %arg3[%c0_3, %c0_4] : memref<1x32xf32, #tpu.memory_space<vmem>>, vector<1x32xf32>
    %4 = vector.broadcast %3 : vector<1x32xf32> to vector<32x32xf32>
    %5 = arith.mulf %2, %4 : vector<32x32xf32>
    %6 = arith.truncf %5 : vector<32x32xf32> to vector<32x32xbf16>
    %c0_5 = arith.constant 0 : index
    %c0_6 = arith.constant 0 : index
    %7 = vector.load %arg2[%c0_5, %c0_6] : memref<32x256xbf16, #tpu.memory_space<vmem>>, vector<32x128xbf16>
    %cst = arith.constant dense<0.000000e+00> : vector<32x128xf32>
    %8 = tpu.matmul %6, %7, %cst {dimension_numbers = #tpu.dot_dimension_numbers<[1], [0], [0], [1], [0, 0, 1, 1], [], []>} : vector<32x32xbf16>, vector<32x128xbf16>, vector<32x128xf32> -> vector<32x128xf32>
    %c0_7 = arith.constant 0 : index
    %c1 = arith.constant 1 : index
    %c0_8 = arith.constant 0 : index
    %c0_9 = arith.constant 0 : index
    %9 = vector.load %arg1[%c0_7, %c1, %c0_8, %c0_9] : memref<1x9x32x32xbf16, #tpu.memory_space<vmem>>, vector<1x1x32x32xbf16>
    %10 = vector.shape_cast %9 : vector<1x1x32x32xbf16> to vector<32x32xbf16>
    %11 = arith.extf %10 : vector<32x32xbf16> to vector<32x32xf32>
    %c0_10 = arith.constant 0 : index
    %c0_11 = arith.constant 0 : index
    %12 = vector.load %arg3[%c0_10, %c0_11] : memref<1x32xf32, #tpu.memory_space<vmem>>, vector<1x32xf32>
    %13 = vector.broadcast %12 : vector<1x32xf32> to vector<32x32xf32>
    %14 = arith.mulf %11, %13 : vector<32x32xf32>
    %15 = arith.truncf %14 : vector<32x32xf32> to vector<32x32xbf16>
    %c0_12 = arith.constant 0 : index
    %c1_13 = arith.constant 1 : index
    %16 = vector.load %arg2[%c0_12, %c1_13] : memref<32x256xbf16, #tpu.memory_space<vmem>>, vector<32x128xbf16>
    %cst_14 = arith.constant dense<0.000000e+00> : vector<32x128xf32>
    %17 = tpu.matmul %15, %16, %cst_14 {dimension_numbers = #tpu.dot_dimension_numbers<[1], [0], [0], [1], [0, 0, 1, 1], [], []>} : vector<32x32xbf16>, vector<32x128xbf16>, vector<32x128xf32> -> vector<32x128xf32>
    %18 = arith.addf %8, %17 : vector<32x128xf32>
    %c0_15 = arith.constant 0 : index
    %c2 = arith.constant 2 : index
    %c0_16 = arith.constant 0 : index
    %c0_17 = arith.constant 0 : index
    %19 = vector.load %arg1[%c0_15, %c2, %c0_16, %c0_17] : memref<1x9x32x32xbf16, #tpu.memory_space<vmem>>, vector<1x1x32x32xbf16>
    %20 = vector.shape_cast %19 : vector<1x1x32x32xbf16> to vector<32x32xbf16>
    %21 = arith.extf %20 : vector<32x32xbf16> to vector<32x32xf32>
    %c0_18 = arith.constant 0 : index
    %c0_19 = arith.constant 0 : index
    %22 = vector.load %arg3[%c0_18, %c0_19] : memref<1x32xf32, #tpu.memory_space<vmem>>, vector<1x32xf32>
    %23 = vector.broadcast %22 : vector<1x32xf32> to vector<32x32xf32>
    %24 = arith.mulf %21, %23 : vector<32x32xf32>
    %25 = arith.truncf %24 : vector<32x32xf32> to vector<32x32xbf16>
    %c0_20 = arith.constant 0 : index
    %c2_21 = arith.constant 2 : index
    %26 = vector.load %arg2[%c0_20, %c2_21] : memref<32x256xbf16, #tpu.memory_space<vmem>>, vector<32x128xbf16>
    %cst_22 = arith.constant dense<0.000000e+00> : vector<32x128xf32>
    %27 = tpu.matmul %25, %26, %cst_22 {dimension_numbers = #tpu.dot_dimension_numbers<[1], [0], [0], [1], [0, 0, 1, 1], [], []>} : vector<32x32xbf16>, vector<32x128xbf16>, vector<32x128xf32> -> vector<32x128xf32>
    %28 = arith.addf %18, %27 : vector<32x128xf32>
    %c0_23 = arith.constant 0 : index
    %c3 = arith.constant 3 : index
    %c0_24 = arith.constant 0 : index
    %c0_25 = arith.constant 0 : index
    %29 = vector.load %arg1[%c0_23, %c3, %c0_24, %c0_25] : memref<1x9x32x32xbf16, #tpu.memory_space<vmem>>, vector<1x1x32x32xbf16>
    %30 = vector.shape_cast %29 : vector<1x1x32x32xbf16> to vector<32x32xbf16>
    %31 = arith.extf %30 : vector<32x32xbf16> to vector<32x32xf32>
    %c0_26 = arith.constant 0 : index
    %c0_27 = arith.constant 0 : index
    %32 = vector.load %arg3[%c0_26, %c0_27] : memref<1x32xf32, #tpu.memory_space<vmem>>, vector<1x32xf32>
    %33 = vector.broadcast %32 : vector<1x32xf32> to vector<32x32xf32>
    %34 = arith.mulf %31, %33 : vector<32x32xf32>
    %35 = arith.truncf %34 : vector<32x32xf32> to vector<32x32xbf16>
    %c0_28 = arith.constant 0 : index
    %c10 = arith.constant 10 : index
    %36 = vector.load %arg2[%c0_28, %c10] : memref<32x256xbf16, #tpu.memory_space<vmem>>, vector<32x128xbf16>
    %cst_29 = arith.constant dense<0.000000e+00> : vector<32x128xf32>
    %37 = tpu.matmul %35, %36, %cst_29 {dimension_numbers = #tpu.dot_dimension_numbers<[1], [0], [0], [1], [0, 0, 1, 1], [], []>} : vector<32x32xbf16>, vector<32x128xbf16>, vector<32x128xf32> -> vector<32x128xf32>
    %38 = arith.addf %28, %37 : vector<32x128xf32>
    %c0_30 = arith.constant 0 : index
    %c4 = arith.constant 4 : index
    %c0_31 = arith.constant 0 : index
    %c0_32 = arith.constant 0 : index
    %39 = vector.load %arg1[%c0_30, %c4, %c0_31, %c0_32] : memref<1x9x32x32xbf16, #tpu.memory_space<vmem>>, vector<1x1x32x32xbf16>
    %40 = vector.shape_cast %39 : vector<1x1x32x32xbf16> to vector<32x32xbf16>
    %41 = arith.extf %40 : vector<32x32xbf16> to vector<32x32xf32>
    %c0_33 = arith.constant 0 : index
    %c0_34 = arith.constant 0 : index
    %42 = vector.load %arg3[%c0_33, %c0_34] : memref<1x32xf32, #tpu.memory_space<vmem>>, vector<1x32xf32>
    %43 = vector.broadcast %42 : vector<1x32xf32> to vector<32x32xf32>
    %44 = arith.mulf %41, %43 : vector<32x32xf32>
    %45 = arith.truncf %44 : vector<32x32xf32> to vector<32x32xbf16>
    %c0_35 = arith.constant 0 : index
    %c11 = arith.constant 11 : index
    %46 = vector.load %arg2[%c0_35, %c11] : memref<32x256xbf16, #tpu.memory_space<vmem>>, vector<32x128xbf16>
    %cst_36 = arith.constant dense<0.000000e+00> : vector<32x128xf32>
    %47 = tpu.matmul %45, %46, %cst_36 {dimension_numbers = #tpu.dot_dimension_numbers<[1], [0], [0], [1], [0, 0, 1, 1], [], []>} : vector<32x32xbf16>, vector<32x128xbf16>, vector<32x128xf32> -> vector<32x128xf32>
    %48 = arith.addf %38, %47 : vector<32x128xf32>
    %c0_37 = arith.constant 0 : index
    %c5 = arith.constant 5 : index
    %c0_38 = arith.constant 0 : index
    %c0_39 = arith.constant 0 : index
    %49 = vector.load %arg1[%c0_37, %c5, %c0_38, %c0_39] : memref<1x9x32x32xbf16, #tpu.memory_space<vmem>>, vector<1x1x32x32xbf16>
    %50 = vector.shape_cast %49 : vector<1x1x32x32xbf16> to vector<32x32xbf16>
    %51 = arith.extf %50 : vector<32x32xbf16> to vector<32x32xf32>
    %c0_40 = arith.constant 0 : index
    %c0_41 = arith.constant 0 : index
    %52 = vector.load %arg3[%c0_40, %c0_41] : memref<1x32xf32, #tpu.memory_space<vmem>>, vector<1x32xf32>
    %53 = vector.broadcast %52 : vector<1x32xf32> to vector<32x32xf32>
    %54 = arith.mulf %51, %53 : vector<32x32xf32>
    %55 = arith.truncf %54 : vector<32x32xf32> to vector<32x32xbf16>
    %c0_42 = arith.constant 0 : index
    %c12 = arith.constant 12 : index
    %56 = vector.load %arg2[%c0_42, %c12] : memref<32x256xbf16, #tpu.memory_space<vmem>>, vector<32x128xbf16>
    %cst_43 = arith.constant dense<0.000000e+00> : vector<32x128xf32>
    %57 = tpu.matmul %55, %56, %cst_43 {dimension_numbers = #tpu.dot_dimension_numbers<[1], [0], [0], [1], [0, 0, 1, 1], [], []>} : vector<32x32xbf16>, vector<32x128xbf16>, vector<32x128xf32> -> vector<32x128xf32>
    %58 = arith.addf %48, %57 : vector<32x128xf32>
    %c0_44 = arith.constant 0 : index
    %c6 = arith.constant 6 : index
    %c0_45 = arith.constant 0 : index
    %c0_46 = arith.constant 0 : index
    %59 = vector.load %arg1[%c0_44, %c6, %c0_45, %c0_46] : memref<1x9x32x32xbf16, #tpu.memory_space<vmem>>, vector<1x1x32x32xbf16>
    %60 = vector.shape_cast %59 : vector<1x1x32x32xbf16> to vector<32x32xbf16>
    %61 = arith.extf %60 : vector<32x32xbf16> to vector<32x32xf32>
    %c0_47 = arith.constant 0 : index
    %c0_48 = arith.constant 0 : index
    %62 = vector.load %arg3[%c0_47, %c0_48] : memref<1x32xf32, #tpu.memory_space<vmem>>, vector<1x32xf32>
    %63 = vector.broadcast %62 : vector<1x32xf32> to vector<32x32xf32>
    %64 = arith.mulf %61, %63 : vector<32x32xf32>
    %65 = arith.truncf %64 : vector<32x32xf32> to vector<32x32xbf16>
    %c0_49 = arith.constant 0 : index
    %c20 = arith.constant 20 : index
    %66 = vector.load %arg2[%c0_49, %c20] : memref<32x256xbf16, #tpu.memory_space<vmem>>, vector<32x128xbf16>
    %cst_50 = arith.constant dense<0.000000e+00> : vector<32x128xf32>
    %67 = tpu.matmul %65, %66, %cst_50 {dimension_numbers = #tpu.dot_dimension_numbers<[1], [0], [0], [1], [0, 0, 1, 1], [], []>} : vector<32x32xbf16>, vector<32x128xbf16>, vector<32x128xf32> -> vector<32x128xf32>
    %68 = arith.addf %58, %67 : vector<32x128xf32>
    %c0_51 = arith.constant 0 : index
    %c7 = arith.constant 7 : index
    %c0_52 = arith.constant 0 : index
    %c0_53 = arith.constant 0 : index
    %69 = vector.load %arg1[%c0_51, %c7, %c0_52, %c0_53] : memref<1x9x32x32xbf16, #tpu.memory_space<vmem>>, vector<1x1x32x32xbf16>
    %70 = vector.shape_cast %69 : vector<1x1x32x32xbf16> to vector<32x32xbf16>
    %71 = arith.extf %70 : vector<32x32xbf16> to vector<32x32xf32>
    %c0_54 = arith.constant 0 : index
    %c0_55 = arith.constant 0 : index
    %72 = vector.load %arg3[%c0_54, %c0_55] : memref<1x32xf32, #tpu.memory_space<vmem>>, vector<1x32xf32>
    %73 = vector.broadcast %72 : vector<1x32xf32> to vector<32x32xf32>
    %74 = arith.mulf %71, %73 : vector<32x32xf32>
    %75 = arith.truncf %74 : vector<32x32xf32> to vector<32x32xbf16>
    %c0_56 = arith.constant 0 : index
    %c21 = arith.constant 21 : index
    %76 = vector.load %arg2[%c0_56, %c21] : memref<32x256xbf16, #tpu.memory_space<vmem>>, vector<32x128xbf16>
    %cst_57 = arith.constant dense<0.000000e+00> : vector<32x128xf32>
    %77 = tpu.matmul %75, %76, %cst_57 {dimension_numbers = #tpu.dot_dimension_numbers<[1], [0], [0], [1], [0, 0, 1, 1], [], []>} : vector<32x32xbf16>, vector<32x128xbf16>, vector<32x128xf32> -> vector<32x128xf32>
    %78 = arith.addf %68, %77 : vector<32x128xf32>
    %c0_58 = arith.constant 0 : index
    %c8 = arith.constant 8 : index
    %c0_59 = arith.constant 0 : index
    %c0_60 = arith.constant 0 : index
    %79 = vector.load %arg1[%c0_58, %c8, %c0_59, %c0_60] : memref<1x9x32x32xbf16, #tpu.memory_space<vmem>>, vector<1x1x32x32xbf16>
    %80 = vector.shape_cast %79 : vector<1x1x32x32xbf16> to vector<32x32xbf16>
    %81 = arith.extf %80 : vector<32x32xbf16> to vector<32x32xf32>
    %c0_61 = arith.constant 0 : index
    %c0_62 = arith.constant 0 : index
    %82 = vector.load %arg3[%c0_61, %c0_62] : memref<1x32xf32, #tpu.memory_space<vmem>>, vector<1x32xf32>
    %83 = vector.broadcast %82 : vector<1x32xf32> to vector<32x32xf32>
    %84 = arith.mulf %81, %83 : vector<32x32xf32>
    %85 = arith.truncf %84 : vector<32x32xf32> to vector<32x32xbf16>
    %c0_63 = arith.constant 0 : index
    %c22 = arith.constant 22 : index
    %86 = vector.load %arg2[%c0_63, %c22] : memref<32x256xbf16, #tpu.memory_space<vmem>>, vector<32x128xbf16>
    %cst_64 = arith.constant dense<0.000000e+00> : vector<32x128xf32>
    %87 = tpu.matmul %85, %86, %cst_64 {dimension_numbers = #tpu.dot_dimension_numbers<[1], [0], [0], [1], [0, 0, 1, 1], [], []>} : vector<32x32xbf16>, vector<32x128xbf16>, vector<32x128xf32> -> vector<32x128xf32>
    %88 = arith.addf %78, %87 : vector<32x128xf32>
    %c0_65 = arith.constant 0 : index
    %c0_66 = arith.constant 0 : index
    %89 = vector.load %arg4[%c0_65, %c0_66] : memref<32x1xf32, #tpu.memory_space<vmem>>, vector<32x1xf32>
    %90 = vector.broadcast %89 : vector<32x1xf32> to vector<32x128xf32>
    %91 = arith.mulf %88, %90 : vector<32x128xf32>
    %c0_67 = arith.constant 0 : index
    %c0_68 = arith.constant 0 : index
    %92 = vector.load %arg5[%c0_67, %c0_68] : memref<32x1xf32, #tpu.memory_space<vmem>>, vector<32x1xf32>
    %93 = vector.broadcast %92 : vector<32x1xf32> to vector<32x128xf32>
    %94 = arith.addf %91, %93 : vector<32x128xf32>
    %c0_69 = arith.constant 0 : index
    %c0_70 = arith.constant 0 : index
    %c0_71 = arith.constant 0 : index
    %95 = vector.load %arg6[%c0_69, %c0_70, %c0_71] : memref<1x1x128xf32, #tpu.memory_space<vmem>>, vector<1x1x128xf32>
    %96 = vector.shape_cast %95 : vector<1x1x128xf32> to vector<1x128xf32>
    %97 = vector.broadcast %96 : vector<1x128xf32> to vector<32x128xf32>
    %98 = arith.addf %94, %97 : vector<32x128xf32>
    %cst_72 = arith.constant 0.000000e+00 : f32
    %99 = vector.broadcast %cst_72 : f32 to vector<32x128xf32>
    %100 = arith.cmpf oge, %98, %99 : vector<32x128xf32>
    %cst_73 = arith.constant 2.000000e-01 : f32
    %101 = vector.broadcast %cst_73 : f32 to vector<32x128xf32>
    %102 = arith.mulf %98, %101 : vector<32x128xf32>
    %103 = arith.select %100, %98, %102 : vector<32x128xi1>, vector<32x128xf32>
    %cst_74 = arith.constant 1.41421354 : f32
    %104 = vector.broadcast %cst_74 : f32 to vector<32x128xf32>
    %105 = arith.mulf %103, %104 : vector<32x128xf32>
    %106 = arith.truncf %105 : vector<32x128xf32> to vector<32x128xbf16>
    %c0_75 = arith.constant 0 : index
    %c0_76 = arith.constant 0 : index
    %c0_77 = arith.constant 0 : index
    %107 = vector.load %arg7[%c0_75, %c0_76, %c0_77] : memref<1x32x128xbf16, #tpu.memory_space<vmem>>, vector<1x32x128xbf16>
    %108 = vector.shape_cast %107 : vector<1x32x128xbf16> to vector<32x128xbf16>
    %109 = vector.shape_cast %106 : vector<32x128xbf16> to vector<1x32x128xbf16>
    tpu.vector_store %arg7[%c0_75, %c0_76, %c0_77], %109 {strides = array<i32>} : memref<1x32x128xbf16, #tpu.memory_space<vmem>>, vector<1x32x128xbf16>,
    return
  }
  func.func @transform_0(%arg0: i32) -> (i32, i32, i32, i32) {
    %c0_i32 = arith.constant 0 : i32
    %c0_i32_0 = arith.constant 0 : i32
    %c0_i32_1 = arith.constant 0 : i32
    %c0_i32_2 = arith.constant 0 : i32
    return %arg0, %c0_i32, %c0_i32_0, %c0_i32_1 : i32, i32, i32, i32
  }
  func.func @transform_1(%arg0: i32) -> (i32, i32) {
    %c0_i32 = arith.constant 0 : i32
    %c0_i32_0 = arith.constant 0 : i32
    %c0_i32_1 = arith.constant 0 : i32
    return %c0_i32, %c0_i32_0 : i32, i32
  }
  func.func @transform_2(%arg0: i32) -> (i32, i32) {
    %c0_i32 = arith.constant 0 : i32
    %c0_i32_0 = arith.constant 0 : i32
    %c0_i32_1 = arith.constant 0 : i32
    return %c0_i32, %c0_i32_0 : i32, i32
  }
  func.func @transform_3(%arg0: i32) -> (i32, i32) {
    %c0_i32 = arith.constant 0 : i32
    %c0_i32_0 = arith.constant 0 : i32
    %c0_i32_1 = arith.constant 0 : i32
    return %c0_i32, %c0_i32_0 : i32, i32
  }
  func.func @transform_4(%arg0: i32) -> (i32, i32) {
    %c0_i32 = arith.constant 0 : i32
    %c0_i32_0 = arith.constant 0 : i32
    %c0_i32_1 = arith.constant 0 : i32
    return %c0_i32, %c0_i32_0 : i32, i32
  }
  func.func @transform_5(%arg0: i32) -> (i32, i32, i32) {
    %c0_i32 = arith.constant 0 : i32
    %c0_i32_0 = arith.constant 0 : i32
    %c0_i32_1 = arith.constant 0 : i32
    return %arg0, %c0_i32, %c0_i32_0 : i32, i32, i32
  }
  func.func @transform_6(%arg0: i32) -> (i32, i32, i32) {
    %c0_i32 = arith.constant 0 : i32
    %c0_i32_0 = arith.constant 0 : i32
    %c0_i32_1 = arith.constant 0 : i32
    return %arg0, %c0_i32, %c0_i32_0 : i32, i32, i32
  }
}

module attributes {stable_mosaic.version = 11 : i64} {
  func.func @_conv_mm_kernel(%arg0: i32, %arg1: memref<1x1x8x32xbf16, #tpu.memory_space<vmem>>, %arg2: memref<32x128xbf16, #tpu.memory_space<vmem>>, %arg3: memref<1x32xf32, #tpu.memory_space<vmem>>, %arg4: memref<8x1xf32, #tpu.memory_space<vmem>>, %arg5: memref<8x128xf32, #tpu.memory_space<vmem>>, %arg6: memref<1x8x128xf32, #tpu.memory_space<vmem>>) attributes {dimension_semantics = [#tpu.dimension_semantics<parallel>], iteration_bounds = array<i64: 1>, scalar_prefetch = 0 : i64, scratch_operands = 0 : i64, tpu.core_type = #tpu.core_type<tc>, window_params = [{transform_indices = @transform_0, window_bounds = array<i64: 1, 1, 8, 32>}, {pipeline_mode = #tpu.pipeline_mode<synchronous>, transform_indices = @transform_1, window_bounds = array<i64: 32, 128>}, {pipeline_mode = #tpu.pipeline_mode<synchronous>, transform_indices = @transform_2, window_bounds = array<i64: 1, 32>}, {pipeline_mode = #tpu.pipeline_mode<synchronous>, transform_indices = @transform_3, window_bounds = array<i64: 8, 1>}, {pipeline_mode = #tpu.pipeline_mode<synchronous>, transform_indices = @transform_4, window_bounds = array<i64: 8, 128>}, {transform_indices = @transform_5, window_bounds = array<i64: 1, 8, 128>}]} {
    %c0 = arith.constant 0 : index
    %c0_0 = arith.constant 0 : index
    %c0_1 = arith.constant 0 : index
    %c0_2 = arith.constant 0 : index
    %0 = vector.load %arg1[%c0, %c0_0, %c0_1, %c0_2] : memref<1x1x8x32xbf16, #tpu.memory_space<vmem>>, vector<1x1x8x32xbf16>
    %1 = vector.shape_cast %0 : vector<1x1x8x32xbf16> to vector<8x32xbf16>
    %2 = arith.extf %1 : vector<8x32xbf16> to vector<8x32xf32>
    %c0_3 = arith.constant 0 : index
    %c0_4 = arith.constant 0 : index
    %3 = vector.load %arg3[%c0_3, %c0_4] : memref<1x32xf32, #tpu.memory_space<vmem>>, vector<1x32xf32>
    %4 = vector.broadcast %3 : vector<1x32xf32> to vector<8x32xf32>
    %5 = arith.mulf %2, %4 : vector<8x32xf32>
    %6 = arith.truncf %5 : vector<8x32xf32> to vector<8x32xbf16>
    %c0_5 = arith.constant 0 : index
    %c0_6 = arith.constant 0 : index
    %7 = vector.load %arg2[%c0_5, %c0_6] : memref<32x128xbf16, #tpu.memory_space<vmem>>, vector<32x128xbf16>
    %cst = arith.constant dense<0.000000e+00> : vector<8x128xf32>
    %8 = tpu.matmul %6, %7, %cst {dimension_numbers = #tpu.dot_dimension_numbers<[1], [0], [0], [1], [0, 0, 1, 1], [], []>} : vector<8x32xbf16>, vector<32x128xbf16>, vector<8x128xf32> -> vector<8x128xf32>
    %c0_7 = arith.constant 0 : index
    %c0_8 = arith.constant 0 : index
    %9 = vector.load %arg4[%c0_7, %c0_8] : memref<8x1xf32, #tpu.memory_space<vmem>>, vector<8x1xf32>
    %10 = vector.broadcast %9 : vector<8x1xf32> to vector<8x128xf32>
    %11 = arith.addf %8, %10 : vector<8x128xf32>
    %c0_9 = arith.constant 0 : index
    %c0_10 = arith.constant 0 : index
    %12 = vector.load %arg5[%c0_9, %c0_10] : memref<8x128xf32, #tpu.memory_space<vmem>>, vector<8x128xf32>
    %13 = arith.addf %11, %12 : vector<8x128xf32>
    %c0_11 = arith.constant 0 : index
    %c0_12 = arith.constant 0 : index
    %c0_13 = arith.constant 0 : index
    %14 = vector.load %arg6[%c0_11, %c0_12, %c0_13] : memref<1x8x128xf32, #tpu.memory_space<vmem>>, vector<1x8x128xf32>
    %15 = vector.shape_cast %14 : vector<1x8x128xf32> to vector<8x128xf32>
    %16 = vector.shape_cast %13 : vector<8x128xf32> to vector<1x8x128xf32>
    tpu.vector_store %arg6[%c0_11, %c0_12, %c0_13], %16 {strides = array<i32>} : memref<1x8x128xf32, #tpu.memory_space<vmem>>, vector<1x8x128xf32>,
    return
  }
  func.func @transform_0(%arg0: i32) -> (i32, i32, i32, i32) {
    %c0_i32 = arith.constant 0 : i32
    %c0_i32_0 = arith.constant 0 : i32
    %c0_i32_1 = arith.constant 0 : i32
    %c0_i32_2 = arith.constant 0 : i32
    return %arg0, %c0_i32, %c0_i32_0, %c0_i32_1 : i32, i32, i32, i32
  }
  func.func @transform_1(%arg0: i32) -> (i32, i32) {
    %c0_i32 = arith.constant 0 : i32
    %c0_i32_0 = arith.constant 0 : i32
    %c0_i32_1 = arith.constant 0 : i32
    return %c0_i32, %c0_i32_0 : i32, i32
  }
  func.func @transform_2(%arg0: i32) -> (i32, i32) {
    %c0_i32 = arith.constant 0 : i32
    %c0_i32_0 = arith.constant 0 : i32
    %c0_i32_1 = arith.constant 0 : i32
    return %c0_i32, %c0_i32_0 : i32, i32
  }
  func.func @transform_3(%arg0: i32) -> (i32, i32) {
    %c0_i32 = arith.constant 0 : i32
    %c0_i32_0 = arith.constant 0 : i32
    %c0_i32_1 = arith.constant 0 : i32
    return %c0_i32, %c0_i32_0 : i32, i32
  }
  func.func @transform_4(%arg0: i32) -> (i32, i32) {
    %c0_i32 = arith.constant 0 : i32
    %c0_i32_0 = arith.constant 0 : i32
    %c0_i32_1 = arith.constant 0 : i32
    return %c0_i32, %c0_i32_0 : i32, i32
  }
  func.func @transform_5(%arg0: i32) -> (i32, i32, i32) {
    %c0_i32 = arith.constant 0 : i32
    %c0_i32_0 = arith.constant 0 : i32
    %c0_i32_1 = arith.constant 0 : i32
    return %arg0, %c0_i32, %c0_i32_0 : i32, i32, i32
  }
}

module attributes {stable_mosaic.version = 11 : i64} {
  func.func @_conv_mm_kernel(%arg0: i32, %arg1: memref<1x9x16x32xbf16, #tpu.memory_space<vmem>>, %arg2: memref<32x256xbf16, #tpu.memory_space<vmem>>, %arg3: memref<1x32xf32, #tpu.memory_space<vmem>>, %arg4: memref<16x1xf32, #tpu.memory_space<vmem>>, %arg5: memref<16x1xf32, #tpu.memory_space<vmem>>, %arg6: memref<1x1x128xf32, #tpu.memory_space<vmem>>, %arg7: memref<1x16x128xbf16, #tpu.memory_space<vmem>>) attributes {dimension_semantics = [#tpu.dimension_semantics<parallel>], iteration_bounds = array<i64: 4>, scalar_prefetch = 0 : i64, scratch_operands = 0 : i64, tpu.core_type = #tpu.core_type<tc>, window_params = [{transform_indices = @transform_0, window_bounds = array<i64: 1, 9, 16, 32>}, {pipeline_mode = #tpu.pipeline_mode<synchronous>, transform_indices = @transform_1, window_bounds = array<i64: 32, 256>}, {pipeline_mode = #tpu.pipeline_mode<synchronous>, transform_indices = @transform_2, window_bounds = array<i64: 1, 32>}, {pipeline_mode = #tpu.pipeline_mode<synchronous>, transform_indices = @transform_3, window_bounds = array<i64: 16, 1>}, {pipeline_mode = #tpu.pipeline_mode<synchronous>, transform_indices = @transform_4, window_bounds = array<i64: 16, 1>}, {transform_indices = @transform_5, window_bounds = array<i64: 1, 1, 128>}, {transform_indices = @transform_6, window_bounds = array<i64: 1, 16, 128>}]} {
    %c0 = arith.constant 0 : index
    %c0_0 = arith.constant 0 : index
    %c0_1 = arith.constant 0 : index
    %c0_2 = arith.constant 0 : index
    %0 = vector.load %arg1[%c0, %c0_0, %c0_1, %c0_2] : memref<1x9x16x32xbf16, #tpu.memory_space<vmem>>, vector<1x1x16x32xbf16>
    %1 = vector.shape_cast %0 : vector<1x1x16x32xbf16> to vector<16x32xbf16>
    %2 = arith.extf %1 : vector<16x32xbf16> to vector<16x32xf32>
    %c0_3 = arith.constant 0 : index
    %c0_4 = arith.constant 0 : index
    %3 = vector.load %arg3[%c0_3, %c0_4] : memref<1x32xf32, #tpu.memory_space<vmem>>, vector<1x32xf32>
    %4 = vector.broadcast %3 : vector<1x32xf32> to vector<16x32xf32>
    %5 = arith.mulf %2, %4 : vector<16x32xf32>
    %6 = arith.truncf %5 : vector<16x32xf32> to vector<16x32xbf16>
    %c0_5 = arith.constant 0 : index
    %c0_6 = arith.constant 0 : index
    %7 = vector.load %arg2[%c0_5, %c0_6] : memref<32x256xbf16, #tpu.memory_space<vmem>>, vector<32x128xbf16>
    %cst = arith.constant dense<0.000000e+00> : vector<16x128xf32>
    %8 = tpu.matmul %6, %7, %cst {dimension_numbers = #tpu.dot_dimension_numbers<[1], [0], [0], [1], [0, 0, 1, 1], [], []>} : vector<16x32xbf16>, vector<32x128xbf16>, vector<16x128xf32> -> vector<16x128xf32>
    %c0_7 = arith.constant 0 : index
    %c1 = arith.constant 1 : index
    %c0_8 = arith.constant 0 : index
    %c0_9 = arith.constant 0 : index
    %9 = vector.load %arg1[%c0_7, %c1, %c0_8, %c0_9] : memref<1x9x16x32xbf16, #tpu.memory_space<vmem>>, vector<1x1x16x32xbf16>
    %10 = vector.shape_cast %9 : vector<1x1x16x32xbf16> to vector<16x32xbf16>
    %11 = arith.extf %10 : vector<16x32xbf16> to vector<16x32xf32>
    %c0_10 = arith.constant 0 : index
    %c0_11 = arith.constant 0 : index
    %12 = vector.load %arg3[%c0_10, %c0_11] : memref<1x32xf32, #tpu.memory_space<vmem>>, vector<1x32xf32>
    %13 = vector.broadcast %12 : vector<1x32xf32> to vector<16x32xf32>
    %14 = arith.mulf %11, %13 : vector<16x32xf32>
    %15 = arith.truncf %14 : vector<16x32xf32> to vector<16x32xbf16>
    %c0_12 = arith.constant 0 : index
    %c1_13 = arith.constant 1 : index
    %16 = vector.load %arg2[%c0_12, %c1_13] : memref<32x256xbf16, #tpu.memory_space<vmem>>, vector<32x128xbf16>
    %cst_14 = arith.constant dense<0.000000e+00> : vector<16x128xf32>
    %17 = tpu.matmul %15, %16, %cst_14 {dimension_numbers = #tpu.dot_dimension_numbers<[1], [0], [0], [1], [0, 0, 1, 1], [], []>} : vector<16x32xbf16>, vector<32x128xbf16>, vector<16x128xf32> -> vector<16x128xf32>
    %18 = arith.addf %8, %17 : vector<16x128xf32>
    %c0_15 = arith.constant 0 : index
    %c2 = arith.constant 2 : index
    %c0_16 = arith.constant 0 : index
    %c0_17 = arith.constant 0 : index
    %19 = vector.load %arg1[%c0_15, %c2, %c0_16, %c0_17] : memref<1x9x16x32xbf16, #tpu.memory_space<vmem>>, vector<1x1x16x32xbf16>
    %20 = vector.shape_cast %19 : vector<1x1x16x32xbf16> to vector<16x32xbf16>
    %21 = arith.extf %20 : vector<16x32xbf16> to vector<16x32xf32>
    %c0_18 = arith.constant 0 : index
    %c0_19 = arith.constant 0 : index
    %22 = vector.load %arg3[%c0_18, %c0_19] : memref<1x32xf32, #tpu.memory_space<vmem>>, vector<1x32xf32>
    %23 = vector.broadcast %22 : vector<1x32xf32> to vector<16x32xf32>
    %24 = arith.mulf %21, %23 : vector<16x32xf32>
    %25 = arith.truncf %24 : vector<16x32xf32> to vector<16x32xbf16>
    %c0_20 = arith.constant 0 : index
    %c2_21 = arith.constant 2 : index
    %26 = vector.load %arg2[%c0_20, %c2_21] : memref<32x256xbf16, #tpu.memory_space<vmem>>, vector<32x128xbf16>
    %cst_22 = arith.constant dense<0.000000e+00> : vector<16x128xf32>
    %27 = tpu.matmul %25, %26, %cst_22 {dimension_numbers = #tpu.dot_dimension_numbers<[1], [0], [0], [1], [0, 0, 1, 1], [], []>} : vector<16x32xbf16>, vector<32x128xbf16>, vector<16x128xf32> -> vector<16x128xf32>
    %28 = arith.addf %18, %27 : vector<16x128xf32>
    %c0_23 = arith.constant 0 : index
    %c3 = arith.constant 3 : index
    %c0_24 = arith.constant 0 : index
    %c0_25 = arith.constant 0 : index
    %29 = vector.load %arg1[%c0_23, %c3, %c0_24, %c0_25] : memref<1x9x16x32xbf16, #tpu.memory_space<vmem>>, vector<1x1x16x32xbf16>
    %30 = vector.shape_cast %29 : vector<1x1x16x32xbf16> to vector<16x32xbf16>
    %31 = arith.extf %30 : vector<16x32xbf16> to vector<16x32xf32>
    %c0_26 = arith.constant 0 : index
    %c0_27 = arith.constant 0 : index
    %32 = vector.load %arg3[%c0_26, %c0_27] : memref<1x32xf32, #tpu.memory_space<vmem>>, vector<1x32xf32>
    %33 = vector.broadcast %32 : vector<1x32xf32> to vector<16x32xf32>
    %34 = arith.mulf %31, %33 : vector<16x32xf32>
    %35 = arith.truncf %34 : vector<16x32xf32> to vector<16x32xbf16>
    %c0_28 = arith.constant 0 : index
    %c10 = arith.constant 10 : index
    %36 = vector.load %arg2[%c0_28, %c10] : memref<32x256xbf16, #tpu.memory_space<vmem>>, vector<32x128xbf16>
    %cst_29 = arith.constant dense<0.000000e+00> : vector<16x128xf32>
    %37 = tpu.matmul %35, %36, %cst_29 {dimension_numbers = #tpu.dot_dimension_numbers<[1], [0], [0], [1], [0, 0, 1, 1], [], []>} : vector<16x32xbf16>, vector<32x128xbf16>, vector<16x128xf32> -> vector<16x128xf32>
    %38 = arith.addf %28, %37 : vector<16x128xf32>
    %c0_30 = arith.constant 0 : index
    %c4 = arith.constant 4 : index
    %c0_31 = arith.constant 0 : index
    %c0_32 = arith.constant 0 : index
    %39 = vector.load %arg1[%c0_30, %c4, %c0_31, %c0_32] : memref<1x9x16x32xbf16, #tpu.memory_space<vmem>>, vector<1x1x16x32xbf16>
    %40 = vector.shape_cast %39 : vector<1x1x16x32xbf16> to vector<16x32xbf16>
    %41 = arith.extf %40 : vector<16x32xbf16> to vector<16x32xf32>
    %c0_33 = arith.constant 0 : index
    %c0_34 = arith.constant 0 : index
    %42 = vector.load %arg3[%c0_33, %c0_34] : memref<1x32xf32, #tpu.memory_space<vmem>>, vector<1x32xf32>
    %43 = vector.broadcast %42 : vector<1x32xf32> to vector<16x32xf32>
    %44 = arith.mulf %41, %43 : vector<16x32xf32>
    %45 = arith.truncf %44 : vector<16x32xf32> to vector<16x32xbf16>
    %c0_35 = arith.constant 0 : index
    %c11 = arith.constant 11 : index
    %46 = vector.load %arg2[%c0_35, %c11] : memref<32x256xbf16, #tpu.memory_space<vmem>>, vector<32x128xbf16>
    %cst_36 = arith.constant dense<0.000000e+00> : vector<16x128xf32>
    %47 = tpu.matmul %45, %46, %cst_36 {dimension_numbers = #tpu.dot_dimension_numbers<[1], [0], [0], [1], [0, 0, 1, 1], [], []>} : vector<16x32xbf16>, vector<32x128xbf16>, vector<16x128xf32> -> vector<16x128xf32>
    %48 = arith.addf %38, %47 : vector<16x128xf32>
    %c0_37 = arith.constant 0 : index
    %c5 = arith.constant 5 : index
    %c0_38 = arith.constant 0 : index
    %c0_39 = arith.constant 0 : index
    %49 = vector.load %arg1[%c0_37, %c5, %c0_38, %c0_39] : memref<1x9x16x32xbf16, #tpu.memory_space<vmem>>, vector<1x1x16x32xbf16>
    %50 = vector.shape_cast %49 : vector<1x1x16x32xbf16> to vector<16x32xbf16>
    %51 = arith.extf %50 : vector<16x32xbf16> to vector<16x32xf32>
    %c0_40 = arith.constant 0 : index
    %c0_41 = arith.constant 0 : index
    %52 = vector.load %arg3[%c0_40, %c0_41] : memref<1x32xf32, #tpu.memory_space<vmem>>, vector<1x32xf32>
    %53 = vector.broadcast %52 : vector<1x32xf32> to vector<16x32xf32>
    %54 = arith.mulf %51, %53 : vector<16x32xf32>
    %55 = arith.truncf %54 : vector<16x32xf32> to vector<16x32xbf16>
    %c0_42 = arith.constant 0 : index
    %c12 = arith.constant 12 : index
    %56 = vector.load %arg2[%c0_42, %c12] : memref<32x256xbf16, #tpu.memory_space<vmem>>, vector<32x128xbf16>
    %cst_43 = arith.constant dense<0.000000e+00> : vector<16x128xf32>
    %57 = tpu.matmul %55, %56, %cst_43 {dimension_numbers = #tpu.dot_dimension_numbers<[1], [0], [0], [1], [0, 0, 1, 1], [], []>} : vector<16x32xbf16>, vector<32x128xbf16>, vector<16x128xf32> -> vector<16x128xf32>
    %58 = arith.addf %48, %57 : vector<16x128xf32>
    %c0_44 = arith.constant 0 : index
    %c6 = arith.constant 6 : index
    %c0_45 = arith.constant 0 : index
    %c0_46 = arith.constant 0 : index
    %59 = vector.load %arg1[%c0_44, %c6, %c0_45, %c0_46] : memref<1x9x16x32xbf16, #tpu.memory_space<vmem>>, vector<1x1x16x32xbf16>
    %60 = vector.shape_cast %59 : vector<1x1x16x32xbf16> to vector<16x32xbf16>
    %61 = arith.extf %60 : vector<16x32xbf16> to vector<16x32xf32>
    %c0_47 = arith.constant 0 : index
    %c0_48 = arith.constant 0 : index
    %62 = vector.load %arg3[%c0_47, %c0_48] : memref<1x32xf32, #tpu.memory_space<vmem>>, vector<1x32xf32>
    %63 = vector.broadcast %62 : vector<1x32xf32> to vector<16x32xf32>
    %64 = arith.mulf %61, %63 : vector<16x32xf32>
    %65 = arith.truncf %64 : vector<16x32xf32> to vector<16x32xbf16>
    %c0_49 = arith.constant 0 : index
    %c20 = arith.constant 20 : index
    %66 = vector.load %arg2[%c0_49, %c20] : memref<32x256xbf16, #tpu.memory_space<vmem>>, vector<32x128xbf16>
    %cst_50 = arith.constant dense<0.000000e+00> : vector<16x128xf32>
    %67 = tpu.matmul %65, %66, %cst_50 {dimension_numbers = #tpu.dot_dimension_numbers<[1], [0], [0], [1], [0, 0, 1, 1], [], []>} : vector<16x32xbf16>, vector<32x128xbf16>, vector<16x128xf32> -> vector<16x128xf32>
    %68 = arith.addf %58, %67 : vector<16x128xf32>
    %c0_51 = arith.constant 0 : index
    %c7 = arith.constant 7 : index
    %c0_52 = arith.constant 0 : index
    %c0_53 = arith.constant 0 : index
    %69 = vector.load %arg1[%c0_51, %c7, %c0_52, %c0_53] : memref<1x9x16x32xbf16, #tpu.memory_space<vmem>>, vector<1x1x16x32xbf16>
    %70 = vector.shape_cast %69 : vector<1x1x16x32xbf16> to vector<16x32xbf16>
    %71 = arith.extf %70 : vector<16x32xbf16> to vector<16x32xf32>
    %c0_54 = arith.constant 0 : index
    %c0_55 = arith.constant 0 : index
    %72 = vector.load %arg3[%c0_54, %c0_55] : memref<1x32xf32, #tpu.memory_space<vmem>>, vector<1x32xf32>
    %73 = vector.broadcast %72 : vector<1x32xf32> to vector<16x32xf32>
    %74 = arith.mulf %71, %73 : vector<16x32xf32>
    %75 = arith.truncf %74 : vector<16x32xf32> to vector<16x32xbf16>
    %c0_56 = arith.constant 0 : index
    %c21 = arith.constant 21 : index
    %76 = vector.load %arg2[%c0_56, %c21] : memref<32x256xbf16, #tpu.memory_space<vmem>>, vector<32x128xbf16>
    %cst_57 = arith.constant dense<0.000000e+00> : vector<16x128xf32>
    %77 = tpu.matmul %75, %76, %cst_57 {dimension_numbers = #tpu.dot_dimension_numbers<[1], [0], [0], [1], [0, 0, 1, 1], [], []>} : vector<16x32xbf16>, vector<32x128xbf16>, vector<16x128xf32> -> vector<16x128xf32>
    %78 = arith.addf %68, %77 : vector<16x128xf32>
    %c0_58 = arith.constant 0 : index
    %c8 = arith.constant 8 : index
    %c0_59 = arith.constant 0 : index
    %c0_60 = arith.constant 0 : index
    %79 = vector.load %arg1[%c0_58, %c8, %c0_59, %c0_60] : memref<1x9x16x32xbf16, #tpu.memory_space<vmem>>, vector<1x1x16x32xbf16>
    %80 = vector.shape_cast %79 : vector<1x1x16x32xbf16> to vector<16x32xbf16>
    %81 = arith.extf %80 : vector<16x32xbf16> to vector<16x32xf32>
    %c0_61 = arith.constant 0 : index
    %c0_62 = arith.constant 0 : index
    %82 = vector.load %arg3[%c0_61, %c0_62] : memref<1x32xf32, #tpu.memory_space<vmem>>, vector<1x32xf32>
    %83 = vector.broadcast %82 : vector<1x32xf32> to vector<16x32xf32>
    %84 = arith.mulf %81, %83 : vector<16x32xf32>
    %85 = arith.truncf %84 : vector<16x32xf32> to vector<16x32xbf16>
    %c0_63 = arith.constant 0 : index
    %c22 = arith.constant 22 : index
    %86 = vector.load %arg2[%c0_63, %c22] : memref<32x256xbf16, #tpu.memory_space<vmem>>, vector<32x128xbf16>
    %cst_64 = arith.constant dense<0.000000e+00> : vector<16x128xf32>
    %87 = tpu.matmul %85, %86, %cst_64 {dimension_numbers = #tpu.dot_dimension_numbers<[1], [0], [0], [1], [0, 0, 1, 1], [], []>} : vector<16x32xbf16>, vector<32x128xbf16>, vector<16x128xf32> -> vector<16x128xf32>
    %88 = arith.addf %78, %87 : vector<16x128xf32>
    %c0_65 = arith.constant 0 : index
    %c0_66 = arith.constant 0 : index
    %89 = vector.load %arg4[%c0_65, %c0_66] : memref<16x1xf32, #tpu.memory_space<vmem>>, vector<16x1xf32>
    %90 = vector.broadcast %89 : vector<16x1xf32> to vector<16x128xf32>
    %91 = arith.mulf %88, %90 : vector<16x128xf32>
    %c0_67 = arith.constant 0 : index
    %c0_68 = arith.constant 0 : index
    %92 = vector.load %arg5[%c0_67, %c0_68] : memref<16x1xf32, #tpu.memory_space<vmem>>, vector<16x1xf32>
    %93 = vector.broadcast %92 : vector<16x1xf32> to vector<16x128xf32>
    %94 = arith.addf %91, %93 : vector<16x128xf32>
    %c0_69 = arith.constant 0 : index
    %c0_70 = arith.constant 0 : index
    %c0_71 = arith.constant 0 : index
    %95 = vector.load %arg6[%c0_69, %c0_70, %c0_71] : memref<1x1x128xf32, #tpu.memory_space<vmem>>, vector<1x1x128xf32>
    %96 = vector.shape_cast %95 : vector<1x1x128xf32> to vector<1x128xf32>
    %97 = vector.broadcast %96 : vector<1x128xf32> to vector<16x128xf32>
    %98 = arith.addf %94, %97 : vector<16x128xf32>
    %cst_72 = arith.constant 0.000000e+00 : f32
    %99 = vector.broadcast %cst_72 : f32 to vector<16x128xf32>
    %100 = arith.cmpf oge, %98, %99 : vector<16x128xf32>
    %cst_73 = arith.constant 2.000000e-01 : f32
    %101 = vector.broadcast %cst_73 : f32 to vector<16x128xf32>
    %102 = arith.mulf %98, %101 : vector<16x128xf32>
    %103 = arith.select %100, %98, %102 : vector<16x128xi1>, vector<16x128xf32>
    %cst_74 = arith.constant 1.41421354 : f32
    %104 = vector.broadcast %cst_74 : f32 to vector<16x128xf32>
    %105 = arith.mulf %103, %104 : vector<16x128xf32>
    %106 = arith.truncf %105 : vector<16x128xf32> to vector<16x128xbf16>
    %c0_75 = arith.constant 0 : index
    %c0_76 = arith.constant 0 : index
    %c0_77 = arith.constant 0 : index
    %107 = vector.load %arg7[%c0_75, %c0_76, %c0_77] : memref<1x16x128xbf16, #tpu.memory_space<vmem>>, vector<1x16x128xbf16>
    %108 = vector.shape_cast %107 : vector<1x16x128xbf16> to vector<16x128xbf16>
    %109 = vector.shape_cast %106 : vector<16x128xbf16> to vector<1x16x128xbf16>
    tpu.vector_store %arg7[%c0_75, %c0_76, %c0_77], %109 {strides = array<i32>} : memref<1x16x128xbf16, #tpu.memory_space<vmem>>, vector<1x16x128xbf16>,
    return
  }
  func.func @transform_0(%arg0: i32) -> (i32, i32, i32, i32) {
    %c0_i32 = arith.constant 0 : i32
    %c0_i32_0 = arith.constant 0 : i32
    %c0_i32_1 = arith.constant 0 : i32
    %c0_i32_2 = arith.constant 0 : i32
    return %arg0, %c0_i32, %c0_i32_0, %c0_i32_1 : i32, i32, i32, i32
  }
  func.func @transform_1(%arg0: i32) -> (i32, i32) {
    %c0_i32 = arith.constant 0 : i32
    %c0_i32_0 = arith.constant 0 : i32
    %c0_i32_1 = arith.constant 0 : i32
    return %c0_i32, %c0_i32_0 : i32, i32
  }
  func.func @transform_2(%arg0: i32) -> (i32, i32) {
    %c0_i32 = arith.constant 0 : i32
    %c0_i32_0 = arith.constant 0 : i32
    %c0_i32_1 = arith.constant 0 : i32
    return %c0_i32, %c0_i32_0 : i32, i32
  }
  func.func @transform_3(%arg0: i32) -> (i32, i32) {
    %c0_i32 = arith.constant 0 : i32
    %c0_i32_0 = arith.constant 0 : i32
    %c0_i32_1 = arith.constant 0 : i32
    return %c0_i32, %c0_i32_0 : i32, i32
  }
  func.func @transform_4(%arg0: i32) -> (i32, i32) {
    %c0_i32 = arith.constant 0 : i32
    %c0_i32_0 = arith.constant 0 : i32
    %c0_i32_1 = arith.constant 0 : i32
    return %c0_i32, %c0_i32_0 : i32, i32
  }
  func.func @transform_5(%arg0: i32) -> (i32, i32, i32) {
    %c0_i32 = arith.constant 0 : i32
    %c0_i32_0 = arith.constant 0 : i32
    %c0_i32_1 = arith.constant 0 : i32
    return %arg0, %c0_i32, %c0_i32_0 : i32, i32, i32
  }
  func.func @transform_6(%arg0: i32) -> (i32, i32, i32) {
    %c0_i32 = arith.constant 0 : i32
    %c0_i32_0 = arith.constant 0 : i32
    %c0_i32_1 = arith.constant 0 : i32
    return %arg0, %c0_i32, %c0_i32_0 : i32, i32, i32
  }
}

module attributes {stable_mosaic.version = 11 : i64} {
  func.func @_conv_mm_kernel(%arg0: i32, %arg1: memref<1x9x16x16xbf16, #tpu.memory_space<vmem>>, %arg2: memref<16x512xbf16, #tpu.memory_space<vmem>>, %arg3: memref<1x16xf32, #tpu.memory_space<vmem>>, %arg4: memref<16x1xf32, #tpu.memory_space<vmem>>, %arg5: memref<16x1xf32, #tpu.memory_space<vmem>>, %arg6: memref<1x1x384xf32, #tpu.memory_space<vmem>>, %arg7: memref<1x16x384xbf16, #tpu.memory_space<vmem>>) attributes {dimension_semantics = [#tpu.dimension_semantics<parallel>], iteration_bounds = array<i64: 1>, scalar_prefetch = 0 : i64, scratch_operands = 0 : i64, tpu.core_type = #tpu.core_type<tc>, window_params = [{transform_indices = @transform_0, window_bounds = array<i64: 1, 9, 16, 16>}, {pipeline_mode = #tpu.pipeline_mode<synchronous>, transform_indices = @transform_1, window_bounds = array<i64: 16, 512>}, {pipeline_mode = #tpu.pipeline_mode<synchronous>, transform_indices = @transform_2, window_bounds = array<i64: 1, 16>}, {pipeline_mode = #tpu.pipeline_mode<synchronous>, transform_indices = @transform_3, window_bounds = array<i64: 16, 1>}, {pipeline_mode = #tpu.pipeline_mode<synchronous>, transform_indices = @transform_4, window_bounds = array<i64: 16, 1>}, {transform_indices = @transform_5, window_bounds = array<i64: 1, 1, 384>}, {transform_indices = @transform_6, window_bounds = array<i64: 1, 16, 384>}]} {
    %c0 = arith.constant 0 : index
    %c0_0 = arith.constant 0 : index
    %c0_1 = arith.constant 0 : index
    %c0_2 = arith.constant 0 : index
    %0 = vector.load %arg1[%c0, %c0_0, %c0_1, %c0_2] : memref<1x9x16x16xbf16, #tpu.memory_space<vmem>>, vector<1x1x16x16xbf16>
    %1 = vector.shape_cast %0 : vector<1x1x16x16xbf16> to vector<16x16xbf16>
    %2 = arith.extf %1 : vector<16x16xbf16> to vector<16x16xf32>
    %c0_3 = arith.constant 0 : index
    %c0_4 = arith.constant 0 : index
    %3 = vector.load %arg3[%c0_3, %c0_4] : memref<1x16xf32, #tpu.memory_space<vmem>>, vector<1x16xf32>
    %4 = vector.broadcast %3 : vector<1x16xf32> to vector<16x16xf32>
    %5 = arith.mulf %2, %4 : vector<16x16xf32>
    %6 = arith.truncf %5 : vector<16x16xf32> to vector<16x16xbf16>
    %c0_5 = arith.constant 0 : index
    %c0_6 = arith.constant 0 : index
    %7 = vector.load %arg2[%c0_5, %c0_6] : memref<16x512xbf16, #tpu.memory_space<vmem>>, vector<16x384xbf16>
    %cst = arith.constant dense<0.000000e+00> : vector<16x384xf32>
    %8 = tpu.matmul %6, %7, %cst {dimension_numbers = #tpu.dot_dimension_numbers<[1], [0], [0], [1], [0, 0, 1, 1], [], []>} : vector<16x16xbf16>, vector<16x384xbf16>, vector<16x384xf32> -> vector<16x384xf32>
    %c0_7 = arith.constant 0 : index
    %c1 = arith.constant 1 : index
    %c0_8 = arith.constant 0 : index
    %c0_9 = arith.constant 0 : index
    %9 = vector.load %arg1[%c0_7, %c1, %c0_8, %c0_9] : memref<1x9x16x16xbf16, #tpu.memory_space<vmem>>, vector<1x1x16x16xbf16>
    %10 = vector.shape_cast %9 : vector<1x1x16x16xbf16> to vector<16x16xbf16>
    %11 = arith.extf %10 : vector<16x16xbf16> to vector<16x16xf32>
    %c0_10 = arith.constant 0 : index
    %c0_11 = arith.constant 0 : index
    %12 = vector.load %arg3[%c0_10, %c0_11] : memref<1x16xf32, #tpu.memory_space<vmem>>, vector<1x16xf32>
    %13 = vector.broadcast %12 : vector<1x16xf32> to vector<16x16xf32>
    %14 = arith.mulf %11, %13 : vector<16x16xf32>
    %15 = arith.truncf %14 : vector<16x16xf32> to vector<16x16xbf16>
    %c0_12 = arith.constant 0 : index
    %c1_13 = arith.constant 1 : index
    %16 = vector.load %arg2[%c0_12, %c1_13] : memref<16x512xbf16, #tpu.memory_space<vmem>>, vector<16x384xbf16>
    %cst_14 = arith.constant dense<0.000000e+00> : vector<16x384xf32>
    %17 = tpu.matmul %15, %16, %cst_14 {dimension_numbers = #tpu.dot_dimension_numbers<[1], [0], [0], [1], [0, 0, 1, 1], [], []>} : vector<16x16xbf16>, vector<16x384xbf16>, vector<16x384xf32> -> vector<16x384xf32>
    %18 = arith.addf %8, %17 : vector<16x384xf32>
    %c0_15 = arith.constant 0 : index
    %c2 = arith.constant 2 : index
    %c0_16 = arith.constant 0 : index
    %c0_17 = arith.constant 0 : index
    %19 = vector.load %arg1[%c0_15, %c2, %c0_16, %c0_17] : memref<1x9x16x16xbf16, #tpu.memory_space<vmem>>, vector<1x1x16x16xbf16>
    %20 = vector.shape_cast %19 : vector<1x1x16x16xbf16> to vector<16x16xbf16>
    %21 = arith.extf %20 : vector<16x16xbf16> to vector<16x16xf32>
    %c0_18 = arith.constant 0 : index
    %c0_19 = arith.constant 0 : index
    %22 = vector.load %arg3[%c0_18, %c0_19] : memref<1x16xf32, #tpu.memory_space<vmem>>, vector<1x16xf32>
    %23 = vector.broadcast %22 : vector<1x16xf32> to vector<16x16xf32>
    %24 = arith.mulf %21, %23 : vector<16x16xf32>
    %25 = arith.truncf %24 : vector<16x16xf32> to vector<16x16xbf16>
    %c0_20 = arith.constant 0 : index
    %c2_21 = arith.constant 2 : index
    %26 = vector.load %arg2[%c0_20, %c2_21] : memref<16x512xbf16, #tpu.memory_space<vmem>>, vector<16x384xbf16>
    %cst_22 = arith.constant dense<0.000000e+00> : vector<16x384xf32>
    %27 = tpu.matmul %25, %26, %cst_22 {dimension_numbers = #tpu.dot_dimension_numbers<[1], [0], [0], [1], [0, 0, 1, 1], [], []>} : vector<16x16xbf16>, vector<16x384xbf16>, vector<16x384xf32> -> vector<16x384xf32>
    %28 = arith.addf %18, %27 : vector<16x384xf32>
    %c0_23 = arith.constant 0 : index
    %c3 = arith.constant 3 : index
    %c0_24 = arith.constant 0 : index
    %c0_25 = arith.constant 0 : index
    %29 = vector.load %arg1[%c0_23, %c3, %c0_24, %c0_25] : memref<1x9x16x16xbf16, #tpu.memory_space<vmem>>, vector<1x1x16x16xbf16>
    %30 = vector.shape_cast %29 : vector<1x1x16x16xbf16> to vector<16x16xbf16>
    %31 = arith.extf %30 : vector<16x16xbf16> to vector<16x16xf32>
    %c0_26 = arith.constant 0 : index
    %c0_27 = arith.constant 0 : index
    %32 = vector.load %arg3[%c0_26, %c0_27] : memref<1x16xf32, #tpu.memory_space<vmem>>, vector<1x16xf32>
    %33 = vector.broadcast %32 : vector<1x16xf32> to vector<16x16xf32>
    %34 = arith.mulf %31, %33 : vector<16x16xf32>
    %35 = arith.truncf %34 : vector<16x16xf32> to vector<16x16xbf16>
    %c0_28 = arith.constant 0 : index
    %c18 = arith.constant 18 : index
    %36 = vector.load %arg2[%c0_28, %c18] : memref<16x512xbf16, #tpu.memory_space<vmem>>, vector<16x384xbf16>
    %cst_29 = arith.constant dense<0.000000e+00> : vector<16x384xf32>
    %37 = tpu.matmul %35, %36, %cst_29 {dimension_numbers = #tpu.dot_dimension_numbers<[1], [0], [0], [1], [0, 0, 1, 1], [], []>} : vector<16x16xbf16>, vector<16x384xbf16>, vector<16x384xf32> -> vector<16x384xf32>
    %38 = arith.addf %28, %37 : vector<16x384xf32>
    %c0_30 = arith.constant 0 : index
    %c4 = arith.constant 4 : index
    %c0_31 = arith.constant 0 : index
    %c0_32 = arith.constant 0 : index
    %39 = vector.load %arg1[%c0_30, %c4, %c0_31, %c0_32] : memref<1x9x16x16xbf16, #tpu.memory_space<vmem>>, vector<1x1x16x16xbf16>
    %40 = vector.shape_cast %39 : vector<1x1x16x16xbf16> to vector<16x16xbf16>
    %41 = arith.extf %40 : vector<16x16xbf16> to vector<16x16xf32>
    %c0_33 = arith.constant 0 : index
    %c0_34 = arith.constant 0 : index
    %42 = vector.load %arg3[%c0_33, %c0_34] : memref<1x16xf32, #tpu.memory_space<vmem>>, vector<1x16xf32>
    %43 = vector.broadcast %42 : vector<1x16xf32> to vector<16x16xf32>
    %44 = arith.mulf %41, %43 : vector<16x16xf32>
    %45 = arith.truncf %44 : vector<16x16xf32> to vector<16x16xbf16>
    %c0_35 = arith.constant 0 : index
    %c19 = arith.constant 19 : index
    %46 = vector.load %arg2[%c0_35, %c19] : memref<16x512xbf16, #tpu.memory_space<vmem>>, vector<16x384xbf16>
    %cst_36 = arith.constant dense<0.000000e+00> : vector<16x384xf32>
    %47 = tpu.matmul %45, %46, %cst_36 {dimension_numbers = #tpu.dot_dimension_numbers<[1], [0], [0], [1], [0, 0, 1, 1], [], []>} : vector<16x16xbf16>, vector<16x384xbf16>, vector<16x384xf32> -> vector<16x384xf32>
    %48 = arith.addf %38, %47 : vector<16x384xf32>
    %c0_37 = arith.constant 0 : index
    %c5 = arith.constant 5 : index
    %c0_38 = arith.constant 0 : index
    %c0_39 = arith.constant 0 : index
    %49 = vector.load %arg1[%c0_37, %c5, %c0_38, %c0_39] : memref<1x9x16x16xbf16, #tpu.memory_space<vmem>>, vector<1x1x16x16xbf16>
    %50 = vector.shape_cast %49 : vector<1x1x16x16xbf16> to vector<16x16xbf16>
    %51 = arith.extf %50 : vector<16x16xbf16> to vector<16x16xf32>
    %c0_40 = arith.constant 0 : index
    %c0_41 = arith.constant 0 : index
    %52 = vector.load %arg3[%c0_40, %c0_41] : memref<1x16xf32, #tpu.memory_space<vmem>>, vector<1x16xf32>
    %53 = vector.broadcast %52 : vector<1x16xf32> to vector<16x16xf32>
    %54 = arith.mulf %51, %53 : vector<16x16xf32>
    %55 = arith.truncf %54 : vector<16x16xf32> to vector<16x16xbf16>
    %c0_42 = arith.constant 0 : index
    %c20 = arith.constant 20 : index
    %56 = vector.load %arg2[%c0_42, %c20] : memref<16x512xbf16, #tpu.memory_space<vmem>>, vector<16x384xbf16>
    %cst_43 = arith.constant dense<0.000000e+00> : vector<16x384xf32>
    %57 = tpu.matmul %55, %56, %cst_43 {dimension_numbers = #tpu.dot_dimension_numbers<[1], [0], [0], [1], [0, 0, 1, 1], [], []>} : vector<16x16xbf16>, vector<16x384xbf16>, vector<16x384xf32> -> vector<16x384xf32>
    %58 = arith.addf %48, %57 : vector<16x384xf32>
    %c0_44 = arith.constant 0 : index
    %c6 = arith.constant 6 : index
    %c0_45 = arith.constant 0 : index
    %c0_46 = arith.constant 0 : index
    %59 = vector.load %arg1[%c0_44, %c6, %c0_45, %c0_46] : memref<1x9x16x16xbf16, #tpu.memory_space<vmem>>, vector<1x1x16x16xbf16>
    %60 = vector.shape_cast %59 : vector<1x1x16x16xbf16> to vector<16x16xbf16>
    %61 = arith.extf %60 : vector<16x16xbf16> to vector<16x16xf32>
    %c0_47 = arith.constant 0 : index
    %c0_48 = arith.constant 0 : index
    %62 = vector.load %arg3[%c0_47, %c0_48] : memref<1x16xf32, #tpu.memory_space<vmem>>, vector<1x16xf32>
    %63 = vector.broadcast %62 : vector<1x16xf32> to vector<16x16xf32>
    %64 = arith.mulf %61, %63 : vector<16x16xf32>
    %65 = arith.truncf %64 : vector<16x16xf32> to vector<16x16xbf16>
    %c0_49 = arith.constant 0 : index
    %c36 = arith.constant 36 : index
    %66 = vector.load %arg2[%c0_49, %c36] : memref<16x512xbf16, #tpu.memory_space<vmem>>, vector<16x384xbf16>
    %cst_50 = arith.constant dense<0.000000e+00> : vector<16x384xf32>
    %67 = tpu.matmul %65, %66, %cst_50 {dimension_numbers = #tpu.dot_dimension_numbers<[1], [0], [0], [1], [0, 0, 1, 1], [], []>} : vector<16x16xbf16>, vector<16x384xbf16>, vector<16x384xf32> -> vector<16x384xf32>
    %68 = arith.addf %58, %67 : vector<16x384xf32>
    %c0_51 = arith.constant 0 : index
    %c7 = arith.constant 7 : index
    %c0_52 = arith.constant 0 : index
    %c0_53 = arith.constant 0 : index
    %69 = vector.load %arg1[%c0_51, %c7, %c0_52, %c0_53] : memref<1x9x16x16xbf16, #tpu.memory_space<vmem>>, vector<1x1x16x16xbf16>
    %70 = vector.shape_cast %69 : vector<1x1x16x16xbf16> to vector<16x16xbf16>
    %71 = arith.extf %70 : vector<16x16xbf16> to vector<16x16xf32>
    %c0_54 = arith.constant 0 : index
    %c0_55 = arith.constant 0 : index
    %72 = vector.load %arg3[%c0_54, %c0_55] : memref<1x16xf32, #tpu.memory_space<vmem>>, vector<1x16xf32>
    %73 = vector.broadcast %72 : vector<1x16xf32> to vector<16x16xf32>
    %74 = arith.mulf %71, %73 : vector<16x16xf32>
    %75 = arith.truncf %74 : vector<16x16xf32> to vector<16x16xbf16>
    %c0_56 = arith.constant 0 : index
    %c37 = arith.constant 37 : index
    %76 = vector.load %arg2[%c0_56, %c37] : memref<16x512xbf16, #tpu.memory_space<vmem>>, vector<16x384xbf16>
    %cst_57 = arith.constant dense<0.000000e+00> : vector<16x384xf32>
    %77 = tpu.matmul %75, %76, %cst_57 {dimension_numbers = #tpu.dot_dimension_numbers<[1], [0], [0], [1], [0, 0, 1, 1], [], []>} : vector<16x16xbf16>, vector<16x384xbf16>, vector<16x384xf32> -> vector<16x384xf32>
    %78 = arith.addf %68, %77 : vector<16x384xf32>
    %c0_58 = arith.constant 0 : index
    %c8 = arith.constant 8 : index
    %c0_59 = arith.constant 0 : index
    %c0_60 = arith.constant 0 : index
    %79 = vector.load %arg1[%c0_58, %c8, %c0_59, %c0_60] : memref<1x9x16x16xbf16, #tpu.memory_space<vmem>>, vector<1x1x16x16xbf16>
    %80 = vector.shape_cast %79 : vector<1x1x16x16xbf16> to vector<16x16xbf16>
    %81 = arith.extf %80 : vector<16x16xbf16> to vector<16x16xf32>
    %c0_61 = arith.constant 0 : index
    %c0_62 = arith.constant 0 : index
    %82 = vector.load %arg3[%c0_61, %c0_62] : memref<1x16xf32, #tpu.memory_space<vmem>>, vector<1x16xf32>
    %83 = vector.broadcast %82 : vector<1x16xf32> to vector<16x16xf32>
    %84 = arith.mulf %81, %83 : vector<16x16xf32>
    %85 = arith.truncf %84 : vector<16x16xf32> to vector<16x16xbf16>
    %c0_63 = arith.constant 0 : index
    %c38 = arith.constant 38 : index
    %86 = vector.load %arg2[%c0_63, %c38] : memref<16x512xbf16, #tpu.memory_space<vmem>>, vector<16x384xbf16>
    %cst_64 = arith.constant dense<0.000000e+00> : vector<16x384xf32>
    %87 = tpu.matmul %85, %86, %cst_64 {dimension_numbers = #tpu.dot_dimension_numbers<[1], [0], [0], [1], [0, 0, 1, 1], [], []>} : vector<16x16xbf16>, vector<16x384xbf16>, vector<16x384xf32> -> vector<16x384xf32>
    %88 = arith.addf %78, %87 : vector<16x384xf32>
    %c0_65 = arith.constant 0 : index
    %c0_66 = arith.constant 0 : index
    %89 = vector.load %arg4[%c0_65, %c0_66] : memref<16x1xf32, #tpu.memory_space<vmem>>, vector<16x1xf32>
    %90 = vector.broadcast %89 : vector<16x1xf32> to vector<16x384xf32>
    %91 = arith.mulf %88, %90 : vector<16x384xf32>
    %c0_67 = arith.constant 0 : index
    %c0_68 = arith.constant 0 : index
    %92 = vector.load %arg5[%c0_67, %c0_68] : memref<16x1xf32, #tpu.memory_space<vmem>>, vector<16x1xf32>
    %93 = vector.broadcast %92 : vector<16x1xf32> to vector<16x384xf32>
    %94 = arith.addf %91, %93 : vector<16x384xf32>
    %c0_69 = arith.constant 0 : index
    %c0_70 = arith.constant 0 : index
    %c0_71 = arith.constant 0 : index
    %95 = vector.load %arg6[%c0_69, %c0_70, %c0_71] : memref<1x1x384xf32, #tpu.memory_space<vmem>>, vector<1x1x384xf32>
    %96 = vector.shape_cast %95 : vector<1x1x384xf32> to vector<1x384xf32>
    %97 = vector.broadcast %96 : vector<1x384xf32> to vector<16x384xf32>
    %98 = arith.addf %94, %97 : vector<16x384xf32>
    %cst_72 = arith.constant 0.000000e+00 : f32
    %99 = vector.broadcast %cst_72 : f32 to vector<16x384xf32>
    %100 = arith.cmpf oge, %98, %99 : vector<16x384xf32>
    %cst_73 = arith.constant 2.000000e-01 : f32
    %101 = vector.broadcast %cst_73 : f32 to vector<16x384xf32>
    %102 = arith.mulf %98, %101 : vector<16x384xf32>
    %103 = arith.select %100, %98, %102 : vector<16x384xi1>, vector<16x384xf32>
    %cst_74 = arith.constant 1.41421354 : f32
    %104 = vector.broadcast %cst_74 : f32 to vector<16x384xf32>
    %105 = arith.mulf %103, %104 : vector<16x384xf32>
    %106 = arith.truncf %105 : vector<16x384xf32> to vector<16x384xbf16>
    %c0_75 = arith.constant 0 : index
    %c0_76 = arith.constant 0 : index
    %c0_77 = arith.constant 0 : index
    %107 = vector.load %arg7[%c0_75, %c0_76, %c0_77] : memref<1x16x384xbf16, #tpu.memory_space<vmem>>, vector<1x16x384xbf16>
    %108 = vector.shape_cast %107 : vector<1x16x384xbf16> to vector<16x384xbf16>
    %109 = vector.shape_cast %106 : vector<16x384xbf16> to vector<1x16x384xbf16>
    tpu.vector_store %arg7[%c0_75, %c0_76, %c0_77], %109 {strides = array<i32>} : memref<1x16x384xbf16, #tpu.memory_space<vmem>>, vector<1x16x384xbf16>,
    return
  }
  func.func @transform_0(%arg0: i32) -> (i32, i32, i32, i32) {
    %c0_i32 = arith.constant 0 : i32
    %c0_i32_0 = arith.constant 0 : i32
    %c0_i32_1 = arith.constant 0 : i32
    %c0_i32_2 = arith.constant 0 : i32
    return %arg0, %c0_i32, %c0_i32_0, %c0_i32_1 : i32, i32, i32, i32
  }
  func.func @transform_1(%arg0: i32) -> (i32, i32) {
    %c0_i32 = arith.constant 0 : i32
    %c0_i32_0 = arith.constant 0 : i32
    %c0_i32_1 = arith.constant 0 : i32
    return %c0_i32, %c0_i32_0 : i32, i32
  }
  func.func @transform_2(%arg0: i32) -> (i32, i32) {
    %c0_i32 = arith.constant 0 : i32
    %c0_i32_0 = arith.constant 0 : i32
    %c0_i32_1 = arith.constant 0 : i32
    return %c0_i32, %c0_i32_0 : i32, i32
  }
  func.func @transform_3(%arg0: i32) -> (i32, i32) {
    %c0_i32 = arith.constant 0 : i32
    %c0_i32_0 = arith.constant 0 : i32
    %c0_i32_1 = arith.constant 0 : i32
    return %c0_i32, %c0_i32_0 : i32, i32
  }
  func.func @transform_4(%arg0: i32) -> (i32, i32) {
    %c0_i32 = arith.constant 0 : i32
    %c0_i32_0 = arith.constant 0 : i32
    %c0_i32_1 = arith.constant 0 : i32
    return %c0_i32, %c0_i32_0 : i32, i32
  }
  func.func @transform_5(%arg0: i32) -> (i32, i32, i32) {
    %c0_i32 = arith.constant 0 : i32
    %c0_i32_0 = arith.constant 0 : i32
    %c0_i32_1 = arith.constant 0 : i32
    return %arg0, %c0_i32, %c0_i32_0 : i32, i32, i32
  }
  func.func @transform_6(%arg0: i32) -> (i32, i32, i32) {
    %c0_i32 = arith.constant 0 : i32
    %c0_i32_0 = arith.constant 0 : i32
    %c0_i32_1 = arith.constant 0 : i32
    return %arg0, %c0_i32, %c0_i32_0 : i32, i32, i32
  }
}

module attributes {stable_mosaic.version = 11 : i64} {
  func.func @_conv_mm_kernel(%arg0: i32, %arg1: memref<1x1x8x16xbf16, #tpu.memory_space<vmem>>, %arg2: memref<16x256xbf16, #tpu.memory_space<vmem>>, %arg3: memref<1x16xf32, #tpu.memory_space<vmem>>, %arg4: memref<8x1xf32, #tpu.memory_space<vmem>>, %arg5: memref<8x256xf32, #tpu.memory_space<vmem>>, %arg6: memref<1x8x256xf32, #tpu.memory_space<vmem>>) attributes {dimension_semantics = [#tpu.dimension_semantics<parallel>], iteration_bounds = array<i64: 1>, scalar_prefetch = 0 : i64, scratch_operands = 0 : i64, tpu.core_type = #tpu.core_type<tc>, window_params = [{transform_indices = @transform_0, window_bounds = array<i64: 1, 1, 8, 16>}, {pipeline_mode = #tpu.pipeline_mode<synchronous>, transform_indices = @transform_1, window_bounds = array<i64: 16, 256>}, {pipeline_mode = #tpu.pipeline_mode<synchronous>, transform_indices = @transform_2, window_bounds = array<i64: 1, 16>}, {pipeline_mode = #tpu.pipeline_mode<synchronous>, transform_indices = @transform_3, window_bounds = array<i64: 8, 1>}, {pipeline_mode = #tpu.pipeline_mode<synchronous>, transform_indices = @transform_4, window_bounds = array<i64: 8, 256>}, {transform_indices = @transform_5, window_bounds = array<i64: 1, 8, 256>}]} {
    %c0 = arith.constant 0 : index
    %c0_0 = arith.constant 0 : index
    %c0_1 = arith.constant 0 : index
    %c0_2 = arith.constant 0 : index
    %0 = vector.load %arg1[%c0, %c0_0, %c0_1, %c0_2] : memref<1x1x8x16xbf16, #tpu.memory_space<vmem>>, vector<1x1x8x16xbf16>
    %1 = vector.shape_cast %0 : vector<1x1x8x16xbf16> to vector<8x16xbf16>
    %2 = arith.extf %1 : vector<8x16xbf16> to vector<8x16xf32>
    %c0_3 = arith.constant 0 : index
    %c0_4 = arith.constant 0 : index
    %3 = vector.load %arg3[%c0_3, %c0_4] : memref<1x16xf32, #tpu.memory_space<vmem>>, vector<1x16xf32>
    %4 = vector.broadcast %3 : vector<1x16xf32> to vector<8x16xf32>
    %5 = arith.mulf %2, %4 : vector<8x16xf32>
    %6 = arith.truncf %5 : vector<8x16xf32> to vector<8x16xbf16>
    %c0_5 = arith.constant 0 : index
    %c0_6 = arith.constant 0 : index
    %7 = vector.load %arg2[%c0_5, %c0_6] : memref<16x256xbf16, #tpu.memory_space<vmem>>, vector<16x256xbf16>
    %cst = arith.constant dense<0.000000e+00> : vector<8x256xf32>
    %8 = tpu.matmul %6, %7, %cst {dimension_numbers = #tpu.dot_dimension_numbers<[1], [0], [0], [1], [0, 0, 1, 1], [], []>} : vector<8x16xbf16>, vector<16x256xbf16>, vector<8x256xf32> -> vector<8x256xf32>
    %c0_7 = arith.constant 0 : index
    %c0_8 = arith.constant 0 : index
    %9 = vector.load %arg4[%c0_7, %c0_8] : memref<8x1xf32, #tpu.memory_space<vmem>>, vector<8x1xf32>
    %10 = vector.broadcast %9 : vector<8x1xf32> to vector<8x256xf32>
    %11 = arith.addf %8, %10 : vector<8x256xf32>
    %c0_9 = arith.constant 0 : index
    %c0_10 = arith.constant 0 : index
    %12 = vector.load %arg5[%c0_9, %c0_10] : memref<8x256xf32, #tpu.memory_space<vmem>>, vector<8x256xf32>
    %13 = arith.addf %11, %12 : vector<8x256xf32>
    %c0_11 = arith.constant 0 : index
    %c0_12 = arith.constant 0 : index
    %c0_13 = arith.constant 0 : index
    %14 = vector.load %arg6[%c0_11, %c0_12, %c0_13] : memref<1x8x256xf32, #tpu.memory_space<vmem>>, vector<1x8x256xf32>
    %15 = vector.shape_cast %14 : vector<1x8x256xf32> to vector<8x256xf32>
    %16 = vector.shape_cast %13 : vector<8x256xf32> to vector<1x8x256xf32>
    tpu.vector_store %arg6[%c0_11, %c0_12, %c0_13], %16 {strides = array<i32>} : memref<1x8x256xf32, #tpu.memory_space<vmem>>, vector<1x8x256xf32>,
    return
  }
  func.func @transform_0(%arg0: i32) -> (i32, i32, i32, i32) {
    %c0_i32 = arith.constant 0 : i32
    %c0_i32_0 = arith.constant 0 : i32
    %c0_i32_1 = arith.constant 0 : i32
    %c0_i32_2 = arith.constant 0 : i32
    return %arg0, %c0_i32, %c0_i32_0, %c0_i32_1 : i32, i32, i32, i32
  }
  func.func @transform_1(%arg0: i32) -> (i32, i32) {
    %c0_i32 = arith.constant 0 : i32
    %c0_i32_0 = arith.constant 0 : i32
    %c0_i32_1 = arith.constant 0 : i32
    return %c0_i32, %c0_i32_0 : i32, i32
  }
  func.func @transform_2(%arg0: i32) -> (i32, i32) {
    %c0_i32 = arith.constant 0 : i32
    %c0_i32_0 = arith.constant 0 : i32
    %c0_i32_1 = arith.constant 0 : i32
    return %c0_i32, %c0_i32_0 : i32, i32
  }
  func.func @transform_3(%arg0: i32) -> (i32, i32) {
    %c0_i32 = arith.constant 0 : i32
    %c0_i32_0 = arith.constant 0 : i32
    %c0_i32_1 = arith.constant 0 : i32
    return %c0_i32, %c0_i32_0 : i32, i32
  }
  func.func @transform_4(%arg0: i32) -> (i32, i32) {
    %c0_i32 = arith.constant 0 : i32
    %c0_i32_0 = arith.constant 0 : i32
    %c0_i32_1 = arith.constant 0 : i32
    return %c0_i32, %c0_i32_0 : i32, i32
  }
  func.func @transform_5(%arg0: i32) -> (i32, i32, i32) {
    %c0_i32 = arith.constant 0 : i32
    %c0_i32_0 = arith.constant 0 : i32
    %c0_i32_1 = arith.constant 0 : i32
    return %arg0, %c0_i32, %c0_i32_0 : i32, i32, i32
  }
}

</mosaic_0001>

<bundles_post_ra>
// kernel: gfpgan_forward.12
= control target key start
LH: loop header
LB: loop body
LE: loop exit
PB: predicated region body
PF: predicated region fallthrough
CT: control target
= control target key end

     0   :  { %vm82_vm0 = vcmask 1044480   ;;  %vm83_vm1 = vcmask 1045504   ;;  %v242_v2 = vmov 65535   ;;  %v243_v12 = vmov 0   ;;  %s333_s1 = inlined_call_operand.vmem [shape: bf16[27,512], index: 1, kind: input, shape index: {}]   ;;  %s334_s2 = inlined_call_operand.vmem [shape: f32[16,1], index: 2, kind: input, shape index: {}]   ;;  %s335_s0 = inlined_call_operand.vmem [shape: bf16[1,1,16,27], index: 0, kind: input, shape index: {}]   ;;  %s336_s3 = inlined_call_operand.vmem [shape: bf16[1,16,512], index: 3, kind: output, shape index: {}]  }
   0x1   :  { %v212_v0 = vld [vmem:[%s333_s1 + $0x20] sm:$0xf]  ;;  %v237_v1 = vld [vmem:[%s333_s1 + $0x2c] sm:$0x30]  ;;  %v84_v3 = vsel %vm82_vm0, 4294967295, %v242_v2  ;;  %241 = vset.pattern.permute.xlu0 %v243_v12  ;;  %vm78_vm2 = vcmask 220160  }
   0x2   :  { %v213_v4 = vor.u32 %v237_v1, %v212_v0  ;;  %v85_v5 = vsel %vm83_vm1, %v84_v3, 0  ;;  %v235_v6 = vld [vmem:[%s333_s1 + $0x24] sm:$0xf]  ;;  %v214_v7 = vld [vmem:[%s333_s1 + $0x30] sm:$0x30]  ;;  %v26_v34 = vld [vmem:[%s334_s2 + $0x8] sm:$0xff] }
   0x3   :  { %v217_v8 = vor.u32 %v235_v6, %v214_v7  ;;  %v220_v9 = vld [vmem:[%s333_s1 + $0x28] sm:$0xf]  ;;  %v238_v10 = vld [vmem:[%s333_s1 + $0x34] sm:$0x30]  ;;  %v236_v11 = vld [vmem:[%s333_s1 + $0x2c] sm:$0xf] }
   0x4   :  { %v87_v13 = vand.u32 %v213_v4, %v85_v5  ;;  %v221_v14 = vor.u32 %v238_v10, %v220_v9  ;;  %v222_v15 = vld [vmem:[%s333_s1 + $0x38] sm:$0x30]  ;;  %v196_v16 = vld [vmem:[%s333_s1] sm:$0xf]  ;;  %v233_v17 = vld [vmem:[%s333_s1 + $0xc] sm:$0xf0] }
   0x5   :  { %v90_v18 = vand.u32 %v217_v8, %v85_v5  ;;  %v225_v19 = vor.u32 %v236_v11, %v222_v15  ;;  %v231_v20 = vld [vmem:[%s333_s1 + $0x4] sm:$0xf]  ;;  %v198_v21 = vld [vmem:[%s333_s1 + $0x10] sm:$0xf0]  ;;  %v204_v22 = vld [vmem:[%s333_s1 + $0x8] sm:$0xf]  ;;  %v197_v24 = vor.u32 %v233_v17, %v196_v16 }
   0x6   :  { %104 = vmatpush.bf16.msra.mxu0 %v87_v13  ;;  %v93_v23 = vand.u32 %v221_v14, %v85_v5  ;;  %v234_v25 = vld [vmem:[%s333_s1 + $0x14] sm:$0xf0]  ;;  %v232_v26 = vld [vmem:[%s333_s1 + $0xc] sm:$0xf]  ;;  %v206_v27 = vld [vmem:[%s333_s1 + $0x18] sm:$0xf0]  ;;  %v201_v29 = vor.u32 %v231_v20, %v198_v21 }
   0x7   :  { %118 = vmatpush.bf16.msra.mxu1 %v90_v18  ;;  %v96_v28 = vand.u32 %v225_v19, %v85_v5  ;;  %v25_v30 = vld [vmem:[%s334_s2] sm:$0xff]  ;;  %v205_v31 = vor.u32 %v234_v25, %v204_v22  ;;  %v209_v32 = vor.u32 %v232_v26, %v206_v27 }
   0x8   :  { %132 = vmatpush.bf16.msra.mxu2 %v93_v23  ;;  %29 = vperm.xlu0 %241, %v25_v30   ;;  %v230_v33 = vld [vmem:[%s335_s0] sm:$0xff] }
   0x9   :  { %146 = vmatpush.bf16.msra.mxu3 %v96_v28 }
   0xa   :  { %105 = vmatpush.bf16.msra.mxu0 %v197_v24 }
   0xb   :  { %119 = vmatpush.bf16.msra.mxu1 %v201_v29 }
   0xc   :  { %133 = vmatpush.bf16.msra.mxu2 %v205_v31 }
   0xd   :  { %147 = vmatpush.bf16.msra.mxu3 %v209_v32  ;;  %226 = vmatmul.msk.bf16.vlgmr.msra.gmra.mxu0 %vm78_vm2, %v230_v33 }
   0xe   :  { %227 = vmatmul.msk.bf16.vlgmr.msra.gmra.mxu1 %vm78_vm2, %v230_v33 }
   0xf   :  { %228 = vmatmul.msk.bf16.vlgmr.msra.gmra.mxu2 %vm78_vm2, %v230_v33 }
  0x10   :  { %229 = vmatmul.msk.bf16.vlgmr.msra.gmra.mxu3 %vm78_vm2, %v230_v33  ;;  %34 = vperm.xlu0 %241, %v26_v34  }
  0x7a   :  { %v30_v35 = vpop.permute.xlu0 %29 }
  0x82   :  { %v35_v45 = vpop.permute.xlu0 %34 }
  0x8a   :  { %v107_v36 = vpop.f32.mrf.mxu0 }
  0x8b   :  { %v108_v37 = vadd.f32 %v107_v36, %v30_v35  ;;  %v121_v38 = vpop.f32.mrf.mxu1 }
  0x8c   :  { %v122_v39 = vadd.f32 %v121_v38, %v30_v35 }
  0x8d   :  { %vm154_vm3 = vcmp.ge.f32.partialorder %v108_v37, 0.0  ;;  %v162_v40 = vmul.f32 0.2, %v108_v37 }
  0x8e   :  { %vm155_vm4 = vcmp.ge.f32.partialorder %v122_v39, 0.0  ;;  %v163_v41 = vmul.f32 0.2, %v122_v39 }
  0x8f   :  { %v170_v42 = vsel %vm154_vm3, %v108_v37, %v162_v40 }
  0x90   :  { %v171_v43 = vsel %vm155_vm4, %v122_v39, %v163_v41 }
  0x91   :  { %v178_v44 = vpack.c.bf16 %v171_v43, %v170_v42 }
  0x92   :  { %v135_v46 = vpop.f32.mrf.mxu2  ;;  %v109_v47 = vpop.f32.mrf.mxu0 }
  0x93   :  { %182 = vst [vmem:[%s336_s3] sm:$0xff] %v178_v44  ;;  %v136_v48 = vadd.f32 %v135_v46, %v30_v35  ;;  %v149_v49 = vpop.f32.mrf.mxu3  ;;  %v110_v50 = vadd.f32 %v109_v47, %v35_v45  ;;  %v123_v51 = vpop.f32.mrf.mxu1 }
  0x94   :  { %v150_v52 = vadd.f32 %v149_v49, %v30_v35  ;;  %v124_v53 = vadd.f32 %v123_v51, %v35_v45 }
  0x95   :  { %vm156_vm5 = vcmp.ge.f32.partialorder %v136_v48, 0.0  ;;  %v164_v54 = vmul.f32 0.2, %v136_v48  ;;  %vm158_vm6 = vcmp.ge.f32.partialorder %v110_v50, 0.0  ;;  %v166_v55 = vmul.f32 0.2, %v110_v50 }
  0x96   :  { %vm157_vm7 = vcmp.ge.f32.partialorder %v150_v52, 0.0  ;;  %v165_v56 = vmul.f32 0.2, %v150_v52  ;;  %vm159_vm8 = vcmp.ge.f32.partialorder %v124_v53, 0.0  ;;  %v167_v57 = vmul.f32 0.2, %v124_v53 }
  0x97   :  { %v172_v58 = vsel %vm156_vm5, %v136_v48, %v164_v54  ;;  %v174_v59 = vsel %vm158_vm6, %v110_v50, %v166_v55 }
  0x98   :  { %v173_v60 = vsel %vm157_vm7, %v150_v52, %v165_v56  ;;  %v175_v61 = vsel %vm159_vm8, %v124_v53, %v167_v57 }
  0x99   :  { %v179_v62 = vpack.c.bf16 %v173_v60, %v172_v58  ;;  %v180_v63 = vpack.c.bf16 %v175_v61, %v174_v59 }
  0x9a   :  { %v137_v0 = vpop.f32.mrf.mxu2 }
  0x9b   :  { %183 = vst [vmem:[%s336_s3 + $0x8] sm:$0xff] %v179_v62  ;;  %v138_v1 = vadd.f32 %v137_v0, %v35_v45  ;;  %v151_v2 = vpop.f32.mrf.mxu3 }
  0x9c   :  { %184 = vst [vmem:[%s336_s3 + $0x10] sm:$0xff] %v180_v63  ;;  %v152_v3 = vadd.f32 %v151_v2, %v35_v45 }
  0x9d   :  { %vm160_vm9 = vcmp.ge.f32.partialorder %v138_v1, 0.0  ;;  %v168_v4 = vmul.f32 0.2, %v138_v1 }
  0x9e   :  { %vm161_vm10 = vcmp.ge.f32.partialorder %v152_v3, 0.0  ;;  %v169_v5 = vmul.f32 0.2, %v152_v3 }
  0x9f   :  { %v176_v6 = vsel %vm160_vm9, %v138_v1, %v168_v4 }
  0xa0   :  { %v177_v7 = vsel %vm161_vm10, %v152_v3, %v169_v5 }
  0xa1   :  { %v181_v8 = vpack.c.bf16 %v177_v7, %v176_v6 }
  0xa3   :  { %185 = vst [vmem:[%s336_s3 + $0x18] sm:$0xff] %v181_v8 }

// kernel: gfpgan_forward.13
= control target key start
LH: loop header
LB: loop body
LE: loop exit
PB: predicated region body
PF: predicated region fallthrough
CT: control target
= control target key end

     0   :  { %v291_v6 = vmov 0   ;;  %vm133_vm0 = vcmask 130048   ;;  %s383_s1 = inlined_call_operand.vmem [shape: bf16[144,128], index: 1, kind: input, shape index: {}]   ;;  %s384_s0 = inlined_call_operand.vmem [shape: bf16[1,1,32,144], index: 0, kind: input, shape index: {}]   ;;  %s385_s2 = inlined_call_operand.vmem [shape: f32[32,1], index: 2, kind: input, shape index: {}]   ;;  %s386_s3 = inlined_call_operand.vmem [shape: bf16[1,32,128], index: 3, kind: output, shape index: {}]  }
   0x1   :  { %v267_v0 = vld [vmem:[%s383_s1 + $0x38] sm:$0xff]  ;;  %v268_v1 = vld [vmem:[%s383_s1 + $0x40] sm:$0xff]  ;;  %v266_v3 = vld [vmem:[%s383_s1 + $0x30] sm:$0xff]  ;;  %290 = vset.pattern.permute.xlu1 %v291_v6  ;;  %289 = vset.pattern.permute.xlu0 %v291_v6 }
   0x2   :  { %v256_v2 = vld [vmem:[%s384_s0 + $0x4] sm:$0xf]  ;;  %140 = vmatpush.bf16.msra.mxu0 %v267_v0  ;;  %280 = vmatpush.bf16.msra.mxu2 %v267_v0  ;;  %v206_v4 = vld [vmem:[%s384_s0 + $0x8] sm:$0xf0]  ;;  %v39_v7 = vld [vmem:[%s385_s2 + $0x10] sm:$0xff] }
   0x3   :  { %166 = vmatpush.bf16.msra.mxu1 %v268_v1  ;;  %v209_v5 = vor.u32 %v256_v2, %v206_v4  ;;  %v265_v8 = vld [vmem:[%s383_s1 + $0x28] sm:$0xff]  ;;  %v37_v9 = vld [vmem:[%s385_s2] sm:$0xff]  ;;  %53 = vperm.xlu1 %290, %v39_v7   ;;  %v40_v11 = vld [vmem:[%s385_s2 + $0x18] sm:$0xff] }
   0x4   :  { %43 = vperm.xlu0 %289, %v37_v9   ;;  %v264_v10 = vld [vmem:[%s383_s1 + $0x20] sm:$0xff]  ;;  %v38_v12 = vld [vmem:[%s385_s2 + $0x8] sm:$0xff]  ;;  %v263_v13 = vld [vmem:[%s383_s1 + $0x18] sm:$0xff] }
   0x5   :  { %v258_v14 = vld [vmem:[%s384_s0 + $0x14] sm:$0xf]  ;;  %v214_v15 = vld [vmem:[%s384_s0 + $0x18] sm:$0xf0]  ;;  %v261_v18 = vld [vmem:[%s383_s1 + $0x8] sm:$0xff] }
   0x6   :  { %141 = vmatpush.bf16.msra.mxu0 %v266_v3  ;;  %281 = vmatpush.bf16.msra.mxu2 %v266_v3  ;;  %v262_v16 = vld [vmem:[%s383_s1 + $0x10] sm:$0xff]  ;;  %v217_v17 = vor.u32 %v258_v14, %v214_v15  ;;  %v260_v19 = vld [vmem:[%s383_s1] sm:$0xff]  ;;  %v257_v21 = vld [vmem:[%s384_s0 + $0x4] sm:$0xf0] }
   0x7   :  { %254 = vmatmul.msk.bf16.vlgmr.msra.gmra.mxu1 %vm133_vm0, %v209_v5  ;;  %v204_v20 = vld [vmem:[%s384_s0] sm:$0xf]  ;;  %v212_v22 = vld [vmem:[%s384_s0 + $0x10] sm:$0xf]  ;;  %v259_v23 = vld [vmem:[%s384_s0 + $0x14] sm:$0xf0] }
   0x8   :  { %v205_v24 = vor.u32 %v257_v21, %v204_v20  ;;  %v213_v25 = vor.u32 %v259_v23, %v212_v22 }
   0xa   :  { %142 = vmatpush.bf16.msra.mxu0 %v265_v8  ;;  %282 = vmatpush.bf16.msra.mxu2 %v265_v8 }
   0xb   :  { %58 = vperm.xlu1 %290, %v40_v11  }
   0xc   :  { %48 = vperm.xlu0 %289, %v38_v12  }
   0xe   :  { %143 = vmatpush.bf16.msra.mxu0 %v264_v10  ;;  %283 = vmatpush.bf16.msra.mxu2 %v264_v10 }
  0x12   :  { %144 = vmatpush.bf16.msra.mxu0 %v263_v13  ;;  %284 = vmatpush.bf16.msra.mxu2 %v263_v13 }
  0x16   :  { %145 = vmatpush.bf16.msra.mxu0 %v262_v16  ;;  %285 = vmatpush.bf16.msra.mxu2 %v262_v16 }
  0x17   :  { %255 = vmatmul.msk.bf16.gmra.mxu1 %vm133_vm0, %v217_v17 }
  0x1a   :  { %146 = vmatpush.bf16.msra.mxu0 %v261_v18  ;;  %286 = vmatpush.bf16.msra.mxu2 %v261_v18 }
  0x1e   :  { %147 = vmatpush.bf16.msra.mxu0 %v260_v19  ;;  %287 = vmatpush.bf16.msra.mxu2 %v260_v19 }
  0x21   :  { %148 = vmatmul.bf16.vlgmr.msra.gmra.mxu0 %v205_v24  ;;  %153 = vmatmul.bf16.vlgmr.msra.gmra.mxu2 %v213_v25 }
  0x75   :  { %v54_v31 = vpop.permute.xlu1 %53 }
  0x76   :  { %v44_v28 = vpop.permute.xlu0 %43 }
  0x7d   :  { %v59_v43 = vpop.permute.xlu1 %58 }
  0x7e   :  { %v49_v35 = vpop.permute.xlu0 %48 }
  0x84   :  { %v168_v26 = vpop.f32.mrf.mxu1 }
  0x8c   :  { %v170_v27 = vpop.f32.mrf.mxu1 }
  0x94   :  { %v173_v32 = vpop.f32.mrf.mxu1 }
  0x9c   :  { %v175_v49 = vpop.f32.mrf.mxu1 }
  0x9e   :  { %v149_v29 = vpop.f32.mrf.mxu0 }
  0x9f   :  { %v150_v30 = vadd.f32 %v149_v29, %v44_v28 }
  0xa1   :  { %v169_v34 = vadd.f32 %v168_v26, %v150_v30 }
  0xa3   :  { %v182_v39 = vmul.f32 0.2, %v169_v34  ;;  %vm178_vm1 = vcmp.ge.f32.partialorder %v169_v34, 0.0 }
  0xa4   :  { %v154_v33 = vpop.f32.mrf.mxu2 }
  0xa5   :  { %v155_v37 = vadd.f32 %v154_v33, %v54_v31  ;;  %v186_v45 = vsel %vm178_vm1, %v169_v34, %v182_v39 }
  0xa6   :  { %v151_v36 = vpop.f32.mrf.mxu0 }
  0xa7   :  { %v152_v38 = vadd.f32 %v151_v36, %v49_v35  ;;  %v174_v41 = vadd.f32 %v173_v32, %v155_v37 }
  0xa9   :  { %v171_v40 = vadd.f32 %v170_v27, %v152_v38  ;;  %v184_v50 = vmul.f32 0.2, %v174_v41  ;;  %vm180_vm3 = vcmp.ge.f32.partialorder %v174_v41, 0.0 }
  0xab   :  { %vm179_vm2 = vcmp.ge.f32.partialorder %v171_v40, 0.0  ;;  %v183_v42 = vmul.f32 0.2, %v171_v40  ;;  %v188_v53 = vsel %vm180_vm3, %v174_v41, %v184_v50 }
  0xac   :  { %v156_v44 = vpop.f32.mrf.mxu2 }
  0xad   :  { %v187_v46 = vsel %vm179_vm2, %v171_v40, %v183_v42  ;;  %v157_v47 = vadd.f32 %v156_v44, %v59_v43 }
  0xae   :  { %v272_v48 = vpack.c.bf16 %v187_v46, %v186_v45 }
  0xaf   :  { %v176_v51 = vadd.f32 %v175_v49, %v157_v47 }
  0xb0   :  { %273 = vst [vmem:[%s386_s3] sm:$0xff] %v272_v48  }
  0xb1   :  { %vm181_vm4 = vcmp.ge.f32.partialorder %v176_v51, 0.0  ;;  %v185_v52 = vmul.f32 0.2, %v176_v51 }
  0xb3   :  { %v189_v54 = vsel %vm181_vm4, %v176_v51, %v185_v52 }
  0xb4   :  { %v277_v55 = vpack.c.bf16 %v189_v54, %v188_v53 }
  0xb6   :  { %279 = vst [vmem:[%s386_s3 + $0x8] sm:$0xff] %v277_v55  }

// kernel: gfpgan_forward.14
= control target key start
LH: loop header
LB: loop body
LE: loop exit
PB: predicated region body
PF: predicated region fallthrough
CT: control target
= control target key end

     0   :  { %vm283_vm0 = vcmask 261120   ;;  %v624_v15 = vmov 0   ;;  %s831_s1 = inlined_call_operand.vmem [shape: bf16[288,128], index: 1, kind: input, shape index: {}]   ;;  %s832_s0 = inlined_call_operand.vmem [shape: bf16[1,1,64,288], index: 0, kind: input, shape index: {}]   ;;  %s833_s2 = inlined_call_operand.vmem [shape: f32[64,1], index: 2, kind: input, shape index: {}]   ;;  %s834_s3 = inlined_call_operand.vmem [shape: bf16[1,64,128], index: 3, kind: output, shape index: {}]  }
   0x1   :  { %v570_v0 = vld [vmem:[%s831_s1 + $0x38] sm:$0xff]  ;;  %v580_v2 = vld [vmem:[%s831_s1 + $0x88] sm:$0xff]  ;;  %v569_v3 = vld [vmem:[%s831_s1 + $0x30] sm:$0xff]  ;;  %622 = vset.pattern.permute.xlu1 %v624_v15  ;;  %621 = vset.pattern.permute.xlu0 %v624_v15 }
   0x2   :  { %v651_v1 = vld [vmem:[%s831_s1 + $0x78] sm:$0xff]  ;;  %296 = vmatpush.bf16.msra.mxu0 %v570_v0  ;;  %604 = vmatpush.bf16.msra.mxu3 %v570_v0  ;;  %v663_v4 = vld [vmem:[%s831_s1 + $0x70] sm:$0xff]  ;;  %v579_v5 = vld [vmem:[%s831_s1 + $0x80] sm:$0xff] }
   0x3   :  { %612 = vmatpush.bf16.msra.mxu1 %v651_v1  ;;  %360 = vmatpush.bf16.msra.mxu2 %v580_v2  ;;  %v437_v6 = vld [vmem:[%s832_s0 + $0x8] sm:$0xf]  ;;  %v553_v7 = vld [vmem:[%s832_s0 + $0x10] sm:$0xf0]  ;;  %v567_v11 = vld [vmem:[%s831_s1 + $0x20] sm:$0xff] }
   0x4   :  { %v568_v8 = vld [vmem:[%s831_s1 + $0x28] sm:$0xff]  ;;  %v438_v10 = vor.u32 %v553_v7, %v437_v6  ;;  %v691_v12 = vld [vmem:[%s831_s1 + $0x60] sm:$0xff]  ;;  %v566_v13 = vld [vmem:[%s831_s1 + $0x18] sm:$0xff]  ;;  %623 = vset.pattern.permute.xlu2 %v624_v15 }
   0x5   :  { %v681_v9 = vld [vmem:[%s831_s1 + $0x68] sm:$0xff]  ;;  %v700_v14 = vld [vmem:[%s831_s1 + $0x58] sm:$0xff]  ;;  %v565_v16 = vld [vmem:[%s831_s1 + $0x10] sm:$0xff] }
   0x6   :  { %297 = vmatpush.bf16.msra.mxu0 %v569_v3  ;;  %605 = vmatpush.bf16.msra.mxu3 %v569_v3  ;;  %v69_v17 = vld [vmem:[%s833_s2 + $0x10] sm:$0xff]  ;;  %v449_v19 = vld [vmem:[%s832_s0 + $0x20] sm:$0xf]  ;;  %v556_v20 = vld [vmem:[%s832_s0 + $0x28] sm:$0xf0] }
   0x7   :  { %613 = vmatpush.bf16.msra.mxu1 %v663_v4  ;;  %361 = vmatpush.bf16.msra.mxu2 %v579_v5  ;;  %v573_v18 = vld [vmem:[%s831_s1 + $0x50] sm:$0xff]  ;;  %v564_v21 = vld [vmem:[%s831_s1 + $0x8] sm:$0xff]  ;;  %v450_v23 = vor.u32 %v556_v20, %v449_v19  ;;  %v67_v24 = vld [vmem:[%s833_s2] sm:$0xff] }
   0x8   :  { %87 = vperm.xlu1 %622, %v69_v17   ;;  %v572_v22 = vld [vmem:[%s831_s1 + $0x48] sm:$0xff]  ;;  %77 = vperm.xlu0 %621, %v67_v24   ;;  %v563_v25 = vld [vmem:[%s831_s1] sm:$0xff]  ;;  %v441_v26 = vld [vmem:[%s832_s0 + $0x18] sm:$0xf] }
   0x9   :  { %v70_v27 = vld [vmem:[%s833_s2 + $0x18] sm:$0xff]  ;;  %v555_v28 = vld [vmem:[%s832_s0 + $0x20] sm:$0xf0]  ;;  %v429_v29 = vld [vmem:[%s832_s0] sm:$0xf] }
   0xa   :  { %298 = vmatpush.bf16.msra.mxu0 %v568_v8  ;;  %606 = vmatpush.bf16.msra.mxu3 %v568_v8  ;;  %v552_v30 = vld [vmem:[%s832_s0 + $0x8] sm:$0xf0]  ;;  %v571_v31 = vld [vmem:[%s831_s1 + $0x40] sm:$0xff]  ;;  %v554_v32 = vld [vmem:[%s832_s0 + $0x1c] sm:$0xf]  ;;  %v442_v34 = vor.u32 %v555_v28, %v441_v26 }
   0xb   :  { %614 = vmatpush.bf16.msra.mxu1 %v681_v9  ;;  %547 = vmatmul.msk.bf16.vlgmr.msra.gmra.mxu2 %vm283_vm0, %v438_v10  ;;  %v443_v33 = vld [vmem:[%s832_s0 + $0x24] sm:$0xf0]  ;;  %v430_v35 = vor.u32 %v552_v30, %v429_v29  ;;  %v74_v38 = vld [vmem:[%s833_s2 + $0x38] sm:$0xff]  ;;  %v71_v39 = vld [vmem:[%s833_s2 + $0x20] sm:$0xff] }
   0xc   :  { %v446_v36 = vor.u32 %v554_v32, %v443_v33  ;;  %v68_v37 = vld [vmem:[%s833_s2 + $0x8] sm:$0xff]  ;;  %v461_v40 = vld [vmem:[%s832_s0 + $0x38] sm:$0xf]  ;;  %v559_v41 = vld [vmem:[%s832_s0 + $0x40] sm:$0xf0]  ;;  %97 = vperm.xlu2 %623, %v71_v39  }
   0xd   :  { %v462_v42 = vor.u32 %v559_v41, %v461_v40  ;;  %v73_v43 = vld [vmem:[%s833_s2 + $0x30] sm:$0xff]  ;;  %v72_v44 = vld [vmem:[%s833_s2 + $0x28] sm:$0xff]  ;;  %v558_v46 = vld [vmem:[%s832_s0 + $0x38] sm:$0xf0] }
   0xe   :  { %299 = vmatpush.bf16.msra.mxu0 %v567_v11  ;;  %607 = vmatpush.bf16.msra.mxu3 %v567_v11  ;;  %v453_v45 = vld [vmem:[%s832_s0 + $0x30] sm:$0xf]  ;;  %v557_v47 = vld [vmem:[%s832_s0 + $0x34] sm:$0xf]  ;;  %v455_v48 = vld [vmem:[%s832_s0 + $0x3c] sm:$0xf0] }
   0xf   :  { %615 = vmatpush.bf16.msra.mxu1 %v691_v12  ;;  %v454_v49 = vor.u32 %v558_v46, %v453_v45  ;;  %v458_v50 = vor.u32 %v557_v47, %v455_v48  ;;  %v473_v51 = vld [vmem:[%s832_s0 + $0x50] sm:$0xf]  ;;  %v562_v52 = vld [vmem:[%s832_s0 + $0x58] sm:$0xf0]  ;;  %v551_v54 = vld [vmem:[%s832_s0 + $0x4] sm:$0xf] }
  0x10   :  { %92 = vperm.xlu1 %622, %v70_v27   ;;  %82 = vperm.xlu0 %621, %v68_v37   ;;  %v474_v53 = vor.u32 %v562_v52, %v473_v51  ;;  %v431_v55 = vld [vmem:[%s832_s0 + $0xc] sm:$0xf0]  ;;  %v465_v57 = vld [vmem:[%s832_s0 + $0x48] sm:$0xf]  ;;  %v561_v58 = vld [vmem:[%s832_s0 + $0x50] sm:$0xf0] }
  0x11   :  { %v434_v56 = vor.u32 %v551_v54, %v431_v55  ;;  %v560_v59 = vld [vmem:[%s832_s0 + $0x4c] sm:$0xf]  ;;  %v467_v60 = vld [vmem:[%s832_s0 + $0x54] sm:$0xf0]  ;;  %v466_v61 = vor.u32 %v561_v58, %v465_v57 }
  0x12   :  { %300 = vmatpush.bf16.msra.mxu0 %v566_v13  ;;  %608 = vmatpush.bf16.msra.mxu3 %v566_v13  ;;  %v470_v62 = vor.u32 %v560_v59, %v467_v60 }
  0x13   :  { %616 = vmatpush.bf16.msra.mxu1 %v700_v14 }
  0x14   :  { %102 = vperm.xlu2 %623, %v72_v44  }
  0x16   :  { %301 = vmatpush.bf16.msra.mxu0 %v565_v16  ;;  %609 = vmatpush.bf16.msra.mxu3 %v565_v16 }
  0x17   :  { %617 = vmatpush.bf16.msra.mxu1 %v573_v18 }
  0x18   :  { %112 = vperm.xlu1 %622, %v74_v38   ;;  %107 = vperm.xlu0 %621, %v73_v43  }
  0x1a   :  { %302 = vmatpush.bf16.msra.mxu0 %v564_v21  ;;  %610 = vmatpush.bf16.msra.mxu3 %v564_v21 }
  0x1b   :  { %618 = vmatpush.bf16.msra.mxu1 %v572_v22  ;;  %548 = vmatmul.msk.bf16.gmra.mxu2 %vm283_vm0, %v450_v23 }
  0x1e   :  { %303 = vmatpush.bf16.msra.mxu0 %v563_v25  ;;  %611 = vmatpush.bf16.msra.mxu3 %v563_v25 }
  0x1f   :  { %619 = vmatpush.bf16.msra.mxu1 %v571_v31 }
  0x21   :  { %309 = vmatmul.bf16.vlgmr.msra.gmra.mxu3 %v442_v34  ;;  %304 = vmatmul.bf16.vlgmr.msra.gmra.mxu0 %v430_v35 }
  0x22   :  { %325 = vmatpush.bf16.msrb.mxu0 %v651_v1  ;;  %338 = vmatmul.bf16.vlgmr.msra.gmra.mxu1 %v446_v36 }
  0x26   :  { %326 = vmatpush.bf16.msrb.mxu0 %v663_v4 }
  0x2a   :  { %327 = vmatpush.bf16.msrb.mxu0 %v681_v9 }
  0x2b   :  { %549 = vmatmul.msk.bf16.gmra.mxu2 %vm283_vm0, %v462_v42 }
  0x2e   :  { %328 = vmatpush.bf16.msrb.mxu0 %v691_v12 }
  0x31   :  { %314 = vmatmul.bf16.gmra.mxu3 %v454_v49 }
  0x32   :  { %329 = vmatpush.bf16.msrb.mxu0 %v700_v14  ;;  %343 = vmatmul.bf16.gmra.mxu1 %v458_v50 }
  0x36   :  { %330 = vmatpush.bf16.msrb.mxu0 %v573_v18 }
  0x3a   :  { %331 = vmatpush.bf16.msrb.mxu0 %v572_v22 }
  0x3b   :  { %550 = vmatmul.msk.bf16.gmra.mxu2 %vm283_vm0, %v474_v53 }
  0x3e   :  { %332 = vmatpush.bf16.msrb.mxu0 %v571_v31 }
  0x41   :  { %333 = vmatmul.bf16.vlgmr.msrb.gmra.mxu0 %v434_v56  ;;  %319 = vmatmul.bf16.gmra.mxu3 %v466_v61 }
  0x42   :  { %348 = vmatmul.bf16.gmra.mxu1 %v470_v62 }
  0x66   :  { %v98_v17 = vpop.permute.xlu2 %97 }
  0x6e   :  { %v103_v31 = vpop.permute.xlu2 %102 }
  0x7a   :  { %v88_v3 = vpop.permute.xlu1 %87  ;;  %v78_v14 = vpop.permute.xlu0 %77 }
  0x82   :  { %v93_v10 = vpop.permute.xlu1 %92  ;;  %v83_v28 = vpop.permute.xlu0 %82 }
  0x8a   :  { %v108_v44 = vpop.permute.xlu0 %107  ;;  %v113_v62 = vpop.permute.xlu1 %112 }
  0x8e   :  { %v363_v63 = vpop.f32.mrf.mxu2 }
  0x96   :  { %v365_v0 = vpop.f32.mrf.mxu2 }
  0x9e   :  { %v368_v1 = vpop.f32.mrf.mxu2  ;;  %v305_v7 = vpop.f32.mrf.mxu0 }
  0x9f   :  { %v339_v2 = vpop.f32.mrf.mxu1  ;;  %v306_v33 = vadd.f32 %v305_v7, %v78_v14 }
  0xa4   :  { %v310_v4 = vpop.f32.mrf.mxu3 }
  0xa5   :  { %v311_v5 = vadd.f32 %v310_v4, %v88_v3 }
  0xa6   :  { %v370_v8 = vpop.f32.mrf.mxu2  ;;  %v307_v20 = vpop.f32.mrf.mxu0 }
  0xa7   :  { %v341_v6 = vpop.f32.mrf.mxu1  ;;  %v340_v9 = vadd.f32 %v339_v2, %v311_v5  ;;  %v308_v42 = vadd.f32 %v307_v20, %v83_v28 }
  0xa9   :  { %v369_v12 = vadd.f32 %v368_v1, %v340_v9 }
  0xab   :  { %v393_v18 = vmul.f32 0.2, %v369_v12  ;;  %vm385_vm1 = vcmp.ge.f32.partialorder %v369_v12, 0.0 }
  0xac   :  { %v312_v11 = vpop.f32.mrf.mxu3 }
  0xad   :  { %v313_v13 = vadd.f32 %v312_v11, %v93_v10  ;;  %v401_v24 = vsel %vm385_vm1, %v369_v12, %v393_v18 }
  0xae   :  { %v373_v21 = vpop.f32.mrf.mxu2 }
  0xaf   :  { %v342_v15 = vadd.f32 %v341_v6, %v313_v13  ;;  %v344_v16 = vpop.f32.mrf.mxu1 }
  0xb1   :  { %v371_v19 = vadd.f32 %v370_v8, %v342_v15 }
  0xb3   :  { %vm386_vm2 = vcmp.ge.f32.partialorder %v371_v19, 0.0  ;;  %v394_v22 = vmul.f32 0.2, %v371_v19 }
  0xb4   :  { %v315_v23 = vpop.f32.mrf.mxu3 }
  0xb5   :  { %v402_v25 = vsel %vm386_vm2, %v371_v19, %v394_v22  ;;  %v316_v26 = vadd.f32 %v315_v23, %v98_v17 }
  0xb6   :  { %v589_v27 = vpack.c.bf16 %v402_v25, %v401_v24  ;;  %v375_v34 = vpop.f32.mrf.mxu2 }
  0xb7   :  { %v345_v29 = vadd.f32 %v344_v16, %v316_v26  ;;  %v346_v30 = vpop.f32.mrf.mxu1 }
  0xb8   :  { %601 = vst [vmem:[%s834_s3 + $0x8] sm:$0xff] %v589_v27  }
  0xb9   :  { %v374_v36 = vadd.f32 %v373_v21, %v345_v29 }
  0xbb   :  { %v395_v40 = vmul.f32 0.2, %v374_v36  ;;  %vm387_vm3 = vcmp.ge.f32.partialorder %v374_v36, 0.0 }
  0xbc   :  { %v317_v35 = vpop.f32.mrf.mxu3 }
  0xbd   :  { %v318_v37 = vadd.f32 %v317_v35, %v103_v31  ;;  %v403_v50 = vsel %vm387_vm3, %v374_v36, %v395_v40 }
  0xbe   :  { %v334_v32 = vpop.f32.mrf.mxu0  ;;  %v378_v55 = vpop.f32.mrf.mxu2 }
  0xbf   :  { %v335_v38 = vadd.f32 %v334_v32, %v306_v33  ;;  %v347_v39 = vadd.f32 %v346_v30, %v318_v37  ;;  %v349_v47 = vpop.f32.mrf.mxu1 }
  0xc1   :  { %v376_v41 = vadd.f32 %v375_v34, %v347_v39  ;;  %v364_v43 = vadd.f32 %v363_v63, %v335_v38 }
  0xc3   :  { %vm388_vm4 = vcmp.ge.f32.partialorder %v376_v41, 0.0  ;;  %v396_v45 = vmul.f32 0.2, %v376_v41  ;;  %v391_v53 = vmul.f32 0.2, %v364_v43  ;;  %vm383_vm5 = vcmp.ge.f32.partialorder %v364_v43, 0.0 }
  0xc4   :  { %v320_v49 = vpop.f32.mrf.mxu3 }
  0xc5   :  { %v404_v51 = vsel %vm388_vm4, %v376_v41, %v396_v45  ;;  %v321_v52 = vadd.f32 %v320_v49, %v108_v44  ;;  %v399_v59 = vsel %vm383_vm5, %v364_v43, %v391_v53 }
  0xc6   :  { %v336_v46 = vpop.f32.mrf.mxu0  ;;  %v594_v54 = vpack.c.bf16 %v404_v51, %v403_v50  ;;  %v380_v4 = vpop.f32.mrf.mxu2 }
  0xc7   :  { %v337_v48 = vadd.f32 %v336_v46, %v308_v42  ;;  %v350_v58 = vadd.f32 %v349_v47, %v321_v52 }
  0xc8   :  { %602 = vst [vmem:[%s834_s3 + $0x10] sm:$0xff] %v594_v54  }
  0xc9   :  { %v366_v56 = vadd.f32 %v365_v0, %v337_v48  ;;  %v379_v1 = vadd.f32 %v378_v55, %v350_v58  ;;  %v351_v0 = vpop.f32.mrf.mxu1 }
  0xcb   :  { %vm384_vm6 = vcmp.ge.f32.partialorder %v366_v56, 0.0  ;;  %v392_v57 = vmul.f32 0.2, %v366_v56  ;;  %v397_v5 = vmul.f32 0.2, %v379_v1  ;;  %vm389_vm7 = vcmp.ge.f32.partialorder %v379_v1, 0.0 }
  0xcc   :  { %v322_v63 = vpop.f32.mrf.mxu3 }
  0xcd   :  { %v400_v60 = vsel %vm384_vm6, %v366_v56, %v392_v57  ;;  %v323_v2 = vadd.f32 %v322_v63, %v113_v62  ;;  %v405_v8 = vsel %vm389_vm7, %v379_v1, %v397_v5 }
  0xce   :  { %v584_v61 = vpack.c.bf16 %v400_v60, %v399_v59 }
  0xcf   :  { %v352_v3 = vadd.f32 %v351_v0, %v323_v2 }
  0xd0   :  { %585 = vst [vmem:[%s834_s3] sm:$0xff] %v584_v61  }
  0xd1   :  { %v381_v6 = vadd.f32 %v380_v4, %v352_v3 }
  0xd3   :  { %vm390_vm8 = vcmp.ge.f32.partialorder %v381_v6, 0.0  ;;  %v398_v7 = vmul.f32 0.2, %v381_v6 }
  0xd5   :  { %v406_v9 = vsel %vm390_vm8, %v381_v6, %v398_v7 }
  0xd6   :  { %v599_v10 = vpack.c.bf16 %v406_v9, %v405_v8 }
  0xd8   :  { %603 = vst [vmem:[%s834_s3 + $0x18] sm:$0xff] %v599_v10  }

// kernel: gfpgan_forward.16
= control target key start
LH: loop header
LB: loop body
LE: loop exit
PB: predicated region body
PF: predicated region fallthrough
CT: control target
= control target key end

     0   :  { %s844_s29 = smov 127   ;;  %s845_s30 = smov 126   ;;  %vm180_vm0 = vcmask 1031168   ;;  %vm89_vm1 = vcmask 1039360   ;;  %vm94_vm2 = vcmask 261120   ;;  %vm237_vm3 = vcmask 998400   ;;  %s1086_s1 = inlined_call_operand.vmem [shape: bf16[32,256], index: 1, kind: input, shape index: {}]   ;;  %s1087_s2 = inlined_call_operand.vmem [shape: f32[1,32], index: 2, kind: input, shape index: {}]   ;;  %s1088_s0 = inlined_call_operand.vmem [shape: bf16[1,9,32,32], index: 0, kind: input, shape index: {}]   ;;  %s1089_s3 = inlined_call_operand.vmem [shape: f32[32,1], index: 3, kind: input, shape index: {}]   ;;  %s1090_s4 = inlined_call_operand.vmem [shape: f32[32,1], index: 4, kind: input, shape index: {}]   ;;  %s1091_s5 = inlined_call_operand.vmem [shape: f32[1,1,128], index: 5, kind: input, shape index: {}]   ;;  %s1092_s6 = inlined_call_operand.vmem [shape: bf16[1,32,128], index: 6, kind: output, shape index: {}]  }
   0x1   :  { %v662_v0 = vld [vmem:[%s1086_s1 + $0x10] sm:$0xf]  ;;  %v727_v1 = vld [vmem:[%s1086_s1 + $0x14] sm:$0xf0]  ;;  %v654_v2 = vld [vmem:[%s1086_s1] sm:$0xf] }
   0x2   :  { %v663_v3 = vor.u32 %v727_v1, %v662_v0  ;;  %v725_v4 = vld [vmem:[%s1086_s1 + $0x4] sm:$0xf0]  ;;  %v726_v6 = vld [vmem:[%s1086_s1 + $0x14] sm:$0xf]  ;;  %v664_v7 = vld [vmem:[%s1086_s1 + $0x18] sm:$0xf0] }
   0x3   :  { %v655_v5 = vor.u32 %v725_v4, %v654_v2  ;;  %v724_v8 = vld [vmem:[%s1086_s1 + $0x4] sm:$0xf]  ;;  %v656_v9 = vld [vmem:[%s1086_s1 + $0x8] sm:$0xf0]  ;;  %v667_v10 = vor.u32 %v726_v6, %v664_v7  ;;  %s846_s15 = smov 122   ;;  %s847_s16 = smov 121  }
   0x4   :  { %85 = vrot.lane.b32.xlu0 %v663_v3, %s844_s29  ;;  %176 = vrot.lane.b32.xlu2 %v663_v3, %s845_s30  ;;  %v659_v11 = vor.u32 %v724_v8, %v656_v9  ;;  %s848_s17 = smov 116   ;;  %s849_s18 = smov 115   ;;  %v812_v18 = vld [vmem:[%s1088_s0 + $0x18] sm:$0xff]   ;;  %v811_v19 = vld [vmem:[%s1088_s0 + $0x10] sm:$0xff]   ;;  %vm294_vm4 = vcmask 990208   ;;  %vm408_vm5 = vcmask 949248  }
   0x5   :  { %81 = vrot.lane.b32.xlu1 %v655_v5, %s844_s29  ;;  %s850_s19 = smov 120   ;;  %s851_s20 = smov 114   ;;  %v922_v20 = vld [vmem:[%s1087_s2] ss:$0 sm:$0xff]  ;;  %v742_v21 = vunpack.c.l.bf16 %v812_v18  ;;  %v743_v22 = vunpack.c.h.bf16 %v812_v18  ;;  %v738_v23 = vunpack.c.l.bf16 %v811_v19  ;;  %v739_v24 = vunpack.c.h.bf16 %v811_v19  ;;  %v676_v27 = vld [vmem:[%s1086_s1 + $0x10] sm:$0xf] }
   0x6   :  { %v723_v28 = vld [vmem:[%s1086_s1 + $0x14] sm:$0xf0]  ;;  %v672_v36 = vld [vmem:[%s1086_s1] sm:$0xf]  ;;  %v722_v37 = vld [vmem:[%s1086_s1 + $0x4] sm:$0xf0] }
   0x7   :  { %v57_v26 = vmul.f32 %v922_v20, %v742_v21  ;;  %v58_v31 = vmul.f32 %v922_v20, %v743_v22  ;;  %v55_v32 = vmul.f32 %v922_v20, %v738_v23  ;;  %v56_v33 = vmul.f32 %v922_v20, %v739_v24  ;;  %v813_v41 = vld [vmem:[%s1088_s0 + $0x20] sm:$0xff]   ;;  %v815_v43 = vld [vmem:[%s1088_s0 + $0x30] sm:$0xff]   ;;  %v814_v4 = vld [vmem:[%s1088_s0 + $0x28] sm:$0xff]  }
   0x8   :  { %v677_v35 = vor.u32 %v723_v28, %v676_v27  ;;  %v673_v42 = vor.u32 %v722_v37, %v672_v36  ;;  %v746_v46 = vunpack.c.l.bf16 %v813_v41  ;;  %v747_v47 = vunpack.c.h.bf16 %v813_v41  ;;  %v729_v51 = vld [vmem:[%s1088_s0] sm:$0xff]   ;;  %v816_v7 = vld [vmem:[%s1088_s0 + $0x38] sm:$0xff]  }
   0x9   :  { %v60_v39 = vpack.c.bf16 %v58_v31, %v57_v26  ;;  %v59_v40 = vpack.c.bf16 %v56_v33, %v55_v32  ;;  %v754_v49 = vunpack.c.l.bf16 %v815_v43  ;;  %v755_v50 = vunpack.c.h.bf16 %v815_v43 }
   0xa   :  { %v166_v52 = vmul.f32 %v922_v20, %v746_v46  ;;  %v167_v53 = vmul.f32 %v922_v20, %v747_v47  ;;  %v730_v55 = vunpack.c.l.bf16 %v729_v51  ;;  %v731_v56 = vunpack.c.h.bf16 %v729_v51 }
   0xb   :  { %v223_v57 = vmul.f32 %v922_v20, %v754_v49  ;;  %v224_v58 = vmul.f32 %v922_v20, %v755_v50  ;;  %v750_v9 = vunpack.c.l.bf16 %v814_v4  ;;  %vm465_vm6 = vcmask 941056  }
   0xc   :  { %87 = vrot.lane.b32.xlu0 %v667_v10, %s844_s29  ;;  %178 = vrot.lane.b32.xlu2 %v667_v10, %s845_s30  ;;  %v170_v62 = vpack.c.bf16 %v167_v53, %v166_v52  ;;  %v36_v63 = vmul.f32 %v922_v20, %v730_v55  ;;  %v37_v0 = vmul.f32 %v922_v20, %v731_v56  ;;  %vm351_vm7 = vcmask 982016   ;;  %v558_v52 = vld [vmem:[%s1089_s3 + $0x10] sm:$0xff] }
   0xd   :  { %83 = vrot.lane.b32.xlu1 %v659_v11, %s844_s29  ;;  %v227_v2 = vpack.c.bf16 %v224_v58, %v223_v57  ;;  %v168_v18 = vmul.f32 %v922_v20, %v750_v9  ;;  %v823_v53 = vld [vmem:[%s1088_s0 + $0x70] sm:$0xff]   ;;  %vm522_vm8 = vcmask 932864  }
  0x14   :  { %233 = vrot.lane.b32.xlu0 %v663_v3, %s846_s15  ;;  %172 = vrot.lane.b32.xlu2 %v655_v5, %s845_s30 }
  0x15   :  { %235 = vrot.lane.b32.xlu1 %v667_v10, %s846_s15 }
  0x1c   :  { %174 = vrot.lane.b32.xlu0 %v659_v11, %s845_s30  ;;  %231 = vrot.lane.b32.xlu2 %v659_v11, %s846_s15 }
  0x1d   :  { %229 = vrot.lane.b32.xlu1 %v655_v5, %s846_s15 }
  0x24   :  { %290 = vrot.lane.b32.xlu0 %v663_v3, %s847_s16  ;;  %286 = vrot.lane.b32.xlu2 %v655_v5, %s847_s16 }
  0x25   :  { %292 = vrot.lane.b32.xlu1 %v667_v10, %s847_s16 }
  0x2c   :  { %288 = vrot.lane.b32.xlu0 %v659_v11, %s847_s16  ;;  %406 = vrot.lane.b32.xlu2 %v667_v10, %s848_s17 }
  0x2d   :  { %404 = vrot.lane.b32.xlu1 %v663_v3, %s848_s17 }
  0x34   :  { %461 = vrot.lane.b32.xlu0 %v663_v3, %s849_s18  ;;  %347 = vrot.lane.b32.xlu2 %v663_v3, %s850_s19 }
  0x35   :  { %463 = vrot.lane.b32.xlu1 %v667_v10, %s849_s18 }
  0x3c   :  { %349 = vrot.lane.b32.xlu0 %v667_v10, %s850_s19  ;;  %402 = vrot.lane.b32.xlu2 %v659_v11, %s848_s17 }
  0x3d   :  { %400 = vrot.lane.b32.xlu1 %v655_v5, %s848_s17 }
  0x44   :  { %457 = vrot.lane.b32.xlu0 %v655_v5, %s849_s18  ;;  %343 = vrot.lane.b32.xlu2 %v655_v5, %s850_s19 }
  0x45   :  { %459 = vrot.lane.b32.xlu1 %v659_v11, %s849_s18 }
  0x4c   :  { %345 = vrot.lane.b32.xlu0 %v659_v11, %s850_s19  ;;  %520 = vrot.lane.b32.xlu2 %v667_v10, %s851_s20  ;;  %v751_v10 = vunpack.c.h.bf16 %v814_v4  ;;  %v822_v4 = vld [vmem:[%s1088_s0 + $0x68] sm:$0xff]  }
  0x4d   :  { %518 = vrot.lane.b32.xlu1 %v663_v3, %s851_s20  ;;  %v40_v3 = vpack.c.bf16 %v37_v0, %v36_v63  ;;  %v584_v0 = vld [vmem:[%s1090_s4] sm:$0xff] }
  0x4e   :  { %v169_v19 = vmul.f32 %v922_v20, %v751_v10 }
  0x50   :  { %v171_v28 = vpack.c.bf16 %v169_v19, %v168_v18  ;;  %v557_v18 = vld [vmem:[%s1089_s3 + $0x8] sm:$0xff]  ;;  %v556_v19 = vld [vmem:[%s1089_s3] sm:$0xff] }
  0x54   :  { %514 = vrot.lane.b32.xlu0 %v655_v5, %s851_s20  ;;  %v817_v5 = vld [vmem:[%s1088_s0 + $0x40] sm:$0xff]  }
  0x55   :  { %516 = vrot.lane.b32.xlu1 %v659_v11, %s851_s20 }
  0x5e   :  { %v177_v12 = vpop.permute.xlu2 %176 }
  0x66   :  { %v179_v13 = vpop.permute.xlu2 %178 }
  0x67   :  { %v182_v14 = vsel %vm180_vm0, %v177_v12, %v179_v13  ;;  %v762_v12 = vunpack.c.l.bf16 %v817_v5  ;;  %v763_v13 = vunpack.c.h.bf16 %v817_v5 }
  0x68   :  { %197 = vmatpush.bf16.msra.mxu2 %v182_v14 }
  0x69   :  { %v280_v21 = vmul.f32 %v922_v20, %v762_v12  ;;  %v281_v22 = vmul.f32 %v922_v20, %v763_v13  ;;  %v783_v12 = vunpack.c.h.bf16 %v822_v4 }
  0x6b   :  { %v284_v31 = vpack.c.bf16 %v281_v22, %v280_v21  ;;  %v824_v22 = vld [vmem:[%s1088_s0 + $0x78] sm:$0xff]  }
  0x6e   :  { %v173_v17 = vpop.permute.xlu2 %172 }
  0x76   :  { %v86_v15 = vpop.permute.xlu0 %85  ;;  %v232_v34 = vpop.permute.xlu2 %231 }
  0x77   :  { %v82_v16 = vpop.permute.xlu1 %81 }
  0x7e   :  { %v88_v25 = vpop.permute.xlu0 %87  ;;  %v287_v54 = vpop.permute.xlu2 %286 }
  0x7f   :  { %v84_v29 = vpop.permute.xlu1 %83  ;;  %v91_v30 = vsel %vm89_vm1, %v86_v15, %v88_v25  ;;  %v758_v15 = vunpack.c.l.bf16 %v816_v7 }
  0x80   :  { %107 = vmatpush.bf16.msra.mxu0 %v91_v30  ;;  %828 = vmatpush.bf16.msra.mxu1 %v91_v30  ;;  %v90_v38 = vsel %vm89_vm1, %v82_v16, %v84_v29  ;;  %v759_v16 = vunpack.c.h.bf16 %v816_v7 }
  0x81   :  { %v225_v25 = vmul.f32 %v922_v20, %v758_v15  ;;  %v825_v15 = vld [vmem:[%s1088_s0 + $0x80] sm:$0xff]  }
  0x82   :  { %v226_v26 = vmul.f32 %v922_v20, %v759_v16 }
  0x84   :  { %108 = vmatpush.bf16.msra.mxu0 %v90_v38  ;;  %829 = vmatpush.bf16.msra.mxu1 %v90_v38  ;;  %v228_v36 = vpack.c.bf16 %v226_v26, %v225_v25  ;;  %v818_v38 = vld [vmem:[%s1088_s0 + $0x48] sm:$0xff]  }
  0x85   :  { %v767_v43 = vunpack.c.h.bf16 %v818_v38 }
  0x86   :  { %v234_v44 = vpop.permute.xlu0 %233  ;;  %v407_v6 = vpop.permute.xlu2 %406 }
  0x87   :  { %v236_v45 = vpop.permute.xlu1 %235  ;;  %669 = vmatmul.msk.bf16.vlgmr.msra.gmra.mxu1 %vm94_vm2, %v60_v39  ;;  %668 = vmatmul.msk.bf16.vlgmr.msra.gmra.mxu0 %vm94_vm2, %v59_v40  ;;  %v821_v39 = vld [vmem:[%s1088_s0 + $0x60] sm:$0xff]   ;;  %v283_v49 = vmul.f32 %v922_v20, %v767_v43 }
  0x88   :  { %144 = vmatpush.bf16.msrb.mxu1 %v677_v35  ;;  %v239_v48 = vsel %vm237_vm3, %v234_v44, %v236_v45  ;;  %v778_v45 = vunpack.c.l.bf16 %v821_v39  ;;  %v779_v46 = vunpack.c.h.bf16 %v821_v39 }
  0x89   :  { %254 = vmatpush.bf16.msra.mxu3 %v239_v48 }
  0x8a   :  { %v394_v50 = vmul.f32 %v922_v20, %v778_v45  ;;  %v395_v51 = vmul.f32 %v922_v20, %v779_v46 }
  0x8c   :  { %145 = vmatpush.bf16.msrb.mxu1 %v673_v42  ;;  %v766_v42 = vunpack.c.l.bf16 %v818_v38 }
  0x8e   :  { %v175_v59 = vpop.permute.xlu0 %174  ;;  %v348_v32 = vpop.permute.xlu2 %347  ;;  %v282_v48 = vmul.f32 %v922_v20, %v766_v42 }
  0x8f   :  { %v230_v60 = vpop.permute.xlu1 %229  ;;  %v181_v61 = vsel %vm180_vm0, %v173_v17, %v175_v59  ;;  %v810_v17 = vld [vmem:[%s1088_s0 + $0x8] sm:$0xff]  }
  0x90   :  { %198 = vmatpush.bf16.msra.mxu2 %v181_v61  ;;  %v238_v1 = vsel %vm237_vm3, %v230_v60, %v232_v34  ;;  %v734_v23 = vunpack.c.l.bf16 %v810_v17  ;;  %v735_v24 = vunpack.c.h.bf16 %v810_v17  ;;  %v285_v58 = vpack.c.bf16 %v283_v49, %v282_v48  ;;  %v585_v48 = vld [vmem:[%s1090_s4 + $0x8] sm:$0xff] }
  0x91   :  { %255 = vmatpush.bf16.msra.mxu3 %v238_v1  ;;  %v398_v60 = vpack.c.bf16 %v395_v51, %v394_v50  ;;  %v786_v61 = vunpack.c.l.bf16 %v823_v53  ;;  %v397_v17 = vmul.f32 %v922_v20, %v783_v12  ;;  %v826_v51 = vld [vmem:[%s1088_s0 + $0x88] sm:$0xff]  }
  0x92   :  { %v38_v33 = vmul.f32 %v922_v20, %v734_v23  ;;  %v39_v34 = vmul.f32 %v922_v20, %v735_v24  ;;  %v587_v23 = vld [vmem:[%s1090_s4 + $0x18] sm:$0xff] }
  0x93   :  { %684 = vmatmul.msk.bf16.vlgmr.msra.gmra.mxu2 %vm94_vm2, %v170_v62  ;;  %v787_v62 = vunpack.c.h.bf16 %v823_v53  ;;  %v451_v1 = vmul.f32 %v922_v20, %v786_v61  ;;  %v798_v53 = vunpack.c.l.bf16 %v826_v51 }
  0x94   :  { %690 = vmatmul.msk.bf16.vlgmr.msra.gmra.mxu3 %vm94_vm2, %v227_v2  ;;  %v41_v37 = vpack.c.bf16 %v39_v34, %v38_v33  ;;  %v791_v33 = vunpack.c.h.bf16 %v824_v22  ;;  %v586_v34 = vld [vmem:[%s1090_s4 + $0x10] sm:$0xff] }
  0x95   :  { %v452_v2 = vmul.f32 %v922_v20, %v787_v62 }
  0x96   :  { %v291_v8 = vpop.permute.xlu0 %290  ;;  %v403_v47 = vpop.permute.xlu2 %402  ;;  %v454_v39 = vmul.f32 %v922_v20, %v791_v33 }
  0x97   :  { %v293_v11 = vpop.permute.xlu1 %292  ;;  %678 = vmatmul.msk.bf16.vlgmr.msrb.gmra.mxu1 %vm94_vm2, %v40_v3  ;;  %v819_v3 = vld [vmem:[%s1088_s0 + $0x50] sm:$0xff]   ;;  %v455_v10 = vpack.c.bf16 %v452_v2, %v451_v1 }
  0x98   :  { %v296_v14 = vsel %vm294_vm4, %v291_v8, %v293_v11  ;;  %v770_v7 = vunpack.c.l.bf16 %v819_v3  ;;  %v771_v8 = vunpack.c.h.bf16 %v819_v3  ;;  %v782_v11 = vunpack.c.l.bf16 %v822_v4 }
  0x99   :  { %311 = vmatpush.bf16.msrb.mxu0 %v296_v14 }
  0x9a   :  { %v337_v13 = vmul.f32 %v922_v20, %v770_v7  ;;  %v338_v14 = vmul.f32 %v922_v20, %v771_v8  ;;  %v396_v16 = vmul.f32 %v922_v20, %v782_v11 }
  0x9e   :  { %v289_v27 = vpop.permute.xlu0 %288  ;;  %v344_v63 = vpop.permute.xlu2 %343 }
  0x9f   :  { %v405_v29 = vpop.permute.xlu1 %404  ;;  %v295_v30 = vsel %vm294_vm4, %v287_v54, %v289_v27  ;;  %v852_v54 = vmov 0   ;;  %v341_v27 = vpack.c.bf16 %v338_v14, %v337_v13 }
  0xa0   :  { %312 = vmatpush.bf16.msrb.mxu0 %v295_v30  ;;  %v410_v35 = vsel %vm408_vm5, %v405_v29, %v407_v6  ;;  %841 = vset.pattern.permute.xlu1 %v852_v54  ;;  %v795_v29 = vunpack.c.h.bf16 %v825_v15 }
  0xa1   :  { %425 = vmatpush.bf16.msrb.mxu2 %v410_v35  ;;  %840 = vset.pattern.permute.xlu0 %v852_v54  ;;  %v559_v35 = vld [vmem:[%s1089_s3 + $0x18] sm:$0xff] }
  0xa2   :  { %572 = vperm.xlu1 %841, %v558_v52   ;;  %839 = vset.pattern.permute.xlu2 %v852_v54  ;;  %v799_v54 = vunpack.c.h.bf16 %v826_v51 }
  0xa3   :  { %685 = vmatmul.msk.bf16.gmra.mxu2 %vm94_vm2, %v171_v28  ;;  %696 = vmatmul.msk.bf16.vlgmr.msrb.gmra.mxu0 %vm94_vm2, %v284_v31  ;;  %v794_v28 = vunpack.c.l.bf16 %v825_v15  ;;  %v399_v31 = vpack.c.bf16 %v397_v17, %v396_v16 }
  0xa4   :  { %691 = vmatmul.msk.bf16.gmra.mxu3 %vm94_vm2, %v228_v36  ;;  %567 = vperm.xlu0 %840, %v557_v18  }
  0xa5   :  { %562 = vperm.xlu2 %839, %v556_v19   ;;  %v508_v36 = vmul.f32 %v922_v20, %v794_v28 }
  0xa6   :  { %v462_v40 = vpop.permute.xlu0 %461  ;;  %v521_v21 = vpop.permute.xlu2 %520 }
  0xa7   :  { %v464_v41 = vpop.permute.xlu1 %463  ;;  %679 = vmatmul.msk.bf16.gmra.mxu1 %vm94_vm2, %v41_v37  ;;  %v509_v37 = vmul.f32 %v922_v20, %v795_v29 }
  0xa8   :  { %v467_v44 = vsel %vm465_vm6, %v462_v40, %v464_v41  ;;  %v820_v40 = vld [vmem:[%s1088_s0 + $0x58] sm:$0xff]  }
  0xa9   :  { %482 = vmatpush.bf16.msrb.mxu3 %v467_v44  ;;  %v774_v43 = vunpack.c.l.bf16 %v820_v40  ;;  %v775_v44 = vunpack.c.h.bf16 %v820_v40  ;;  %v512_v46 = vpack.c.bf16 %v509_v37, %v508_v36 }
  0xaa   :  { %590 = vperm.xlu1 %841, %v584_v0  }
  0xab   :  { %v339_v49 = vmul.f32 %v922_v20, %v774_v43  ;;  %v340_v50 = vmul.f32 %v922_v20, %v775_v44  ;;  %v843_v44 = vld [vmem:[%s1091_s5] ss:$0 sm:$0xff] }
  0xac   :  { %600 = vperm.xlu0 %840, %v586_v34  }
  0xad   :  { %577 = vperm.xlu2 %839, %v559_v35   ;;  %v342_v52 = vpack.c.bf16 %v340_v50, %v339_v49 }
  0xae   :  { %v350_v55 = vpop.permute.xlu0 %349 }
  0xaf   :  { %v353_v56 = vsel %vm351_vm7, %v348_v32, %v350_v55  ;;  %v401_v57 = vpop.permute.xlu1 %400  ;;  %v790_v32 = vunpack.c.l.bf16 %v824_v22  ;;  %v510_v55 = vmul.f32 %v922_v20, %v798_v53 }
  0xb0   :  { %368 = vmatpush.bf16.msra.mxu1 %v353_v56  ;;  %v409_v59 = vsel %vm408_vm5, %v401_v57, %v403_v47  ;;  %v511_v56 = vmul.f32 %v922_v20, %v799_v54 }
  0xb1   :  { %426 = vmatpush.bf16.msrb.mxu2 %v409_v59  ;;  %v453_v38 = vmul.f32 %v922_v20, %v790_v32 }
  0xb2   :  { %605 = vperm.xlu1 %841, %v587_v23   ;;  %v513_v57 = vpack.c.bf16 %v511_v56, %v510_v55 }
  0xb3   :  { %697 = vmatmul.msk.bf16.gmra.mxu0 %vm94_vm2, %v285_v58  ;;  %v456_v47 = vpack.c.bf16 %v454_v39, %v453_v38 }
  0xb4   :  { %708 = vmatmul.msk.bf16.vlgmr.msrb.gmra.mxu2 %vm94_vm2, %v398_v60 }
  0xb5   :  { %595 = vperm.xlu2 %839, %v585_v48  }
  0xb6   :  { %v458_v5 = vpop.permute.xlu0 %457 }
  0xb7   :  { %v460_v6 = vpop.permute.xlu1 %459 }
  0xb8   :  { %v466_v9 = vsel %vm465_vm6, %v458_v5, %v460_v6 }
  0xb9   :  { %483 = vmatpush.bf16.msrb.mxu3 %v466_v9 }
  0xbc   :  { %714 = vmatmul.msk.bf16.vlgmr.msrb.gmra.mxu3 %vm94_vm2, %v455_v10 }
  0xbe   :  { %v346_v24 = vpop.permute.xlu0 %345 }
  0xbf   :  { %v519_v25 = vpop.permute.xlu1 %518  ;;  %v352_v26 = vsel %vm351_vm7, %v344_v63, %v346_v24 }
  0xc0   :  { %v524_v30 = vsel %vm522_vm8, %v519_v25, %v521_v21  ;;  %369 = vmatpush.bf16.msra.mxu1 %v352_v26 }
  0xc1   :  { %539 = vmatpush.bf16.msra.mxu0 %v524_v30 }
  0xc3   :  { %702 = vmatmul.msk.bf16.vlgmr.msra.gmra.mxu1 %vm94_vm2, %v341_v27 }
  0xc4   :  { %709 = vmatmul.msk.bf16.gmra.mxu2 %vm94_vm2, %v399_v31 }
  0xc6   :  { %v515_v41 = vpop.permute.xlu0 %514 }
  0xc7   :  { %v517_v42 = vpop.permute.xlu1 %516 }
  0xc8   :  { %v523_v45 = vsel %vm522_vm8, %v515_v41, %v517_v42 }
  0xc9   :  { %540 = vmatpush.bf16.msra.mxu0 %v523_v45 }
  0xcc   :  { %720 = vmatmul.msk.bf16.vlgmr.msra.gmra.mxu0 %vm94_vm2, %v512_v46  ;;  %715 = vmatmul.msk.bf16.gmra.mxu3 %vm94_vm2, %v456_v47 }
  0xd3   :  { %703 = vmatmul.msk.bf16.gmra.mxu1 %vm94_vm2, %v342_v52 }
  0xdc   :  { %721 = vmatmul.msk.bf16.gmra.mxu0 %vm94_vm2, %v513_v57 }
  0xff   :  { %v563_v18 = vpop.permute.xlu2 %562 }
 0x104   :  { %v115_v58 = vpop.f32.mrf.mxu1  ;;  %v110_v59 = vpop.f32.mrf.mxu0 }
 0x107   :  { %v578_v36 = vpop.permute.xlu2 %577 }
 0x10c   :  { %v117_v60 = vpop.f32.mrf.mxu1  ;;  %v112_v62 = vpop.f32.mrf.mxu0 }
 0x10f   :  { %v596_v56 = vpop.permute.xlu2 %595 }
 0x114   :  { %v147_v63 = vpop.f32.mrf.mxu1  ;;  %v573_v21 = vpop.permute.xlu1 %572 }
 0x115   :  { %v148_v9 = vadd.f32 %v147_v63, %v110_v59 }
 0x116   :  { %v200_v61 = vpop.f32.mrf.mxu2  ;;  %v568_v49 = vpop.permute.xlu0 %567 }
 0x117   :  { %v257_v0 = vpop.f32.mrf.mxu3  ;;  %v210_v12 = vadd.f32 %v200_v61, %v148_v9 }
 0x119   :  { %v267_v14 = vadd.f32 %v257_v0, %v210_v12 }
 0x11c   :  { %v149_v3 = vpop.f32.mrf.mxu1  ;;  %v591_v38 = vpop.permute.xlu1 %590 }
 0x11d   :  { %v150_v15 = vadd.f32 %v149_v3, %v112_v62 }
 0x11e   :  { %v202_v1 = vpop.f32.mrf.mxu2  ;;  %v601_v9 = vpop.permute.xlu0 %600 }
 0x11f   :  { %v259_v4 = vpop.f32.mrf.mxu3  ;;  %v211_v22 = vadd.f32 %v202_v1, %v150_v15 }
 0x120   :  { %v314_v2 = vpop.f32.mrf.mxu0 }
 0x121   :  { %v324_v17 = vadd.f32 %v314_v2, %v267_v14  ;;  %v268_v27 = vadd.f32 %v259_v4, %v211_v22 }
 0x124   :  { %v152_v7 = vpop.f32.mrf.mxu1 }
 0x125   :  { %v153_v28 = vadd.f32 %v152_v7, %v115_v58 }
 0x126   :  { %v205_v5 = vpop.f32.mrf.mxu2 }
 0x127   :  { %v262_v8 = vpop.f32.mrf.mxu3  ;;  %v212_v33 = vadd.f32 %v205_v5, %v153_v28 }
 0x128   :  { %v316_v6 = vpop.f32.mrf.mxu0 }
 0x129   :  { %v325_v29 = vadd.f32 %v316_v6, %v268_v27  ;;  %v269_v42 = vadd.f32 %v262_v8, %v212_v33 }
 0x12c   :  { %v154_v11 = vpop.f32.mrf.mxu1 }
 0x12d   :  { %v155_v43 = vadd.f32 %v154_v11, %v117_v60 }
 0x12e   :  { %v207_v20 = vpop.f32.mrf.mxu2 }
 0x12f   :  { %v264_v13 = vpop.f32.mrf.mxu3  ;;  %v213_v50 = vadd.f32 %v207_v20, %v155_v43 }
 0x130   :  { %v319_v10 = vpop.f32.mrf.mxu0 }
 0x131   :  { %v326_v46 = vadd.f32 %v319_v10, %v269_v42  ;;  %v270_v59 = vadd.f32 %v264_v13, %v213_v50 }
 0x137   :  { %v428_v16 = vpop.f32.mrf.mxu2 }
 0x138   :  { %v321_v23 = vpop.f32.mrf.mxu0 }
 0x139   :  { %v327_v63 = vadd.f32 %v321_v23, %v270_v59 }
 0x13f   :  { %v485_v25 = vpop.f32.mrf.mxu3  ;;  %v430_v30 = vpop.f32.mrf.mxu2 }
 0x140   :  { %v371_v19 = vpop.f32.mrf.mxu1 }
 0x141   :  { %v381_v24 = vadd.f32 %v371_v19, %v324_v17 }
 0x143   :  { %v438_v26 = vadd.f32 %v428_v16, %v381_v24  ;;  %v606_v24 = vpop.permute.xlu1 %605 }
 0x145   :  { %v495_v31 = vadd.f32 %v485_v25, %v438_v26 }
 0x147   :  { %v487_v39 = vpop.f32.mrf.mxu3  ;;  %v433_v53 = vpop.f32.mrf.mxu2 }
 0x148   :  { %v373_v32 = vpop.f32.mrf.mxu1 }
 0x149   :  { %v382_v34 = vadd.f32 %v373_v32, %v325_v29  ;;  %v542_v35 = vpop.f32.mrf.mxu0 }
 0x14a   :  { %v552_v37 = vadd.f32 %v542_v35, %v495_v31 }
 0x14b   :  { %v439_v40 = vadd.f32 %v430_v30, %v382_v34 }
 0x14c   :  { %v580_v41 = vmul.f32 %v563_v18, %v552_v37 }
 0x14d   :  { %v496_v47 = vadd.f32 %v487_v39, %v439_v40 }
 0x14e   :  { %v608_v45 = vadd.f32 %v591_v38, %v580_v41 }
 0x14f   :  { %v490_v60 = vpop.f32.mrf.mxu3  ;;  %v435_v8 = vpop.f32.mrf.mxu2 }
 0x150   :  { %v376_v48 = vpop.f32.mrf.mxu1  ;;  %v616_v54 = vadd.f32 %v843_v44, %v608_v45 }
 0x151   :  { %v383_v51 = vadd.f32 %v376_v48, %v326_v46  ;;  %v544_v52 = vpop.f32.mrf.mxu0 }
 0x152   :  { %v553_v55 = vadd.f32 %v544_v52, %v496_v47  ;;  %v624_v61 = vmul.f32 0.2, %v616_v54  ;;  %vm620_vm9 = vcmp.ge.f32.partialorder %v616_v54, 0.0 }
 0x153   :  { %v440_v58 = vadd.f32 %v433_v53, %v383_v51 }
 0x154   :  { %v581_v57 = vmul.f32 %v568_v49, %v553_v55  ;;  %v628_v5 = vsel %vm620_vm9, %v616_v54, %v624_v61 }
 0x155   :  { %v497_v1 = vadd.f32 %v490_v60, %v440_v58  ;;  %v632_v12 = vmul.f32 1.4142135, %v628_v5 }
 0x156   :  { %v609_v62 = vadd.f32 %v596_v56, %v581_v57 }
 0x157   :  { %v492_v16 = vpop.f32.mrf.mxu3 }
 0x158   :  { %v617_v0 = vadd.f32 %v843_v44, %v609_v62  ;;  %v378_v2 = vpop.f32.mrf.mxu1 }
 0x159   :  { %v384_v3 = vadd.f32 %v378_v2, %v327_v63  ;;  %v547_v4 = vpop.f32.mrf.mxu0 }
 0x15a   :  { %vm621_vm10 = vcmp.ge.f32.partialorder %v617_v0, 0.0  ;;  %v625_v6 = vmul.f32 0.2, %v617_v0  ;;  %v554_v7 = vadd.f32 %v547_v4, %v497_v1 }
 0x15b   :  { %v441_v10 = vadd.f32 %v435_v8, %v384_v3 }
 0x15c   :  { %v629_v20 = vsel %vm621_vm10, %v617_v0, %v625_v6  ;;  %v582_v11 = vmul.f32 %v573_v21, %v554_v7 }
 0x15d   :  { %v633_v13 = vmul.f32 1.4142135, %v629_v20  ;;  %v498_v17 = vadd.f32 %v492_v16, %v441_v10 }
 0x15e   :  { %v610_v14 = vadd.f32 %v601_v9, %v582_v11 }
 0x15f   :  { %v803_v15 = vpack.c.bf16 %v633_v13, %v632_v12 }
 0x160   :  { %v618_v19 = vadd.f32 %v843_v44, %v610_v14 }
 0x161   :  { %804 = vst [vmem:[%s1092_s6] sm:$0xff] %v803_v15   ;;  %v549_v18 = vpop.f32.mrf.mxu0 }
 0x162   :  { %v555_v22 = vadd.f32 %v549_v18, %v498_v17  ;;  %v626_v25 = vmul.f32 0.2, %v618_v19  ;;  %vm622_vm11 = vcmp.ge.f32.partialorder %v618_v19, 0.0 }
 0x164   :  { %v583_v23 = vmul.f32 %v578_v36, %v555_v22  ;;  %v630_v21 = vsel %vm622_vm11, %v618_v19, %v626_v25 }
 0x165   :  { %v634_v30 = vmul.f32 1.4142135, %v630_v21 }
 0x166   :  { %v611_v26 = vadd.f32 %v606_v24, %v583_v23 }
 0x168   :  { %v619_v27 = vadd.f32 %v843_v44, %v611_v26 }
 0x16a   :  { %vm623_vm12 = vcmp.ge.f32.partialorder %v619_v27, 0.0  ;;  %v627_v28 = vmul.f32 0.2, %v619_v27 }
 0x16c   :  { %v631_v29 = vsel %vm623_vm12, %v619_v27, %v627_v28 }
 0x16d   :  { %v635_v31 = vmul.f32 1.4142135, %v631_v29 }
 0x16f   :  { %v808_v32 = vpack.c.bf16 %v635_v31, %v634_v30 }
 0x171   :  { %827 = vst [vmem:[%s1092_s6 + $0x8] sm:$0xff] %v808_v32  }

// kernel: gfpgan_forward.17
= control target key start
LH: loop header
LB: loop body
LE: loop exit
PB: predicated region body
PF: predicated region fallthrough
CT: control target
= control target key end

     0   :  { %v84_v2 = vmov 0   ;;  %vm48_vm0 = vcmask 261120   ;;  %s128_s1 = inlined_call_operand.vmem [shape: bf16[32,128], index: 1, kind: input, shape index: {}]   ;;  %s129_s0 = inlined_call_operand.vmem [shape: bf16[1,1,8,32], index: 0, kind: input, shape index: {}]   ;;  %s130_s2 = inlined_call_operand.vmem [shape: f32[1,32], index: 2, kind: input, shape index: {}]   ;;  %s131_s3 = inlined_call_operand.vmem [shape: f32[8,1], index: 3, kind: input, shape index: {}]   ;;  %s132_s4 = inlined_call_operand.vmem [shape: f32[1,8,128], index: 4, kind: output, shape index: {}]  }
   0x1   :  { %v80_v0 = vld [vmem:[%s128_s1 + $0x8] sm:$0xff]  ;;  %v18_v1 = vld [vmem:[%s129_s0] sm:$0xf]  ;;  %82 = vset.pattern.permute.xlu0 %v84_v2 }
   0x2   :  { %v19_v3 = vunpack.c.l.bf16 %v18_v1  ;;  %v83_v4 = vld [vmem:[%s130_s2] ss:$0 sm:$0xff]  ;;  %58 = vmatpush.bf16.msra.mxu0 %v80_v0 }
   0x3   :  { %v30_v5 = vld [vmem:[%s131_s3] sm:$0xff] }
   0x4   :  { %v79_v6 = vld [vmem:[%s128_s1] sm:$0xff]  ;;  %33 = vperm.xlu0 %82, %v30_v5   ;;  %v24_v7 = vmul.f32 %v83_v4, %v19_v3 }
   0x6   :  { %v25_v8 = vpack.c.bf16 %v24_v7, %v24_v7  ;;  %59 = vmatpush.bf16.msra.mxu0 %v79_v6 }
   0x9   :  { %78 = vmatmul.msk.bf16.vlgmr.msra.gmra.mxu0 %vm48_vm0, %v25_v8 }
  0x76   :  { %v34_v9 = vpop.permute.xlu0 %33 }
  0x86   :  { %v61_v10 = vpop.f32.mrf.mxu0 }
  0x87   :  { %v62_v11 = vadd.f32 %v61_v10, %v34_v9 }
  0x89   :  { %65 = vst [vmem:[%s132_s4] sm:$0xff] %v62_v11 }
  0x8e   :  { %v63_v12 = vpop.f32.mrf.mxu0 }

// kernel: gfpgan_forward.15
= control target key start
LH: loop header
LB: loop body
LE: loop exit
PB: predicated region body
PF: predicated region fallthrough
CT: control target
= control target key end

     0   :  { %v4334_v8 = vmov 0   ;;  %s6131_s1 = inlined_call_operand.vmem [shape: bf16[1024,128], index: 1, kind: input, shape index: {}]   ;;  %s6132_s2 = inlined_call_operand.vmem [shape: f32[384,1], index: 2, kind: input, shape index: {}]   ;;  %s6133_s0 = inlined_call_operand.vmem [shape: bf16[1,1,384,1024], index: 0, kind: input, shape index: {}]   ;;  %s6134_s3 = inlined_call_operand.vmem [shape: f32[1,384,128], index: 3, kind: output, shape index: {}]  }
   0x1   :  { %v4273_v0 = vld [vmem:[%s6131_s1 + $0x38] sm:$0xff]  ;;  %v4272_v4 = vld [vmem:[%s6131_s1 + $0x30] sm:$0xff]  ;;  %4331 = vset.pattern.permute.xlu0 %v4334_v8  ;;  %4332 = vset.pattern.permute.xlu1 %v4334_v8  ;;  %v4271_v9 = vld [vmem:[%s6131_s1 + $0x28] sm:$0xff] }
   0x2   :  { %v4281_v1 = vld [vmem:[%s6131_s1 + $0x78] sm:$0xff]  ;;  %1966 = vmatpush.bf16.msra.mxu0 %v4273_v0  ;;  %v4280_v5 = vld [vmem:[%s6131_s1 + $0x70] sm:$0xff]  ;;  %4333 = vset.pattern.permute.xlu2 %v4334_v8  ;;  %v4279_v10 = vld [vmem:[%s6131_s1 + $0x68] sm:$0xff] }
   0x3   :  { %v4289_v2 = vld [vmem:[%s6131_s1 + $0xb8] sm:$0xff]  ;;  %2095 = vmatpush.bf16.msra.mxu1 %v4281_v1  ;;  %v4288_v6 = vld [vmem:[%s6131_s1 + $0xb0] sm:$0xff]  ;;  %v4287_v11 = vld [vmem:[%s6131_s1 + $0xa8] sm:$0xff] }
   0x4   :  { %v4297_v3 = vld [vmem:[%s6131_s1 + $0xf8] sm:$0xff]  ;;  %2224 = vmatpush.bf16.msra.mxu2 %v4289_v2  ;;  %v4296_v7 = vld [vmem:[%s6131_s1 + $0xf0] sm:$0xff]  ;;  %v4295_v12 = vld [vmem:[%s6131_s1 + $0xe8] sm:$0xff] }
   0x5   :  { %2353 = vmatpush.bf16.msra.mxu3 %v4297_v3  ;;  %v4270_v13 = vld [vmem:[%s6131_s1 + $0x20] sm:$0xff]  ;;  %v4269_v17 = vld [vmem:[%s6131_s1 + $0x18] sm:$0xff]  ;;  %v4268_v22 = vld [vmem:[%s6131_s1 + $0x10] sm:$0xff] }
   0x6   :  { %1967 = vmatpush.bf16.msra.mxu0 %v4272_v4  ;;  %v4278_v14 = vld [vmem:[%s6131_s1 + $0x60] sm:$0xff]  ;;  %v4277_v18 = vld [vmem:[%s6131_s1 + $0x58] sm:$0xff]  ;;  %v4276_v23 = vld [vmem:[%s6131_s1 + $0x50] sm:$0xff] }
   0x7   :  { %2096 = vmatpush.bf16.msra.mxu1 %v4280_v5  ;;  %v4286_v15 = vld [vmem:[%s6131_s1 + $0xa0] sm:$0xff]  ;;  %v4285_v20 = vld [vmem:[%s6131_s1 + $0x98] sm:$0xff]  ;;  %v336_v24 = vld [vmem:[%s6132_s2 + $0x10] sm:$0xff] }
   0x8   :  { %2225 = vmatpush.bf16.msra.mxu2 %v4288_v6  ;;  %v4294_v16 = vld [vmem:[%s6131_s1 + $0xe0] sm:$0xff]  ;;  %v4293_v21 = vld [vmem:[%s6131_s1 + $0xd8] sm:$0xff]  ;;  %v4284_v25 = vld [vmem:[%s6131_s1 + $0x90] sm:$0xff]  ;;  %394 = vperm.xlu1 %4332, %v336_v24  }
   0x9   :  { %2354 = vmatpush.bf16.msra.mxu3 %v4296_v7  ;;  %v334_v19 = vld [vmem:[%s6132_s2] sm:$0xff]  ;;  %v4292_v26 = vld [vmem:[%s6131_s1 + $0xd0] sm:$0xff]  ;;  %v335_v27 = vld [vmem:[%s6132_s2 + $0x8] sm:$0xff] }
   0xa   :  { %1968 = vmatpush.bf16.msra.mxu0 %v4271_v9  ;;  %384 = vperm.xlu0 %4331, %v334_v19   ;;  %v4267_v28 = vld [vmem:[%s6131_s1 + $0x8] sm:$0xff]  ;;  %v4266_v32 = vld [vmem:[%s6131_s1] sm:$0xff]  ;;  %v4321_v44 = vld [vmem:[%s6131_s1 + $0x1b8] sm:$0xff] }
   0xb   :  { %2097 = vmatpush.bf16.msra.mxu1 %v4279_v10  ;;  %v4275_v29 = vld [vmem:[%s6131_s1 + $0x48] sm:$0xff]  ;;  %v4274_v33 = vld [vmem:[%s6131_s1 + $0x40] sm:$0xff]  ;;  %v4305_v45 = vld [vmem:[%s6131_s1 + $0x138] sm:$0xff] }
   0xc   :  { %2226 = vmatpush.bf16.msra.mxu2 %v4287_v11  ;;  %v4283_v30 = vld [vmem:[%s6131_s1 + $0x88] sm:$0xff]  ;;  %v4282_v34 = vld [vmem:[%s6131_s1 + $0x80] sm:$0xff]  ;;  %v4329_v50 = vld [vmem:[%s6131_s1 + $0x1f8] sm:$0xff] }
   0xd   :  { %2355 = vmatpush.bf16.msra.mxu3 %v4295_v12  ;;  %v4291_v31 = vld [vmem:[%s6131_s1 + $0xc8] sm:$0xff]  ;;  %v4290_v35 = vld [vmem:[%s6131_s1 + $0xc0] sm:$0xff]  ;;  %v4313_v51 = vld [vmem:[%s6131_s1 + $0x178] sm:$0xff] }
   0xe   :  { %1969 = vmatpush.bf16.msra.mxu0 %v4270_v13  ;;  %v3052_v36 = vld [vmem:[%s6133_s0] sm:$0xf]  ;;  %v4074_v38 = vld [vmem:[%s6133_s0 + $0x4] sm:$0xf]  ;;  %v3060_v40 = vld [vmem:[%s6133_s0 + $0x8] sm:$0xf] }
   0xf   :  { %2098 = vmatpush.bf16.msra.mxu1 %v4278_v14  ;;  %v4078_v37 = vld [vmem:[%s6133_s0 + $0x1c] sm:$0xf0]  ;;  %v3054_v39 = vld [vmem:[%s6133_s0 + $0x20] sm:$0xf0]  ;;  %v4079_v41 = vld [vmem:[%s6133_s0 + $0x24] sm:$0xf0] }
  0x10   :  { %2227 = vmatpush.bf16.msra.mxu2 %v4286_v15  ;;  %v4075_v42 = vld [vmem:[%s6133_s0 + $0xc] sm:$0xf]  ;;  %v3053_v46 = vor.u32 %v4078_v37, %v3052_v36  ;;  %v3057_v47 = vor.u32 %v4074_v38, %v3054_v39  ;;  %v3061_v48 = vor.u32 %v4079_v41, %v3060_v40  ;;  %v337_v52 = vld [vmem:[%s6132_s2 + $0x18] sm:$0xff]  ;;  %v3084_v53 = vld [vmem:[%s6133_s0 + $0x40] sm:$0xf] }
  0x11   :  { %2356 = vmatpush.bf16.msra.mxu3 %v4294_v16  ;;  %v3062_v43 = vld [vmem:[%s6133_s0 + $0x28] sm:$0xf0]  ;;  %399 = vperm.xlu1 %4332, %v337_v52   ;;  %v4086_v54 = vld [vmem:[%s6133_s0 + $0x5c] sm:$0xf0]  ;;  %v4082_v55 = vld [vmem:[%s6133_s0 + $0x44] sm:$0xf] }
  0x12   :  { %1970 = vmatpush.bf16.msra.mxu0 %v4269_v17  ;;  %389 = vperm.xlu0 %4331, %v335_v27   ;;  %v3065_v49 = vor.u32 %v4075_v42, %v3062_v43  ;;  %v3086_v56 = vld [vmem:[%s6133_s0 + $0x60] sm:$0xf0]  ;;  %v3092_v57 = vld [vmem:[%s6133_s0 + $0x48] sm:$0xf]  ;;  %v4083_v59 = vld [vmem:[%s6133_s0 + $0x4c] sm:$0xf]  ;;  %v3085_v61 = vor.u32 %v4086_v54, %v3084_v53 }
  0x13   :  { %2099 = vmatpush.bf16.msra.mxu1 %v4277_v18  ;;  %v4087_v58 = vld [vmem:[%s6133_s0 + $0x64] sm:$0xf0]  ;;  %v3094_v60 = vld [vmem:[%s6133_s0 + $0x68] sm:$0xf0]  ;;  %v3089_v62 = vor.u32 %v4082_v55, %v3086_v56  ;;  %v4320_v1 = vld [vmem:[%s6131_s1 + $0x1b0] sm:$0xff] }
  0x14   :  { %2228 = vmatpush.bf16.msra.mxu2 %v4285_v20  ;;  %v3093_v63 = vor.u32 %v4087_v58, %v3092_v57  ;;  %v3097_v0 = vor.u32 %v4083_v59, %v3094_v60  ;;  %v4304_v2 = vld [vmem:[%s6131_s1 + $0x130] sm:$0xff]  ;;  %v3116_v6 = vld [vmem:[%s6133_s0 + $0x80] sm:$0xf]  ;;  %v4090_v8 = vld [vmem:[%s6133_s0 + $0x84] sm:$0xf] }
  0x15   :  { %2357 = vmatpush.bf16.msra.mxu3 %v4293_v21  ;;  %v4328_v3 = vld [vmem:[%s6131_s1 + $0x1f0] sm:$0xff]  ;;  %v4094_v7 = vld [vmem:[%s6133_s0 + $0x9c] sm:$0xf0]  ;;  %v3118_v9 = vld [vmem:[%s6133_s0 + $0xa0] sm:$0xf0] }
  0x16   :  { %1971 = vmatpush.bf16.msra.mxu0 %v4268_v22  ;;  %v4312_v4 = vld [vmem:[%s6131_s1 + $0x170] sm:$0xff]  ;;  %v3124_v10 = vld [vmem:[%s6133_s0 + $0x88] sm:$0xf]  ;;  %v4091_v12 = vld [vmem:[%s6133_s0 + $0x8c] sm:$0xf]  ;;  %v3117_v14 = vor.u32 %v4094_v7, %v3116_v6  ;;  %v3121_v15 = vor.u32 %v4090_v8, %v3118_v9 }
  0x17   :  { %2100 = vmatpush.bf16.msra.mxu1 %v4276_v23  ;;  %v340_v5 = vld [vmem:[%s6132_s2 + $0x30] sm:$0xff]  ;;  %v4095_v11 = vld [vmem:[%s6133_s0 + $0xa4] sm:$0xf0]  ;;  %v3126_v13 = vld [vmem:[%s6133_s0 + $0xa8] sm:$0xf0] }
  0x18   :  { %2229 = vmatpush.bf16.msra.mxu2 %v4284_v25  ;;  %v3125_v16 = vor.u32 %v4095_v11, %v3124_v10  ;;  %v3129_v17 = vor.u32 %v4091_v12, %v3126_v13  ;;  %v338_v18 = vld [vmem:[%s6132_s2 + $0x20] sm:$0xff]  ;;  %v341_v19 = vld [vmem:[%s6132_s2 + $0x38] sm:$0xff]  ;;  %v339_v20 = vld [vmem:[%s6132_s2 + $0x28] sm:$0xff] }
  0x19   :  { %2358 = vmatpush.bf16.msra.mxu3 %v4292_v26  ;;  %404 = vperm.xlu2 %4333, %v338_v18   ;;  %v3148_v21 = vld [vmem:[%s6133_s0 + $0xc0] sm:$0xf]  ;;  %v4098_v23 = vld [vmem:[%s6133_s0 + $0xc4] sm:$0xf]  ;;  %v3156_v25 = vld [vmem:[%s6133_s0 + $0xc8] sm:$0xf] }
  0x1a   :  { %1972 = vmatpush.bf16.msra.mxu0 %v4267_v28  ;;  %414 = vperm.xlu0 %4331, %v340_v5   ;;  %v4102_v22 = vld [vmem:[%s6133_s0 + $0xdc] sm:$0xf0]  ;;  %v3150_v24 = vld [vmem:[%s6133_s0 + $0xe0] sm:$0xf0]  ;;  %v4103_v26 = vld [vmem:[%s6133_s0 + $0xe4] sm:$0xf0] }
  0x1b   :  { %2101 = vmatpush.bf16.msra.mxu1 %v4275_v29  ;;  %419 = vperm.xlu1 %4332, %v341_v19   ;;  %v4099_v27 = vld [vmem:[%s6133_s0 + $0xcc] sm:$0xf]  ;;  %v3149_v29 = vor.u32 %v4102_v22, %v3148_v21  ;;  %v4110_v36 = vld [vmem:[%s6133_s0 + $0x11c] sm:$0xf0]  ;;  %v4106_v37 = vld [vmem:[%s6133_s0 + $0x104] sm:$0xf] }
  0x1c   :  { %2230 = vmatpush.bf16.msra.mxu2 %v4283_v30  ;;  %v3158_v28 = vld [vmem:[%s6133_s0 + $0xe8] sm:$0xf0]  ;;  %v3153_v30 = vor.u32 %v4098_v23, %v3150_v24  ;;  %v3182_v38 = vld [vmem:[%s6133_s0 + $0x120] sm:$0xf0]  ;;  %v3188_v39 = vld [vmem:[%s6133_s0 + $0x108] sm:$0xf] }
  0x1d   :  { %2359 = vmatpush.bf16.msra.mxu3 %v4291_v31  ;;  %v3157_v31 = vor.u32 %v4103_v26, %v3156_v25  ;;  %v4111_v40 = vld [vmem:[%s6133_s0 + $0x124] sm:$0xf0]  ;;  %v4107_v41 = vld [vmem:[%s6133_s0 + $0x10c] sm:$0xf]  ;;  %v346_v52 = vld [vmem:[%s6132_s2 + $0x60] sm:$0xff] }
  0x1e   :  { %1973 = vmatpush.bf16.msra.mxu0 %v4266_v32  ;;  %v3161_v32 = vor.u32 %v4099_v27, %v3158_v28  ;;  %v3190_v42 = vld [vmem:[%s6133_s0 + $0x128] sm:$0xf0]  ;;  %v3212_v53 = vld [vmem:[%s6133_s0 + $0x140] sm:$0xf]  ;;  %v4114_v55 = vld [vmem:[%s6133_s0 + $0x144] sm:$0xf] }
  0x1f   :  { %2102 = vmatpush.bf16.msra.mxu1 %v4274_v33  ;;  %v343_v33 = vld [vmem:[%s6132_s2 + $0x48] sm:$0xff]  ;;  %v4118_v54 = vld [vmem:[%s6133_s0 + $0x15c] sm:$0xf0]  ;;  %v3214_v56 = vld [vmem:[%s6133_s0 + $0x160] sm:$0xf0] }
  0x20   :  { %2231 = vmatpush.bf16.msra.mxu2 %v4282_v34  ;;  %v344_v34 = vld [vmem:[%s6132_s2 + $0x50] sm:$0xff]  ;;  %v3220_v57 = vld [vmem:[%s6133_s0 + $0x148] sm:$0xf]  ;;  %v4115_v59 = vld [vmem:[%s6133_s0 + $0x14c] sm:$0xf] }
  0x21   :  { %2360 = vmatpush.bf16.msra.mxu3 %v4290_v35  ;;  %1974 = vmatmul.bf16.vlgmr.msra.gmra.mxu0 %v3053_v46  ;;  %v3180_v35 = vld [vmem:[%s6133_s0 + $0x100] sm:$0xf]  ;;  %v3193_v46 = vor.u32 %v4107_v41, %v3190_v42  ;;  %v4119_v58 = vld [vmem:[%s6133_s0 + $0x164] sm:$0xf0]  ;;  %v3222_v60 = vld [vmem:[%s6133_s0 + $0x168] sm:$0xf0] }
  0x22   :  { %2482 = vmatpush.bf16.msrb.mxu0 %v4305_v45  ;;  %2103 = vmatmul.bf16.vlgmr.msra.gmra.mxu1 %v3057_v47  ;;  %v3181_v43 = vor.u32 %v4110_v36, %v3180_v35  ;;  %v3189_v45 = vor.u32 %v4111_v40, %v3188_v39  ;;  %v4319_v47 = vld [vmem:[%s6131_s1 + $0x1a8] sm:$0xff]  ;;  %v4122_v5 = vld [vmem:[%s6133_s0 + $0x184] sm:$0xf]  ;;  %v4142_v35 = vld [vmem:[%s6133_s0 + $0x21c] sm:$0xf0] }
  0x23   :  { %2232 = vmatmul.bf16.vlgmr.msra.gmra.mxu2 %v3061_v48  ;;  %2611 = vmatpush.bf16.msrb.mxu1 %v4313_v51  ;;  %v4303_v48 = vld [vmem:[%s6131_s1 + $0x128] sm:$0xff]  ;;  %v342_v51 = vld [vmem:[%s6132_s2 + $0x40] sm:$0xff] }
  0x24   :  { %2740 = vmatpush.bf16.msrb.mxu2 %v4321_v44  ;;  %2361 = vmatmul.bf16.vlgmr.msra.gmra.mxu3 %v3065_v49  ;;  %v3185_v44 = vor.u32 %v4106_v37, %v3182_v38  ;;  %v4327_v49 = vld [vmem:[%s6131_s1 + $0x1e8] sm:$0xff]  ;;  %v3246_v6 = vld [vmem:[%s6133_s0 + $0x1a0] sm:$0xf0] }
  0x25   :  { %2869 = vmatpush.bf16.msrb.mxu3 %v4329_v50  ;;  %409 = vperm.xlu2 %4333, %v339_v20   ;;  %v4311_v50 = vld [vmem:[%s6131_s1 + $0x168] sm:$0xff]  ;;  %v3249_v12 = vor.u32 %v4122_v5, %v3246_v6  ;;  %v4130_v18 = vld [vmem:[%s6133_s0 + $0x1c4] sm:$0xf] }
  0x26   :  { %2483 = vmatpush.bf16.msrb.mxu0 %v4304_v2  ;;  %429 = vperm.xlu0 %4331, %v343_v33   ;;  %v345_v2 = vld [vmem:[%s6132_s2 + $0x58] sm:$0xff]  ;;  %v3252_v7 = vld [vmem:[%s6133_s0 + $0x188] sm:$0xf]  ;;  %v4123_v9 = vld [vmem:[%s6133_s0 + $0x18c] sm:$0xf] }
  0x27   :  { %2612 = vmatpush.bf16.msrb.mxu1 %v4312_v4  ;;  %434 = vperm.xlu1 %4332, %v344_v34   ;;  %v4126_v4 = vld [vmem:[%s6133_s0 + $0x19c] sm:$0xf0]  ;;  %v4127_v8 = vld [vmem:[%s6133_s0 + $0x1a4] sm:$0xf0]  ;;  %v3254_v10 = vld [vmem:[%s6133_s0 + $0x1a8] sm:$0xf0] }
  0x28   :  { %2741 = vmatpush.bf16.msrb.mxu2 %v4320_v1  ;;  %v347_v1 = vld [vmem:[%s6132_s2 + $0x68] sm:$0xff]  ;;  %v3253_v13 = vor.u32 %v4127_v8, %v3252_v7  ;;  %v3278_v19 = vld [vmem:[%s6133_s0 + $0x1e0] sm:$0xf0]  ;;  %v3308_v34 = vld [vmem:[%s6133_s0 + $0x200] sm:$0xf] }
  0x29   :  { %2870 = vmatpush.bf16.msrb.mxu3 %v4328_v3  ;;  %v3244_v3 = vld [vmem:[%s6133_s0 + $0x180] sm:$0xf]  ;;  %v3284_v20 = vld [vmem:[%s6133_s0 + $0x1c8] sm:$0xf]  ;;  %v4131_v22 = vld [vmem:[%s6133_s0 + $0x1cc] sm:$0xf]  ;;  %v3281_v25 = vor.u32 %v4130_v18, %v3278_v19 }
  0x2a   :  { %2484 = vmatpush.bf16.msrb.mxu0 %v4303_v48  ;;  %v3245_v11 = vor.u32 %v4126_v4, %v3244_v3  ;;  %v4135_v21 = vld [vmem:[%s6133_s0 + $0x1e4] sm:$0xf0]  ;;  %v3286_v23 = vld [vmem:[%s6133_s0 + $0x1e8] sm:$0xf0]  ;;  %v350_v28 = vld [vmem:[%s6132_s2 + $0x80] sm:$0xff] }
  0x2b   :  { %2613 = vmatpush.bf16.msrb.mxu1 %v4311_v50  ;;  %v3285_v26 = vor.u32 %v4135_v21, %v3284_v20  ;;  %v3289_v27 = vor.u32 %v4131_v22, %v3286_v23  ;;  %v4310_v33 = vld [vmem:[%s6131_s1 + $0x160] sm:$0xff]  ;;  %v3316_v39 = vld [vmem:[%s6133_s0 + $0x208] sm:$0xf]  ;;  %v4139_v41 = vld [vmem:[%s6133_s0 + $0x20c] sm:$0xf] }
  0x2c   :  { %2742 = vmatpush.bf16.msrb.mxu2 %v4319_v47  ;;  %v4138_v37 = vld [vmem:[%s6133_s0 + $0x204] sm:$0xf]  ;;  %v4143_v40 = vld [vmem:[%s6133_s0 + $0x224] sm:$0xf0]  ;;  %v3318_v42 = vld [vmem:[%s6133_s0 + $0x228] sm:$0xf0] }
  0x2d   :  { %2871 = vmatpush.bf16.msrb.mxu3 %v4327_v49  ;;  %424 = vperm.xlu2 %4333, %v342_v51   ;;  %v3310_v38 = vld [vmem:[%s6133_s0 + $0x220] sm:$0xf0]  ;;  %v3317_v47 = vor.u32 %v4143_v40, %v3316_v39  ;;  %v3321_v48 = vor.u32 %v4139_v41, %v3318_v42  ;;  %v352_v49 = vld [vmem:[%s6132_s2 + $0x90] sm:$0xff]  ;;  %v3348_v4 = vld [vmem:[%s6133_s0 + $0x248] sm:$0xf] }
  0x2e   :  { %444 = vperm.xlu0 %4331, %v346_v52   ;;  %v353_v52 = vld [vmem:[%s6132_s2 + $0x98] sm:$0xff]  ;;  %v3342_v3 = vld [vmem:[%s6133_s0 + $0x260] sm:$0xf0]  ;;  %v4151_v5 = vld [vmem:[%s6133_s0 + $0x264] sm:$0xf0] }
  0x2f   :  { %449 = vperm.xlu1 %4332, %v347_v1   ;;  %2614 = vmatpush.bf16.msrb.mxu1 %v4310_v33  ;;  %v4147_v6 = vld [vmem:[%s6133_s0 + $0x24c] sm:$0xf]  ;;  %v4154_v33 = vld [vmem:[%s6133_s0 + $0x284] sm:$0xf] }
  0x30   :  { %v3350_v7 = vld [vmem:[%s6133_s0 + $0x268] sm:$0xf0] }
  0x31   :  { %1979 = vmatmul.bf16.gmra.mxu0 %v3085_v61  ;;  %v3213_v61 = vor.u32 %v4118_v54, %v3212_v53  ;;  %v355_v20 = vld [vmem:[%s6132_s2 + $0xa8] sm:$0xff] }
  0x32   :  { %2108 = vmatmul.bf16.gmra.mxu1 %v3089_v62  ;;  %v3217_v62 = vor.u32 %v4114_v55, %v3214_v56 }
  0x33   :  { %2237 = vmatmul.bf16.gmra.mxu2 %v3093_v63  ;;  %v3221_v63 = vor.u32 %v4119_v58, %v3220_v57 }
  0x34   :  { %2366 = vmatmul.bf16.gmra.mxu3 %v3097_v0  ;;  %v3225_v0 = vor.u32 %v4115_v59, %v3222_v60 }
  0x35   :  { %439 = vperm.xlu2 %4333, %v345_v2   ;;  %v4146_v2 = vld [vmem:[%s6133_s0 + $0x244] sm:$0xf] }
  0x37   :  { %464 = vperm.xlu1 %4332, %v350_v28  }
  0x3f   :  { %479 = vperm.xlu1 %4332, %v353_v52   ;;  %v4317_v52 = vld [vmem:[%s6131_s1 + $0x198] sm:$0xff] }
  0x41   :  { %1984 = vmatmul.bf16.gmra.mxu0 %v3117_v14  ;;  %v3257_v14 = vor.u32 %v4123_v9, %v3254_v10 }
  0x42   :  { %2113 = vmatmul.bf16.gmra.mxu1 %v3121_v15  ;;  %v349_v15 = vld [vmem:[%s6132_s2 + $0x78] sm:$0xff] }
  0x43   :  { %2242 = vmatmul.bf16.gmra.mxu2 %v3125_v16  ;;  %459 = vperm.xlu0 %4331, %v349_v15   ;;  %v3276_v16 = vld [vmem:[%s6133_s0 + $0x1c0] sm:$0xf]  ;;  %v3349_v15 = vor.u32 %v4151_v5, %v3348_v4  ;;  %v4162_v5 = vld [vmem:[%s6133_s0 + $0x2c4] sm:$0xf] }
  0x44   :  { %2371 = vmatmul.bf16.gmra.mxu3 %v3129_v17  ;;  %v4134_v17 = vld [vmem:[%s6133_s0 + $0x1dc] sm:$0xf0] }
  0x45   :  { %v3277_v24 = vor.u32 %v4134_v17, %v3276_v16  ;;  %v3353_v16 = vor.u32 %v4147_v6, %v3350_v7  ;;  %v4166_v4 = vld [vmem:[%s6133_s0 + $0x2dc] sm:$0xf0]  ;;  %v3406_v6 = vld [vmem:[%s6133_s0 + $0x2e0] sm:$0xf0]  ;;  %v3412_v7 = vld [vmem:[%s6133_s0 + $0x2c8] sm:$0xf] }
  0x4b   :  { %474 = vperm.xlu0 %4331, %v352_v49  }
  0x51   :  { %1989 = vmatmul.bf16.gmra.mxu0 %v3149_v29  ;;  %v4318_v29 = vld [vmem:[%s6131_s1 + $0x1a0] sm:$0xff] }
  0x52   :  { %2118 = vmatmul.bf16.gmra.mxu1 %v3153_v30  ;;  %v4302_v30 = vld [vmem:[%s6131_s1 + $0x120] sm:$0xff]  ;;  %2743 = vmatpush.bf16.msrb.mxu2 %v4318_v29 }
  0x53   :  { %2247 = vmatmul.bf16.gmra.mxu2 %v3157_v31  ;;  %v4326_v31 = vld [vmem:[%s6131_s1 + $0x1e0] sm:$0xff]  ;;  %2485 = vmatpush.bf16.msrb.mxu0 %v4302_v30 }
  0x54   :  { %2376 = vmatmul.bf16.gmra.mxu3 %v3161_v32  ;;  %v348_v32 = vld [vmem:[%s6132_s2 + $0x70] sm:$0xff]  ;;  %489 = vperm.xlu0 %4331, %v355_v20   ;;  %v3372_v30 = vld [vmem:[%s6133_s0 + $0x280] sm:$0xf] }
  0x55   :  { %2872 = vmatpush.bf16.msrb.mxu3 %v4326_v31  ;;  %454 = vperm.xlu2 %4333, %v348_v32   ;;  %v4158_v31 = vld [vmem:[%s6133_s0 + $0x29c] sm:$0xf0] }
  0x56   :  { %v3373_v41 = vor.u32 %v4158_v31, %v3372_v30  ;;  %2744 = vmatpush.bf16.msrb.mxu2 %v4317_v52 }
  0x61   :  { %1994 = vmatmul.bf16.gmra.mxu0 %v3181_v43  ;;  %v3309_v43 = vor.u32 %v4142_v35, %v3308_v34  ;;  %v3374_v34 = vld [vmem:[%s6133_s0 + $0x2a0] sm:$0xf0]  ;;  %v3380_v35 = vld [vmem:[%s6133_s0 + $0x288] sm:$0xf] }
  0x62   :  { %2123 = vmatmul.bf16.gmra.mxu1 %v3185_v44  ;;  %v3313_v44 = vor.u32 %v4138_v37, %v3310_v38  ;;  %v4155_v37 = vld [vmem:[%s6133_s0 + $0x28c] sm:$0xf]  ;;  %v3377_v42 = vor.u32 %v4154_v33, %v3374_v34 }
  0x63   :  { %2252 = vmatmul.bf16.gmra.mxu2 %v3189_v45  ;;  %v3382_v38 = vld [vmem:[%s6133_s0 + $0x2a8] sm:$0xf0] }
  0x64   :  { %2381 = vmatmul.bf16.gmra.mxu3 %v3193_v46 }
  0x71   :  { %1999 = vmatmul.bf16.gmra.mxu0 %v3213_v61 }
  0x72   :  { %2128 = vmatmul.bf16.gmra.mxu1 %v3217_v62  ;;  %v3340_v62 = vld [vmem:[%s6133_s0 + $0x240] sm:$0xf] }
  0x73   :  { %2257 = vmatmul.bf16.gmra.mxu2 %v3221_v63  ;;  %v4150_v63 = vld [vmem:[%s6133_s0 + $0x25c] sm:$0xf0]  ;;  %v405_v32 = vpop.permute.xlu2 %404 }
  0x74   :  { %2386 = vmatmul.bf16.gmra.mxu3 %v3225_v0  ;;  %v351_v0 = vld [vmem:[%s6132_s2 + $0x88] sm:$0xff]  ;;  %v3341_v10 = vor.u32 %v4150_v63, %v3340_v62  ;;  %v354_v62 = vld [vmem:[%s6132_s2 + $0xa0] sm:$0xff] }
  0x75   :  { %469 = vperm.xlu2 %4333, %v351_v0  }
  0x7a   :  { %v395_v1 = vpop.permute.xlu1 %394 }
  0x7c   :  { %v385_v36 = vpop.permute.xlu0 %384 }
  0x7d   :  { %484 = vperm.xlu2 %4333, %v354_v62  }
  0x81   :  { %2004 = vmatmul.bf16.gmra.mxu0 %v3245_v11  ;;  %v3345_v11 = vor.u32 %v4146_v2, %v3342_v3  ;;  %v3404_v3 = vld [vmem:[%s6133_s0 + $0x2c0] sm:$0xf] }
  0x82   :  { %2133 = vmatmul.bf16.gmra.mxu1 %v3249_v12 }
  0x83   :  { %2262 = vmatmul.bf16.gmra.mxu2 %v3253_v13  ;;  %v400_v21 = vpop.permute.xlu1 %399 }
  0x84   :  { %2391 = vmatmul.bf16.gmra.mxu3 %v3257_v14  ;;  %v390_v53 = vpop.permute.xlu0 %389 }
  0x91   :  { %2009 = vmatmul.bf16.gmra.mxu0 %v3277_v24 }
  0x92   :  { %2138 = vmatmul.bf16.gmra.mxu1 %v3281_v25 }
  0x93   :  { %2267 = vmatmul.bf16.gmra.mxu2 %v3285_v26 }
  0x94   :  { %2396 = vmatmul.bf16.gmra.mxu3 %v3289_v27 }
  0x9e   :  { %v1975_v45 = vpop.f32.mrf.mxu0 }
  0x9f   :  { %v2104_v46 = vpop.f32.mrf.mxu1  ;;  %v1976_v50 = vadd.f32 %v1975_v45, %v385_v36  ;;  %v4159_v36 = vld [vmem:[%s6133_s0 + $0x2a4] sm:$0xf0] }
  0xa1   :  { %v2105_v51 = vadd.f32 %v2104_v46, %v1976_v50  ;;  %2014 = vmatmul.bf16.gmra.mxu0 %v3309_v43  ;;  %v3381_v46 = vor.u32 %v4159_v36, %v3380_v35 }
  0xa2   :  { %2143 = vmatmul.bf16.gmra.mxu1 %v3313_v44 }
  0xa3   :  { %2272 = vmatmul.bf16.gmra.mxu2 %v3317_v47  ;;  %v3385_v47 = vor.u32 %v4155_v37, %v3382_v38  ;;  %v3436_v37 = vld [vmem:[%s6133_s0 + $0x300] sm:$0xf] }
  0xa4   :  { %2401 = vmatmul.bf16.gmra.mxu3 %v3321_v48  ;;  %v356_v48 = vld [vmem:[%s6132_s2 + $0xb0] sm:$0xff]  ;;  %v4174_v38 = vld [vmem:[%s6133_s0 + $0x31c] sm:$0xf0] }
  0xa5   :  { %494 = vperm.xlu1 %4332, %v356_v48  }
  0xa6   :  { %v2233_v54 = vpop.f32.mrf.mxu2  ;;  %v1977_v57 = vpop.f32.mrf.mxu0 }
  0xa7   :  { %v2362_v55 = vpop.f32.mrf.mxu3  ;;  %v2234_v56 = vadd.f32 %v2233_v54, %v2105_v51  ;;  %v2106_v58 = vpop.f32.mrf.mxu1  ;;  %v1978_v59 = vadd.f32 %v1977_v57, %v390_v53  ;;  %v4301_v53 = vld [vmem:[%s6131_s1 + $0x118] sm:$0xff] }
  0xa8   :  { %v4325_v54 = vld [vmem:[%s6131_s1 + $0x1d8] sm:$0xff]  ;;  %2486 = vmatpush.bf16.msrb.mxu0 %v4301_v53 }
  0xa9   :  { %v4772_v60 = vadd.f32 %v2362_v55, %v2234_v56  ;;  %v2107_v61 = vadd.f32 %v2106_v58, %v1978_v59  ;;  %v410_v55 = vpop.permute.xlu2 %409  ;;  %2873 = vmatpush.bf16.msrb.mxu3 %v4325_v54 }
  0xae   :  { %v2235_v8 = vpop.f32.mrf.mxu2  ;;  %v1980_v13 = vpop.f32.mrf.mxu0 }
  0xaf   :  { %v2364_v9 = vpop.f32.mrf.mxu3  ;;  %v2236_v12 = vadd.f32 %v2235_v8, %v2107_v61  ;;  %v2109_v14 = vpop.f32.mrf.mxu1  ;;  %v1981_v17 = vadd.f32 %v1980_v13, %v395_v1  ;;  %v4309_v1 = vld [vmem:[%s6131_s1 + $0x158] sm:$0xff]  ;;  %v4167_v8 = vld [vmem:[%s6133_s0 + $0x2e4] sm:$0xf0] }
  0xb0   :  { %2615 = vmatpush.bf16.msrb.mxu1 %v4309_v1  ;;  %v3413_v20 = vor.u32 %v4167_v8, %v3412_v7  ;;  %v3468_v8 = vld [vmem:[%s6133_s0 + $0x340] sm:$0xf] }
  0xb1   :  { %v4801_v18 = vadd.f32 %v2364_v9, %v2236_v12  ;;  %v2110_v19 = vadd.f32 %v2109_v14, %v1981_v17  ;;  %2019 = vmatmul.bf16.gmra.mxu0 %v3341_v10  ;;  %v4163_v9 = vld [vmem:[%s6133_s0 + $0x2cc] sm:$0xf]  ;;  %v3405_v14 = vor.u32 %v4166_v4, %v3404_v3 }
  0xb2   :  { %2148 = vmatmul.bf16.gmra.mxu1 %v3345_v11  ;;  %v3414_v10 = vld [vmem:[%s6133_s0 + $0x2e8] sm:$0xf0]  ;;  %v415_v11 = vpop.permute.xlu0 %414 }
  0xb3   :  { %2277 = vmatmul.bf16.gmra.mxu2 %v3349_v15  ;;  %v3409_v15 = vor.u32 %v4162_v5, %v3406_v6 }
  0xb4   :  { %2406 = vmatmul.bf16.gmra.mxu3 %v3353_v16 }
  0xb6   :  { %v2238_v22 = vpop.f32.mrf.mxu2  ;;  %v1982_v25 = vpop.f32.mrf.mxu0 }
  0xb7   :  { %v2367_v23 = vpop.f32.mrf.mxu3  ;;  %v2239_v24 = vadd.f32 %v2238_v22, %v2110_v19  ;;  %v2111_v26 = vpop.f32.mrf.mxu1  ;;  %v1983_v27 = vadd.f32 %v1982_v25, %v400_v21  ;;  %v3417_v21 = vor.u32 %v4163_v9, %v3414_v10  ;;  %v358_v22 = vld [vmem:[%s6132_s2 + $0xc0] sm:$0xff] }
  0xb8   :  { %504 = vperm.xlu0 %4331, %v358_v22   ;;  %v4182_v9 = vld [vmem:[%s6133_s0 + $0x35c] sm:$0xf0]  ;;  %v4178_v10 = vld [vmem:[%s6133_s0 + $0x344] sm:$0xf] }
  0xb9   :  { %v4806_v28 = vadd.f32 %v2367_v23, %v2239_v24  ;;  %v2112_v29 = vadd.f32 %v2111_v26, %v1983_v27  ;;  %v359_v26 = vld [vmem:[%s6132_s2 + $0xc8] sm:$0xff]  ;;  %v420_v27 = vpop.permute.xlu1 %419 }
  0xba   :  { %509 = vperm.xlu1 %4332, %v359_v26   ;;  %v430_v62 = vpop.permute.xlu0 %429 }
  0xbe   :  { %v2240_v39 = vpop.f32.mrf.mxu2  ;;  %v1985_v44 = vpop.f32.mrf.mxu0 }
  0xbf   :  { %v2369_v40 = vpop.f32.mrf.mxu3  ;;  %v2241_v43 = vadd.f32 %v2240_v39, %v2112_v29  ;;  %v2114_v45 = vpop.f32.mrf.mxu1  ;;  %v1986_v49 = vadd.f32 %v1985_v44, %v405_v32  ;;  %v357_v39 = vld [vmem:[%s6132_s2 + $0xb8] sm:$0xff]  ;;  %v4171_v44 = vld [vmem:[%s6133_s0 + $0x30c] sm:$0xf] }
  0xc0   :  { %499 = vperm.xlu2 %4333, %v357_v39  }
  0xc1   :  { %v4835_v50 = vadd.f32 %v2369_v40, %v2241_v43  ;;  %v2115_v51 = vadd.f32 %v2114_v45, %v1986_v49  ;;  %2024 = vmatmul.bf16.gmra.mxu0 %v3373_v41  ;;  %v4170_v40 = vld [vmem:[%s6133_s0 + $0x304] sm:$0xf]  ;;  %v4175_v43 = vld [vmem:[%s6133_s0 + $0x324] sm:$0xf0]  ;;  %v3446_v45 = vld [vmem:[%s6133_s0 + $0x328] sm:$0xf0]  ;;  %v3437_v49 = vor.u32 %v4174_v38, %v3436_v37 }
  0xc2   :  { %2153 = vmatmul.bf16.gmra.mxu1 %v3377_v42  ;;  %v3438_v41 = vld [vmem:[%s6133_s0 + $0x320] sm:$0xf0]  ;;  %v3444_v42 = vld [vmem:[%s6133_s0 + $0x308] sm:$0xf] }
  0xc3   :  { %2282 = vmatmul.bf16.gmra.mxu2 %v3381_v46  ;;  %v425_v46 = vpop.permute.xlu2 %424 }
  0xc4   :  { %2411 = vmatmul.bf16.gmra.mxu3 %v3385_v47 }
  0xc6   :  { %v2243_v56 = vpop.f32.mrf.mxu2  ;;  %v1987_v59 = vpop.f32.mrf.mxu0 }
  0xc7   :  { %v2372_v57 = vpop.f32.mrf.mxu3  ;;  %v2244_v58 = vadd.f32 %v2243_v56, %v2115_v51  ;;  %v2116_v61 = vpop.f32.mrf.mxu1  ;;  %v1988_v63 = vadd.f32 %v1987_v59, %v410_v55  ;;  %v3441_v51 = vor.u32 %v4170_v40, %v3438_v41  ;;  %v3445_v55 = vor.u32 %v4175_v43, %v3444_v42  ;;  %v360_v43 = vld [vmem:[%s6132_s2 + $0xd0] sm:$0xff] }
  0xc8   :  { %v3449_v56 = vor.u32 %v4171_v44, %v3446_v45  ;;  %514 = vperm.xlu2 %4333, %v360_v43  }
  0xc9   :  { %v4849_v0 = vadd.f32 %v2372_v57, %v2244_v58  ;;  %v2117_v2 = vadd.f32 %v2116_v61, %v1988_v63  ;;  %v361_v61 = vld [vmem:[%s6132_s2 + $0xd8] sm:$0xff] }
  0xca   :  { %519 = vperm.xlu0 %4331, %v361_v61  }
  0xcb   :  { %v440_v37 = vpop.permute.xlu2 %439 }
  0xce   :  { %v2245_v12 = vpop.f32.mrf.mxu2  ;;  %v1990_v17 = vpop.f32.mrf.mxu0 }
  0xcf   :  { %v2374_v13 = vpop.f32.mrf.mxu3  ;;  %v2246_v16 = vadd.f32 %v2245_v12, %v2117_v2  ;;  %v2119_v19 = vpop.f32.mrf.mxu1  ;;  %v1991_v23 = vadd.f32 %v1990_v17, %v415_v11  ;;  %v3470_v11 = vld [vmem:[%s6133_s0 + $0x360] sm:$0xf0]  ;;  %v3476_v12 = vld [vmem:[%s6133_s0 + $0x348] sm:$0xf] }
  0xd1   :  { %v4881_v24 = vadd.f32 %v2374_v13, %v2246_v16  ;;  %2029 = vmatmul.bf16.gmra.mxu0 %v3405_v14  ;;  %v2120_v25 = vadd.f32 %v2119_v19, %v1991_v23  ;;  %v4183_v13 = vld [vmem:[%s6133_s0 + $0x364] sm:$0xf0]  ;;  %v4179_v14 = vld [vmem:[%s6133_s0 + $0x34c] sm:$0xf]  ;;  %v435_v16 = vpop.permute.xlu1 %434 }
  0xd2   :  { %2158 = vmatmul.bf16.gmra.mxu1 %v3409_v15  ;;  %v3478_v15 = vld [vmem:[%s6133_s0 + $0x368] sm:$0xf0]  ;;  %v3477_v26 = vor.u32 %v4183_v13, %v3476_v12 }
  0xd3   :  { %2287 = vmatmul.bf16.gmra.mxu2 %v3413_v20  ;;  %v3469_v20 = vor.u32 %v4182_v9, %v3468_v8 }
  0xd4   :  { %2416 = vmatmul.bf16.gmra.mxu3 %v3417_v21  ;;  %v3473_v21 = vor.u32 %v4178_v10, %v3470_v11  ;;  %v365_v11 = vld [vmem:[%s6132_s2 + $0xf8] sm:$0xff] }
  0xd6   :  { %v2248_v29 = vpop.f32.mrf.mxu2  ;;  %v1992_v32 = vpop.f32.mrf.mxu0 }
  0xd7   :  { %v2377_v30 = vpop.f32.mrf.mxu3  ;;  %v2249_v31 = vadd.f32 %v2248_v29, %v2120_v25  ;;  %v2121_v33 = vpop.f32.mrf.mxu1  ;;  %v1993_v34 = vadd.f32 %v1992_v32, %v420_v27  ;;  %v3481_v27 = vor.u32 %v4179_v14, %v3478_v15  ;;  %v362_v29 = vld [vmem:[%s6132_s2 + $0xe0] sm:$0xff] }
  0xd8   :  { %524 = vperm.xlu1 %4332, %v362_v29   ;;  %v3540_v29 = vld [vmem:[%s6133_s0 + $0x3c8] sm:$0xf] }
  0xd9   :  { %v4886_v35 = vadd.f32 %v2377_v30, %v2249_v31  ;;  %v2122_v36 = vadd.f32 %v2121_v33, %v1993_v34  ;;  %v4316_v33 = vld [vmem:[%s6131_s1 + $0x190] sm:$0xff]  ;;  %v450_v12 = vpop.permute.xlu1 %449 }
  0xda   :  { %v4300_v34 = vld [vmem:[%s6131_s1 + $0x110] sm:$0xff]  ;;  %2745 = vmatpush.bf16.msrb.mxu2 %v4316_v33  ;;  %v3542_v33 = vld [vmem:[%s6133_s0 + $0x3e8] sm:$0xf0] }
  0xdb   :  { %2487 = vmatpush.bf16.msrb.mxu0 %v4300_v34  ;;  %v455_v34 = vpop.permute.xlu2 %454 }
  0xde   :  { %v2250_v47 = vpop.f32.mrf.mxu2  ;;  %v1995_v53 = vpop.f32.mrf.mxu0 }
  0xdf   :  { %v2379_v48 = vpop.f32.mrf.mxu3  ;;  %v2251_v52 = vadd.f32 %v2250_v47, %v2122_v36  ;;  %v2124_v54 = vpop.f32.mrf.mxu1  ;;  %v1996_v57 = vadd.f32 %v1995_v53, %v425_v46  ;;  %v4324_v36 = vld [vmem:[%s6131_s1 + $0x1d0] sm:$0xff]  ;;  %v3508_v53 = vld [vmem:[%s6133_s0 + $0x388] sm:$0xf] }
  0xe0   :  { %2874 = vmatpush.bf16.msrb.mxu3 %v4324_v36  ;;  %v4308_v46 = vld [vmem:[%s6131_s1 + $0x150] sm:$0xff]  ;;  %539 = vperm.xlu1 %4332, %v365_v11  }
  0xe1   :  { %v4915_v58 = vadd.f32 %v2379_v48, %v2251_v52  ;;  %2034 = vmatmul.bf16.gmra.mxu0 %v3437_v49  ;;  %v2125_v59 = vadd.f32 %v2124_v54, %v1996_v57  ;;  %v3500_v48 = vld [vmem:[%s6133_s0 + $0x380] sm:$0xf]  ;;  %v3502_v52 = vld [vmem:[%s6133_s0 + $0x3a0] sm:$0xf0]  ;;  %2616 = vmatpush.bf16.msrb.mxu1 %v4308_v46  ;;  %v4191_v54 = vld [vmem:[%s6133_s0 + $0x3a4] sm:$0xf0]  ;;  %v445_v57 = vpop.permute.xlu0 %444 }
  0xe2   :  { %2163 = vmatmul.bf16.gmra.mxu1 %v3441_v51  ;;  %v4190_v49 = vld [vmem:[%s6133_s0 + $0x39c] sm:$0xf0]  ;;  %v4186_v51 = vld [vmem:[%s6133_s0 + $0x384] sm:$0xf] }
  0xe3   :  { %2292 = vmatmul.bf16.gmra.mxu2 %v3445_v55  ;;  %v4187_v55 = vld [vmem:[%s6133_s0 + $0x38c] sm:$0xf] }
  0xe4   :  { %2421 = vmatmul.bf16.gmra.mxu3 %v3449_v56  ;;  %v3510_v56 = vld [vmem:[%s6133_s0 + $0x3a8] sm:$0xf0] }
  0xe6   :  { %v2253_v63 = vpop.f32.mrf.mxu2  ;;  %v1997_v3 = vpop.f32.mrf.mxu0 }
  0xe7   :  { %v2382_v1 = vpop.f32.mrf.mxu3  ;;  %v2254_v2 = vadd.f32 %v2253_v63, %v2125_v59  ;;  %v2126_v4 = vpop.f32.mrf.mxu1  ;;  %v1998_v5 = vadd.f32 %v1997_v3, %v430_v62  ;;  %v3501_v62 = vor.u32 %v4190_v49, %v3500_v48  ;;  %v3505_v63 = vor.u32 %v4186_v51, %v3502_v52  ;;  %v367_v49 = vld [vmem:[%s6132_s2 + $0x108] sm:$0xff] }
  0xe9   :  { %v4920_v6 = vadd.f32 %v2382_v1, %v2254_v2  ;;  %v2127_v7 = vadd.f32 %v2126_v4, %v1998_v5  ;;  %v3509_v4 = vor.u32 %v4191_v54, %v3508_v53  ;;  %v3513_v5 = vor.u32 %v4187_v55, %v3510_v56  ;;  %v460_v51 = vpop.permute.xlu0 %459 }
  0xee   :  { %v2255_v17 = vpop.f32.mrf.mxu2  ;;  %v2000_v23 = vpop.f32.mrf.mxu0 }
  0xef   :  { %v2384_v19 = vpop.f32.mrf.mxu3  ;;  %v2256_v22 = vadd.f32 %v2255_v17, %v2127_v7  ;;  %v2129_v25 = vpop.f32.mrf.mxu1  ;;  %v2001_v30 = vadd.f32 %v2000_v23, %v435_v16  ;;  %v364_v7 = vld [vmem:[%s6132_s2 + $0xf0] sm:$0xff]  ;;  %v4198_v23 = vld [vmem:[%s6133_s0 + $0x3dc] sm:$0xf0] }
  0xf0   :  { %534 = vperm.xlu0 %4331, %v364_v7   ;;  %v3574_v7 = vld [vmem:[%s6133_s0 + $0x428] sm:$0xf0] }
  0xf1   :  { %v4949_v31 = vadd.f32 %v2384_v19, %v2256_v22  ;;  %2039 = vmatmul.bf16.gmra.mxu0 %v3469_v20  ;;  %v2130_v32 = vadd.f32 %v2129_v25, %v2001_v30  ;;  %v3532_v22 = vld [vmem:[%s6133_s0 + $0x3c0] sm:$0xf]  ;;  %v363_v25 = vld [vmem:[%s6132_s2 + $0xe8] sm:$0xff] }
  0xf2   :  { %2168 = vmatmul.bf16.gmra.mxu1 %v3473_v21  ;;  %529 = vperm.xlu2 %4333, %v363_v25   ;;  %v4199_v30 = vld [vmem:[%s6133_s0 + $0x3e4] sm:$0xf0] }
  0xf3   :  { %2297 = vmatmul.bf16.gmra.mxu2 %v3477_v26  ;;  %v4194_v26 = vld [vmem:[%s6133_s0 + $0x3c4] sm:$0xf]  ;;  %v3541_v43 = vor.u32 %v4199_v30, %v3540_v29  ;;  %v4323_v29 = vld [vmem:[%s6131_s1 + $0x1c8] sm:$0xff]  ;;  %v470_v30 = vpop.permute.xlu2 %469 }
  0xf4   :  { %2426 = vmatmul.bf16.gmra.mxu3 %v3481_v27  ;;  %v3534_v27 = vld [vmem:[%s6133_s0 + $0x3e0] sm:$0xf0] }
  0xf5   :  { %2875 = vmatpush.bf16.msrb.mxu3 %v4323_v29  ;;  %v3630_v29 = vld [vmem:[%s6133_s0 + $0x4a0] sm:$0xf0] }
  0xf6   :  { %v2258_v38 = vpop.f32.mrf.mxu2  ;;  %v2002_v41 = vpop.f32.mrf.mxu0 }
  0xf7   :  { %v2387_v39 = vpop.f32.mrf.mxu3  ;;  %v2259_v40 = vadd.f32 %v2258_v38, %v2130_v32  ;;  %v2131_v42 = vpop.f32.mrf.mxu1  ;;  %v2003_v44 = vadd.f32 %v2002_v41, %v440_v37  ;;  %v4195_v32 = vld [vmem:[%s6133_s0 + $0x3cc] sm:$0xf]  ;;  %v3533_v38 = vor.u32 %v4198_v23, %v3532_v22 }
  0xf8   :  { %549 = vperm.xlu0 %4331, %v367_v49   ;;  %v3604_v49 = vld [vmem:[%s6133_s0 + $0x448] sm:$0xf] }
  0xf9   :  { %v4963_v45 = vadd.f32 %v2387_v39, %v2259_v40  ;;  %v2132_v47 = vadd.f32 %v2131_v42, %v2003_v44  ;;  %v3537_v39 = vor.u32 %v4194_v26, %v3534_v27  ;;  %v3545_v44 = vor.u32 %v4195_v32, %v3542_v33  ;;  %v4315_v26 = vld [vmem:[%s6131_s1 + $0x188] sm:$0xff] }
  0xfa   :  { %v4299_v27 = vld [vmem:[%s6131_s1 + $0x108] sm:$0xff]  ;;  %2746 = vmatpush.bf16.msrb.mxu2 %v4315_v26  ;;  %v369_v26 = vld [vmem:[%s6132_s2 + $0x118] sm:$0xff] }
  0xfb   :  { %2488 = vmatpush.bf16.msrb.mxu0 %v4299_v27  ;;  %v4218_v27 = vld [vmem:[%s6133_s0 + $0x484] sm:$0xf] }
  0xfe   :  { %v2260_v59 = vpop.f32.mrf.mxu2  ;;  %v2005_v2 = vpop.f32.mrf.mxu0 }
  0xff   :  { %v2389_v61 = vpop.f32.mrf.mxu3  ;;  %v2261_v1 = vadd.f32 %v2260_v59, %v2132_v47  ;;  %v2134_v3 = vpop.f32.mrf.mxu1  ;;  %v2006_v8 = vadd.f32 %v2005_v2, %v445_v57  ;;  %v3566_v2 = vld [vmem:[%s6133_s0 + $0x420] sm:$0xf0] }
 0x101   :  { %v4995_v9 = vadd.f32 %v2389_v61, %v2261_v1  ;;  %2044 = vmatmul.bf16.gmra.mxu0 %v3501_v62  ;;  %v2135_v10 = vadd.f32 %v2134_v3, %v2006_v8  ;;  %v3564_v62 = vld [vmem:[%s6133_s0 + $0x400] sm:$0xf]  ;;  %v4202_v1 = vld [vmem:[%s6133_s0 + $0x404] sm:$0xf]  ;;  %v3572_v3 = vld [vmem:[%s6133_s0 + $0x408] sm:$0xf]  ;;  %v465_v8 = vpop.permute.xlu1 %464 }
 0x102   :  { %2173 = vmatmul.bf16.gmra.mxu1 %v3505_v63  ;;  %v4206_v63 = vld [vmem:[%s6133_s0 + $0x41c] sm:$0xf0] }
 0x103   :  { %2302 = vmatmul.bf16.gmra.mxu2 %v3509_v4  ;;  %v4207_v4 = vld [vmem:[%s6133_s0 + $0x424] sm:$0xf0] }
 0x104   :  { %2431 = vmatmul.bf16.gmra.mxu3 %v3513_v5  ;;  %v4203_v5 = vld [vmem:[%s6133_s0 + $0x40c] sm:$0xf] }
 0x106   :  { %v2263_v13 = vpop.f32.mrf.mxu2  ;;  %v2007_v16 = vpop.f32.mrf.mxu0 }
 0x107   :  { %v2392_v14 = vpop.f32.mrf.mxu3  ;;  %v2264_v15 = vadd.f32 %v2263_v13, %v2135_v10  ;;  %v2136_v17 = vpop.f32.mrf.mxu1  ;;  %v2008_v19 = vadd.f32 %v2007_v16, %v450_v12  ;;  %v3565_v12 = vor.u32 %v4206_v63, %v3564_v62  ;;  %v3569_v13 = vor.u32 %v4202_v1, %v3566_v2 }
 0x109   :  { %v5000_v20 = vadd.f32 %v2392_v14, %v2264_v15  ;;  %v2137_v21 = vadd.f32 %v2136_v17, %v2008_v19  ;;  %v3573_v17 = vor.u32 %v4207_v4, %v3572_v3  ;;  %v3577_v19 = vor.u32 %v4203_v5, %v3574_v7  ;;  %v370_v4 = vld [vmem:[%s6132_s2 + $0x120] sm:$0xff] }
 0x10a   :  { %564 = vperm.xlu0 %4331, %v370_v4   ;;  %v4230_v4 = vld [vmem:[%s6133_s0 + $0x4dc] sm:$0xf0] }
 0x10e   :  { %v2265_v36 = vpop.f32.mrf.mxu2  ;;  %v2010_v41 = vpop.f32.mrf.mxu0 }
 0x10f   :  { %v2394_v37 = vpop.f32.mrf.mxu3  ;;  %v2266_v40 = vadd.f32 %v2265_v36, %v2137_v21  ;;  %v2139_v42 = vpop.f32.mrf.mxu1  ;;  %v2011_v46 = vadd.f32 %v2010_v41, %v455_v34  ;;  %v368_v21 = vld [vmem:[%s6132_s2 + $0x110] sm:$0xff]  ;;  %v4307_v41 = vld [vmem:[%s6131_s1 + $0x148] sm:$0xff] }
 0x110   :  { %554 = vperm.xlu1 %4332, %v368_v21   ;;  %2617 = vmatpush.bf16.msrb.mxu1 %v4307_v41  ;;  %v3633_v41 = vor.u32 %v4218_v27, %v3630_v29 }
 0x111   :  { %v5029_v47 = vadd.f32 %v2394_v37, %v2266_v40  ;;  %2049 = vmatmul.bf16.gmra.mxu0 %v3533_v38  ;;  %v2140_v48 = vadd.f32 %v2139_v42, %v2011_v46  ;;  %v366_v38 = vld [vmem:[%s6132_s2 + $0x100] sm:$0xff] }
 0x112   :  { %2178 = vmatmul.bf16.gmra.mxu1 %v3537_v39  ;;  %544 = vperm.xlu2 %4333, %v366_v38   ;;  %v4210_v46 = vld [vmem:[%s6133_s0 + $0x444] sm:$0xf] }
 0x113   :  { %2307 = vmatmul.bf16.gmra.mxu2 %v3541_v43  ;;  %v3596_v43 = vld [vmem:[%s6133_s0 + $0x440] sm:$0xf] }
 0x114   :  { %2436 = vmatmul.bf16.gmra.mxu3 %v3545_v44  ;;  %v4214_v44 = vld [vmem:[%s6133_s0 + $0x45c] sm:$0xf0] }
 0x116   :  { %v2268_v52 = vpop.f32.mrf.mxu2  ;;  %v2012_v55 = vpop.f32.mrf.mxu0 }
 0x117   :  { %v2397_v53 = vpop.f32.mrf.mxu3  ;;  %v2269_v54 = vadd.f32 %v2268_v52, %v2140_v48  ;;  %v2141_v56 = vpop.f32.mrf.mxu1  ;;  %v2013_v57 = vadd.f32 %v2012_v55, %v460_v51  ;;  %v3598_v48 = vld [vmem:[%s6133_s0 + $0x460] sm:$0xf0]  ;;  %v4215_v51 = vld [vmem:[%s6133_s0 + $0x464] sm:$0xf0]  ;;  %v4211_v52 = vld [vmem:[%s6133_s0 + $0x44c] sm:$0xf] }
 0x118   :  { %v3605_v2 = vor.u32 %v4215_v51, %v3604_v49 }
 0x119   :  { %v5034_v59 = vadd.f32 %v2397_v53, %v2269_v54  ;;  %v2142_v61 = vadd.f32 %v2141_v56, %v2013_v57  ;;  %v3606_v53 = vld [vmem:[%s6133_s0 + $0x468] sm:$0xf0]  ;;  %v475_v54 = vpop.permute.xlu0 %474  ;;  %v3597_v57 = vor.u32 %v4214_v44, %v3596_v43 }
 0x11a   :  { %v3609_v3 = vor.u32 %v4211_v52, %v3606_v53  ;;  %559 = vperm.xlu2 %4333, %v369_v26   ;;  %v373_v53 = vld [vmem:[%s6132_s2 + $0x138] sm:$0xff] }
 0x11b   :  { %579 = vperm.xlu0 %4331, %v373_v53   ;;  %v4306_v53 = vld [vmem:[%s6131_s1 + $0x140] sm:$0xff] }
 0x11c   :  { %2618 = vmatpush.bf16.msrb.mxu1 %v4306_v53  ;;  %v4243_v53 = vld [vmem:[%s6133_s0 + $0x54c] sm:$0xf] }
 0x11e   :  { %v2270_v10 = vpop.f32.mrf.mxu2  ;;  %v2015_v15 = vpop.f32.mrf.mxu0 }
 0x11f   :  { %v2399_v11 = vpop.f32.mrf.mxu3  ;;  %v2271_v14 = vadd.f32 %v2270_v10, %v2142_v61  ;;  %v2144_v16 = vpop.f32.mrf.mxu1  ;;  %v2016_v22 = vadd.f32 %v2015_v15, %v465_v8  ;;  %v3601_v61 = vor.u32 %v4210_v46, %v3598_v48  ;;  %v371_v10 = vld [vmem:[%s6132_s2 + $0x128] sm:$0xff] }
 0x120   :  { %569 = vperm.xlu1 %4332, %v371_v10   ;;  %v3668_v10 = vld [vmem:[%s6133_s0 + $0x4c8] sm:$0xf] }
 0x121   :  { %v5063_v23 = vadd.f32 %v2399_v11, %v2271_v14  ;;  %2054 = vmatmul.bf16.gmra.mxu0 %v3565_v12  ;;  %v2145_v25 = vadd.f32 %v2144_v16, %v2016_v22  ;;  %v480_v11 = vpop.permute.xlu1 %479  ;;  %v3628_v22 = vld [vmem:[%s6133_s0 + $0x480] sm:$0xf] }
 0x122   :  { %2183 = vmatmul.bf16.gmra.mxu1 %v3569_v13 }
 0x123   :  { %2312 = vmatmul.bf16.gmra.mxu2 %v3573_v17 }
 0x124   :  { %2441 = vmatmul.bf16.gmra.mxu3 %v3577_v19 }
 0x126   :  { %v2273_v32 = vpop.f32.mrf.mxu2  ;;  %v2017_v36 = vpop.f32.mrf.mxu0 }
 0x127   :  { %v2402_v33 = vpop.f32.mrf.mxu3  ;;  %v2274_v34 = vadd.f32 %v2273_v32, %v2145_v25  ;;  %v2146_v37 = vpop.f32.mrf.mxu1  ;;  %v2018_v39 = vadd.f32 %v2017_v36, %v470_v30  ;;  %v4222_v25 = vld [vmem:[%s6133_s0 + $0x49c] sm:$0xf0]  ;;  %v3636_v30 = vld [vmem:[%s6133_s0 + $0x488] sm:$0xf] }
 0x128   :  { %v4223_v32 = vld [vmem:[%s6133_s0 + $0x4a4] sm:$0xf0]  ;;  %v485_v36 = vpop.permute.xlu2 %484 }
 0x129   :  { %v5077_v40 = vadd.f32 %v2402_v33, %v2274_v34  ;;  %v2147_v42 = vadd.f32 %v2146_v37, %v2018_v39  ;;  %v4219_v33 = vld [vmem:[%s6133_s0 + $0x48c] sm:$0xf]  ;;  %v3629_v39 = vor.u32 %v4222_v25, %v3628_v22  ;;  %v3637_v46 = vor.u32 %v4223_v32, %v3636_v30  ;;  %v374_v30 = vld [vmem:[%s6132_s2 + $0x140] sm:$0xff] }
 0x12a   :  { %v3638_v34 = vld [vmem:[%s6133_s0 + $0x4a8] sm:$0xf0]  ;;  %584 = vperm.xlu1 %4332, %v374_v30  }
 0x12b   :  { %v3641_v48 = vor.u32 %v4219_v33, %v3638_v34 }
 0x12e   :  { %v2275_v55 = vpop.f32.mrf.mxu2  ;;  %v2020_v63 = vpop.f32.mrf.mxu0 }
 0x12f   :  { %v2404_v56 = vpop.f32.mrf.mxu3  ;;  %v2276_v62 = vadd.f32 %v2275_v55, %v2147_v42  ;;  %v2149_v1 = vpop.f32.mrf.mxu1  ;;  %v2021_v5 = vadd.f32 %v2020_v63, %v475_v54 }
 0x130   :  { %v490_v54 = vpop.permute.xlu0 %489 }
 0x131   :  { %v5109_v7 = vadd.f32 %v2404_v56, %v2276_v62  ;;  %2059 = vmatmul.bf16.gmra.mxu0 %v3597_v57  ;;  %v2150_v8 = vadd.f32 %v2149_v1, %v2021_v5  ;;  %v4226_v5 = vld [vmem:[%s6133_s0 + $0x4c4] sm:$0xf] }
 0x132   :  { %2188 = vmatmul.bf16.gmra.mxu1 %v3601_v61 }
 0x133   :  { %2317 = vmatmul.bf16.gmra.mxu2 %v3605_v2 }
 0x134   :  { %2446 = vmatmul.bf16.gmra.mxu3 %v3609_v3  ;;  %v3660_v3 = vld [vmem:[%s6133_s0 + $0x4c0] sm:$0xf] }
 0x136   :  { %v2278_v12 = vpop.f32.mrf.mxu2  ;;  %v2022_v15 = vpop.f32.mrf.mxu0 }
 0x137   :  { %v2407_v13 = vpop.f32.mrf.mxu3  ;;  %v2279_v14 = vadd.f32 %v2278_v12, %v2150_v8  ;;  %v2151_v16 = vpop.f32.mrf.mxu1  ;;  %v2023_v17 = vadd.f32 %v2022_v15, %v480_v11  ;;  %v3662_v8 = vld [vmem:[%s6133_s0 + $0x4e0] sm:$0xf0]  ;;  %v4231_v11 = vld [vmem:[%s6133_s0 + $0x4e4] sm:$0xf0]  ;;  %v4227_v12 = vld [vmem:[%s6133_s0 + $0x4cc] sm:$0xf] }
 0x138   :  { %v3669_v27 = vor.u32 %v4231_v11, %v3668_v10 }
 0x139   :  { %v5114_v19 = vadd.f32 %v2407_v13, %v2279_v14  ;;  %v2152_v21 = vadd.f32 %v2151_v16, %v2023_v17  ;;  %v3670_v13 = vld [vmem:[%s6133_s0 + $0x4e8] sm:$0xf0]  ;;  %v495_v14 = vpop.permute.xlu1 %494  ;;  %v3661_v17 = vor.u32 %v4230_v4, %v3660_v3  ;;  %v505_v4 = vpop.permute.xlu0 %504 }
 0x13a   :  { %v3673_v29 = vor.u32 %v4227_v12, %v3670_v13  ;;  %v3702_v3 = vld [vmem:[%s6133_s0 + $0x528] sm:$0xf0] }
 0x13e   :  { %v2280_v37 = vpop.f32.mrf.mxu2  ;;  %v2025_v43 = vpop.f32.mrf.mxu0 }
 0x13f   :  { %v2409_v38 = vpop.f32.mrf.mxu3  ;;  %v2281_v42 = vadd.f32 %v2280_v37, %v2152_v21  ;;  %v2154_v44 = vpop.f32.mrf.mxu1  ;;  %v2026_v49 = vadd.f32 %v2025_v43, %v485_v36  ;;  %v3665_v21 = vor.u32 %v4226_v5, %v3662_v8  ;;  %v4314_v36 = vld [vmem:[%s6131_s1 + $0x180] sm:$0xff] }
 0x140   :  { %v4298_v37 = vld [vmem:[%s6131_s1 + $0x100] sm:$0xff]  ;;  %2747 = vmatpush.bf16.msrb.mxu2 %v4314_v36 }
 0x141   :  { %v5143_v51 = vadd.f32 %v2409_v38, %v2281_v42  ;;  %2064 = vmatmul.bf16.gmra.mxu0 %v3629_v39  ;;  %v2155_v52 = vadd.f32 %v2154_v44, %v2026_v49  ;;  %v4322_v38 = vld [vmem:[%s6131_s1 + $0x1c0] sm:$0xff]  ;;  %v500_v39 = vpop.permute.xlu2 %499 }
 0x142   :  { %2193 = vmatmul.bf16.gmra.mxu1 %v3633_v41  ;;  %2489 = vmatpush.bf16.msrb.mxu0 %v4298_v37 }
 0x143   :  { %2322 = vmatmul.bf16.gmra.mxu2 %v3637_v46  ;;  %2876 = vmatpush.bf16.msrb.mxu3 %v4322_v38 }
 0x144   :  { %2451 = vmatmul.bf16.gmra.mxu3 %v3641_v48  ;;  %v372_v48 = vld [vmem:[%s6132_s2 + $0x130] sm:$0xff] }
 0x145   :  { %574 = vperm.xlu2 %4333, %v372_v48   ;;  %v3732_v48 = vld [vmem:[%s6133_s0 + $0x548] sm:$0xf] }
 0x146   :  { %v2283_v55 = vpop.f32.mrf.mxu2  ;;  %v2027_v61 = vpop.f32.mrf.mxu0 }
 0x147   :  { %v2412_v56 = vpop.f32.mrf.mxu3  ;;  %v2284_v57 = vadd.f32 %v2283_v55, %v2155_v52  ;;  %v2156_v62 = vpop.f32.mrf.mxu1  ;;  %v2028_v63 = vadd.f32 %v2027_v61, %v490_v54  ;;  %v3692_v55 = vld [vmem:[%s6133_s0 + $0x500] sm:$0xf]  ;;  %v3694_v61 = vld [vmem:[%s6133_s0 + $0x520] sm:$0xf0] }
 0x149   :  { %v5148_v1 = vadd.f32 %v2412_v56, %v2284_v57  ;;  %v2157_v2 = vadd.f32 %v2156_v62, %v2028_v63  ;;  %v4238_v56 = vld [vmem:[%s6133_s0 + $0x51c] sm:$0xf0]  ;;  %v4234_v57 = vld [vmem:[%s6133_s0 + $0x504] sm:$0xf]  ;;  %v3700_v62 = vld [vmem:[%s6133_s0 + $0x508] sm:$0xf] }
 0x14a   :  { %v4239_v63 = vld [vmem:[%s6133_s0 + $0x524] sm:$0xf0]  ;;  %v3693_v10 = vor.u32 %v4238_v56, %v3692_v55  ;;  %v3697_v11 = vor.u32 %v4234_v57, %v3694_v61  ;;  %v515_v55 = vpop.permute.xlu2 %514 }
 0x14e   :  { %v2285_v15 = vpop.f32.mrf.mxu2  ;;  %v2030_v25 = vpop.f32.mrf.mxu0 }
 0x14f   :  { %v2414_v16 = vpop.f32.mrf.mxu3  ;;  %v2286_v22 = vadd.f32 %v2285_v15, %v2157_v2  ;;  %v2159_v26 = vpop.f32.mrf.mxu1  ;;  %v2031_v32 = vadd.f32 %v2030_v25, %v495_v14  ;;  %v4235_v2 = vld [vmem:[%s6133_s0 + $0x50c] sm:$0xf]  ;;  %v3701_v15 = vor.u32 %v4239_v63, %v3700_v62 }
 0x151   :  { %v5177_v33 = vadd.f32 %v2414_v16, %v2286_v22  ;;  %2069 = vmatmul.bf16.gmra.mxu0 %v3661_v17  ;;  %v2160_v34 = vadd.f32 %v2159_v26, %v2031_v32  ;;  %v3705_v16 = vor.u32 %v4235_v2, %v3702_v3  ;;  %v376_v17 = vld [vmem:[%s6132_s2 + $0x150] sm:$0xff]  ;;  %v377_v26 = vld [vmem:[%s6132_s2 + $0x158] sm:$0xff] }
 0x152   :  { %2198 = vmatmul.bf16.gmra.mxu1 %v3665_v21  ;;  %594 = vperm.xlu0 %4331, %v376_v17  }
 0x153   :  { %2327 = vmatmul.bf16.gmra.mxu2 %v3669_v27  ;;  %599 = vperm.xlu1 %4332, %v377_v26   ;;  %v510_v27 = vpop.permute.xlu1 %509 }
 0x154   :  { %2456 = vmatmul.bf16.gmra.mxu3 %v3673_v29 }
 0x156   :  { %v2288_v41 = vpop.f32.mrf.mxu2  ;;  %v2032_v44 = vpop.f32.mrf.mxu0 }
 0x157   :  { %v2417_v42 = vpop.f32.mrf.mxu3  ;;  %v2289_v43 = vadd.f32 %v2288_v41, %v2160_v34  ;;  %v2161_v46 = vpop.f32.mrf.mxu1  ;;  %v2033_v49 = vadd.f32 %v2032_v44, %v500_v39  ;;  %v3724_v41 = vld [vmem:[%s6133_s0 + $0x540] sm:$0xf]  ;;  %v4242_v44 = vld [vmem:[%s6133_s0 + $0x544] sm:$0xf] }
 0x159   :  { %v5191_v52 = vadd.f32 %v2417_v42, %v2289_v43  ;;  %v2162_v54 = vadd.f32 %v2161_v46, %v2033_v49  ;;  %v4246_v42 = vld [vmem:[%s6133_s0 + $0x55c] sm:$0xf0]  ;;  %v375_v43 = vld [vmem:[%s6132_s2 + $0x148] sm:$0xff]  ;;  %v3726_v46 = vld [vmem:[%s6133_s0 + $0x560] sm:$0xf0] }
 0x15a   :  { %589 = vperm.xlu2 %4333, %v375_v43   ;;  %v4247_v49 = vld [vmem:[%s6133_s0 + $0x564] sm:$0xf0]  ;;  %v3725_v61 = vor.u32 %v4246_v42, %v3724_v41  ;;  %v3729_v62 = vor.u32 %v4242_v44, %v3726_v46  ;;  %v3766_v41 = vld [vmem:[%s6133_s0 + $0x5a8] sm:$0xf0] }
 0x15b   :  { %v525_v42 = vpop.permute.xlu1 %524 }
 0x15e   :  { %v2290_v5 = vpop.f32.mrf.mxu2  ;;  %v2035_v13 = vpop.f32.mrf.mxu0 }
 0x15f   :  { %v2419_v8 = vpop.f32.mrf.mxu3  ;;  %v2291_v12 = vadd.f32 %v2290_v5, %v2162_v54  ;;  %v2164_v14 = vpop.f32.mrf.mxu1  ;;  %v2036_v21 = vadd.f32 %v2035_v13, %v505_v4  ;;  %v3734_v54 = vld [vmem:[%s6133_s0 + $0x568] sm:$0xf0]  ;;  %v3733_v4 = vor.u32 %v4247_v49, %v3732_v48 }
 0x160   :  { %v3737_v5 = vor.u32 %v4243_v53, %v3734_v54  ;;  %v520_v13 = vpop.permute.xlu0 %519 }
 0x161   :  { %v5223_v22 = vadd.f32 %v2419_v8, %v2291_v12  ;;  %2074 = vmatmul.bf16.gmra.mxu0 %v3693_v10  ;;  %v2165_v25 = vadd.f32 %v2164_v14, %v2036_v21  ;;  %v379_v12 = vld [vmem:[%s6132_s2 + $0x168] sm:$0xff] }
 0x162   :  { %2203 = vmatmul.bf16.gmra.mxu1 %v3697_v11  ;;  %609 = vperm.xlu0 %4331, %v379_v12   ;;  %v378_v12 = vld [vmem:[%s6132_s2 + $0x160] sm:$0xff] }
 0x163   :  { %2332 = vmatmul.bf16.gmra.mxu2 %v3701_v15  ;;  %604 = vperm.xlu2 %4333, %v378_v12   ;;  %v381_v12 = vld [vmem:[%s6132_s2 + $0x178] sm:$0xff] }
 0x164   :  { %2461 = vmatmul.bf16.gmra.mxu3 %v3705_v16 }
 0x166   :  { %v2293_v29 = vpop.f32.mrf.mxu2  ;;  %v2037_v34 = vpop.f32.mrf.mxu0 }
 0x167   :  { %v2422_v30 = vpop.f32.mrf.mxu3  ;;  %v2294_v32 = vadd.f32 %v2293_v29, %v2165_v25  ;;  %v2166_v36 = vpop.f32.mrf.mxu1  ;;  %v2038_v37 = vadd.f32 %v2037_v34, %v510_v27  ;;  %v3756_v29 = vld [vmem:[%s6133_s0 + $0x580] sm:$0xf]  ;;  %v3758_v34 = vld [vmem:[%s6133_s0 + $0x5a0] sm:$0xf0] }
 0x169   :  { %v5228_v38 = vadd.f32 %v2422_v30, %v2294_v32  ;;  %v2167_v39 = vadd.f32 %v2166_v36, %v2038_v37  ;;  %v4254_v30 = vld [vmem:[%s6133_s0 + $0x59c] sm:$0xf0]  ;;  %v4250_v32 = vld [vmem:[%s6133_s0 + $0x584] sm:$0xf]  ;;  %v3764_v36 = vld [vmem:[%s6133_s0 + $0x588] sm:$0xf] }
 0x16a   :  { %v4255_v37 = vld [vmem:[%s6133_s0 + $0x5a4] sm:$0xf0]  ;;  %v3757_v46 = vor.u32 %v4254_v30, %v3756_v29  ;;  %v3761_v48 = vor.u32 %v4250_v32, %v3758_v34  ;;  %v4259_v30 = vld [vmem:[%s6133_s0 + $0x5cc] sm:$0xf]  ;;  %v535_v34 = vpop.permute.xlu0 %534 }
 0x16b   :  { %v4263_v29 = vld [vmem:[%s6133_s0 + $0x5e4] sm:$0xf0]  ;;  %v3798_v32 = vld [vmem:[%s6133_s0 + $0x5e8] sm:$0xf0]  ;;  %619 = vperm.xlu2 %4333, %v381_v12   ;;  %v3108_v12 = vld [vmem:[%s6133_s0 + $0x58] sm:$0xf] }
 0x16e   :  { %v2295_v56 = vpop.f32.mrf.mxu2  ;;  %v2040_v2 = vpop.f32.mrf.mxu0 }
 0x16f   :  { %v2424_v57 = vpop.f32.mrf.mxu3  ;;  %v2296_v63 = vadd.f32 %v2295_v56, %v2167_v39  ;;  %v2169_v3 = vpop.f32.mrf.mxu1  ;;  %v2041_v8 = vadd.f32 %v2040_v2, %v515_v55  ;;  %v4251_v39 = vld [vmem:[%s6133_s0 + $0x58c] sm:$0xf]  ;;  %v3765_v55 = vor.u32 %v4255_v37, %v3764_v36 }
 0x170   :  { %v3769_v56 = vor.u32 %v4251_v39, %v3766_v41  ;;  %v530_v2 = vpop.permute.xlu2 %529 }
 0x171   :  { %v5257_v10 = vadd.f32 %v2424_v57, %v2296_v63  ;;  %2079 = vmatmul.bf16.gmra.mxu0 %v3725_v61  ;;  %v2170_v11 = vadd.f32 %v2169_v3, %v2041_v8  ;;  %v380_v57 = vld [vmem:[%s6132_s2 + $0x170] sm:$0xff] }
 0x172   :  { %2208 = vmatmul.bf16.gmra.mxu1 %v3729_v62  ;;  %614 = vperm.xlu1 %4332, %v380_v57  }
 0x173   :  { %2337 = vmatmul.bf16.gmra.mxu2 %v3733_v4 }
 0x174   :  { %2466 = vmatmul.bf16.gmra.mxu3 %v3737_v5 }
 0x176   :  { %v2298_v14 = vpop.f32.mrf.mxu2  ;;  %v2042_v17 = vpop.f32.mrf.mxu0 }
 0x177   :  { %v2427_v15 = vpop.f32.mrf.mxu3  ;;  %v2299_v16 = vadd.f32 %v2298_v14, %v2170_v11  ;;  %v2171_v21 = vpop.f32.mrf.mxu1  ;;  %v2043_v25 = vadd.f32 %v2042_v17, %v520_v13  ;;  %v4262_v17 = vld [vmem:[%s6133_s0 + $0x5dc] sm:$0xf0] }
 0x179   :  { %v5262_v26 = vadd.f32 %v2427_v15, %v2299_v16  ;;  %v2172_v27 = vadd.f32 %v2171_v21, %v2043_v25  ;;  %v3788_v16 = vld [vmem:[%s6133_s0 + $0x5c0] sm:$0xf]  ;;  %v4258_v21 = vld [vmem:[%s6133_s0 + $0x5c4] sm:$0xf] }
 0x17a   :  { %v3790_v25 = vld [vmem:[%s6133_s0 + $0x5e0] sm:$0xf0]  ;;  %v3789_v39 = vor.u32 %v4262_v17, %v3788_v16  ;;  %v3076_v16 = vld [vmem:[%s6133_s0 + $0x18] sm:$0xf] }
 0x17b   :  { %v3793_v41 = vor.u32 %v4258_v21, %v3790_v25  ;;  %v4081_v17 = vld [vmem:[%s6133_s0 + $0x34] sm:$0xf0]  ;;  %v4077_v21 = vld [vmem:[%s6133_s0 + $0x1c] sm:$0xf] }
 0x17c   :  { %v3078_v25 = vld [vmem:[%s6133_s0 + $0x38] sm:$0xf0] }
 0x17e   :  { %v2300_v43 = vpop.f32.mrf.mxu2  ;;  %v2045_v53 = vpop.f32.mrf.mxu0 }
 0x17f   :  { %v2429_v44 = vpop.f32.mrf.mxu3  ;;  %v2301_v49 = vadd.f32 %v2300_v43, %v2172_v27  ;;  %v2174_v54 = vpop.f32.mrf.mxu1  ;;  %v2046_v61 = vadd.f32 %v2045_v53, %v525_v42  ;;  %v3796_v27 = vld [vmem:[%s6133_s0 + $0x5c8] sm:$0xf] }
 0x181   :  { %v5291_v62 = vadd.f32 %v2429_v44, %v2301_v49  ;;  %2084 = vmatmul.bf16.gmra.mxu0 %v3757_v46  ;;  %v2175_v63 = vadd.f32 %v2174_v54, %v2046_v61  ;;  %v3797_v46 = vor.u32 %v4263_v29, %v3796_v27  ;;  %v545_v27 = vpop.permute.xlu2 %544 }
 0x182   :  { %2213 = vmatmul.bf16.gmra.mxu1 %v3761_v48  ;;  %v3801_v48 = vor.u32 %v4259_v30, %v3798_v32 }
 0x183   :  { %2342 = vmatmul.bf16.gmra.mxu2 %v3765_v55  ;;  %v540_v55 = vpop.permute.xlu1 %539 }
 0x184   :  { %2471 = vmatmul.bf16.gmra.mxu3 %v3769_v56 }
 0x186   :  { %v2303_v3 = vpop.f32.mrf.mxu2  ;;  %v2047_v8 = vpop.f32.mrf.mxu0 }
 0x187   :  { %v2432_v4 = vpop.f32.mrf.mxu3  ;;  %v2304_v5 = vadd.f32 %v2303_v3, %v2175_v63  ;;  %v2176_v11 = vpop.f32.mrf.mxu1  ;;  %v2048_v13 = vadd.f32 %v2047_v8, %v530_v2  ;;  %v3068_v8 = vld [vmem:[%s6133_s0 + $0x10] sm:$0xf] }
 0x189   :  { %v5296_v14 = vadd.f32 %v2432_v4, %v2304_v5  ;;  %v2177_v15 = vadd.f32 %v2176_v11, %v2048_v13  ;;  %v4080_v11 = vld [vmem:[%s6133_s0 + $0x2c] sm:$0xf0]  ;;  %v4076_v13 = vld [vmem:[%s6133_s0 + $0x14] sm:$0xf] }
 0x18a   :  { %v3069_v32 = vor.u32 %v4080_v11, %v3068_v8  ;;  %v4084_v8 = vld [vmem:[%s6133_s0 + $0x54] sm:$0xf] }
 0x18b   :  { %v3102_v11 = vld [vmem:[%s6133_s0 + $0x70] sm:$0xf0] }
 0x18e   :  { %v2305_v36 = vpop.f32.mrf.mxu2  ;;  %v2050_v43 = vpop.f32.mrf.mxu0 }
 0x18f   :  { %v2434_v37 = vpop.f32.mrf.mxu3  ;;  %v2306_v42 = vadd.f32 %v2305_v36, %v2177_v15  ;;  %v2179_v44 = vpop.f32.mrf.mxu1  ;;  %v2051_v49 = vadd.f32 %v2050_v43, %v535_v34  ;;  %v3070_v15 = vld [vmem:[%s6133_s0 + $0x30] sm:$0xf0] }
 0x190   :  { %v3073_v34 = vor.u32 %v4076_v13, %v3070_v15  ;;  %v4089_v13 = vld [vmem:[%s6133_s0 + $0x74] sm:$0xf0]  ;;  %v4085_v15 = vld [vmem:[%s6133_s0 + $0x5c] sm:$0xf] }
 0x191   :  { %v5322_v53 = vadd.f32 %v2434_v37, %v2306_v42  ;;  %2089 = vmatmul.bf16.gmra.mxu0 %v3789_v39  ;;  %v2180_v54 = vadd.f32 %v2179_v44, %v2051_v49  ;;  %v3081_v42 = vor.u32 %v4077_v21, %v3078_v25 }
 0x192   :  { %2218 = vmatmul.bf16.gmra.mxu1 %v3793_v41  ;;  %v3077_v41 = vor.u32 %v4081_v17, %v3076_v16  ;;  %v3110_v16 = vld [vmem:[%s6133_s0 + $0x78] sm:$0xf0]  ;;  %v555_v17 = vpop.permute.xlu1 %554 }
 0x193   :  { %2347 = vmatmul.bf16.gmra.mxu2 %v3797_v46 }
 0x194   :  { %2476 = vmatmul.bf16.gmra.mxu3 %v3801_v48  ;;  %v550_v48 = vpop.permute.xlu0 %549 }
 0x196   :  { %v2308_v56 = vpop.f32.mrf.mxu2  ;;  %v2052_v63 = vpop.f32.mrf.mxu0 }
 0x197   :  { %v2437_v57 = vpop.f32.mrf.mxu3  ;;  %v2309_v61 = vadd.f32 %v2308_v56, %v2180_v54  ;;  %v2181_v2 = vpop.f32.mrf.mxu1  ;;  %v2053_v3 = vadd.f32 %v2052_v63, %v540_v55 }
 0x199   :  { %v5324_v4 = vadd.f32 %v2437_v57, %v2309_v61  ;;  %v2182_v5 = vadd.f32 %v2181_v2, %v2053_v3  ;;  %v3100_v3 = vld [vmem:[%s6133_s0 + $0x50] sm:$0xf] }
 0x19e   :  { %v2310_v29 = vpop.f32.mrf.mxu2  ;;  %v2055_v37 = vpop.f32.mrf.mxu0 }
 0x19f   :  { %v2439_v30 = vpop.f32.mrf.mxu3  ;;  %v2311_v36 = vadd.f32 %v2310_v29, %v2182_v5  ;;  %v2184_v39 = vpop.f32.mrf.mxu1  ;;  %v2056_v43 = vadd.f32 %v2055_v37, %v545_v27  ;;  %v4088_v5 = vld [vmem:[%s6133_s0 + $0x6c] sm:$0xf0]  ;;  %v3105_v29 = vor.u32 %v4084_v8, %v3102_v11  ;;  %v3113_v37 = vor.u32 %v4085_v15, %v3110_v16  ;;  %v3134_v8 = vld [vmem:[%s6133_s0 + $0xb0] sm:$0xf0]  ;;  %v3140_v11 = vld [vmem:[%s6133_s0 + $0x98] sm:$0xf] }
 0x1a0   :  { %v3101_v27 = vor.u32 %v4088_v5, %v3100_v3  ;;  %v4096_v3 = vld [vmem:[%s6133_s0 + $0xac] sm:$0xf0]  ;;  %v4092_v5 = vld [vmem:[%s6133_s0 + $0x94] sm:$0xf]  ;;  %v3142_v15 = vld [vmem:[%s6133_s0 + $0xb8] sm:$0xf0]  ;;  %v565_v16 = vpop.permute.xlu0 %564 }
 0x1a1   :  { %v5353_v44 = vadd.f32 %v2439_v30, %v2311_v36  ;;  %2490 = vmatmul.bf16.vlgmr.msrb.gmra.mxu0 %v3069_v32  ;;  %v2185_v46 = vadd.f32 %v2184_v39, %v2056_v43  ;;  %v3109_v36 = vor.u32 %v4089_v13, %v3108_v12  ;;  %v560_v43 = vpop.permute.xlu2 %559  ;;  %v4097_v12 = vld [vmem:[%s6133_s0 + $0xb4] sm:$0xf0]  ;;  %v4093_v13 = vld [vmem:[%s6133_s0 + $0x9c] sm:$0xf] }
 0x1a2   :  { %2619 = vmatmul.bf16.vlgmr.msrb.gmra.mxu1 %v3073_v34 }
 0x1a3   :  { %2748 = vmatmul.bf16.vlgmr.msrb.gmra.mxu2 %v3077_v41 }
 0x1a4   :  { %2877 = vmatmul.bf16.vlgmr.msrb.gmra.mxu3 %v3081_v42 }
 0x1a6   :  { %v2313_v49 = vpop.f32.mrf.mxu2  ;;  %v2057_v56 = vpop.f32.mrf.mxu0 }
 0x1a7   :  { %v2442_v54 = vpop.f32.mrf.mxu3  ;;  %v2314_v55 = vadd.f32 %v2313_v49, %v2185_v46  ;;  %v2186_v57 = vpop.f32.mrf.mxu1  ;;  %v2058_v61 = vadd.f32 %v2057_v56, %v550_v48 }
 0x1a9   :  { %v5355_v63 = vadd.f32 %v2442_v54, %v2314_v55  ;;  %v2187_v2 = vadd.f32 %v2186_v57, %v2058_v61 }
 0x1ae   :  { %v2315_v21 = vpop.f32.mrf.mxu2  ;;  %v2060_v32 = vpop.f32.mrf.mxu0 }
 0x1af   :  { %v2444_v25 = vpop.f32.mrf.mxu3  ;;  %v2316_v30 = vadd.f32 %v2315_v21, %v2187_v2  ;;  %v2189_v34 = vpop.f32.mrf.mxu1  ;;  %v2061_v39 = vadd.f32 %v2060_v32, %v555_v17  ;;  %v3132_v2 = vld [vmem:[%s6133_s0 + $0x90] sm:$0xf] }
 0x1b1   :  { %v5381_v41 = vadd.f32 %v2444_v25, %v2316_v30  ;;  %2495 = vmatmul.bf16.gmra.mxu0 %v3101_v27  ;;  %v2190_v42 = vadd.f32 %v2189_v34, %v2061_v39  ;;  %v3133_v25 = vor.u32 %v4096_v3, %v3132_v2  ;;  %v3137_v27 = vor.u32 %v4092_v5, %v3134_v8  ;;  %v3164_v3 = vld [vmem:[%s6133_s0 + $0xd0] sm:$0xf]  ;;  %v4100_v8 = vld [vmem:[%s6133_s0 + $0xd4] sm:$0xf] }
 0x1b2   :  { %2624 = vmatmul.bf16.gmra.mxu1 %v3105_v29  ;;  %v3141_v34 = vor.u32 %v4097_v12, %v3140_v11  ;;  %v4104_v5 = vld [vmem:[%s6133_s0 + $0xec] sm:$0xf0]  ;;  %v3166_v11 = vld [vmem:[%s6133_s0 + $0xf0] sm:$0xf0]  ;;  %v3172_v12 = vld [vmem:[%s6133_s0 + $0xd8] sm:$0xf] }
 0x1b3   :  { %2753 = vmatmul.bf16.gmra.mxu2 %v3109_v36  ;;  %v3145_v36 = vor.u32 %v4093_v13, %v3142_v15  ;;  %v4105_v13 = vld [vmem:[%s6133_s0 + $0xf4] sm:$0xf0]  ;;  %v4101_v15 = vld [vmem:[%s6133_s0 + $0xdc] sm:$0xf] }
 0x1b4   :  { %2882 = vmatmul.bf16.gmra.mxu3 %v3113_v37 }
 0x1b6   :  { %v2318_v46 = vpop.f32.mrf.mxu2  ;;  %v2062_v54 = vpop.f32.mrf.mxu0 }
 0x1b7   :  { %v2447_v48 = vpop.f32.mrf.mxu3  ;;  %v2319_v49 = vadd.f32 %v2318_v46, %v2190_v42  ;;  %v2191_v55 = vpop.f32.mrf.mxu1  ;;  %v2063_v56 = vadd.f32 %v2062_v54, %v560_v43 }
 0x1b8   :  { %v570_v43 = vpop.permute.xlu1 %569 }
 0x1b9   :  { %v5383_v57 = vadd.f32 %v2447_v48, %v2319_v49  ;;  %v2192_v61 = vadd.f32 %v2191_v55, %v2063_v56 }
 0x1be   :  { %v2320_v17 = vpop.f32.mrf.mxu2  ;;  %v2065_v30 = vpop.f32.mrf.mxu0 }
 0x1bf   :  { %v2449_v21 = vpop.f32.mrf.mxu3  ;;  %v2321_v29 = vadd.f32 %v2320_v17, %v2192_v61  ;;  %v2194_v32 = vpop.f32.mrf.mxu1  ;;  %v2066_v37 = vadd.f32 %v2065_v30, %v565_v16  ;;  %v3174_v16 = vld [vmem:[%s6133_s0 + $0xf8] sm:$0xf0] }
 0x1c0   :  { %v575_v17 = vpop.permute.xlu2 %574 }
 0x1c1   :  { %v5409_v39 = vadd.f32 %v2449_v21, %v2321_v29  ;;  %2500 = vmatmul.bf16.gmra.mxu0 %v3133_v25  ;;  %v2195_v42 = vadd.f32 %v2194_v32, %v2066_v37  ;;  %v3169_v29 = vor.u32 %v4100_v8, %v3166_v11  ;;  %v3177_v37 = vor.u32 %v4101_v15, %v3174_v16  ;;  %v3196_v11 = vld [vmem:[%s6133_s0 + $0x110] sm:$0xf]  ;;  %v3198_v15 = vld [vmem:[%s6133_s0 + $0x130] sm:$0xf0]  ;;  %v3204_v16 = vld [vmem:[%s6133_s0 + $0x118] sm:$0xf] }
 0x1c2   :  { %2629 = vmatmul.bf16.gmra.mxu1 %v3137_v27  ;;  %v3165_v27 = vor.u32 %v4104_v5, %v3164_v3 }
 0x1c3   :  { %2758 = vmatmul.bf16.gmra.mxu2 %v3141_v34 }
 0x1c4   :  { %2887 = vmatmul.bf16.gmra.mxu3 %v3145_v36  ;;  %v3173_v36 = vor.u32 %v4105_v13, %v3172_v12  ;;  %v4112_v12 = vld [vmem:[%s6133_s0 + $0x12c] sm:$0xf0]  ;;  %v4108_v13 = vld [vmem:[%s6133_s0 + $0x114] sm:$0xf] }
 0x1c6   :  { %v2323_v46 = vpop.f32.mrf.mxu2  ;;  %v2067_v54 = vpop.f32.mrf.mxu0 }
 0x1c7   :  { %v2452_v48 = vpop.f32.mrf.mxu3  ;;  %v2324_v49 = vadd.f32 %v2323_v46, %v2195_v42  ;;  %v2196_v55 = vpop.f32.mrf.mxu1  ;;  %v2068_v56 = vadd.f32 %v2067_v54, %v570_v43 }
 0x1c9   :  { %v5411_v61 = vadd.f32 %v2452_v48, %v2324_v49  ;;  %v2197_v2 = vadd.f32 %v2196_v55, %v2068_v56  ;;  %v580_v48 = vpop.permute.xlu0 %579 }
 0x1ce   :  { %v2325_v21 = vpop.f32.mrf.mxu2  ;;  %v2070_v32 = vpop.f32.mrf.mxu0 }
 0x1cf   :  { %v2454_v25 = vpop.f32.mrf.mxu3  ;;  %v2326_v30 = vadd.f32 %v2325_v21, %v2197_v2  ;;  %v2199_v34 = vpop.f32.mrf.mxu1  ;;  %v2071_v42 = vadd.f32 %v2070_v32, %v575_v17  ;;  %v4113_v17 = vld [vmem:[%s6133_s0 + $0x134] sm:$0xf0]  ;;  %v4109_v21 = vld [vmem:[%s6133_s0 + $0x11c] sm:$0xf]  ;;  %v3197_v32 = vor.u32 %v4112_v12, %v3196_v11 }
 0x1d1   :  { %v5437_v43 = vadd.f32 %v2454_v25, %v2326_v30  ;;  %2505 = vmatmul.bf16.gmra.mxu0 %v3165_v27  ;;  %v2200_v46 = vadd.f32 %v2199_v34, %v2071_v42  ;;  %v3206_v25 = vld [vmem:[%s6133_s0 + $0x138] sm:$0xf0]  ;;  %v585_v27 = vpop.permute.xlu1 %584  ;;  %v3201_v34 = vor.u32 %v4108_v13, %v3198_v15  ;;  %v3228_v15 = vld [vmem:[%s6133_s0 + $0x150] sm:$0xf] }
 0x1d2   :  { %2634 = vmatmul.bf16.gmra.mxu1 %v3169_v29 }
 0x1d3   :  { %6135 = vst [vmem:[#allocation2_spill] sm:$0xff] %v5437_v43  ;;  %2763 = vmatmul.bf16.gmra.mxu2 %v3173_v36 }
 0x1d4   :  { %2892 = vmatmul.bf16.gmra.mxu3 %v3177_v37 }
 0x1d6   :  { %v2328_v49 = vpop.f32.mrf.mxu2  ;;  %v2072_v56 = vpop.f32.mrf.mxu0 }
 0x1d7   :  { %v2457_v54 = vpop.f32.mrf.mxu3  ;;  %v2329_v55 = vadd.f32 %v2328_v49, %v2200_v46  ;;  %v2201_v3 = vpop.f32.mrf.mxu1  ;;  %v2073_v5 = vadd.f32 %v2072_v56, %v580_v48  ;;  %v3205_v46 = vor.u32 %v4113_v17, %v3204_v16  ;;  %v3209_v48 = vor.u32 %v4109_v21, %v3206_v25  ;;  %v4120_v16 = vld [vmem:[%s6133_s0 + $0x16c] sm:$0xf0]  ;;  %v4116_v17 = vld [vmem:[%s6133_s0 + $0x154] sm:$0xf]  ;;  %v4117_v25 = vld [vmem:[%s6133_s0 + $0x15c] sm:$0xf] }
 0x1d8   :  { %v590_v56 = vpop.permute.xlu2 %589  ;;  %v3230_v21 = vld [vmem:[%s6133_s0 + $0x170] sm:$0xf0] }
 0x1d9   :  { %v5439_v2 = vadd.f32 %v2457_v54, %v2329_v55  ;;  %v2202_v8 = vadd.f32 %v2201_v3, %v2073_v5 }
 0x1db   :  { %6136 = vst [vmem:[#allocation3_spill] sm:$0xff] %v5439_v2 }
 0x1de   :  { %v2330_v29 = vpop.f32.mrf.mxu2  ;;  %v2075_v37 = vpop.f32.mrf.mxu0 }
 0x1df   :  { %v2459_v30 = vpop.f32.mrf.mxu3  ;;  %v2331_v36 = vadd.f32 %v2330_v29, %v2202_v8  ;;  %v2204_v42 = vpop.f32.mrf.mxu1  ;;  %v2076_v49 = vadd.f32 %v2075_v37, %v585_v27  ;;  %v3238_v27 = vld [vmem:[%s6133_s0 + $0x178] sm:$0xf0] }
 0x1e0   :  { %v595_v29 = vpop.permute.xlu0 %594 }
 0x1e1   :  { %v5465_v54 = vadd.f32 %v2459_v30, %v2331_v36  ;;  %2510 = vmatmul.bf16.gmra.mxu0 %v3197_v32  ;;  %v2205_v55 = vadd.f32 %v2204_v42, %v2076_v49  ;;  %v3233_v36 = vor.u32 %v4116_v17, %v3230_v21  ;;  %v3241_v49 = vor.u32 %v4117_v25, %v3238_v27  ;;  %v3260_v21 = vld [vmem:[%s6133_s0 + $0x190] sm:$0xf]  ;;  %v3262_v25 = vld [vmem:[%s6133_s0 + $0x1b0] sm:$0xf0]  ;;  %v4125_v27 = vld [vmem:[%s6133_s0 + $0x19c] sm:$0xf] }
 0x1e2   :  { %2639 = vmatmul.bf16.gmra.mxu1 %v3201_v34  ;;  %v3229_v34 = vor.u32 %v4120_v16, %v3228_v15 }
 0x1e3   :  { %6137 = vst [vmem:[#allocation4_spill] sm:$0xff] %v5465_v54  ;;  %2768 = vmatmul.bf16.gmra.mxu2 %v3205_v46 }
 0x1e4   :  { %2897 = vmatmul.bf16.gmra.mxu3 %v3209_v48 }
 0x1e6   :  { %v2333_v3 = vpop.f32.mrf.mxu2  ;;  %v2077_v43 = vpop.f32.mrf.mxu0 }
 0x1e7   :  { %v2462_v5 = vpop.f32.mrf.mxu3  ;;  %v2334_v2 = vadd.f32 %v2333_v3, %v2205_v55  ;;  %v2206_v11 = vpop.f32.mrf.mxu1  ;;  %v2078_v12 = vadd.f32 %v2077_v43, %v590_v56  ;;  %v3236_v43 = vld [vmem:[%s6133_s0 + $0x158] sm:$0xf] }
 0x1e9   :  { %v5467_v8 = vadd.f32 %v2462_v5, %v2334_v2  ;;  %v2207_v13 = vadd.f32 %v2206_v11, %v2078_v12  ;;  %v4121_v2 = vld [vmem:[%s6133_s0 + $0x174] sm:$0xf0]  ;;  %v600_v5 = vpop.permute.xlu1 %599 }
 0x1ea   :  { %v3237_v48 = vor.u32 %v4121_v2, %v3236_v43  ;;  %v4128_v43 = vld [vmem:[%s6133_s0 + $0x1ac] sm:$0xf0]  ;;  %v4124_v2 = vld [vmem:[%s6133_s0 + $0x194] sm:$0xf] }
 0x1eb   :  { %6138 = vst [vmem:[#allocation5_spill] sm:$0xff] %v5467_v8 }
 0x1ee   :  { %v2335_v30 = vpop.f32.mrf.mxu2  ;;  %v2080_v42 = vpop.f32.mrf.mxu0 }
 0x1ef   :  { %v2464_v32 = vpop.f32.mrf.mxu3  ;;  %v2336_v37 = vadd.f32 %v2335_v30, %v2207_v13  ;;  %v2209_v46 = vpop.f32.mrf.mxu1  ;;  %v2081_v55 = vadd.f32 %v2080_v42, %v595_v29  ;;  %v3270_v29 = vld [vmem:[%s6133_s0 + $0x1b8] sm:$0xf0] }
 0x1f0   :  { %v605_v30 = vpop.permute.xlu2 %604 }
 0x1f1   :  { %v5493_v56 = vadd.f32 %v2464_v32, %v2336_v37  ;;  %2515 = vmatmul.bf16.gmra.mxu0 %v3229_v34  ;;  %v2210_v3 = vadd.f32 %v2209_v46, %v2081_v55  ;;  %v3265_v37 = vor.u32 %v4124_v2, %v3262_v25  ;;  %v3273_v55 = vor.u32 %v4125_v27, %v3270_v29  ;;  %v3292_v25 = vld [vmem:[%s6133_s0 + $0x1d0] sm:$0xf]  ;;  %v3294_v27 = vld [vmem:[%s6133_s0 + $0x1f0] sm:$0xf0]  ;;  %v4133_v29 = vld [vmem:[%s6133_s0 + $0x1dc] sm:$0xf] }
 0x1f2   :  { %2644 = vmatmul.bf16.gmra.mxu1 %v3233_v36  ;;  %v3261_v36 = vor.u32 %v4128_v43, %v3260_v21 }
 0x1f3   :  { %6139 = vst [vmem:[#allocation6_spill] sm:$0xff] %v5493_v56  ;;  %2773 = vmatmul.bf16.gmra.mxu2 %v3237_v48 }
 0x1f4   :  { %2902 = vmatmul.bf16.gmra.mxu3 %v3241_v49 }
 0x1f6   :  { %v2338_v11 = vpop.f32.mrf.mxu2  ;;  %v2082_v54 = vpop.f32.mrf.mxu0 }
 0x1f7   :  { %v2467_v12 = vpop.f32.mrf.mxu3  ;;  %v2339_v8 = vadd.f32 %v2338_v11, %v2210_v3  ;;  %v2211_v15 = vpop.f32.mrf.mxu1  ;;  %v2083_v16 = vadd.f32 %v2082_v54, %v600_v5  ;;  %v3268_v54 = vld [vmem:[%s6133_s0 + $0x198] sm:$0xf] }
 0x1f9   :  { %v5495_v13 = vadd.f32 %v2467_v12, %v2339_v8  ;;  %v2212_v17 = vadd.f32 %v2211_v15, %v2083_v16  ;;  %v4129_v8 = vld [vmem:[%s6133_s0 + $0x1b4] sm:$0xf0]  ;;  %v610_v12 = vpop.permute.xlu0 %609 }
 0x1fa   :  { %v3269_v49 = vor.u32 %v4129_v8, %v3268_v54  ;;  %v4136_v54 = vld [vmem:[%s6133_s0 + $0x1ec] sm:$0xf0]  ;;  %v4132_v8 = vld [vmem:[%s6133_s0 + $0x1d4] sm:$0xf] }
 0x1fb   :  { %6140 = vst [vmem:[#allocation7_spill] sm:$0xff] %v5495_v13 }
 0x1fe   :  { %v2340_v32 = vpop.f32.mrf.mxu2  ;;  %v2085_v46 = vpop.f32.mrf.mxu0 }
 0x1ff   :  { %v2469_v34 = vpop.f32.mrf.mxu3  ;;  %v2341_v42 = vadd.f32 %v2340_v32, %v2212_v17  ;;  %v2214_v48 = vpop.f32.mrf.mxu1  ;;  %v2086_v3 = vadd.f32 %v2085_v46, %v605_v30  ;;  %v3302_v30 = vld [vmem:[%s6133_s0 + $0x1f8] sm:$0xf0] }
 0x200   :  { %v615_v32 = vpop.permute.xlu1 %614 }
 0x201   :  { %v5521_v5 = vadd.f32 %v2469_v34, %v2341_v42  ;;  %2520 = vmatmul.bf16.gmra.mxu0 %v3261_v36  ;;  %v2215_v11 = vadd.f32 %v2214_v48, %v2086_v3  ;;  %v3297_v42 = vor.u32 %v4132_v8, %v3294_v27  ;;  %v3305_v3 = vor.u32 %v4133_v29, %v3302_v30  ;;  %v3324_v27 = vld [vmem:[%s6133_s0 + $0x210] sm:$0xf]  ;;  %v3326_v29 = vld [vmem:[%s6133_s0 + $0x230] sm:$0xf0]  ;;  %v4141_v30 = vld [vmem:[%s6133_s0 + $0x21c] sm:$0xf] }
 0x202   :  { %2649 = vmatmul.bf16.gmra.mxu1 %v3265_v37  ;;  %v3293_v37 = vor.u32 %v4136_v54, %v3292_v25 }
 0x203   :  { %6141 = vst [vmem:[#allocation8_spill] sm:$0xff] %v5521_v5  ;;  %2778 = vmatmul.bf16.gmra.mxu2 %v3269_v49 }
 0x204   :  { %2907 = vmatmul.bf16.gmra.mxu3 %v3273_v55 }
 0x206   :  { %v2343_v15 = vpop.f32.mrf.mxu2  ;;  %v2087_v56 = vpop.f32.mrf.mxu0 }
 0x207   :  { %v2472_v16 = vpop.f32.mrf.mxu3  ;;  %v2344_v13 = vadd.f32 %v2343_v15, %v2215_v11  ;;  %v2216_v21 = vpop.f32.mrf.mxu1  ;;  %v2088_v43 = vadd.f32 %v2087_v56, %v610_v12  ;;  %v3300_v56 = vld [vmem:[%s6133_s0 + $0x1d8] sm:$0xf] }
 0x209   :  { %v5523_v17 = vadd.f32 %v2472_v16, %v2344_v13  ;;  %v2217_v2 = vadd.f32 %v2216_v21, %v2088_v43  ;;  %v4137_v13 = vld [vmem:[%s6133_s0 + $0x1f4] sm:$0xf0]  ;;  %v620_v16 = vpop.permute.xlu2 %619 }
 0x20a   :  { %v3301_v55 = vor.u32 %v4137_v13, %v3300_v56  ;;  %v4144_v56 = vld [vmem:[%s6133_s0 + $0x22c] sm:$0xf0]  ;;  %v4140_v13 = vld [vmem:[%s6133_s0 + $0x214] sm:$0xf] }
 0x20b   :  { %6142 = vst [vmem:[#allocation9_spill] sm:$0xff] %v5523_v17 }
 0x20e   :  { %v2345_v34 = vpop.f32.mrf.mxu2  ;;  %v2090_v48 = vpop.f32.mrf.mxu0 }
 0x20f   :  { %v2474_v36 = vpop.f32.mrf.mxu3  ;;  %v2346_v46 = vadd.f32 %v2345_v34, %v2217_v2  ;;  %v2219_v49 = vpop.f32.mrf.mxu1  ;;  %v2091_v11 = vadd.f32 %v2090_v48, %v615_v32  ;;  %v3334_v32 = vld [vmem:[%s6133_s0 + $0x238] sm:$0xf0] }
 0x211   :  { %v5549_v12 = vadd.f32 %v2474_v36, %v2346_v46  ;;  %2525 = vmatmul.bf16.gmra.mxu0 %v3293_v37  ;;  %v2220_v15 = vadd.f32 %v2219_v49, %v2091_v11  ;;  %v3325_v37 = vor.u32 %v4144_v56, %v3324_v27 }
 0x212   :  { %2654 = vmatmul.bf16.gmra.mxu1 %v3297_v42  ;;  %v3329_v42 = vor.u32 %v4140_v13, %v3326_v29  ;;  %v3356_v13 = vld [vmem:[%s6133_s0 + $0x250] sm:$0xf]  ;;  %v4148_v29 = vld [vmem:[%s6133_s0 + $0x254] sm:$0xf] }
 0x213   :  { %2783 = vmatmul.bf16.gmra.mxu2 %v3301_v55 }
 0x214   :  { %2912 = vmatmul.bf16.gmra.mxu3 %v3305_v3  ;;  %v3337_v3 = vor.u32 %v4141_v30, %v3334_v32  ;;  %v4149_v30 = vld [vmem:[%s6133_s0 + $0x25c] sm:$0xf] }
 0x215   :  { %v3366_v32 = vld [vmem:[%s6133_s0 + $0x278] sm:$0xf0] }
 0x216   :  { %v2348_v21 = vpop.f32.mrf.mxu2  ;;  %v2092_v5 = vpop.f32.mrf.mxu0 }
 0x217   :  { %v2477_v43 = vpop.f32.mrf.mxu3  ;;  %v2349_v17 = vadd.f32 %v2348_v21, %v2220_v15  ;;  %v2221_v25 = vpop.f32.mrf.mxu1  ;;  %v2093_v54 = vadd.f32 %v2092_v5, %v620_v16  ;;  %v3332_v5 = vld [vmem:[%s6133_s0 + $0x218] sm:$0xf] }
 0x219   :  { %v5551_v2 = vadd.f32 %v2477_v43, %v2349_v17  ;;  %v2222_v8 = vadd.f32 %v2221_v25, %v2093_v54  ;;  %v4145_v17 = vld [vmem:[%s6133_s0 + $0x234] sm:$0xf0] }
 0x21a   :  { %v3333_v55 = vor.u32 %v4145_v17, %v3332_v5  ;;  %v3364_v5 = vld [vmem:[%s6133_s0 + $0x258] sm:$0xf] }
 0x21b   :  { %v4153_v17 = vld [vmem:[%s6133_s0 + $0x274] sm:$0xf0] }
 0x21e   :  { %v2350_v34 = vpop.f32.mrf.mxu2  ;;  %v2491_v48 = vpop.f32.mrf.mxu0 }
 0x21f   :  { %v2479_v36 = vpop.f32.mrf.mxu3  ;;  %v2351_v46 = vadd.f32 %v2350_v34, %v2222_v8  ;;  %v2620_v49 = vpop.f32.mrf.mxu1  ;;  %v2492_v15 = vadd.f32 %v2491_v48, %v4772_v60  ;;  %v4152_v60 = vld [vmem:[%s6133_s0 + $0x26c] sm:$0xf0] }
 0x221   :  { %v5577_v11 = vadd.f32 %v2479_v36, %v2351_v46  ;;  %2530 = vmatmul.bf16.gmra.mxu0 %v3325_v37  ;;  %v2621_v16 = vadd.f32 %v2620_v49, %v2492_v15  ;;  %v3369_v15 = vor.u32 %v4149_v30, %v3366_v32  ;;  %v4157_v30 = vld [vmem:[%s6133_s0 + $0x29c] sm:$0xf] }
 0x222   :  { %2659 = vmatmul.bf16.gmra.mxu1 %v3329_v42  ;;  %v3357_v42 = vor.u32 %v4152_v60, %v3356_v13  ;;  %v3398_v32 = vld [vmem:[%s6133_s0 + $0x2b8] sm:$0xf0] }
 0x223   :  { %2788 = vmatmul.bf16.gmra.mxu2 %v3333_v55 }
 0x224   :  { %2917 = vmatmul.bf16.gmra.mxu3 %v3337_v3  ;;  %v3365_v3 = vor.u32 %v4153_v17, %v3364_v5  ;;  %v3396_v5 = vld [vmem:[%s6133_s0 + $0x298] sm:$0xf] }
 0x225   :  { %v4161_v17 = vld [vmem:[%s6133_s0 + $0x2b4] sm:$0xf0] }
 0x226   :  { %v2749_v21 = vpop.f32.mrf.mxu2  ;;  %v2493_v54 = vpop.f32.mrf.mxu0 }
 0x227   :  { %v2878_v43 = vpop.f32.mrf.mxu3  ;;  %v2750_v25 = vadd.f32 %v2749_v21, %v2621_v16  ;;  %v2622_v27 = vpop.f32.mrf.mxu1  ;;  %v2494_v8 = vadd.f32 %v2493_v54, %v4801_v18  ;;  %v3358_v18 = vld [vmem:[%s6133_s0 + $0x270] sm:$0xf0] }
 0x228   :  { %v3361_v46 = vor.u32 %v4148_v29, %v3358_v18  ;;  %v4160_v29 = vld [vmem:[%s6133_s0 + $0x2ac] sm:$0xf0]  ;;  %v4156_v18 = vld [vmem:[%s6133_s0 + $0x294] sm:$0xf] }
 0x229   :  { %v2879_v56 = vadd.f32 %v2878_v43, %v2750_v25  ;;  %v2623_v34 = vadd.f32 %v2622_v27, %v2494_v8 }
 0x22b   :  { %2998 = vst [vmem:[%s6134_s3] sm:$0xff] %v2879_v56 }
 0x22e   :  { %v2751_v36 = vpop.f32.mrf.mxu2  ;;  %v2496_v49 = vpop.f32.mrf.mxu0 }
 0x22f   :  { %v2880_v37 = vpop.f32.mrf.mxu3  ;;  %v2752_v48 = vadd.f32 %v2751_v36, %v2623_v34  ;;  %v2625_v55 = vpop.f32.mrf.mxu1  ;;  %v2497_v21 = vadd.f32 %v2496_v49, %v4806_v28  ;;  %v3388_v28 = vld [vmem:[%s6133_s0 + $0x290] sm:$0xf] }
 0x231   :  { %v2881_v16 = vadd.f32 %v2880_v37, %v2752_v48  ;;  %2535 = vmatmul.bf16.gmra.mxu0 %v3357_v42  ;;  %v2626_v43 = vadd.f32 %v2625_v55, %v2497_v21  ;;  %v3389_v42 = vor.u32 %v4160_v29, %v3388_v28  ;;  %v4168_v28 = vld [vmem:[%s6133_s0 + $0x2ec] sm:$0xf0]  ;;  %v4164_v29 = vld [vmem:[%s6133_s0 + $0x2d4] sm:$0xf] }
 0x232   :  { %2664 = vmatmul.bf16.gmra.mxu1 %v3361_v46 }
 0x233   :  { %2999 = vst [vmem:[%s6134_s3 + $0x8] sm:$0xff] %v2881_v16  ;;  %2793 = vmatmul.bf16.gmra.mxu2 %v3365_v3  ;;  %v3397_v3 = vor.u32 %v4161_v17, %v3396_v5  ;;  %v4165_v5 = vld [vmem:[%s6133_s0 + $0x2dc] sm:$0xf] }
 0x234   :  { %2922 = vmatmul.bf16.gmra.mxu3 %v3369_v15  ;;  %v3401_v15 = vor.u32 %v4157_v30, %v3398_v32  ;;  %v3430_v17 = vld [vmem:[%s6133_s0 + $0x2f8] sm:$0xf0] }
 0x236   :  { %v2754_v25 = vpop.f32.mrf.mxu2  ;;  %v2498_v56 = vpop.f32.mrf.mxu0 }
 0x237   :  { %v2883_v54 = vpop.f32.mrf.mxu3  ;;  %v2755_v27 = vadd.f32 %v2754_v25, %v2626_v43  ;;  %v2627_v8 = vpop.f32.mrf.mxu1  ;;  %v2499_v60 = vadd.f32 %v2498_v56, %v4835_v50  ;;  %v3390_v50 = vld [vmem:[%s6133_s0 + $0x2b0] sm:$0xf0] }
 0x238   :  { %v3393_v46 = vor.u32 %v4156_v18, %v3390_v50  ;;  %v3428_v18 = vld [vmem:[%s6133_s0 + $0x2d8] sm:$0xf] }
 0x239   :  { %v2884_v13 = vadd.f32 %v2883_v54, %v2755_v27  ;;  %v2628_v34 = vadd.f32 %v2627_v8, %v2499_v60  ;;  %v4169_v50 = vld [vmem:[%s6133_s0 + $0x2f4] sm:$0xf0] }
 0x23b   :  { %3000 = vst [vmem:[%s6134_s3 + $0x10] sm:$0xff] %v2884_v13 }
 0x23e   :  { %v2756_v36 = vpop.f32.mrf.mxu2  ;;  %v2501_v49 = vpop.f32.mrf.mxu0 }
 0x23f   :  { %v2885_v37 = vpop.f32.mrf.mxu3  ;;  %v2757_v48 = vadd.f32 %v2756_v36, %v2628_v34  ;;  %v2630_v55 = vpop.f32.mrf.mxu1  ;;  %v2502_v21 = vadd.f32 %v2501_v49, %v4849_v0  ;;  %v3420_v0 = vld [vmem:[%s6133_s0 + $0x2d0] sm:$0xf]  ;;  %v3429_v49 = vor.u32 %v4169_v50, %v3428_v18 }
 0x240   :  { %v3421_v36 = vor.u32 %v4168_v28, %v3420_v0  ;;  %v3460_v0 = vld [vmem:[%s6133_s0 + $0x318] sm:$0xf] }
 0x241   :  { %v2886_v16 = vadd.f32 %v2885_v37, %v2757_v48  ;;  %2540 = vmatmul.bf16.gmra.mxu0 %v3389_v42  ;;  %v2631_v43 = vadd.f32 %v2630_v55, %v2502_v21  ;;  %v3433_v55 = vor.u32 %v4165_v5, %v3430_v17  ;;  %v4177_v28 = vld [vmem:[%s6133_s0 + $0x334] sm:$0xf0] }
 0x242   :  { %2669 = vmatmul.bf16.gmra.mxu1 %v3393_v46 }
 0x243   :  { %3001 = vst [vmem:[%s6134_s3 + $0x18] sm:$0xff] %v2886_v16  ;;  %2798 = vmatmul.bf16.gmra.mxu2 %v3397_v3 }
 0x244   :  { %2927 = vmatmul.bf16.gmra.mxu3 %v3401_v15 }
 0x246   :  { %v2759_v25 = vpop.f32.mrf.mxu2  ;;  %v2503_v56 = vpop.f32.mrf.mxu0 }
 0x247   :  { %v2888_v54 = vpop.f32.mrf.mxu3  ;;  %v2760_v27 = vadd.f32 %v2759_v25, %v2631_v43  ;;  %v2632_v8 = vpop.f32.mrf.mxu1  ;;  %v2504_v60 = vadd.f32 %v2503_v56, %v4881_v24  ;;  %v3422_v24 = vld [vmem:[%s6133_s0 + $0x2f0] sm:$0xf0] }
 0x248   :  { %v3425_v37 = vor.u32 %v4164_v29, %v3422_v24  ;;  %v4173_v29 = vld [vmem:[%s6133_s0 + $0x31c] sm:$0xf] }
 0x249   :  { %v2889_v13 = vadd.f32 %v2888_v54, %v2760_v27  ;;  %v2633_v30 = vadd.f32 %v2632_v8, %v2504_v60  ;;  %v4172_v60 = vld [vmem:[%s6133_s0 + $0x314] sm:$0xf]  ;;  %v3462_v24 = vld [vmem:[%s6133_s0 + $0x338] sm:$0xf0] }
 0x24b   :  { %3002 = vst [vmem:[%s6134_s3 + $0x20] sm:$0xff] %v2889_v13  ;;  %v4176_v13 = vld [vmem:[%s6133_s0 + $0x32c] sm:$0xf0] }
 0x24e   :  { %v2761_v32 = vpop.f32.mrf.mxu2  ;;  %v2506_v46 = vpop.f32.mrf.mxu0 }
 0x24f   :  { %v2890_v34 = vpop.f32.mrf.mxu3  ;;  %v2762_v42 = vadd.f32 %v2761_v32, %v2633_v30  ;;  %v2635_v48 = vpop.f32.mrf.mxu1  ;;  %v2507_v15 = vadd.f32 %v2506_v46, %v4886_v35  ;;  %v3452_v35 = vld [vmem:[%s6133_s0 + $0x310] sm:$0xf] }
 0x250   :  { %v3453_v17 = vor.u32 %v4176_v13, %v3452_v35  ;;  %v4181_v35 = vld [vmem:[%s6133_s0 + $0x35c] sm:$0xf] }
 0x251   :  { %v2891_v3 = vadd.f32 %v2890_v34, %v2762_v42  ;;  %2545 = vmatmul.bf16.gmra.mxu0 %v3421_v36  ;;  %v2636_v16 = vadd.f32 %v2635_v48, %v2507_v15  ;;  %v3465_v42 = vor.u32 %v4173_v29, %v3462_v24  ;;  %v3494_v13 = vld [vmem:[%s6133_s0 + $0x378] sm:$0xf0] }
 0x252   :  { %2674 = vmatmul.bf16.gmra.mxu1 %v3425_v37  ;;  %v3461_v37 = vor.u32 %v4177_v28, %v3460_v0 }
 0x253   :  { %3003 = vst [vmem:[%s6134_s3 + $0x28] sm:$0xff] %v2891_v3  ;;  %2803 = vmatmul.bf16.gmra.mxu2 %v3429_v49 }
 0x254   :  { %2932 = vmatmul.bf16.gmra.mxu3 %v3433_v55 }
 0x256   :  { %v2764_v21 = vpop.f32.mrf.mxu2  ;;  %v2508_v54 = vpop.f32.mrf.mxu0 }
 0x257   :  { %v2893_v43 = vpop.f32.mrf.mxu3  ;;  %v2765_v25 = vadd.f32 %v2764_v21, %v2636_v16  ;;  %v2637_v27 = vpop.f32.mrf.mxu1  ;;  %v2509_v8 = vadd.f32 %v2508_v54, %v4915_v58  ;;  %v3454_v58 = vld [vmem:[%s6133_s0 + $0x330] sm:$0xf0]  ;;  %v4184_v54 = vld [vmem:[%s6133_s0 + $0x36c] sm:$0xf0] }
 0x258   :  { %v3457_v30 = vor.u32 %v4172_v60, %v3454_v58 }
 0x259   :  { %v2894_v56 = vadd.f32 %v2893_v43, %v2765_v25  ;;  %v2638_v18 = vadd.f32 %v2637_v27, %v2509_v8  ;;  %v4180_v27 = vld [vmem:[%s6133_s0 + $0x354] sm:$0xf]  ;;  %v4185_v8 = vld [vmem:[%s6133_s0 + $0x374] sm:$0xf0] }
 0x25b   :  { %3004 = vst [vmem:[%s6134_s3 + $0x30] sm:$0xff] %v2894_v56  ;;  %v3492_v56 = vld [vmem:[%s6133_s0 + $0x358] sm:$0xf] }
 0x25e   :  { %v2766_v50 = vpop.f32.mrf.mxu2  ;;  %v2511_v34 = vpop.f32.mrf.mxu0 }
 0x25f   :  { %v2895_v5 = vpop.f32.mrf.mxu3  ;;  %v2767_v32 = vadd.f32 %v2766_v50, %v2638_v18  ;;  %v2640_v36 = vpop.f32.mrf.mxu1  ;;  %v2512_v48 = vadd.f32 %v2511_v34, %v4920_v6  ;;  %v3484_v6 = vld [vmem:[%s6133_s0 + $0x350] sm:$0xf] }
 0x260   :  { %v3485_v28 = vor.u32 %v4184_v54, %v3484_v6 }
 0x261   :  { %v2896_v46 = vadd.f32 %v2895_v5, %v2767_v32  ;;  %2550 = vmatmul.bf16.gmra.mxu0 %v3453_v17  ;;  %v2641_v49 = vadd.f32 %v2640_v36, %v2512_v48  ;;  %v3493_v5 = vor.u32 %v4185_v8, %v3492_v56  ;;  %v3497_v17 = vor.u32 %v4181_v35, %v3494_v13 }
 0x262   :  { %2679 = vmatmul.bf16.gmra.mxu1 %v3457_v30 }
 0x263   :  { %3005 = vst [vmem:[%s6134_s3 + $0x38] sm:$0xff] %v2896_v46  ;;  %2808 = vmatmul.bf16.gmra.mxu2 %v3461_v37 }
 0x264   :  { %2937 = vmatmul.bf16.gmra.mxu3 %v3465_v42 }
 0x266   :  { %v2769_v55 = vpop.f32.mrf.mxu2  ;;  %v2513_v16 = vpop.f32.mrf.mxu0 }
 0x267   :  { %v2898_v3 = vpop.f32.mrf.mxu3  ;;  %v2770_v15 = vadd.f32 %v2769_v55, %v2641_v49  ;;  %v2642_v21 = vpop.f32.mrf.mxu1  ;;  %v2514_v25 = vadd.f32 %v2513_v16, %v4949_v31  ;;  %v3486_v31 = vld [vmem:[%s6133_s0 + $0x370] sm:$0xf0]  ;;  %v3524_v16 = vld [vmem:[%s6133_s0 + $0x398] sm:$0xf] }
 0x268   :  { %v3489_v29 = vor.u32 %v4180_v27, %v3486_v31 }
 0x269   :  { %v2899_v43 = vadd.f32 %v2898_v3, %v2770_v15  ;;  %v2643_v60 = vadd.f32 %v2642_v21, %v2514_v25  ;;  %v4192_v3 = vld [vmem:[%s6133_s0 + $0x3ac] sm:$0xf0]  ;;  %v4188_v15 = vld [vmem:[%s6133_s0 + $0x394] sm:$0xf]  ;;  %v4193_v21 = vld [vmem:[%s6133_s0 + $0x3b4] sm:$0xf0] }
 0x26a   :  { %v3526_v25 = vld [vmem:[%s6133_s0 + $0x3b8] sm:$0xf0] }
 0x26b   :  { %3006 = vst [vmem:[%s6134_s3 + $0x40] sm:$0xff] %v2899_v43  ;;  %v4189_v43 = vld [vmem:[%s6133_s0 + $0x39c] sm:$0xf] }
 0x26e   :  { %v2771_v58 = vpop.f32.mrf.mxu2  ;;  %v2516_v18 = vpop.f32.mrf.mxu0 }
 0x26f   :  { %v2900_v0 = vpop.f32.mrf.mxu3  ;;  %v2772_v24 = vadd.f32 %v2771_v58, %v2643_v60  ;;  %v2645_v50 = vpop.f32.mrf.mxu1  ;;  %v2517_v32 = vadd.f32 %v2516_v18, %v4963_v45  ;;  %v3516_v45 = vld [vmem:[%s6133_s0 + $0x390] sm:$0xf]  ;;  %v3525_v60 = vor.u32 %v4193_v21, %v3524_v16  ;;  %v3529_v58 = vor.u32 %v4189_v43, %v3526_v25 }
 0x270   :  { %v3517_v31 = vor.u32 %v4192_v3, %v3516_v45 }
 0x271   :  { %v2901_v30 = vadd.f32 %v2900_v0, %v2772_v24  ;;  %2555 = vmatmul.bf16.gmra.mxu0 %v3485_v28  ;;  %v2646_v34 = vadd.f32 %v2645_v50, %v2517_v32 }
 0x272   :  { %2684 = vmatmul.bf16.gmra.mxu1 %v3489_v29 }
 0x273   :  { %3007 = vst [vmem:[%s6134_s3 + $0x48] sm:$0xff] %v2901_v30  ;;  %2813 = vmatmul.bf16.gmra.mxu2 %v3493_v5 }
 0x274   :  { %2942 = vmatmul.bf16.gmra.mxu3 %v3497_v17 }
 0x276   :  { %v2774_v36 = vpop.f32.mrf.mxu2  ;;  %v2518_v46 = vpop.f32.mrf.mxu0 }
 0x277   :  { %v2903_v37 = vpop.f32.mrf.mxu3  ;;  %v2775_v42 = vadd.f32 %v2774_v36, %v2646_v34  ;;  %v2647_v48 = vpop.f32.mrf.mxu1  ;;  %v2519_v55 = vadd.f32 %v2518_v46, %v4995_v9  ;;  %v3518_v9 = vld [vmem:[%s6133_s0 + $0x3b0] sm:$0xf0]  ;;  %v4200_v34 = vld [vmem:[%s6133_s0 + $0x3ec] sm:$0xf0]  ;;  %v4197_v46 = vld [vmem:[%s6133_s0 + $0x3dc] sm:$0xf] }
 0x278   :  { %v3521_v56 = vor.u32 %v4188_v15, %v3518_v9  ;;  %v4196_v36 = vld [vmem:[%s6133_s0 + $0x3d4] sm:$0xf] }
 0x279   :  { %v2904_v49 = vadd.f32 %v2903_v37, %v2775_v42  ;;  %v2648_v6 = vadd.f32 %v2647_v48, %v2519_v55  ;;  %v3556_v37 = vld [vmem:[%s6133_s0 + $0x3d8] sm:$0xf]  ;;  %v3558_v48 = vld [vmem:[%s6133_s0 + $0x3f8] sm:$0xf0] }
 0x27a   :  { %v4201_v42 = vld [vmem:[%s6133_s0 + $0x3f4] sm:$0xf0]  ;;  %v3561_v25 = vor.u32 %v4197_v46, %v3558_v48 }
 0x27b   :  { %3008 = vst [vmem:[%s6134_s3 + $0x50] sm:$0xff] %v2904_v49  ;;  %v3557_v43 = vor.u32 %v4201_v42, %v3556_v37 }
 0x27e   :  { %v2776_v54 = vpop.f32.mrf.mxu2  ;;  %v2521_v35 = vpop.f32.mrf.mxu0 }
 0x27f   :  { %v2905_v27 = vpop.f32.mrf.mxu3  ;;  %v2777_v8 = vadd.f32 %v2776_v54, %v2648_v6  ;;  %v2650_v13 = vpop.f32.mrf.mxu1  ;;  %v2522_v28 = vadd.f32 %v2521_v35, %v5000_v20  ;;  %v3548_v20 = vld [vmem:[%s6133_s0 + $0x3d0] sm:$0xf] }
 0x280   :  { %v3549_v3 = vor.u32 %v4200_v34, %v3548_v20 }
 0x281   :  { %v2906_v0 = vadd.f32 %v2905_v27, %v2777_v8  ;;  %2560 = vmatmul.bf16.gmra.mxu0 %v3517_v31  ;;  %v2651_v29 = vadd.f32 %v2650_v13, %v2522_v28  ;;  %v4204_v28 = vld [vmem:[%s6133_s0 + $0x414] sm:$0xf] }
 0x282   :  { %2689 = vmatmul.bf16.gmra.mxu1 %v3521_v56 }
 0x283   :  { %3009 = vst [vmem:[%s6134_s3 + $0x58] sm:$0xff] %v2906_v0  ;;  %2818 = vmatmul.bf16.gmra.mxu2 %v3525_v60  ;;  %v4208_v0 = vld [vmem:[%s6133_s0 + $0x42c] sm:$0xf0] }
 0x284   :  { %2947 = vmatmul.bf16.gmra.mxu3 %v3529_v58 }
 0x286   :  { %v2779_v24 = vpop.f32.mrf.mxu2  ;;  %v2523_v5 = vpop.f32.mrf.mxu0 }
 0x287   :  { %v2908_v18 = vpop.f32.mrf.mxu3  ;;  %v2780_v50 = vadd.f32 %v2779_v24, %v2651_v29  ;;  %v2652_v17 = vpop.f32.mrf.mxu1  ;;  %v2524_v32 = vadd.f32 %v2523_v5, %v5029_v47  ;;  %v3550_v47 = vld [vmem:[%s6133_s0 + $0x3f0] sm:$0xf0]  ;;  %v3588_v29 = vld [vmem:[%s6133_s0 + $0x418] sm:$0xf] }
 0x288   :  { %v3553_v15 = vor.u32 %v4196_v36, %v3550_v47  ;;  %v4209_v24 = vld [vmem:[%s6133_s0 + $0x434] sm:$0xf0] }
 0x289   :  { %v2909_v30 = vadd.f32 %v2908_v18, %v2780_v50  ;;  %v2653_v49 = vadd.f32 %v2652_v17, %v2524_v32  ;;  %v4205_v18 = vld [vmem:[%s6133_s0 + $0x41c] sm:$0xf]  ;;  %v3589_v37 = vor.u32 %v4209_v24, %v3588_v29 }
 0x28a   :  { %v3590_v50 = vld [vmem:[%s6133_s0 + $0x438] sm:$0xf0] }
 0x28b   :  { %3010 = vst [vmem:[%s6134_s3 + $0x60] sm:$0xff] %v2909_v30  ;;  %v3593_v42 = vor.u32 %v4205_v18, %v3590_v50 }
 0x28e   :  { %v2781_v55 = vpop.f32.mrf.mxu2  ;;  %v2526_v16 = vpop.f32.mrf.mxu0 }
 0x28f   :  { %v2910_v45 = vpop.f32.mrf.mxu3  ;;  %v2782_v9 = vadd.f32 %v2781_v55, %v2653_v49  ;;  %v2655_v21 = vpop.f32.mrf.mxu1  ;;  %v2527_v54 = vadd.f32 %v2526_v16, %v5034_v59  ;;  %v3580_v59 = vld [vmem:[%s6133_s0 + $0x410] sm:$0xf] }
 0x290   :  { %v3581_v32 = vor.u32 %v4208_v0, %v3580_v59 }
 0x291   :  { %v2911_v6 = vadd.f32 %v2910_v45, %v2782_v9  ;;  %2565 = vmatmul.bf16.gmra.mxu0 %v3549_v3  ;;  %v2656_v27 = vadd.f32 %v2655_v21, %v2527_v54  ;;  %v4217_v54 = vld [vmem:[%s6133_s0 + $0x474] sm:$0xf0] }
 0x292   :  { %2694 = vmatmul.bf16.gmra.mxu1 %v3553_v15 }
 0x293   :  { %3011 = vst [vmem:[%s6134_s3 + $0x68] sm:$0xff] %v2911_v6  ;;  %2823 = vmatmul.bf16.gmra.mxu2 %v3557_v43  ;;  %v4216_v43 = vld [vmem:[%s6133_s0 + $0x46c] sm:$0xf0]  ;;  %v3620_v6 = vld [vmem:[%s6133_s0 + $0x458] sm:$0xf] }
 0x294   :  { %2952 = vmatmul.bf16.gmra.mxu3 %v3561_v25  ;;  %v4212_v25 = vld [vmem:[%s6133_s0 + $0x454] sm:$0xf] }
 0x296   :  { %v2784_v31 = vpop.f32.mrf.mxu2  ;;  %v2528_v35 = vpop.f32.mrf.mxu0 }
 0x297   :  { %v2913_v56 = vpop.f32.mrf.mxu3  ;;  %v2785_v8 = vadd.f32 %v2784_v31, %v2656_v27  ;;  %v2657_v13 = vpop.f32.mrf.mxu1  ;;  %v2529_v58 = vadd.f32 %v2528_v35, %v5063_v23  ;;  %v3582_v23 = vld [vmem:[%s6133_s0 + $0x430] sm:$0xf0]  ;;  %v4213_v27 = vld [vmem:[%s6133_s0 + $0x45c] sm:$0xf] }
 0x298   :  { %v3585_v20 = vor.u32 %v4204_v28, %v3582_v23  ;;  %v3622_v31 = vld [vmem:[%s6133_s0 + $0x478] sm:$0xf0]  ;;  %v3621_v28 = vor.u32 %v4217_v54, %v3620_v6 }
 0x299   :  { %v2914_v60 = vadd.f32 %v2913_v56, %v2785_v8  ;;  %v2658_v5 = vadd.f32 %v2657_v13, %v2529_v58  ;;  %v3625_v23 = vor.u32 %v4213_v27, %v3622_v31 }
 0x29b   :  { %3012 = vst [vmem:[%s6134_s3 + $0x70] sm:$0xff] %v2914_v60 }
 0x29e   :  { %v2786_v17 = vpop.f32.mrf.mxu2  ;;  %v2531_v36 = vpop.f32.mrf.mxu0 }
 0x29f   :  { %v2915_v30 = vpop.f32.mrf.mxu3  ;;  %v2787_v34 = vadd.f32 %v2786_v17, %v2658_v5  ;;  %v2660_v47 = vpop.f32.mrf.mxu1  ;;  %v2532_v48 = vadd.f32 %v2531_v36, %v5077_v40  ;;  %v3612_v40 = vld [vmem:[%s6133_s0 + $0x450] sm:$0xf] }
 0x2a0   :  { %v3613_v13 = vor.u32 %v4216_v43, %v3612_v40  ;;  %v4224_v36 = vld [vmem:[%s6133_s0 + $0x4ac] sm:$0xf0] }
 0x2a1   :  { %v2916_v46 = vadd.f32 %v2915_v30, %v2787_v34  ;;  %2570 = vmatmul.bf16.gmra.mxu0 %v3581_v32  ;;  %v2661_v49 = vadd.f32 %v2660_v47, %v2532_v48  ;;  %v4220_v47 = vld [vmem:[%s6133_s0 + $0x494] sm:$0xf]  ;;  %v3654_v48 = vld [vmem:[%s6133_s0 + $0x4b8] sm:$0xf0] }
 0x2a2   :  { %2699 = vmatmul.bf16.gmra.mxu1 %v3585_v20 }
 0x2a3   :  { %3013 = vst [vmem:[%s6134_s3 + $0x78] sm:$0xff] %v2916_v46  ;;  %2828 = vmatmul.bf16.gmra.mxu2 %v3589_v37  ;;  %v3652_v37 = vld [vmem:[%s6133_s0 + $0x498] sm:$0xf]  ;;  %v4221_v46 = vld [vmem:[%s6133_s0 + $0x49c] sm:$0xf] }
 0x2a4   :  { %2957 = vmatmul.bf16.gmra.mxu3 %v3593_v42  ;;  %v4225_v42 = vld [vmem:[%s6133_s0 + $0x4b4] sm:$0xf0]  ;;  %v3657_v43 = vor.u32 %v4221_v46, %v3654_v48 }
 0x2a5   :  { %v3653_v40 = vor.u32 %v4225_v42, %v3652_v37 }
 0x2a6   :  { %v2789_v55 = vpop.f32.mrf.mxu2  ;;  %v2533_v15 = vpop.f32.mrf.mxu0 }
 0x2a7   :  { %v2918_v45 = vpop.f32.mrf.mxu3  ;;  %v2790_v3 = vadd.f32 %v2789_v55, %v2661_v49  ;;  %v2662_v9 = vpop.f32.mrf.mxu1  ;;  %v2534_v21 = vadd.f32 %v2533_v15, %v5109_v7  ;;  %v3614_v7 = vld [vmem:[%s6133_s0 + $0x470] sm:$0xf0] }
 0x2a8   :  { %v3617_v60 = vor.u32 %v4212_v25, %v3614_v7 }
 0x2a9   :  { %v2919_v16 = vadd.f32 %v2918_v45, %v2790_v3  ;;  %v2663_v56 = vadd.f32 %v2662_v9, %v2534_v21 }
 0x2ab   :  { %3014 = vst [vmem:[%s6134_s3 + $0x80] sm:$0xff] %v2919_v16 }
 0x2ae   :  { %v2791_v8 = vpop.f32.mrf.mxu2  ;;  %v2536_v59 = vpop.f32.mrf.mxu0 }
 0x2af   :  { %v2920_v35 = vpop.f32.mrf.mxu3  ;;  %v2792_v58 = vadd.f32 %v2791_v8, %v2663_v56  ;;  %v2665_v0 = vpop.f32.mrf.mxu1  ;;  %v2537_v24 = vadd.f32 %v2536_v59, %v5114_v19  ;;  %v3644_v19 = vld [vmem:[%s6133_s0 + $0x490] sm:$0xf]  ;;  %v3684_v59 = vld [vmem:[%s6133_s0 + $0x4d8] sm:$0xf] }
 0x2b0   :  { %v3645_v3 = vor.u32 %v4224_v36, %v3644_v19 }
 0x2b1   :  { %v2921_v29 = vadd.f32 %v2920_v35, %v2792_v58  ;;  %2575 = vmatmul.bf16.gmra.mxu0 %v3613_v13  ;;  %v2666_v18 = vadd.f32 %v2665_v0, %v2537_v24  ;;  %v4228_v58 = vld [vmem:[%s6133_s0 + $0x4d4] sm:$0xf]  ;;  %v4233_v0 = vld [vmem:[%s6133_s0 + $0x4f4] sm:$0xf0] }
 0x2b2   :  { %2704 = vmatmul.bf16.gmra.mxu1 %v3617_v60  ;;  %v4232_v60 = vld [vmem:[%s6133_s0 + $0x4ec] sm:$0xf0] }
 0x2b3   :  { %3015 = vst [vmem:[%s6134_s3 + $0x88] sm:$0xff] %v2921_v29  ;;  %2833 = vmatmul.bf16.gmra.mxu2 %v3621_v28  ;;  %v4229_v28 = vld [vmem:[%s6133_s0 + $0x4dc] sm:$0xf] }
 0x2b4   :  { %2962 = vmatmul.bf16.gmra.mxu3 %v3625_v23  ;;  %v3686_v23 = vld [vmem:[%s6133_s0 + $0x4f8] sm:$0xf0] }
 0x2b6   :  { %v2794_v50 = vpop.f32.mrf.mxu2  ;;  %v2538_v30 = vpop.f32.mrf.mxu0 }
 0x2b7   :  { %v2923_v5 = vpop.f32.mrf.mxu3  ;;  %v2795_v17 = vadd.f32 %v2794_v50, %v2666_v18  ;;  %v2667_v32 = vpop.f32.mrf.mxu1  ;;  %v2539_v34 = vadd.f32 %v2538_v30, %v5143_v51  ;;  %v3646_v51 = vld [vmem:[%s6133_s0 + $0x4b0] sm:$0xf0] }
 0x2b8   :  { %v3649_v15 = vor.u32 %v4220_v47, %v3646_v51 }
 0x2b9   :  { %v2924_v20 = vadd.f32 %v2923_v5, %v2795_v17  ;;  %v2668_v49 = vadd.f32 %v2667_v32, %v2539_v34  ;;  %v3689_v34 = vor.u32 %v4229_v28, %v3686_v23 }
 0x2bb   :  { %3016 = vst [vmem:[%s6134_s3 + $0x90] sm:$0xff] %v2924_v20  ;;  %v3685_v20 = vor.u32 %v4233_v0, %v3684_v59 }
 0x2be   :  { %v2796_v55 = vpop.f32.mrf.mxu2  ;;  %v2541_v16 = vpop.f32.mrf.mxu0 }
 0x2bf   :  { %v2925_v45 = vpop.f32.mrf.mxu3  ;;  %v2797_v9 = vadd.f32 %v2796_v55, %v2668_v49  ;;  %v2670_v21 = vpop.f32.mrf.mxu1  ;;  %v2542_v7 = vadd.f32 %v2541_v16, %v5148_v1  ;;  %v3676_v1 = vld [vmem:[%s6133_s0 + $0x4d0] sm:$0xf]  ;;  %v4237_v16 = vld [vmem:[%s6133_s0 + $0x51c] sm:$0xf] }
 0x2c0   :  { %v3677_v50 = vor.u32 %v4232_v60, %v3676_v1 }
 0x2c1   :  { %v2926_v25 = vadd.f32 %v2925_v45, %v2797_v9  ;;  %2580 = vmatmul.bf16.gmra.mxu0 %v3645_v3  ;;  %v2671_v6 = vadd.f32 %v2670_v21, %v2542_v7  ;;  %v4240_v45 = vld [vmem:[%s6133_s0 + $0x52c] sm:$0xf0]  ;;  %v4236_v3 = vld [vmem:[%s6133_s0 + $0x514] sm:$0xf]  ;;  %v4241_v9 = vld [vmem:[%s6133_s0 + $0x534] sm:$0xf0] }
 0x2c2   :  { %2709 = vmatmul.bf16.gmra.mxu1 %v3649_v15  ;;  %v3716_v15 = vld [vmem:[%s6133_s0 + $0x518] sm:$0xf]  ;;  %v3718_v21 = vld [vmem:[%s6133_s0 + $0x538] sm:$0xf0] }
 0x2c3   :  { %3017 = vst [vmem:[%s6134_s3 + $0x98] sm:$0xff] %v2926_v25  ;;  %2838 = vmatmul.bf16.gmra.mxu2 %v3653_v40 }
 0x2c4   :  { %2967 = vmatmul.bf16.gmra.mxu3 %v3657_v43 }
 0x2c6   :  { %v2799_v54 = vpop.f32.mrf.mxu2  ;;  %v2543_v56 = vpop.f32.mrf.mxu0 }
 0x2c7   :  { %v2928_v27 = vpop.f32.mrf.mxu3  ;;  %v2800_v31 = vadd.f32 %v2799_v54, %v2671_v6  ;;  %v2672_v8 = vpop.f32.mrf.mxu1  ;;  %v2544_v13 = vadd.f32 %v2543_v56, %v5177_v33  ;;  %v3678_v33 = vld [vmem:[%s6133_s0 + $0x4f0] sm:$0xf0]  ;;  %v3717_v56 = vor.u32 %v4241_v9, %v3716_v15 }
 0x2c8   :  { %v3681_v5 = vor.u32 %v4228_v58, %v3678_v33 }
 0x2c9   :  { %v2929_v35 = vadd.f32 %v2928_v27, %v2800_v31  ;;  %v2673_v29 = vadd.f32 %v2672_v8, %v2544_v13  ;;  %v3721_v8 = vor.u32 %v4237_v16, %v3718_v21  ;;  %v4256_v16 = vld [vmem:[%s6133_s0 + $0x5ac] sm:$0xf0]  ;;  %v4252_v21 = vld [vmem:[%s6133_s0 + $0x594] sm:$0xf] }
 0x2cb   :  { %3018 = vst [vmem:[%s6134_s3 + $0xa0] sm:$0xff] %v2929_v35 }
 0x2ce   :  { %v2801_v24 = vpop.f32.mrf.mxu2  ;;  %v2546_v30 = vpop.f32.mrf.mxu0 }
 0x2cf   :  { %v2930_v18 = vpop.f32.mrf.mxu3  ;;  %v2802_v17 = vadd.f32 %v2801_v24, %v2673_v29  ;;  %v2675_v32 = vpop.f32.mrf.mxu1  ;;  %v2547_v36 = vadd.f32 %v2546_v30, %v5191_v52  ;;  %v3708_v52 = vld [vmem:[%s6133_s0 + $0x510] sm:$0xf]  ;;  %v4244_v24 = vld [vmem:[%s6133_s0 + $0x554] sm:$0xf] }
 0x2d0   :  { %v3709_v7 = vor.u32 %v4240_v45, %v3708_v52  ;;  %v4248_v29 = vld [vmem:[%s6133_s0 + $0x56c] sm:$0xf0] }
 0x2d1   :  { %v2931_v19 = vadd.f32 %v2930_v18, %v2802_v17  ;;  %2585 = vmatmul.bf16.gmra.mxu0 %v3677_v50  ;;  %v2676_v47 = vadd.f32 %v2675_v32, %v2547_v36  ;;  %v3748_v18 = vld [vmem:[%s6133_s0 + $0x558] sm:$0xf]  ;;  %v3750_v17 = vld [vmem:[%s6133_s0 + $0x578] sm:$0xf0] }
 0x2d2   :  { %2714 = vmatmul.bf16.gmra.mxu1 %v3681_v5  ;;  %v4249_v50 = vld [vmem:[%s6133_s0 + $0x574] sm:$0xf0]  ;;  %v4245_v5 = vld [vmem:[%s6133_s0 + $0x55c] sm:$0xf] }
 0x2d3   :  { %3019 = vst [vmem:[%s6134_s3 + $0xa8] sm:$0xff] %v2931_v19  ;;  %2843 = vmatmul.bf16.gmra.mxu2 %v3685_v20 }
 0x2d4   :  { %2972 = vmatmul.bf16.gmra.mxu3 %v3689_v34 }
 0x2d6   :  { %v2804_v51 = vpop.f32.mrf.mxu2  ;;  %v2548_v46 = vpop.f32.mrf.mxu0 }
 0x2d7   :  { %v2933_v37 = vpop.f32.mrf.mxu3  ;;  %v2805_v42 = vadd.f32 %v2804_v51, %v2676_v47  ;;  %v2677_v48 = vpop.f32.mrf.mxu1  ;;  %v2549_v55 = vadd.f32 %v2548_v46, %v5223_v22  ;;  %v3710_v22 = vld [vmem:[%s6133_s0 + $0x530] sm:$0xf0] }
 0x2d8   :  { %v3713_v6 = vor.u32 %v4236_v3, %v3710_v22 }
 0x2d9   :  { %v2934_v49 = vadd.f32 %v2933_v37, %v2805_v42  ;;  %v2678_v40 = vadd.f32 %v2677_v48, %v2549_v55  ;;  %v3749_v37 = vor.u32 %v4249_v50, %v3748_v18  ;;  %v3753_v42 = vor.u32 %v4245_v5, %v3750_v17  ;;  %v4264_v18 = vld [vmem:[%s6133_s0 + $0x5ec] sm:$0xf0]  ;;  %v4260_v50 = vld [vmem:[%s6133_s0 + $0x5d4] sm:$0xf]  ;;  %v3812_v5 = vld [vmem:[%s6133_s0 + $0x5d8] sm:$0xf] }
 0x2da   :  { %v4265_v17 = vld [vmem:[%s6133_s0 + $0x5f4] sm:$0xf0] }
 0x2db   :  { %3020 = vst [vmem:[%s6134_s3 + $0xb0] sm:$0xff] %v2934_v49 }
 0x2de   :  { %v2806_v43 = vpop.f32.mrf.mxu2  ;;  %v2551_v27 = vpop.f32.mrf.mxu0 }
 0x2df   :  { %v2935_v25 = vpop.f32.mrf.mxu3  ;;  %v2807_v54 = vadd.f32 %v2806_v43, %v2678_v40  ;;  %v2680_v31 = vpop.f32.mrf.mxu1  ;;  %v2552_v13 = vadd.f32 %v2551_v27, %v5228_v38  ;;  %v3740_v38 = vld [vmem:[%s6133_s0 + $0x550] sm:$0xf]  ;;  %v3780_v40 = vld [vmem:[%s6133_s0 + $0x598] sm:$0xf] }
 0x2e0   :  { %v3741_v34 = vor.u32 %v4248_v29, %v3740_v38  ;;  %v4257_v43 = vld [vmem:[%s6133_s0 + $0x5b4] sm:$0xf0] }
 0x2e1   :  { %v2936_v35 = vadd.f32 %v2935_v25, %v2807_v54  ;;  %2590 = vmatmul.bf16.gmra.mxu0 %v3709_v7  ;;  %v2681_v1 = vadd.f32 %v2680_v31, %v2552_v13  ;;  %v4253_v25 = vld [vmem:[%s6133_s0 + $0x59c] sm:$0xf] }
 0x2e2   :  { %2719 = vmatmul.bf16.gmra.mxu1 %v3713_v6  ;;  %v3782_v7 = vld [vmem:[%s6133_s0 + $0x5b8] sm:$0xf0] }
 0x2e3   :  { %3021 = vst [vmem:[%s6134_s3 + $0xb8] sm:$0xff] %v2936_v35  ;;  %2848 = vmatmul.bf16.gmra.mxu2 %v3717_v56 }
 0x2e4   :  { %2977 = vmatmul.bf16.gmra.mxu3 %v3721_v8 }
 0x2e6   :  { %v2809_v60 = vpop.f32.mrf.mxu2  ;;  %v2553_v59 = vpop.f32.mrf.mxu0 }
 0x2e7   :  { %v2938_v58 = vpop.f32.mrf.mxu3  ;;  %v2810_v33 = vadd.f32 %v2809_v60, %v2681_v1  ;;  %v2682_v0 = vpop.f32.mrf.mxu1  ;;  %v2554_v23 = vadd.f32 %v2553_v59, %v5257_v10  ;;  %v3742_v10 = vld [vmem:[%s6133_s0 + $0x570] sm:$0xf0]  ;;  %v3781_v1 = vor.u32 %v4257_v43, %v3780_v40  ;;  %v3785_v60 = vor.u32 %v4253_v25, %v3782_v7 }
 0x2e8   :  { %v3745_v19 = vor.u32 %v4244_v24, %v3742_v10 }
 0x2e9   :  { %v2939_v28 = vadd.f32 %v2938_v58, %v2810_v33  ;;  %v2683_v30 = vadd.f32 %v2682_v0, %v2554_v23 }
 0x2eb   :  { %3022 = vst [vmem:[%s6134_s3 + $0xc0] sm:$0xff] %v2939_v28 }
 0x2ee   :  { %v2811_v32 = vpop.f32.mrf.mxu2  ;;  %v2556_v47 = vpop.f32.mrf.mxu0 }
 0x2ef   :  { %v2940_v20 = vpop.f32.mrf.mxu3  ;;  %v2812_v36 = vadd.f32 %v2811_v32, %v2683_v30  ;;  %v2685_v51 = vpop.f32.mrf.mxu1  ;;  %v2557_v48 = vadd.f32 %v2556_v47, %v5262_v26  ;;  %v3772_v26 = vld [vmem:[%s6133_s0 + $0x590] sm:$0xf]  ;;  %v4261_v30 = vld [vmem:[%s6133_s0 + $0x5dc] sm:$0xf] }
 0x2f0   :  { %v3773_v31 = vor.u32 %v4256_v16, %v3772_v26  ;;  %v3814_v32 = vld [vmem:[%s6133_s0 + $0x5f8] sm:$0xf0] }
 0x2f1   :  { %v2941_v46 = vadd.f32 %v2940_v20, %v2812_v36  ;;  %2595 = vmatmul.bf16.gmra.mxu0 %v3741_v34  ;;  %v2686_v49 = vadd.f32 %v2685_v51, %v2557_v48  ;;  %v3817_v48 = vor.u32 %v4261_v30, %v3814_v32 }
 0x2f2   :  { %2724 = vmatmul.bf16.gmra.mxu1 %v3745_v19 }
 0x2f3   :  { %3023 = vst [vmem:[%s6134_s3 + $0xc8] sm:$0xff] %v2941_v46  ;;  %2853 = vmatmul.bf16.gmra.mxu2 %v3749_v37  ;;  %v3813_v46 = vor.u32 %v4265_v17, %v3812_v5 }
 0x2f4   :  { %2982 = vmatmul.bf16.gmra.mxu3 %v3753_v42 }
 0x2f6   :  { %v2814_v55 = vpop.f32.mrf.mxu2  ;;  %v2558_v3 = vpop.f32.mrf.mxu0 }
 0x2f7   :  { %v2943_v52 = vpop.f32.mrf.mxu3  ;;  %v2815_v45 = vadd.f32 %v2814_v55, %v2686_v49  ;;  %v2687_v22 = vpop.f32.mrf.mxu1  ;;  %v2559_v9 = vadd.f32 %v2558_v3, %v5291_v62  ;;  %v3774_v62 = vld [vmem:[%s6133_s0 + $0x5b0] sm:$0xf0] }
 0x2f8   :  { %v3777_v56 = vor.u32 %v4252_v21, %v3774_v62 }
 0x2f9   :  { %v2944_v15 = vadd.f32 %v2943_v52, %v2815_v45  ;;  %v2688_v6 = vadd.f32 %v2687_v22, %v2559_v9 }
 0x2fb   :  { %3024 = vst [vmem:[%s6134_s3 + $0xd0] sm:$0xff] %v2944_v15 }
 0x2fe   :  { %v2816_v54 = vpop.f32.mrf.mxu2  ;;  %v2561_v35 = vpop.f32.mrf.mxu0 }
 0x2ff   :  { %v2945_v27 = vpop.f32.mrf.mxu3  ;;  %v2817_v8 = vadd.f32 %v2816_v54, %v2688_v6  ;;  %v2690_v13 = vpop.f32.mrf.mxu1  ;;  %v2562_v33 = vadd.f32 %v2561_v35, %v5296_v14  ;;  %v3804_v14 = vld [vmem:[%s6133_s0 + $0x5d0] sm:$0xf] }
 0x300   :  { %v3805_v36 = vor.u32 %v4264_v18, %v3804_v14 }
 0x301   :  { %v2946_v58 = vadd.f32 %v2945_v27, %v2817_v8  ;;  %2600 = vmatmul.bf16.gmra.mxu0 %v3773_v31  ;;  %v2691_v59 = vadd.f32 %v2690_v13, %v2562_v33 }
 0x302   :  { %2729 = vmatmul.bf16.gmra.mxu1 %v3777_v56 }
 0x303   :  { %3025 = vst [vmem:[%s6134_s3 + $0xd8] sm:$0xff] %v2946_v58  ;;  %2858 = vmatmul.bf16.gmra.mxu2 %v3781_v1 }
 0x304   :  { %2987 = vmatmul.bf16.gmra.mxu3 %v3785_v60 }
 0x306   :  { %v2819_v0 = vpop.f32.mrf.mxu2  ;;  %v2563_v38 = vpop.f32.mrf.mxu0 }
 0x307   :  { %v2948_v28 = vpop.f32.mrf.mxu3  ;;  %v2820_v23 = vadd.f32 %v2819_v0, %v2691_v59  ;;  %v2692_v29 = vpop.f32.mrf.mxu1  ;;  %v2564_v10 = vadd.f32 %v2563_v38, %v5322_v53  ;;  %v3806_v53 = vld [vmem:[%s6133_s0 + $0x5f0] sm:$0xf0] }
 0x308   :  { %v3809_v47 = vor.u32 %v4260_v50, %v3806_v53 }
 0x309   :  { %v2949_v24 = vadd.f32 %v2948_v28, %v2820_v23  ;;  %v2693_v20 = vadd.f32 %v2692_v29, %v2564_v10 }
 0x30b   :  { %3026 = vst [vmem:[%s6134_s3 + $0xe0] sm:$0xff] %v2949_v24 }
 0x30e   :  { %v2821_v34 = vpop.f32.mrf.mxu2  ;;  %v2566_v37 = vpop.f32.mrf.mxu0 }
 0x30f   :  { %v2950_v19 = vpop.f32.mrf.mxu3  ;;  %v2822_v51 = vadd.f32 %v2821_v34, %v2693_v20  ;;  %v2695_v42 = vpop.f32.mrf.mxu1  ;;  %v2567_v55 = vadd.f32 %v2566_v37, %v5324_v4 }
 0x311   :  { %v2951_v49 = vadd.f32 %v2950_v19, %v2822_v51  ;;  %2605 = vmatmul.bf16.gmra.mxu0 %v3805_v36  ;;  %v2696_v52 = vadd.f32 %v2695_v42, %v2567_v55  ;;  %v6143_v42 = vld [vmem:[#allocation2_spill] sm:$0xff] }
 0x312   :  { %2734 = vmatmul.bf16.gmra.mxu1 %v3809_v47 }
 0x313   :  { %3027 = vst [vmem:[%s6134_s3 + $0xe8] sm:$0xff] %v2951_v49  ;;  %2863 = vmatmul.bf16.gmra.mxu2 %v3813_v46 }
 0x314   :  { %2992 = vmatmul.bf16.gmra.mxu3 %v3817_v48 }
 0x316   :  { %v2824_v45 = vpop.f32.mrf.mxu2  ;;  %v2568_v15 = vpop.f32.mrf.mxu0 }
 0x317   :  { %v2953_v3 = vpop.f32.mrf.mxu3  ;;  %v2825_v22 = vadd.f32 %v2824_v45, %v2696_v52  ;;  %v2697_v9 = vpop.f32.mrf.mxu1  ;;  %v2569_v16 = vadd.f32 %v2568_v15, %v5353_v44 }
 0x319   :  { %v2954_v26 = vadd.f32 %v2953_v3, %v2825_v22  ;;  %v2698_v4 = vadd.f32 %v2697_v9, %v2569_v16  ;;  %v6144_v22 = vld [vmem:[#allocation3_spill] sm:$0xff] }
 0x31b   :  { %3028 = vst [vmem:[%s6134_s3 + $0xf0] sm:$0xff] %v2954_v26 }
 0x31e   :  { %v2826_v21 = vpop.f32.mrf.mxu2  ;;  %v2571_v43 = vpop.f32.mrf.mxu0 }
 0x31f   :  { %v2955_v62 = vpop.f32.mrf.mxu3  ;;  %v2827_v40 = vadd.f32 %v2826_v21, %v2698_v4  ;;  %v2700_v25 = vpop.f32.mrf.mxu1  ;;  %v2572_v6 = vadd.f32 %v2571_v43, %v5355_v63  ;;  %v6145_v43 = vld [vmem:[#allocation4_spill] sm:$0xff] }
 0x321   :  { %v2956_v7 = vadd.f32 %v2955_v62, %v2827_v40  ;;  %v2701_v54 = vadd.f32 %v2700_v25, %v2572_v6 }
 0x323   :  { %3029 = vst [vmem:[%s6134_s3 + $0xf8] sm:$0xff] %v2956_v7 }
 0x326   :  { %v2829_v27 = vpop.f32.mrf.mxu2  ;;  %v2573_v56 = vpop.f32.mrf.mxu0 }
 0x327   :  { %v2958_v44 = vpop.f32.mrf.mxu3  ;;  %v2830_v31 = vadd.f32 %v2829_v27, %v2701_v54  ;;  %v2702_v8 = vpop.f32.mrf.mxu1  ;;  %v2574_v13 = vadd.f32 %v2573_v56, %v5381_v41 }
 0x329   :  { %v2959_v35 = vadd.f32 %v2958_v44, %v2830_v31  ;;  %v2703_v1 = vadd.f32 %v2702_v8, %v2574_v13  ;;  %v6146_v8 = vld [vmem:[#allocation5_spill] sm:$0xff] }
 0x32b   :  { %3030 = vst [vmem:[%s6134_s3 + $0x100] sm:$0xff] %v2959_v35 }
 0x32e   :  { %v2831_v60 = vpop.f32.mrf.mxu2  ;;  %v2576_v33 = vpop.f32.mrf.mxu0 }
 0x32f   :  { %v2960_v63 = vpop.f32.mrf.mxu3  ;;  %v2832_v58 = vadd.f32 %v2831_v60, %v2703_v1  ;;  %v2705_v59 = vpop.f32.mrf.mxu1  ;;  %v2577_v28 = vadd.f32 %v2576_v33, %v5383_v57 }
 0x331   :  { %v2961_v0 = vadd.f32 %v2960_v63, %v2832_v58  ;;  %v2706_v23 = vadd.f32 %v2705_v59, %v2577_v28 }
 0x333   :  { %3031 = vst [vmem:[%s6134_s3 + $0x108] sm:$0xff] %v2961_v0  ;;  %v6147_v0 = vld [vmem:[#allocation6_spill] sm:$0xff] }
 0x336   :  { %v2834_v38 = vpop.f32.mrf.mxu2  ;;  %v2578_v24 = vpop.f32.mrf.mxu0 }
 0x337   :  { %v2963_v41 = vpop.f32.mrf.mxu3  ;;  %v2835_v29 = vadd.f32 %v2834_v38, %v2706_v23  ;;  %v2707_v10 = vpop.f32.mrf.mxu1  ;;  %v2579_v18 = vadd.f32 %v2578_v24, %v5409_v39 }
 0x339   :  { %v2964_v14 = vadd.f32 %v2963_v41, %v2835_v29  ;;  %v2708_v50 = vadd.f32 %v2707_v10, %v2579_v18  ;;  %v6148_v18 = vld [vmem:[#allocation7_spill] sm:$0xff] }
 0x33b   :  { %3032 = vst [vmem:[%s6134_s3 + $0x110] sm:$0xff] %v2964_v14 }
 0x33e   :  { %v2836_v53 = vpop.f32.mrf.mxu2  ;;  %v2581_v17 = vpop.f32.mrf.mxu0 }
 0x33f   :  { %v2965_v57 = vpop.f32.mrf.mxu3  ;;  %v2837_v5 = vadd.f32 %v2836_v53, %v2708_v50  ;;  %v2710_v30 = vpop.f32.mrf.mxu1  ;;  %v2582_v20 = vadd.f32 %v2581_v17, %v5411_v61 }
 0x341   :  { %v2966_v32 = vadd.f32 %v2965_v57, %v2837_v5  ;;  %v2711_v34 = vadd.f32 %v2710_v30, %v2582_v20 }
 0x343   :  { %3033 = vst [vmem:[%s6134_s3 + $0x118] sm:$0xff] %v2966_v32 }
 0x346   :  { %v2839_v19 = vpop.f32.mrf.mxu2  ;;  %v2583_v47 = vpop.f32.mrf.mxu0 }
 0x347   :  { %v2968_v39 = vpop.f32.mrf.mxu3  ;;  %v2840_v36 = vadd.f32 %v2839_v19, %v2711_v34  ;;  %v2712_v51 = vpop.f32.mrf.mxu1  ;;  %v2584_v46 = vadd.f32 %v2583_v47, %v6143_v42  ;;  %v6149_v34 = vld [vmem:[#allocation8_spill] sm:$0xff] }
 0x349   :  { %v2969_v37 = vadd.f32 %v2968_v39, %v2840_v36  ;;  %v2713_v48 = vadd.f32 %v2712_v51, %v2584_v46 }
 0x34b   :  { %3034 = vst [vmem:[%s6134_s3 + $0x120] sm:$0xff] %v2969_v37 }
 0x34e   :  { %v2841_v49 = vpop.f32.mrf.mxu2  ;;  %v2586_v52 = vpop.f32.mrf.mxu0 }
 0x34f   :  { %v2970_v61 = vpop.f32.mrf.mxu3  ;;  %v2842_v55 = vadd.f32 %v2841_v49, %v2713_v48  ;;  %v2715_v45 = vpop.f32.mrf.mxu1  ;;  %v2587_v15 = vadd.f32 %v2586_v52, %v6144_v22  ;;  %v6150_v48 = vld [vmem:[#allocation9_spill] sm:$0xff] }
 0x351   :  { %v2971_v3 = vadd.f32 %v2970_v61, %v2842_v55  ;;  %v2716_v9 = vadd.f32 %v2715_v45, %v2587_v15 }
 0x353   :  { %3035 = vst [vmem:[%s6134_s3 + $0x128] sm:$0xff] %v2971_v3 }
 0x356   :  { %v2844_v26 = vpop.f32.mrf.mxu2  ;;  %v2588_v21 = vpop.f32.mrf.mxu0 }
 0x357   :  { %v2973_v16 = vpop.f32.mrf.mxu3  ;;  %v2845_v4 = vadd.f32 %v2844_v26, %v2716_v9  ;;  %v2717_v62 = vpop.f32.mrf.mxu1  ;;  %v2589_v25 = vadd.f32 %v2588_v21, %v6145_v43 }
 0x359   :  { %v2974_v40 = vadd.f32 %v2973_v16, %v2845_v4  ;;  %v2718_v7 = vadd.f32 %v2717_v62, %v2589_v25 }
 0x35b   :  { %3036 = vst [vmem:[%s6134_s3 + $0x130] sm:$0xff] %v2974_v40 }
 0x35e   :  { %v2846_v6 = vpop.f32.mrf.mxu2  ;;  %v2591_v44 = vpop.f32.mrf.mxu0 }
 0x35f   :  { %v2975_v54 = vpop.f32.mrf.mxu3  ;;  %v2847_v27 = vadd.f32 %v2846_v6, %v2718_v7  ;;  %v2720_v31 = vpop.f32.mrf.mxu1  ;;  %v2592_v35 = vadd.f32 %v2591_v44, %v6146_v8 }
 0x361   :  { %v2976_v56 = vadd.f32 %v2975_v54, %v2847_v27  ;;  %v2721_v13 = vadd.f32 %v2720_v31, %v2592_v35 }
 0x363   :  { %3037 = vst [vmem:[%s6134_s3 + $0x138] sm:$0xff] %v2976_v56 }
 0x366   :  { %v2849_v1 = vpop.f32.mrf.mxu2  ;;  %v2593_v58 = vpop.f32.mrf.mxu0 }
 0x367   :  { %v2978_v60 = vpop.f32.mrf.mxu3  ;;  %v2850_v63 = vadd.f32 %v2849_v1, %v2721_v13  ;;  %v2722_v33 = vpop.f32.mrf.mxu1  ;;  %v2594_v28 = vadd.f32 %v2593_v58, %v6147_v0 }
 0x369   :  { %v2979_v59 = vadd.f32 %v2978_v60, %v2850_v63  ;;  %v2723_v23 = vadd.f32 %v2722_v33, %v2594_v28 }
 0x36b   :  { %3038 = vst [vmem:[%s6134_s3 + $0x140] sm:$0xff] %v2979_v59 }
 0x36e   :  { %v2851_v38 = vpop.f32.mrf.mxu2  ;;  %v2596_v24 = vpop.f32.mrf.mxu0 }
 0x36f   :  { %v2980_v41 = vpop.f32.mrf.mxu3  ;;  %v2852_v29 = vadd.f32 %v2851_v38, %v2723_v23  ;;  %v2725_v10 = vpop.f32.mrf.mxu1  ;;  %v2597_v50 = vadd.f32 %v2596_v24, %v6148_v18 }
 0x371   :  { %v2981_v14 = vadd.f32 %v2980_v41, %v2852_v29  ;;  %v2726_v53 = vadd.f32 %v2725_v10, %v2597_v50 }
 0x373   :  { %3039 = vst [vmem:[%s6134_s3 + $0x148] sm:$0xff] %v2981_v14 }
 0x376   :  { %v2854_v57 = vpop.f32.mrf.mxu2  ;;  %v2598_v30 = vpop.f32.mrf.mxu0 }
 0x377   :  { %v2983_v5 = vpop.f32.mrf.mxu3  ;;  %v2855_v17 = vadd.f32 %v2854_v57, %v2726_v53  ;;  %v2727_v32 = vpop.f32.mrf.mxu1  ;;  %v2599_v19 = vadd.f32 %v2598_v30, %v6149_v34 }
 0x379   :  { %v2984_v20 = vadd.f32 %v2983_v5, %v2855_v17  ;;  %v2728_v39 = vadd.f32 %v2727_v32, %v2599_v19 }
 0x37b   :  { %3040 = vst [vmem:[%s6134_s3 + $0x150] sm:$0xff] %v2984_v20 }
 0x37e   :  { %v2856_v36 = vpop.f32.mrf.mxu2  ;;  %v2601_v37 = vpop.f32.mrf.mxu0 }
 0x37f   :  { %v2985_v47 = vpop.f32.mrf.mxu3  ;;  %v2857_v51 = vadd.f32 %v2856_v36, %v2728_v39  ;;  %v2730_v42 = vpop.f32.mrf.mxu1  ;;  %v2602_v49 = vadd.f32 %v2601_v37, %v6150_v48 }
 0x381   :  { %v2986_v46 = vadd.f32 %v2985_v47, %v2857_v51  ;;  %v2731_v61 = vadd.f32 %v2730_v42, %v2602_v49 }
 0x383   :  { %3041 = vst [vmem:[%s6134_s3 + $0x158] sm:$0xff] %v2986_v46 }
 0x386   :  { %v2859_v55 = vpop.f32.mrf.mxu2  ;;  %v2603_v3 = vpop.f32.mrf.mxu0 }
 0x387   :  { %v2988_v52 = vpop.f32.mrf.mxu3  ;;  %v2860_v45 = vadd.f32 %v2859_v55, %v2731_v61  ;;  %v2732_v22 = vpop.f32.mrf.mxu1  ;;  %v2604_v9 = vadd.f32 %v2603_v3, %v5549_v12 }
 0x389   :  { %v2989_v15 = vadd.f32 %v2988_v52, %v2860_v45  ;;  %v2733_v26 = vadd.f32 %v2732_v22, %v2604_v9 }
 0x38b   :  { %3042 = vst [vmem:[%s6134_s3 + $0x160] sm:$0xff] %v2989_v15 }
 0x38e   :  { %v2861_v16 = vpop.f32.mrf.mxu2  ;;  %v2606_v62 = vpop.f32.mrf.mxu0 }
 0x38f   :  { %v2990_v4 = vpop.f32.mrf.mxu3  ;;  %v2862_v21 = vadd.f32 %v2861_v16, %v2733_v26  ;;  %v2607_v43 = vadd.f32 %v2606_v62, %v5551_v2  ;;  %v2735_v25 = vpop.f32.mrf.mxu1 }
 0x391   :  { %v2991_v40 = vadd.f32 %v2990_v4, %v2862_v21  ;;  %v2736_v7 = vadd.f32 %v2735_v25, %v2607_v43 }
 0x393   :  { %3043 = vst [vmem:[%s6134_s3 + $0x168] sm:$0xff] %v2991_v40 }
 0x396   :  { %v2864_v6 = vpop.f32.mrf.mxu2  ;;  %v2608_v27 = vpop.f32.mrf.mxu0 }
 0x397   :  { %v2993_v12 = vpop.f32.mrf.mxu3  ;;  %v2865_v54 = vadd.f32 %v2864_v6, %v2736_v7  ;;  %v2609_v31 = vadd.f32 %v2608_v27, %v5577_v11  ;;  %v2737_v56 = vpop.f32.mrf.mxu1 }
 0x399   :  { %v2994_v44 = vadd.f32 %v2993_v12, %v2865_v54  ;;  %v2738_v8 = vadd.f32 %v2737_v56, %v2609_v31 }
 0x39b   :  { %3044 = vst [vmem:[%s6134_s3 + $0x170] sm:$0xff] %v2994_v44 }
 0x39e   :  { %v2866_v2 = vpop.f32.mrf.mxu2 }
 0x39f   :  { %v2867_v35 = vadd.f32 %v2866_v2, %v2738_v8  ;;  %v2995_v13 = vpop.f32.mrf.mxu3 }
 0x3a1   :  { %v2996_v1 = vadd.f32 %v2995_v13, %v2867_v35 }
 0x3a3   :  { %3045 = vst [vmem:[%s6134_s3 + $0x178] sm:$0xff] %v2996_v1 }

// kernel: gfpgan_forward.20
= control target key start
LH: loop header
LB: loop body
LE: loop exit
PB: predicated region body
PF: predicated region fallthrough
CT: control target
= control target key end

     0   :  { %v89_v2 = vmov 0   ;;  %vm51_vm0 = vcmask 261120   ;;  %s141_s1 = inlined_call_operand.vmem [shape: bf16[32,128], index: 1, kind: input, shape index: {}]   ;;  %s142_s0 = inlined_call_operand.vmem [shape: bf16[1,1,8,32], index: 0, kind: input, shape index: {}]   ;;  %s143_s2 = inlined_call_operand.vmem [shape: f32[1,32], index: 2, kind: input, shape index: {}]   ;;  %s144_s3 = inlined_call_operand.vmem [shape: f32[8,1], index: 3, kind: input, shape index: {}]   ;;  %s145_s4 = inlined_call_operand.vmem [shape: f32[8,128], index: 4, kind: input, shape index: {}]   ;;  %s146_s5 = inlined_call_operand.vmem [shape: f32[1,8,128], index: 5, kind: output, shape index: {}]  }
   0x1   :  { %v85_v0 = vld [vmem:[%s141_s1 + $0x8] sm:$0xff]  ;;  %v21_v1 = vld [vmem:[%s142_s0] sm:$0xf]  ;;  %87 = vset.pattern.permute.xlu0 %v89_v2 }
   0x2   :  { %v22_v3 = vunpack.c.l.bf16 %v21_v1  ;;  %v88_v4 = vld [vmem:[%s143_s2] ss:$0 sm:$0xff]  ;;  %61 = vmatpush.bf16.msra.mxu0 %v85_v0 }
   0x3   :  { %v33_v5 = vld [vmem:[%s144_s3] sm:$0xff] }
   0x4   :  { %v84_v6 = vld [vmem:[%s141_s1] sm:$0xff]  ;;  %36 = vperm.xlu0 %87, %v33_v5   ;;  %v27_v7 = vmul.f32 %v88_v4, %v22_v3 }
   0x5   :  { %v68_v11 = vld [vmem:[%s145_s4] sm:$0xff] }
   0x6   :  { %v28_v8 = vpack.c.bf16 %v27_v7, %v27_v7  ;;  %62 = vmatpush.bf16.msra.mxu0 %v84_v6 }
   0x9   :  { %83 = vmatmul.msk.bf16.vlgmr.msra.gmra.mxu0 %vm51_vm0, %v28_v8 }
  0x76   :  { %v37_v9 = vpop.permute.xlu0 %36 }
  0x86   :  { %v64_v10 = vpop.f32.mrf.mxu0 }
  0x87   :  { %v65_v12 = vadd.f32 %v64_v10, %v37_v9 }
  0x89   :  { %v69_v13 = vadd.f32 %v68_v11, %v65_v12 }
  0x8b   :  { %70 = vst [vmem:[%s146_s5] sm:$0xff] %v69_v13 }
  0x8e   :  { %v66_v14 = vpop.f32.mrf.mxu0 }

// kernel: gfpgan_forward.18
= control target key start
LH: loop header
LB: loop body
LE: loop exit
PB: predicated region body
PF: predicated region fallthrough
CT: control target
= control target key end

     0   :  { %s1219_s21 = smov 0   ;;  %s1408_s0 = inlined_call_operand.vmem [shape: bf16[4,9,32,32], index: 0, kind: input, shape index: {}]   ;;  %s1409_s1 = inlined_call_operand.vmem [shape: bf16[32,256], index: 1, kind: input, shape index: {}]   ;;  %s1410_s2 = inlined_call_operand.vmem [shape: f32[1,32], index: 2, kind: input, shape index: {}]   ;;  %s1411_s3 = inlined_call_operand.vmem [shape: f32[32,1], index: 3, kind: input, shape index: {}]   ;;  %s1412_s4 = inlined_call_operand.vmem [shape: f32[32,1], index: 4, kind: input, shape index: {}]   ;;  %s1413_s5 = inlined_call_operand.vmem [shape: f32[4,1,128], index: 5, kind: input, shape index: {}]   ;;  %s1414_s6 = inlined_call_operand.vmem [shape: bf16[4,32,128], index: 6, kind: output, shape index: {}]  }
   0x1 LB: > { %s951_s22 = sadd.s32 4294967295, %s1173_s21   ;;  %p955_p0 = scmp.ge.s32.totalorder %s1173_s21, 1  ;;  %s1173_s21 = sphi %s1219_s21, %s16_s21  }
   0x2   : > { %p220_p1 = scmp.lt.s32.totalorder %s1173_s21, 5 }
   0x4   : > { %p221_p2 = pnand %p955_p0, %p220_p1 }
   0x5   : > { %s1175_s7 = smov (!%p221_p2), 127   ;;  %s1176_s8 = smov (!%p221_p2), 126  }
   0x6   : > { %224 = sbr.rel (%p221_p2) target bundleno = 380 (0x17c), region = 44  ;;  %s1177_s17 = smov (!%p221_p2), 122  }
   0x7   : > { %s1178_s18 = smov (!%p221_p2), 121   ;;  %s1179_s19 = smov (!%p221_p2), 116  }
   0x8   : > { %s1180_s20 = smov (!%p221_p2), 115   ;;  %s1181_s23 = smov (!%p221_p2), 120  }
   0x9   : > { %s1182_s24 = smov (!%p221_p2), 114   ;;  %p253_p3 = scmp.lt.s32.totalorder (!%p221_p2), %s951_s22, 3 }
   0xb   : > { %v973_v0 = vld [vmem:[%s1409_s1 + $0x10] sm:$0xf]  ;;  %v1041_v1 = vld [vmem:[%s1409_s1 + $0x14] sm:$0xf0]  ;;  %v965_v3 = vld [vmem:[%s1409_s1] sm:$0xf] }
   0xc   : > { %v974_v2 = vor.u32 %v1041_v1, %v973_v0  ;;  %v1039_v4 = vld [vmem:[%s1409_s1 + $0x4] sm:$0xf0]  ;;  %v1040_v6 = vld [vmem:[%s1409_s1 + $0x14] sm:$0xf]  ;;  %v975_v7 = vld [vmem:[%s1409_s1 + $0x18] sm:$0xf0] }
   0xd   : > { %v966_v5 = vor.u32 %v1039_v4, %v965_v3  ;;  %v1038_v8 = vld [vmem:[%s1409_s1 + $0x4] sm:$0xf]  ;;  %v967_v9 = vld [vmem:[%s1409_s1 + $0x8] sm:$0xf0]  ;;  %v978_v10 = vor.u32 %v1040_v6, %v975_v7  ;;  %vm423_vm0 = vcmask 1031168   ;;  %s1416_s22 = smov (!%p253_p3, %s951_s22), 3 }
   0xe   : > { %328 = vrot.lane.b32.xlu0 %v974_v2, %s1175_s7  ;;  %419 = vrot.lane.b32.xlu2 %v974_v2, %s1176_s8  ;;  %v970_v11 = vor.u32 %v1038_v8, %v967_v9  ;;  %s1144_s25 = smul.u32 144, %s1416_s22  ;;  %v1269_v20 = vld [vmem:[%s1410_s2] ss:$0 sm:$0xff]  ;;  %vm332_vm1 = vcmask 1039360   ;;  %v987_v27 = vld [vmem:[%s1409_s1 + $0x10] sm:$0xf]  ;;  %s260_s12 = scalar_lea.vmem %s1413_s5, %s1416_s22 }
   0xf   : > { %324 = vrot.lane.b32.xlu1 %v966_v5, %s1175_s7  ;;  %v1037_v28 = vld [vmem:[%s1409_s1 + $0x14] sm:$0xf0]  ;;  %v983_v36 = vld [vmem:[%s1409_s1] sm:$0xf]  ;;  %v1036_v37 = vld [vmem:[%s1409_s1 + $0x4] sm:$0xf0] }
  0x10   : > { %s1262_s28 = scalar_lea.vmem %s1408_s0, %s1144_s25  ;;  %v988_v35 = vor.u32 %v1037_v28, %v987_v27  ;;  %vm337_vm2 = vcmask 261120   ;;  %vm480_vm3 = vcmask 998400   ;;  %v984_v42 = vor.u32 %v1036_v37, %v983_v36  ;;  %s1035_s14 = sshll.u32 %s1416_s22, 4 }
  0x11   : > { %v1126_v18 = vld [vmem:[%s1262_s28 + $0x18] sm:$0xff]   ;;  %v1125_v19 = vld [vmem:[%s1262_s28 + $0x10] sm:$0xff]   ;;  %v1127_v41 = vld [vmem:[%s1262_s28 + $0x20] sm:$0xff]   ;;  %vm537_vm4 = vcmask 990208   ;;  %vm651_vm5 = vcmask 949248   ;;  %vm708_vm6 = vcmask 941056  }
  0x12   : > { %v1056_v21 = vunpack.c.l.bf16 %v1126_v18  ;;  %v1057_v22 = vunpack.c.h.bf16 %v1126_v18  ;;  %v1052_v23 = vunpack.c.l.bf16 %v1125_v19  ;;  %v1053_v24 = vunpack.c.h.bf16 %v1125_v19  ;;  %v1129_v43 = vld [vmem:[%s1262_s28 + $0x30] sm:$0xff]   ;;  %v1043_v51 = vld [vmem:[%s1262_s28] sm:$0xff]   ;;  %v1128_v4 = vld [vmem:[%s1262_s28 + $0x28] sm:$0xff]  }
  0x13   : > { %v1060_v46 = vunpack.c.l.bf16 %v1127_v41  ;;  %v1061_v47 = vunpack.c.h.bf16 %v1127_v41  ;;  %v1068_v49 = vunpack.c.l.bf16 %v1129_v43  ;;  %v1069_v50 = vunpack.c.h.bf16 %v1129_v43  ;;  %v1130_v7 = vld [vmem:[%s1262_s28 + $0x38] sm:$0xff]  }
  0x14   : > { %v300_v26 = vmul.f32 %v1269_v20, %v1056_v21  ;;  %v301_v31 = vmul.f32 %v1269_v20, %v1057_v22  ;;  %v298_v32 = vmul.f32 %v1269_v20, %v1052_v23  ;;  %v299_v33 = vmul.f32 %v1269_v20, %v1053_v24 }
  0x15   : > { %v409_v52 = vmul.f32 %v1269_v20, %v1060_v46  ;;  %v410_v53 = vmul.f32 %v1269_v20, %v1061_v47  ;;  %v1044_v55 = vunpack.c.l.bf16 %v1043_v51  ;;  %v1045_v56 = vunpack.c.h.bf16 %v1043_v51 }
  0x16   : > { %330 = vrot.lane.b32.xlu0 %v978_v10, %s1175_s7  ;;  %421 = vrot.lane.b32.xlu2 %v978_v10, %s1176_s8  ;;  %v303_v39 = vpack.c.bf16 %v301_v31, %v300_v26  ;;  %v302_v40 = vpack.c.bf16 %v299_v33, %v298_v32  ;;  %v466_v57 = vmul.f32 %v1269_v20, %v1068_v49  ;;  %v1064_v9 = vunpack.c.l.bf16 %v1128_v4 }
  0x17   : > { %326 = vrot.lane.b32.xlu1 %v970_v11, %s1175_s7  ;;  %v467_v58 = vmul.f32 %v1269_v20, %v1069_v50  ;;  %v413_v62 = vpack.c.bf16 %v410_v53, %v409_v52  ;;  %v279_v63 = vmul.f32 %v1269_v20, %v1044_v55  ;;  %v280_v0 = vmul.f32 %v1269_v20, %v1045_v56  ;;  %v801_v52 = vld [vmem:[%s1411_s3 + $0x10] sm:$0xff] }
  0x18   : > { %v411_v18 = vmul.f32 %v1269_v20, %v1064_v9  ;;  %vm594_vm7 = vcmask 982016   ;;  %v1137_v53 = vld [vmem:[%s1262_s28 + $0x70] sm:$0xff]   ;;  %vm765_vm8 = vcmask 932864  }
  0x19   : > { %v283_v3 = vpack.c.bf16 %v280_v0, %v279_v63  ;;  %v827_v0 = vld [vmem:[%s1412_s4] sm:$0xff] }
  0x1e   : > { %476 = vrot.lane.b32.xlu0 %v974_v2, %s1177_s17  ;;  %415 = vrot.lane.b32.xlu2 %v966_v5, %s1176_s8 }
  0x1f   : > { %478 = vrot.lane.b32.xlu1 %v978_v10, %s1177_s17 }
  0x26   : > { %417 = vrot.lane.b32.xlu0 %v970_v11, %s1176_s8  ;;  %474 = vrot.lane.b32.xlu2 %v970_v11, %s1177_s17 }
  0x27   : > { %472 = vrot.lane.b32.xlu1 %v966_v5, %s1177_s17  ;;  %s265_s17 = scalar_lea.vmem %s1414_s6, %s1035_s14 }
  0x2e   : > { %533 = vrot.lane.b32.xlu0 %v974_v2, %s1178_s18  ;;  %529 = vrot.lane.b32.xlu2 %v966_v5, %s1178_s18 }
  0x2f   : > { %535 = vrot.lane.b32.xlu1 %v978_v10, %s1178_s18 }
  0x36   : > { %531 = vrot.lane.b32.xlu0 %v970_v11, %s1178_s18  ;;  %649 = vrot.lane.b32.xlu2 %v978_v10, %s1179_s19 }
  0x37   : > { %647 = vrot.lane.b32.xlu1 %v974_v2, %s1179_s19 }
  0x3e   : > { %704 = vrot.lane.b32.xlu0 %v974_v2, %s1180_s20  ;;  %590 = vrot.lane.b32.xlu2 %v974_v2, %s1181_s23 }
  0x3f   : > { %706 = vrot.lane.b32.xlu1 %v978_v10, %s1180_s20 }
  0x46   : > { %592 = vrot.lane.b32.xlu0 %v978_v10, %s1181_s23  ;;  %645 = vrot.lane.b32.xlu2 %v970_v11, %s1179_s19 }
  0x47   : > { %643 = vrot.lane.b32.xlu1 %v966_v5, %s1179_s19 }
  0x4e   : > { %700 = vrot.lane.b32.xlu0 %v966_v5, %s1180_s20  ;;  %586 = vrot.lane.b32.xlu2 %v966_v5, %s1181_s23 }
  0x4f   : > { %702 = vrot.lane.b32.xlu1 %v970_v11, %s1180_s20 }
  0x56   : > { %588 = vrot.lane.b32.xlu0 %v970_v11, %s1181_s23  ;;  %763 = vrot.lane.b32.xlu2 %v978_v10, %s1182_s24  ;;  %v1065_v10 = vunpack.c.h.bf16 %v1128_v4  ;;  %v1136_v4 = vld [vmem:[%s1262_s28 + $0x68] sm:$0xff]  }
  0x57   : > { %761 = vrot.lane.b32.xlu1 %v974_v2, %s1182_s24  ;;  %v470_v2 = vpack.c.bf16 %v467_v58, %v466_v57 }
  0x58   : > { %v412_v19 = vmul.f32 %v1269_v20, %v1065_v10 }
  0x5a   : > { %v414_v28 = vpack.c.bf16 %v412_v19, %v411_v18  ;;  %v800_v18 = vld [vmem:[%s1411_s3 + $0x8] sm:$0xff]  ;;  %v799_v19 = vld [vmem:[%s1411_s3] sm:$0xff] }
  0x5e   : > { %757 = vrot.lane.b32.xlu0 %v966_v5, %s1182_s24  ;;  %v1131_v5 = vld [vmem:[%s1262_s28 + $0x40] sm:$0xff]  }
  0x5f   : > { %759 = vrot.lane.b32.xlu1 %v970_v11, %s1182_s24 }
  0x68   : > { %v420_v12 = vpop.permute.xlu2 %419 }
  0x70   : > { %v422_v13 = vpop.permute.xlu2 %421 }
  0x71   : > { %v425_v14 = vsel %vm423_vm0, %v420_v12, %v422_v13  ;;  %v1076_v12 = vunpack.c.l.bf16 %v1131_v5  ;;  %v1077_v13 = vunpack.c.h.bf16 %v1131_v5 }
  0x72   : > { %440 = vmatpush.bf16.msra.mxu2 %v425_v14 }
  0x73   : > { %v523_v21 = vmul.f32 %v1269_v20, %v1076_v12  ;;  %v524_v22 = vmul.f32 %v1269_v20, %v1077_v13  ;;  %v1097_v12 = vunpack.c.h.bf16 %v1136_v4 }
  0x75   : > { %v527_v31 = vpack.c.bf16 %v524_v22, %v523_v21  ;;  %v1138_v22 = vld [vmem:[%s1262_s28 + $0x78] sm:$0xff]  }
  0x78   : > { %v416_v17 = vpop.permute.xlu2 %415 }
  0x80   : > { %v329_v15 = vpop.permute.xlu0 %328  ;;  %v475_v34 = vpop.permute.xlu2 %474 }
  0x81   : > { %v325_v16 = vpop.permute.xlu1 %324 }
  0x88   : > { %v331_v25 = vpop.permute.xlu0 %330  ;;  %v530_v54 = vpop.permute.xlu2 %529 }
  0x89   : > { %v327_v29 = vpop.permute.xlu1 %326  ;;  %v334_v30 = vsel %vm332_vm1, %v329_v15, %v331_v25  ;;  %v1072_v15 = vunpack.c.l.bf16 %v1130_v7 }
  0x8a   : > { %350 = vmatpush.bf16.msra.mxu0 %v334_v30  ;;  %1142 = vmatpush.bf16.msra.mxu1 %v334_v30  ;;  %v333_v38 = vsel %vm332_vm1, %v325_v16, %v327_v29  ;;  %v1073_v16 = vunpack.c.h.bf16 %v1130_v7 }
  0x8b   : > { %v468_v25 = vmul.f32 %v1269_v20, %v1072_v15  ;;  %v1139_v15 = vld [vmem:[%s1262_s28 + $0x80] sm:$0xff]  }
  0x8c   : > { %v469_v26 = vmul.f32 %v1269_v20, %v1073_v16 }
  0x8e   : > { %351 = vmatpush.bf16.msra.mxu0 %v333_v38  ;;  %1143 = vmatpush.bf16.msra.mxu1 %v333_v38  ;;  %v471_v36 = vpack.c.bf16 %v469_v26, %v468_v25  ;;  %v1132_v38 = vld [vmem:[%s1262_s28 + $0x48] sm:$0xff]  }
  0x8f   : > { %v1081_v43 = vunpack.c.h.bf16 %v1132_v38 }
  0x90   : > { %v477_v44 = vpop.permute.xlu0 %476  ;;  %v650_v6 = vpop.permute.xlu2 %649 }
  0x91   : > { %v479_v45 = vpop.permute.xlu1 %478  ;;  %980 = vmatmul.msk.bf16.vlgmr.msra.gmra.mxu1 %vm337_vm2, %v303_v39  ;;  %979 = vmatmul.msk.bf16.vlgmr.msra.gmra.mxu0 %vm337_vm2, %v302_v40  ;;  %v1135_v39 = vld [vmem:[%s1262_s28 + $0x60] sm:$0xff]   ;;  %v526_v49 = vmul.f32 %v1269_v20, %v1081_v43 }
  0x92   : > { %387 = vmatpush.bf16.msrb.mxu1 %v988_v35  ;;  %v482_v48 = vsel %vm480_vm3, %v477_v44, %v479_v45  ;;  %v1092_v45 = vunpack.c.l.bf16 %v1135_v39  ;;  %v1093_v46 = vunpack.c.h.bf16 %v1135_v39 }
  0x93   : > { %497 = vmatpush.bf16.msra.mxu3 %v482_v48 }
  0x94   : > { %v637_v50 = vmul.f32 %v1269_v20, %v1092_v45  ;;  %v638_v51 = vmul.f32 %v1269_v20, %v1093_v46 }
  0x96   : > { %388 = vmatpush.bf16.msrb.mxu1 %v984_v42  ;;  %v1080_v42 = vunpack.c.l.bf16 %v1132_v38 }
  0x98   : > { %v418_v59 = vpop.permute.xlu0 %417  ;;  %v591_v32 = vpop.permute.xlu2 %590  ;;  %v525_v48 = vmul.f32 %v1269_v20, %v1080_v42 }
  0x99   : > { %v473_v60 = vpop.permute.xlu1 %472  ;;  %v424_v61 = vsel %vm423_vm0, %v416_v17, %v418_v59  ;;  %v1124_v17 = vld [vmem:[%s1262_s28 + $0x8] sm:$0xff]  }
  0x9a   : > { %441 = vmatpush.bf16.msra.mxu2 %v424_v61  ;;  %v481_v1 = vsel %vm480_vm3, %v473_v60, %v475_v34  ;;  %v1048_v23 = vunpack.c.l.bf16 %v1124_v17  ;;  %v1049_v24 = vunpack.c.h.bf16 %v1124_v17  ;;  %v528_v58 = vpack.c.bf16 %v526_v49, %v525_v48  ;;  %v828_v48 = vld [vmem:[%s1412_s4 + $0x8] sm:$0xff] }
  0x9b   : > { %498 = vmatpush.bf16.msra.mxu3 %v481_v1  ;;  %v641_v60 = vpack.c.bf16 %v638_v51, %v637_v50  ;;  %v1100_v61 = vunpack.c.l.bf16 %v1137_v53  ;;  %v640_v17 = vmul.f32 %v1269_v20, %v1097_v12  ;;  %v1140_v51 = vld [vmem:[%s1262_s28 + $0x88] sm:$0xff]  }
  0x9c   : > { %v281_v33 = vmul.f32 %v1269_v20, %v1048_v23  ;;  %v282_v34 = vmul.f32 %v1269_v20, %v1049_v24  ;;  %v830_v23 = vld [vmem:[%s1412_s4 + $0x18] sm:$0xff] }
  0x9d   : > { %995 = vmatmul.msk.bf16.vlgmr.msra.gmra.mxu2 %vm337_vm2, %v413_v62  ;;  %v1101_v62 = vunpack.c.h.bf16 %v1137_v53  ;;  %v694_v1 = vmul.f32 %v1269_v20, %v1100_v61  ;;  %v1112_v53 = vunpack.c.l.bf16 %v1140_v51 }
  0x9e   : > { %1001 = vmatmul.msk.bf16.vlgmr.msra.gmra.mxu3 %vm337_vm2, %v470_v2  ;;  %v284_v37 = vpack.c.bf16 %v282_v34, %v281_v33  ;;  %v1105_v33 = vunpack.c.h.bf16 %v1138_v22  ;;  %v829_v34 = vld [vmem:[%s1412_s4 + $0x10] sm:$0xff] }
  0x9f   : > { %v695_v2 = vmul.f32 %v1269_v20, %v1101_v62 }
  0xa0   : > { %v534_v8 = vpop.permute.xlu0 %533  ;;  %v646_v47 = vpop.permute.xlu2 %645  ;;  %v697_v39 = vmul.f32 %v1269_v20, %v1105_v33 }
  0xa1   : > { %v536_v11 = vpop.permute.xlu1 %535  ;;  %989 = vmatmul.msk.bf16.vlgmr.msrb.gmra.mxu1 %vm337_vm2, %v283_v3  ;;  %v1133_v3 = vld [vmem:[%s1262_s28 + $0x50] sm:$0xff]   ;;  %v698_v10 = vpack.c.bf16 %v695_v2, %v694_v1 }
  0xa2   : > { %v539_v14 = vsel %vm537_vm4, %v534_v8, %v536_v11  ;;  %v1084_v7 = vunpack.c.l.bf16 %v1133_v3  ;;  %v1085_v8 = vunpack.c.h.bf16 %v1133_v3  ;;  %v1096_v11 = vunpack.c.l.bf16 %v1136_v4 }
  0xa3   : > { %554 = vmatpush.bf16.msrb.mxu0 %v539_v14 }
  0xa4   : > { %v580_v13 = vmul.f32 %v1269_v20, %v1084_v7  ;;  %v581_v14 = vmul.f32 %v1269_v20, %v1085_v8  ;;  %v639_v16 = vmul.f32 %v1269_v20, %v1096_v11 }
  0xa8   : > { %v532_v27 = vpop.permute.xlu0 %531  ;;  %v587_v63 = vpop.permute.xlu2 %586 }
  0xa9   : > { %v648_v29 = vpop.permute.xlu1 %647  ;;  %v538_v30 = vsel %vm537_vm4, %v530_v54, %v532_v27  ;;  %v1183_v54 = vmov 0   ;;  %v584_v27 = vpack.c.bf16 %v581_v14, %v580_v13 }
  0xaa   : > { %555 = vmatpush.bf16.msrb.mxu0 %v538_v30  ;;  %v653_v35 = vsel %vm651_vm5, %v648_v29, %v650_v6  ;;  %1164 = vset.pattern.permute.xlu1 %v1183_v54  ;;  %v1109_v29 = vunpack.c.h.bf16 %v1139_v15 }
  0xab   : > { %668 = vmatpush.bf16.msrb.mxu2 %v653_v35  ;;  %1163 = vset.pattern.permute.xlu0 %v1183_v54  ;;  %v802_v35 = vld [vmem:[%s1411_s3 + $0x18] sm:$0xff] }
  0xac   : > { %815 = vperm.xlu1 %1164, %v801_v52   ;;  %1162 = vset.pattern.permute.xlu2 %v1183_v54  ;;  %v1113_v54 = vunpack.c.h.bf16 %v1140_v51 }
  0xad   : > { %996 = vmatmul.msk.bf16.gmra.mxu2 %vm337_vm2, %v414_v28  ;;  %1007 = vmatmul.msk.bf16.vlgmr.msrb.gmra.mxu0 %vm337_vm2, %v527_v31  ;;  %v1108_v28 = vunpack.c.l.bf16 %v1139_v15  ;;  %v642_v31 = vpack.c.bf16 %v640_v17, %v639_v16 }
  0xae   : > { %1002 = vmatmul.msk.bf16.gmra.mxu3 %vm337_vm2, %v471_v36  ;;  %810 = vperm.xlu0 %1163, %v800_v18  }
  0xaf   : > { %805 = vperm.xlu2 %1162, %v799_v19   ;;  %v751_v36 = vmul.f32 %v1269_v20, %v1108_v28 }
  0xb0   : > { %v705_v40 = vpop.permute.xlu0 %704  ;;  %v764_v21 = vpop.permute.xlu2 %763 }
  0xb1   : > { %v707_v41 = vpop.permute.xlu1 %706  ;;  %990 = vmatmul.msk.bf16.gmra.mxu1 %vm337_vm2, %v284_v37  ;;  %v752_v37 = vmul.f32 %v1269_v20, %v1109_v29 }
  0xb2   : > { %v710_v44 = vsel %vm708_vm6, %v705_v40, %v707_v41  ;;  %v1134_v40 = vld [vmem:[%s1262_s28 + $0x58] sm:$0xff]  }
  0xb3   : > { %725 = vmatpush.bf16.msrb.mxu3 %v710_v44  ;;  %v1088_v43 = vunpack.c.l.bf16 %v1134_v40  ;;  %v1089_v44 = vunpack.c.h.bf16 %v1134_v40  ;;  %v755_v46 = vpack.c.bf16 %v752_v37, %v751_v36 }
  0xb4   : > { %833 = vperm.xlu1 %1164, %v827_v0  }
  0xb5   : > { %v582_v49 = vmul.f32 %v1269_v20, %v1088_v43  ;;  %v583_v50 = vmul.f32 %v1269_v20, %v1089_v44 }
  0xb6   : > { %843 = vperm.xlu0 %1163, %v829_v34  }
  0xb7   : > { %820 = vperm.xlu2 %1162, %v802_v35   ;;  %v585_v52 = vpack.c.bf16 %v583_v50, %v582_v49 }
  0xb8   : > { %v593_v55 = vpop.permute.xlu0 %592 }
  0xb9   : > { %v596_v56 = vsel %vm594_vm7, %v591_v32, %v593_v55  ;;  %v644_v57 = vpop.permute.xlu1 %643  ;;  %v1104_v32 = vunpack.c.l.bf16 %v1138_v22  ;;  %v753_v55 = vmul.f32 %v1269_v20, %v1112_v53 }
  0xba   : > { %611 = vmatpush.bf16.msra.mxu1 %v596_v56  ;;  %v652_v59 = vsel %vm651_vm5, %v644_v57, %v646_v47  ;;  %v754_v56 = vmul.f32 %v1269_v20, %v1113_v54 }
  0xbb   : > { %669 = vmatpush.bf16.msrb.mxu2 %v652_v59  ;;  %v696_v38 = vmul.f32 %v1269_v20, %v1104_v32 }
  0xbc   : > { %848 = vperm.xlu1 %1164, %v830_v23   ;;  %v756_v57 = vpack.c.bf16 %v754_v56, %v753_v55 }
  0xbd   : > { %1008 = vmatmul.msk.bf16.gmra.mxu0 %vm337_vm2, %v528_v58  ;;  %v699_v47 = vpack.c.bf16 %v697_v39, %v696_v38 }
  0xbe   : > { %1019 = vmatmul.msk.bf16.vlgmr.msrb.gmra.mxu2 %vm337_vm2, %v641_v60 }
  0xbf   : > { %838 = vperm.xlu2 %1162, %v828_v48  }
  0xc0   : > { %v701_v5 = vpop.permute.xlu0 %700 }
  0xc1   : > { %v703_v6 = vpop.permute.xlu1 %702 }
  0xc2   : > { %v709_v9 = vsel %vm708_vm6, %v701_v5, %v703_v6 }
  0xc3   : > { %726 = vmatpush.bf16.msrb.mxu3 %v709_v9 }
  0xc6   : > { %1025 = vmatmul.msk.bf16.vlgmr.msrb.gmra.mxu3 %vm337_vm2, %v698_v10 }
  0xc8   : > { %v589_v24 = vpop.permute.xlu0 %588 }
  0xc9   : > { %v762_v25 = vpop.permute.xlu1 %761  ;;  %v595_v26 = vsel %vm594_vm7, %v587_v63, %v589_v24 }
  0xca   : > { %v767_v30 = vsel %vm765_vm8, %v762_v25, %v764_v21  ;;  %612 = vmatpush.bf16.msra.mxu1 %v595_v26 }
  0xcb   : > { %782 = vmatpush.bf16.msra.mxu0 %v767_v30 }
  0xcd   : > { %1013 = vmatmul.msk.bf16.vlgmr.msra.gmra.mxu1 %vm337_vm2, %v584_v27 }
  0xce   : > { %1020 = vmatmul.msk.bf16.gmra.mxu2 %vm337_vm2, %v642_v31 }
  0xd0   : > { %v758_v41 = vpop.permute.xlu0 %757 }
  0xd1   : > { %v760_v42 = vpop.permute.xlu1 %759 }
  0xd2   : > { %v766_v45 = vsel %vm765_vm8, %v758_v41, %v760_v42 }
  0xd3   : > { %783 = vmatpush.bf16.msra.mxu0 %v766_v45  ;;  %v1166_v45 = vld [vmem:[%s260_s12] ss:$0 sm:$0xff] }
  0xd6   : > { %1031 = vmatmul.msk.bf16.vlgmr.msra.gmra.mxu0 %vm337_vm2, %v755_v46  ;;  %1026 = vmatmul.msk.bf16.gmra.mxu3 %vm337_vm2, %v699_v47 }
  0xdd   : > { %1014 = vmatmul.msk.bf16.gmra.mxu1 %vm337_vm2, %v585_v52 }
  0xe6   : > { %1032 = vmatmul.msk.bf16.gmra.mxu0 %vm337_vm2, %v756_v57 }
 0x109   : > { %v806_v18 = vpop.permute.xlu2 %805 }
 0x10e   : > { %v358_v58 = vpop.f32.mrf.mxu1  ;;  %v353_v59 = vpop.f32.mrf.mxu0 }
 0x111   : > { %v821_v36 = vpop.permute.xlu2 %820 }
 0x116   : > { %v360_v60 = vpop.f32.mrf.mxu1  ;;  %v355_v62 = vpop.f32.mrf.mxu0 }
 0x119   : > { %v839_v56 = vpop.permute.xlu2 %838 }
 0x11e   : > { %v390_v63 = vpop.f32.mrf.mxu1  ;;  %v816_v21 = vpop.permute.xlu1 %815 }
 0x11f   : > { %v391_v9 = vadd.f32 %v390_v63, %v353_v59 }
 0x120   : > { %v443_v61 = vpop.f32.mrf.mxu2  ;;  %v811_v49 = vpop.permute.xlu0 %810 }
 0x121   : > { %v500_v0 = vpop.f32.mrf.mxu3  ;;  %v453_v12 = vadd.f32 %v443_v61, %v391_v9 }
 0x123   : > { %v510_v14 = vadd.f32 %v500_v0, %v453_v12 }
 0x126   : > { %v392_v3 = vpop.f32.mrf.mxu1  ;;  %v834_v38 = vpop.permute.xlu1 %833 }
 0x127   : > { %v393_v15 = vadd.f32 %v392_v3, %v355_v62 }
 0x128   : > { %v445_v1 = vpop.f32.mrf.mxu2  ;;  %v844_v9 = vpop.permute.xlu0 %843 }
 0x129   : > { %v502_v4 = vpop.f32.mrf.mxu3  ;;  %v454_v22 = vadd.f32 %v445_v1, %v393_v15 }
 0x12a   : > { %v557_v2 = vpop.f32.mrf.mxu0 }
 0x12b   : > { %v567_v17 = vadd.f32 %v557_v2, %v510_v14  ;;  %v511_v27 = vadd.f32 %v502_v4, %v454_v22 }
 0x12e   : > { %v395_v7 = vpop.f32.mrf.mxu1 }
 0x12f   : > { %v396_v28 = vadd.f32 %v395_v7, %v358_v58 }
 0x130   : > { %v448_v5 = vpop.f32.mrf.mxu2 }
 0x131   : > { %v505_v8 = vpop.f32.mrf.mxu3  ;;  %v455_v33 = vadd.f32 %v448_v5, %v396_v28 }
 0x132   : > { %v559_v6 = vpop.f32.mrf.mxu0 }
 0x133   : > { %v568_v29 = vadd.f32 %v559_v6, %v511_v27  ;;  %v512_v42 = vadd.f32 %v505_v8, %v455_v33 }
 0x136   : > { %v397_v11 = vpop.f32.mrf.mxu1 }
 0x137   : > { %v398_v43 = vadd.f32 %v397_v11, %v360_v60 }
 0x138   : > { %v450_v20 = vpop.f32.mrf.mxu2 }
 0x139   : > { %v507_v13 = vpop.f32.mrf.mxu3  ;;  %v456_v50 = vadd.f32 %v450_v20, %v398_v43 }
 0x13a   : > { %v562_v10 = vpop.f32.mrf.mxu0 }
 0x13b   : > { %v569_v46 = vadd.f32 %v562_v10, %v512_v42  ;;  %v513_v59 = vadd.f32 %v507_v13, %v456_v50 }
 0x141   : > { %v671_v16 = vpop.f32.mrf.mxu2 }
 0x142   : > { %v564_v23 = vpop.f32.mrf.mxu0 }
 0x143   : > { %v570_v63 = vadd.f32 %v564_v23, %v513_v59 }
 0x149   : > { %v728_v25 = vpop.f32.mrf.mxu3  ;;  %v673_v30 = vpop.f32.mrf.mxu2 }
 0x14a   : > { %v614_v19 = vpop.f32.mrf.mxu1 }
 0x14b   : > { %v624_v24 = vadd.f32 %v614_v19, %v567_v17 }
 0x14d   : > { %v681_v26 = vadd.f32 %v671_v16, %v624_v24  ;;  %v849_v24 = vpop.permute.xlu1 %848 }
 0x14f   : > { %v738_v31 = vadd.f32 %v728_v25, %v681_v26 }
 0x151   : > { %v730_v39 = vpop.f32.mrf.mxu3  ;;  %v676_v53 = vpop.f32.mrf.mxu2 }
 0x152   : > { %v616_v32 = vpop.f32.mrf.mxu1 }
 0x153   : > { %v625_v34 = vadd.f32 %v616_v32, %v568_v29  ;;  %v785_v35 = vpop.f32.mrf.mxu0 }
 0x154   : > { %v795_v37 = vadd.f32 %v785_v35, %v738_v31 }
 0x155   : > { %v682_v40 = vadd.f32 %v673_v30, %v625_v34 }
 0x156   : > { %v823_v41 = vmul.f32 %v806_v18, %v795_v37 }
 0x157   : > { %v739_v47 = vadd.f32 %v730_v39, %v682_v40 }
 0x158   : > { %v851_v44 = vadd.f32 %v834_v38, %v823_v41 }
 0x159   : > { %v733_v60 = vpop.f32.mrf.mxu3  ;;  %v678_v8 = vpop.f32.mrf.mxu2 }
 0x15a   : > { %v619_v48 = vpop.f32.mrf.mxu1  ;;  %v859_v54 = vadd.f32 %v1166_v45, %v851_v44 }
 0x15b   : > { %v626_v51 = vadd.f32 %v619_v48, %v569_v46  ;;  %v787_v52 = vpop.f32.mrf.mxu0 }
 0x15c   : > { %v796_v55 = vadd.f32 %v787_v52, %v739_v47  ;;  %v867_v61 = vmul.f32 0.2, %v859_v54  ;;  %vm863_vm9 = vcmp.ge.f32.partialorder %v859_v54, 0.0 }
 0x15d   : > { %v683_v58 = vadd.f32 %v676_v53, %v626_v51 }
 0x15e   : > { %v824_v57 = vmul.f32 %v811_v49, %v796_v55  ;;  %v871_v5 = vsel %vm863_vm9, %v859_v54, %v867_v61 }
 0x15f   : > { %v740_v1 = vadd.f32 %v733_v60, %v683_v58  ;;  %v875_v12 = vmul.f32 1.4142135, %v871_v5 }
 0x160   : > { %v852_v62 = vadd.f32 %v839_v56, %v824_v57 }
 0x161   : > { %v735_v16 = vpop.f32.mrf.mxu3 }
 0x162   : > { %v860_v0 = vadd.f32 %v1166_v45, %v852_v62  ;;  %v621_v2 = vpop.f32.mrf.mxu1 }
 0x163   : > { %v627_v3 = vadd.f32 %v621_v2, %v570_v63  ;;  %v790_v4 = vpop.f32.mrf.mxu0 }
 0x164   : > { %vm864_vm10 = vcmp.ge.f32.partialorder %v860_v0, 0.0  ;;  %v868_v6 = vmul.f32 0.2, %v860_v0  ;;  %v797_v7 = vadd.f32 %v790_v4, %v740_v1 }
 0x165   : > { %v684_v10 = vadd.f32 %v678_v8, %v627_v3 }
 0x166   : > { %v872_v20 = vsel %vm864_vm10, %v860_v0, %v868_v6  ;;  %v825_v11 = vmul.f32 %v816_v21, %v797_v7 }
 0x167   : > { %v876_v13 = vmul.f32 1.4142135, %v872_v20  ;;  %v741_v17 = vadd.f32 %v735_v16, %v684_v10 }
 0x168   : > { %v853_v14 = vadd.f32 %v844_v9, %v825_v11 }
 0x169   : > { %v1117_v15 = vpack.c.bf16 %v876_v13, %v875_v12 }
 0x16a   : > { %v861_v19 = vadd.f32 %v1166_v45, %v853_v14 }
 0x16b   : > { %1118 = vst [vmem:[%s265_s17] sm:$0xff] %v1117_v15   ;;  %v792_v18 = vpop.f32.mrf.mxu0 }
 0x16c   : > { %v798_v22 = vadd.f32 %v792_v18, %v741_v17  ;;  %v869_v25 = vmul.f32 0.2, %v861_v19  ;;  %vm865_vm11 = vcmp.ge.f32.partialorder %v861_v19, 0.0 }
 0x16e   : > { %v826_v23 = vmul.f32 %v821_v36, %v798_v22  ;;  %v873_v27 = vsel %vm865_vm11, %v861_v19, %v869_v25 }
 0x16f   : > { %v877_v30 = vmul.f32 1.4142135, %v873_v27 }
 0x170   : > { %v854_v26 = vadd.f32 %v849_v24, %v826_v23 }
 0x172   : > { %v862_v21 = vadd.f32 %v1166_v45, %v854_v26 }
 0x174   : > { %vm866_vm12 = vcmp.ge.f32.partialorder %v862_v21, 0.0  ;;  %v870_v28 = vmul.f32 0.2, %v862_v21 }
 0x176   : > { %v874_v29 = vsel %vm866_vm12, %v862_v21, %v870_v28 }
 0x177   : > { %v878_v31 = vmul.f32 1.4142135, %v874_v29 }
 0x179   : > { %v1122_v32 = vpack.c.bf16 %v878_v31, %v877_v30 }
 0x17b   : > { %1141 = vst [vmem:[%s265_s17 + $0x8] sm:$0xff] %v1122_v32  }
 0x17c PF: > { %s16_s21 = sadd.s32 1, %s1173_s21  }
 0x17d   : > { %p13_p4 = scmp.ge.s32.totalorder %s16_s21, 6  }
 0x17f   :  { %15 = sbr.rel (!%p13_p4) target bundleno = 1 (0x1), region = 85 }

// kernel: gfpgan_forward.19
= control target key start
LH: loop header
LB: loop body
LE: loop exit
PB: predicated region body
PF: predicated region fallthrough
CT: control target
= control target key end

     0   :  { %s844_s29 = smov 127   ;;  %s845_s30 = smov 126   ;;  %vm180_vm0 = vcmask 1031168   ;;  %vm89_vm1 = vcmask 1039360   ;;  %vm94_vm2 = vcmask 261120   ;;  %vm237_vm3 = vcmask 965632   ;;  %s1086_s1 = inlined_call_operand.vmem [shape: bf16[32,256], index: 1, kind: input, shape index: {}]   ;;  %s1087_s2 = inlined_call_operand.vmem [shape: f32[1,32], index: 2, kind: input, shape index: {}]   ;;  %s1088_s0 = inlined_call_operand.vmem [shape: bf16[1,9,32,32], index: 0, kind: input, shape index: {}]   ;;  %s1089_s3 = inlined_call_operand.vmem [shape: f32[32,1], index: 3, kind: input, shape index: {}]   ;;  %s1090_s4 = inlined_call_operand.vmem [shape: f32[32,1], index: 4, kind: input, shape index: {}]   ;;  %s1091_s5 = inlined_call_operand.vmem [shape: f32[1,1,128], index: 5, kind: input, shape index: {}]   ;;  %s1092_s6 = inlined_call_operand.vmem [shape: bf16[1,32,128], index: 6, kind: output, shape index: {}]  }
   0x1   :  { %v662_v0 = vld [vmem:[%s1086_s1 + $0x10] sm:$0xf]  ;;  %v727_v1 = vld [vmem:[%s1086_s1 + $0x14] sm:$0xf0]  ;;  %v654_v2 = vld [vmem:[%s1086_s1] sm:$0xf] }
   0x2   :  { %v663_v3 = vor.u32 %v727_v1, %v662_v0  ;;  %v725_v4 = vld [vmem:[%s1086_s1 + $0x4] sm:$0xf0]  ;;  %v726_v6 = vld [vmem:[%s1086_s1 + $0x14] sm:$0xf]  ;;  %v664_v7 = vld [vmem:[%s1086_s1 + $0x18] sm:$0xf0] }
   0x3   :  { %v655_v5 = vor.u32 %v725_v4, %v654_v2  ;;  %v724_v8 = vld [vmem:[%s1086_s1 + $0x4] sm:$0xf]  ;;  %v656_v9 = vld [vmem:[%s1086_s1 + $0x8] sm:$0xf0]  ;;  %v667_v10 = vor.u32 %v726_v6, %v664_v7  ;;  %s846_s15 = smov 118   ;;  %s847_s16 = smov 117  }
   0x4   :  { %85 = vrot.lane.b32.xlu0 %v663_v3, %s844_s29  ;;  %176 = vrot.lane.b32.xlu2 %v663_v3, %s845_s30  ;;  %v659_v11 = vor.u32 %v724_v8, %v656_v9  ;;  %s848_s17 = smov 108   ;;  %s849_s18 = smov 107   ;;  %v812_v18 = vld [vmem:[%s1088_s0 + $0x18] sm:$0xff]   ;;  %v811_v19 = vld [vmem:[%s1088_s0 + $0x10] sm:$0xff]   ;;  %vm294_vm4 = vcmask 957440   ;;  %vm408_vm5 = vcmask 883712  }
   0x5   :  { %81 = vrot.lane.b32.xlu1 %v655_v5, %s844_s29  ;;  %s850_s19 = smov 116   ;;  %s851_s20 = smov 106   ;;  %v922_v20 = vld [vmem:[%s1087_s2] ss:$0 sm:$0xff]  ;;  %v742_v21 = vunpack.c.l.bf16 %v812_v18  ;;  %v743_v22 = vunpack.c.h.bf16 %v812_v18  ;;  %v738_v23 = vunpack.c.l.bf16 %v811_v19  ;;  %v739_v24 = vunpack.c.h.bf16 %v811_v19  ;;  %v676_v27 = vld [vmem:[%s1086_s1 + $0x10] sm:$0xf] }
   0x6   :  { %v723_v28 = vld [vmem:[%s1086_s1 + $0x14] sm:$0xf0]  ;;  %v672_v36 = vld [vmem:[%s1086_s1] sm:$0xf]  ;;  %v722_v37 = vld [vmem:[%s1086_s1 + $0x4] sm:$0xf0] }
   0x7   :  { %v57_v26 = vmul.f32 %v922_v20, %v742_v21  ;;  %v58_v31 = vmul.f32 %v922_v20, %v743_v22  ;;  %v55_v32 = vmul.f32 %v922_v20, %v738_v23  ;;  %v56_v33 = vmul.f32 %v922_v20, %v739_v24  ;;  %v813_v41 = vld [vmem:[%s1088_s0 + $0x20] sm:$0xff]   ;;  %v815_v43 = vld [vmem:[%s1088_s0 + $0x30] sm:$0xff]   ;;  %v814_v4 = vld [vmem:[%s1088_s0 + $0x28] sm:$0xff]  }
   0x8   :  { %v677_v35 = vor.u32 %v723_v28, %v676_v27  ;;  %v673_v42 = vor.u32 %v722_v37, %v672_v36  ;;  %v746_v46 = vunpack.c.l.bf16 %v813_v41  ;;  %v747_v47 = vunpack.c.h.bf16 %v813_v41  ;;  %v729_v51 = vld [vmem:[%s1088_s0] sm:$0xff]   ;;  %v816_v7 = vld [vmem:[%s1088_s0 + $0x38] sm:$0xff]  }
   0x9   :  { %v60_v39 = vpack.c.bf16 %v58_v31, %v57_v26  ;;  %v59_v40 = vpack.c.bf16 %v56_v33, %v55_v32  ;;  %v754_v49 = vunpack.c.l.bf16 %v815_v43  ;;  %v755_v50 = vunpack.c.h.bf16 %v815_v43 }
   0xa   :  { %v166_v52 = vmul.f32 %v922_v20, %v746_v46  ;;  %v167_v53 = vmul.f32 %v922_v20, %v747_v47  ;;  %v730_v55 = vunpack.c.l.bf16 %v729_v51  ;;  %v731_v56 = vunpack.c.h.bf16 %v729_v51 }
   0xb   :  { %v223_v57 = vmul.f32 %v922_v20, %v754_v49  ;;  %v224_v58 = vmul.f32 %v922_v20, %v755_v50  ;;  %v750_v9 = vunpack.c.l.bf16 %v814_v4  ;;  %vm465_vm6 = vcmask 875520  }
   0xc   :  { %87 = vrot.lane.b32.xlu0 %v667_v10, %s844_s29  ;;  %178 = vrot.lane.b32.xlu2 %v667_v10, %s845_s30  ;;  %v170_v62 = vpack.c.bf16 %v167_v53, %v166_v52  ;;  %v36_v63 = vmul.f32 %v922_v20, %v730_v55  ;;  %v37_v0 = vmul.f32 %v922_v20, %v731_v56  ;;  %vm351_vm7 = vcmask 949248   ;;  %v558_v52 = vld [vmem:[%s1089_s3 + $0x10] sm:$0xff] }
   0xd   :  { %83 = vrot.lane.b32.xlu1 %v659_v11, %s844_s29  ;;  %v227_v2 = vpack.c.bf16 %v224_v58, %v223_v57  ;;  %v168_v18 = vmul.f32 %v922_v20, %v750_v9  ;;  %v823_v53 = vld [vmem:[%s1088_s0 + $0x70] sm:$0xff]   ;;  %vm522_vm8 = vcmask 867328  }
  0x14   :  { %233 = vrot.lane.b32.xlu0 %v663_v3, %s846_s15  ;;  %172 = vrot.lane.b32.xlu2 %v655_v5, %s845_s30 }
  0x15   :  { %235 = vrot.lane.b32.xlu1 %v667_v10, %s846_s15 }
  0x1c   :  { %174 = vrot.lane.b32.xlu0 %v659_v11, %s845_s30  ;;  %231 = vrot.lane.b32.xlu2 %v659_v11, %s846_s15 }
  0x1d   :  { %229 = vrot.lane.b32.xlu1 %v655_v5, %s846_s15 }
  0x24   :  { %290 = vrot.lane.b32.xlu0 %v663_v3, %s847_s16  ;;  %286 = vrot.lane.b32.xlu2 %v655_v5, %s847_s16 }
  0x25   :  { %292 = vrot.lane.b32.xlu1 %v667_v10, %s847_s16 }
  0x2c   :  { %288 = vrot.lane.b32.xlu0 %v659_v11, %s847_s16  ;;  %406 = vrot.lane.b32.xlu2 %v667_v10, %s848_s17 }
  0x2d   :  { %404 = vrot.lane.b32.xlu1 %v663_v3, %s848_s17 }
  0x34   :  { %461 = vrot.lane.b32.xlu0 %v663_v3, %s849_s18  ;;  %347 = vrot.lane.b32.xlu2 %v663_v3, %s850_s19 }
  0x35   :  { %463 = vrot.lane.b32.xlu1 %v667_v10, %s849_s18 }
  0x3c   :  { %349 = vrot.lane.b32.xlu0 %v667_v10, %s850_s19  ;;  %402 = vrot.lane.b32.xlu2 %v659_v11, %s848_s17 }
  0x3d   :  { %400 = vrot.lane.b32.xlu1 %v655_v5, %s848_s17 }
  0x44   :  { %457 = vrot.lane.b32.xlu0 %v655_v5, %s849_s18  ;;  %343 = vrot.lane.b32.xlu2 %v655_v5, %s850_s19 }
  0x45   :  { %459 = vrot.lane.b32.xlu1 %v659_v11, %s849_s18 }
  0x4c   :  { %345 = vrot.lane.b32.xlu0 %v659_v11, %s850_s19  ;;  %520 = vrot.lane.b32.xlu2 %v667_v10, %s851_s20  ;;  %v751_v10 = vunpack.c.h.bf16 %v814_v4  ;;  %v822_v4 = vld [vmem:[%s1088_s0 + $0x68] sm:$0xff]  }
  0x4d   :  { %518 = vrot.lane.b32.xlu1 %v663_v3, %s851_s20  ;;  %v40_v3 = vpack.c.bf16 %v37_v0, %v36_v63  ;;  %v584_v0 = vld [vmem:[%s1090_s4] sm:$0xff] }
  0x4e   :  { %v169_v19 = vmul.f32 %v922_v20, %v751_v10 }
  0x50   :  { %v171_v28 = vpack.c.bf16 %v169_v19, %v168_v18  ;;  %v557_v18 = vld [vmem:[%s1089_s3 + $0x8] sm:$0xff]  ;;  %v556_v19 = vld [vmem:[%s1089_s3] sm:$0xff] }
  0x54   :  { %514 = vrot.lane.b32.xlu0 %v655_v5, %s851_s20  ;;  %v817_v5 = vld [vmem:[%s1088_s0 + $0x40] sm:$0xff]  }
  0x55   :  { %516 = vrot.lane.b32.xlu1 %v659_v11, %s851_s20 }
  0x5e   :  { %v177_v12 = vpop.permute.xlu2 %176 }
  0x66   :  { %v179_v13 = vpop.permute.xlu2 %178 }
  0x67   :  { %v182_v14 = vsel %vm180_vm0, %v177_v12, %v179_v13  ;;  %v762_v12 = vunpack.c.l.bf16 %v817_v5  ;;  %v763_v13 = vunpack.c.h.bf16 %v817_v5 }
  0x68   :  { %197 = vmatpush.bf16.msra.mxu2 %v182_v14 }
  0x69   :  { %v280_v21 = vmul.f32 %v922_v20, %v762_v12  ;;  %v281_v22 = vmul.f32 %v922_v20, %v763_v13  ;;  %v783_v12 = vunpack.c.h.bf16 %v822_v4 }
  0x6b   :  { %v284_v31 = vpack.c.bf16 %v281_v22, %v280_v21  ;;  %v824_v22 = vld [vmem:[%s1088_s0 + $0x78] sm:$0xff]  }
  0x6e   :  { %v173_v17 = vpop.permute.xlu2 %172 }
  0x76   :  { %v86_v15 = vpop.permute.xlu0 %85  ;;  %v232_v34 = vpop.permute.xlu2 %231 }
  0x77   :  { %v82_v16 = vpop.permute.xlu1 %81 }
  0x7e   :  { %v88_v25 = vpop.permute.xlu0 %87  ;;  %v287_v54 = vpop.permute.xlu2 %286 }
  0x7f   :  { %v84_v29 = vpop.permute.xlu1 %83  ;;  %v91_v30 = vsel %vm89_vm1, %v86_v15, %v88_v25  ;;  %v758_v15 = vunpack.c.l.bf16 %v816_v7 }
  0x80   :  { %107 = vmatpush.bf16.msra.mxu0 %v91_v30  ;;  %828 = vmatpush.bf16.msra.mxu1 %v91_v30  ;;  %v90_v38 = vsel %vm89_vm1, %v82_v16, %v84_v29  ;;  %v759_v16 = vunpack.c.h.bf16 %v816_v7 }
  0x81   :  { %v225_v25 = vmul.f32 %v922_v20, %v758_v15  ;;  %v825_v15 = vld [vmem:[%s1088_s0 + $0x80] sm:$0xff]  }
  0x82   :  { %v226_v26 = vmul.f32 %v922_v20, %v759_v16 }
  0x84   :  { %108 = vmatpush.bf16.msra.mxu0 %v90_v38  ;;  %829 = vmatpush.bf16.msra.mxu1 %v90_v38  ;;  %v228_v36 = vpack.c.bf16 %v226_v26, %v225_v25  ;;  %v818_v38 = vld [vmem:[%s1088_s0 + $0x48] sm:$0xff]  }
  0x85   :  { %v767_v43 = vunpack.c.h.bf16 %v818_v38 }
  0x86   :  { %v234_v44 = vpop.permute.xlu0 %233  ;;  %v407_v6 = vpop.permute.xlu2 %406 }
  0x87   :  { %v236_v45 = vpop.permute.xlu1 %235  ;;  %669 = vmatmul.msk.bf16.vlgmr.msra.gmra.mxu1 %vm94_vm2, %v60_v39  ;;  %668 = vmatmul.msk.bf16.vlgmr.msra.gmra.mxu0 %vm94_vm2, %v59_v40  ;;  %v821_v39 = vld [vmem:[%s1088_s0 + $0x60] sm:$0xff]   ;;  %v283_v49 = vmul.f32 %v922_v20, %v767_v43 }
  0x88   :  { %144 = vmatpush.bf16.msrb.mxu1 %v677_v35  ;;  %v239_v48 = vsel %vm237_vm3, %v234_v44, %v236_v45  ;;  %v778_v45 = vunpack.c.l.bf16 %v821_v39  ;;  %v779_v46 = vunpack.c.h.bf16 %v821_v39 }
  0x89   :  { %254 = vmatpush.bf16.msra.mxu3 %v239_v48 }
  0x8a   :  { %v394_v50 = vmul.f32 %v922_v20, %v778_v45  ;;  %v395_v51 = vmul.f32 %v922_v20, %v779_v46 }
  0x8c   :  { %145 = vmatpush.bf16.msrb.mxu1 %v673_v42  ;;  %v766_v42 = vunpack.c.l.bf16 %v818_v38 }
  0x8e   :  { %v175_v59 = vpop.permute.xlu0 %174  ;;  %v348_v32 = vpop.permute.xlu2 %347  ;;  %v282_v48 = vmul.f32 %v922_v20, %v766_v42 }
  0x8f   :  { %v230_v60 = vpop.permute.xlu1 %229  ;;  %v181_v61 = vsel %vm180_vm0, %v173_v17, %v175_v59  ;;  %v810_v17 = vld [vmem:[%s1088_s0 + $0x8] sm:$0xff]  }
  0x90   :  { %198 = vmatpush.bf16.msra.mxu2 %v181_v61  ;;  %v238_v1 = vsel %vm237_vm3, %v230_v60, %v232_v34  ;;  %v734_v23 = vunpack.c.l.bf16 %v810_v17  ;;  %v735_v24 = vunpack.c.h.bf16 %v810_v17  ;;  %v285_v58 = vpack.c.bf16 %v283_v49, %v282_v48  ;;  %v585_v48 = vld [vmem:[%s1090_s4 + $0x8] sm:$0xff] }
  0x91   :  { %255 = vmatpush.bf16.msra.mxu3 %v238_v1  ;;  %v398_v60 = vpack.c.bf16 %v395_v51, %v394_v50  ;;  %v786_v61 = vunpack.c.l.bf16 %v823_v53  ;;  %v397_v17 = vmul.f32 %v922_v20, %v783_v12  ;;  %v826_v51 = vld [vmem:[%s1088_s0 + $0x88] sm:$0xff]  }
  0x92   :  { %v38_v33 = vmul.f32 %v922_v20, %v734_v23  ;;  %v39_v34 = vmul.f32 %v922_v20, %v735_v24  ;;  %v587_v23 = vld [vmem:[%s1090_s4 + $0x18] sm:$0xff] }
  0x93   :  { %684 = vmatmul.msk.bf16.vlgmr.msra.gmra.mxu2 %vm94_vm2, %v170_v62  ;;  %v787_v62 = vunpack.c.h.bf16 %v823_v53  ;;  %v451_v1 = vmul.f32 %v922_v20, %v786_v61  ;;  %v798_v53 = vunpack.c.l.bf16 %v826_v51 }
  0x94   :  { %690 = vmatmul.msk.bf16.vlgmr.msra.gmra.mxu3 %vm94_vm2, %v227_v2  ;;  %v41_v37 = vpack.c.bf16 %v39_v34, %v38_v33  ;;  %v791_v33 = vunpack.c.h.bf16 %v824_v22  ;;  %v586_v34 = vld [vmem:[%s1090_s4 + $0x10] sm:$0xff] }
  0x95   :  { %v452_v2 = vmul.f32 %v922_v20, %v787_v62 }
  0x96   :  { %v291_v8 = vpop.permute.xlu0 %290  ;;  %v403_v47 = vpop.permute.xlu2 %402  ;;  %v454_v39 = vmul.f32 %v922_v20, %v791_v33 }
  0x97   :  { %v293_v11 = vpop.permute.xlu1 %292  ;;  %678 = vmatmul.msk.bf16.vlgmr.msrb.gmra.mxu1 %vm94_vm2, %v40_v3  ;;  %v819_v3 = vld [vmem:[%s1088_s0 + $0x50] sm:$0xff]   ;;  %v455_v10 = vpack.c.bf16 %v452_v2, %v451_v1 }
  0x98   :  { %v296_v14 = vsel %vm294_vm4, %v291_v8, %v293_v11  ;;  %v770_v7 = vunpack.c.l.bf16 %v819_v3  ;;  %v771_v8 = vunpack.c.h.bf16 %v819_v3  ;;  %v782_v11 = vunpack.c.l.bf16 %v822_v4 }
  0x99   :  { %311 = vmatpush.bf16.msrb.mxu0 %v296_v14 }
  0x9a   :  { %v337_v13 = vmul.f32 %v922_v20, %v770_v7  ;;  %v338_v14 = vmul.f32 %v922_v20, %v771_v8  ;;  %v396_v16 = vmul.f32 %v922_v20, %v782_v11 }
  0x9e   :  { %v289_v27 = vpop.permute.xlu0 %288  ;;  %v344_v63 = vpop.permute.xlu2 %343 }
  0x9f   :  { %v405_v29 = vpop.permute.xlu1 %404  ;;  %v295_v30 = vsel %vm294_vm4, %v287_v54, %v289_v27  ;;  %v852_v54 = vmov 0   ;;  %v341_v27 = vpack.c.bf16 %v338_v14, %v337_v13 }
  0xa0   :  { %312 = vmatpush.bf16.msrb.mxu0 %v295_v30  ;;  %v410_v35 = vsel %vm408_vm5, %v405_v29, %v407_v6  ;;  %841 = vset.pattern.permute.xlu1 %v852_v54  ;;  %v795_v29 = vunpack.c.h.bf16 %v825_v15 }
  0xa1   :  { %425 = vmatpush.bf16.msrb.mxu2 %v410_v35  ;;  %840 = vset.pattern.permute.xlu0 %v852_v54  ;;  %v559_v35 = vld [vmem:[%s1089_s3 + $0x18] sm:$0xff] }
  0xa2   :  { %572 = vperm.xlu1 %841, %v558_v52   ;;  %839 = vset.pattern.permute.xlu2 %v852_v54  ;;  %v799_v54 = vunpack.c.h.bf16 %v826_v51 }
  0xa3   :  { %685 = vmatmul.msk.bf16.gmra.mxu2 %vm94_vm2, %v171_v28  ;;  %696 = vmatmul.msk.bf16.vlgmr.msrb.gmra.mxu0 %vm94_vm2, %v284_v31  ;;  %v794_v28 = vunpack.c.l.bf16 %v825_v15  ;;  %v399_v31 = vpack.c.bf16 %v397_v17, %v396_v16 }
  0xa4   :  { %691 = vmatmul.msk.bf16.gmra.mxu3 %vm94_vm2, %v228_v36  ;;  %567 = vperm.xlu0 %840, %v557_v18  }
  0xa5   :  { %562 = vperm.xlu2 %839, %v556_v19   ;;  %v508_v36 = vmul.f32 %v922_v20, %v794_v28 }
  0xa6   :  { %v462_v40 = vpop.permute.xlu0 %461  ;;  %v521_v21 = vpop.permute.xlu2 %520 }
  0xa7   :  { %v464_v41 = vpop.permute.xlu1 %463  ;;  %679 = vmatmul.msk.bf16.gmra.mxu1 %vm94_vm2, %v41_v37  ;;  %v509_v37 = vmul.f32 %v922_v20, %v795_v29 }
  0xa8   :  { %v467_v44 = vsel %vm465_vm6, %v462_v40, %v464_v41  ;;  %v820_v40 = vld [vmem:[%s1088_s0 + $0x58] sm:$0xff]  }
  0xa9   :  { %482 = vmatpush.bf16.msrb.mxu3 %v467_v44  ;;  %v774_v43 = vunpack.c.l.bf16 %v820_v40  ;;  %v775_v44 = vunpack.c.h.bf16 %v820_v40  ;;  %v512_v46 = vpack.c.bf16 %v509_v37, %v508_v36 }
  0xaa   :  { %590 = vperm.xlu1 %841, %v584_v0  }
  0xab   :  { %v339_v49 = vmul.f32 %v922_v20, %v774_v43  ;;  %v340_v50 = vmul.f32 %v922_v20, %v775_v44  ;;  %v843_v44 = vld [vmem:[%s1091_s5] ss:$0 sm:$0xff] }
  0xac   :  { %600 = vperm.xlu0 %840, %v586_v34  }
  0xad   :  { %577 = vperm.xlu2 %839, %v559_v35   ;;  %v342_v52 = vpack.c.bf16 %v340_v50, %v339_v49 }
  0xae   :  { %v350_v55 = vpop.permute.xlu0 %349 }
  0xaf   :  { %v353_v56 = vsel %vm351_vm7, %v348_v32, %v350_v55  ;;  %v401_v57 = vpop.permute.xlu1 %400  ;;  %v790_v32 = vunpack.c.l.bf16 %v824_v22  ;;  %v510_v55 = vmul.f32 %v922_v20, %v798_v53 }
  0xb0   :  { %368 = vmatpush.bf16.msra.mxu1 %v353_v56  ;;  %v409_v59 = vsel %vm408_vm5, %v401_v57, %v403_v47  ;;  %v511_v56 = vmul.f32 %v922_v20, %v799_v54 }
  0xb1   :  { %426 = vmatpush.bf16.msrb.mxu2 %v409_v59  ;;  %v453_v38 = vmul.f32 %v922_v20, %v790_v32 }
  0xb2   :  { %605 = vperm.xlu1 %841, %v587_v23   ;;  %v513_v57 = vpack.c.bf16 %v511_v56, %v510_v55 }
  0xb3   :  { %697 = vmatmul.msk.bf16.gmra.mxu0 %vm94_vm2, %v285_v58  ;;  %v456_v47 = vpack.c.bf16 %v454_v39, %v453_v38 }
  0xb4   :  { %708 = vmatmul.msk.bf16.vlgmr.msrb.gmra.mxu2 %vm94_vm2, %v398_v60 }
  0xb5   :  { %595 = vperm.xlu2 %839, %v585_v48  }
  0xb6   :  { %v458_v5 = vpop.permute.xlu0 %457 }
  0xb7   :  { %v460_v6 = vpop.permute.xlu1 %459 }
  0xb8   :  { %v466_v9 = vsel %vm465_vm6, %v458_v5, %v460_v6 }
  0xb9   :  { %483 = vmatpush.bf16.msrb.mxu3 %v466_v9 }
  0xbc   :  { %714 = vmatmul.msk.bf16.vlgmr.msrb.gmra.mxu3 %vm94_vm2, %v455_v10 }
  0xbe   :  { %v346_v24 = vpop.permute.xlu0 %345 }
  0xbf   :  { %v519_v25 = vpop.permute.xlu1 %518  ;;  %v352_v26 = vsel %vm351_vm7, %v344_v63, %v346_v24 }
  0xc0   :  { %v524_v30 = vsel %vm522_vm8, %v519_v25, %v521_v21  ;;  %369 = vmatpush.bf16.msra.mxu1 %v352_v26 }
  0xc1   :  { %539 = vmatpush.bf16.msra.mxu0 %v524_v30 }
  0xc3   :  { %702 = vmatmul.msk.bf16.vlgmr.msra.gmra.mxu1 %vm94_vm2, %v341_v27 }
  0xc4   :  { %709 = vmatmul.msk.bf16.gmra.mxu2 %vm94_vm2, %v399_v31 }
  0xc6   :  { %v515_v41 = vpop.permute.xlu0 %514 }
  0xc7   :  { %v517_v42 = vpop.permute.xlu1 %516 }
  0xc8   :  { %v523_v45 = vsel %vm522_vm8, %v515_v41, %v517_v42 }
  0xc9   :  { %540 = vmatpush.bf16.msra.mxu0 %v523_v45 }
  0xcc   :  { %720 = vmatmul.msk.bf16.vlgmr.msra.gmra.mxu0 %vm94_vm2, %v512_v46  ;;  %715 = vmatmul.msk.bf16.gmra.mxu3 %vm94_vm2, %v456_v47 }
  0xd3   :  { %703 = vmatmul.msk.bf16.gmra.mxu1 %vm94_vm2, %v342_v52 }
  0xdc   :  { %721 = vmatmul.msk.bf16.gmra.mxu0 %vm94_vm2, %v513_v57 }
  0xff   :  { %v563_v18 = vpop.permute.xlu2 %562 }
 0x104   :  { %v115_v58 = vpop.f32.mrf.mxu1  ;;  %v110_v59 = vpop.f32.mrf.mxu0 }
 0x107   :  { %v578_v36 = vpop.permute.xlu2 %577 }
 0x10c   :  { %v117_v60 = vpop.f32.mrf.mxu1  ;;  %v112_v62 = vpop.f32.mrf.mxu0 }
 0x10f   :  { %v596_v56 = vpop.permute.xlu2 %595 }
 0x114   :  { %v147_v63 = vpop.f32.mrf.mxu1  ;;  %v573_v21 = vpop.permute.xlu1 %572 }
 0x115   :  { %v148_v9 = vadd.f32 %v147_v63, %v110_v59 }
 0x116   :  { %v200_v61 = vpop.f32.mrf.mxu2  ;;  %v568_v49 = vpop.permute.xlu0 %567 }
 0x117   :  { %v257_v0 = vpop.f32.mrf.mxu3  ;;  %v210_v12 = vadd.f32 %v200_v61, %v148_v9 }
 0x119   :  { %v267_v14 = vadd.f32 %v257_v0, %v210_v12 }
 0x11c   :  { %v149_v3 = vpop.f32.mrf.mxu1  ;;  %v591_v38 = vpop.permute.xlu1 %590 }
 0x11d   :  { %v150_v15 = vadd.f32 %v149_v3, %v112_v62 }
 0x11e   :  { %v202_v1 = vpop.f32.mrf.mxu2  ;;  %v601_v9 = vpop.permute.xlu0 %600 }
 0x11f   :  { %v259_v4 = vpop.f32.mrf.mxu3  ;;  %v211_v22 = vadd.f32 %v202_v1, %v150_v15 }
 0x120   :  { %v314_v2 = vpop.f32.mrf.mxu0 }
 0x121   :  { %v324_v17 = vadd.f32 %v314_v2, %v267_v14  ;;  %v268_v27 = vadd.f32 %v259_v4, %v211_v22 }
 0x124   :  { %v152_v7 = vpop.f32.mrf.mxu1 }
 0x125   :  { %v153_v28 = vadd.f32 %v152_v7, %v115_v58 }
 0x126   :  { %v205_v5 = vpop.f32.mrf.mxu2 }
 0x127   :  { %v262_v8 = vpop.f32.mrf.mxu3  ;;  %v212_v33 = vadd.f32 %v205_v5, %v153_v28 }
 0x128   :  { %v316_v6 = vpop.f32.mrf.mxu0 }
 0x129   :  { %v325_v29 = vadd.f32 %v316_v6, %v268_v27  ;;  %v269_v42 = vadd.f32 %v262_v8, %v212_v33 }
 0x12c   :  { %v154_v11 = vpop.f32.mrf.mxu1 }
 0x12d   :  { %v155_v43 = vadd.f32 %v154_v11, %v117_v60 }
 0x12e   :  { %v207_v20 = vpop.f32.mrf.mxu2 }
 0x12f   :  { %v264_v13 = vpop.f32.mrf.mxu3  ;;  %v213_v50 = vadd.f32 %v207_v20, %v155_v43 }
 0x130   :  { %v319_v10 = vpop.f32.mrf.mxu0 }
 0x131   :  { %v326_v46 = vadd.f32 %v319_v10, %v269_v42  ;;  %v270_v59 = vadd.f32 %v264_v13, %v213_v50 }
 0x137   :  { %v428_v16 = vpop.f32.mrf.mxu2 }
 0x138   :  { %v321_v23 = vpop.f32.mrf.mxu0 }
 0x139   :  { %v327_v63 = vadd.f32 %v321_v23, %v270_v59 }
 0x13f   :  { %v485_v25 = vpop.f32.mrf.mxu3  ;;  %v430_v30 = vpop.f32.mrf.mxu2 }
 0x140   :  { %v371_v19 = vpop.f32.mrf.mxu1 }
 0x141   :  { %v381_v24 = vadd.f32 %v371_v19, %v324_v17 }
 0x143   :  { %v438_v26 = vadd.f32 %v428_v16, %v381_v24  ;;  %v606_v24 = vpop.permute.xlu1 %605 }
 0x145   :  { %v495_v31 = vadd.f32 %v485_v25, %v438_v26 }
 0x147   :  { %v487_v39 = vpop.f32.mrf.mxu3  ;;  %v433_v53 = vpop.f32.mrf.mxu2 }
 0x148   :  { %v373_v32 = vpop.f32.mrf.mxu1 }
 0x149   :  { %v382_v34 = vadd.f32 %v373_v32, %v325_v29  ;;  %v542_v35 = vpop.f32.mrf.mxu0 }
 0x14a   :  { %v552_v37 = vadd.f32 %v542_v35, %v495_v31 }
 0x14b   :  { %v439_v40 = vadd.f32 %v430_v30, %v382_v34 }
 0x14c   :  { %v580_v41 = vmul.f32 %v563_v18, %v552_v37 }
 0x14d   :  { %v496_v47 = vadd.f32 %v487_v39, %v439_v40 }
 0x14e   :  { %v608_v45 = vadd.f32 %v591_v38, %v580_v41 }
 0x14f   :  { %v490_v60 = vpop.f32.mrf.mxu3  ;;  %v435_v8 = vpop.f32.mrf.mxu2 }
 0x150   :  { %v376_v48 = vpop.f32.mrf.mxu1  ;;  %v616_v54 = vadd.f32 %v843_v44, %v608_v45 }
 0x151   :  { %v383_v51 = vadd.f32 %v376_v48, %v326_v46  ;;  %v544_v52 = vpop.f32.mrf.mxu0 }
 0x152   :  { %v553_v55 = vadd.f32 %v544_v52, %v496_v47  ;;  %v624_v61 = vmul.f32 0.2, %v616_v54  ;;  %vm620_vm9 = vcmp.ge.f32.partialorder %v616_v54, 0.0 }
 0x153   :  { %v440_v58 = vadd.f32 %v433_v53, %v383_v51 }
 0x154   :  { %v581_v57 = vmul.f32 %v568_v49, %v553_v55  ;;  %v628_v5 = vsel %vm620_vm9, %v616_v54, %v624_v61 }
 0x155   :  { %v497_v1 = vadd.f32 %v490_v60, %v440_v58  ;;  %v632_v12 = vmul.f32 1.4142135, %v628_v5 }
 0x156   :  { %v609_v62 = vadd.f32 %v596_v56, %v581_v57 }
 0x157   :  { %v492_v16 = vpop.f32.mrf.mxu3 }
 0x158   :  { %v617_v0 = vadd.f32 %v843_v44, %v609_v62  ;;  %v378_v2 = vpop.f32.mrf.mxu1 }
 0x159   :  { %v384_v3 = vadd.f32 %v378_v2, %v327_v63  ;;  %v547_v4 = vpop.f32.mrf.mxu0 }
 0x15a   :  { %vm621_vm10 = vcmp.ge.f32.partialorder %v617_v0, 0.0  ;;  %v625_v6 = vmul.f32 0.2, %v617_v0  ;;  %v554_v7 = vadd.f32 %v547_v4, %v497_v1 }
 0x15b   :  { %v441_v10 = vadd.f32 %v435_v8, %v384_v3 }
 0x15c   :  { %v629_v20 = vsel %vm621_vm10, %v617_v0, %v625_v6  ;;  %v582_v11 = vmul.f32 %v573_v21, %v554_v7 }
 0x15d   :  { %v633_v13 = vmul.f32 1.4142135, %v629_v20  ;;  %v498_v17 = vadd.f32 %v492_v16, %v441_v10 }
 0x15e   :  { %v610_v14 = vadd.f32 %v601_v9, %v582_v11 }
 0x15f   :  { %v803_v15 = vpack.c.bf16 %v633_v13, %v632_v12 }
 0x160   :  { %v618_v19 = vadd.f32 %v843_v44, %v610_v14 }
 0x161   :  { %804 = vst [vmem:[%s1092_s6] sm:$0xff] %v803_v15   ;;  %v549_v18 = vpop.f32.mrf.mxu0 }
 0x162   :  { %v555_v22 = vadd.f32 %v549_v18, %v498_v17  ;;  %v626_v25 = vmul.f32 0.2, %v618_v19  ;;  %vm622_vm11 = vcmp.ge.f32.partialorder %v618_v19, 0.0 }
 0x164   :  { %v583_v23 = vmul.f32 %v578_v36, %v555_v22  ;;  %v630_v21 = vsel %vm622_vm11, %v618_v19, %v626_v25 }
 0x165   :  { %v634_v30 = vmul.f32 1.4142135, %v630_v21 }
 0x166   :  { %v611_v26 = vadd.f32 %v606_v24, %v583_v23 }
 0x168   :  { %v619_v27 = vadd.f32 %v843_v44, %v611_v26 }
 0x16a   :  { %vm623_vm12 = vcmp.ge.f32.partialorder %v619_v27, 0.0  ;;  %v627_v28 = vmul.f32 0.2, %v619_v27 }
 0x16c   :  { %v631_v29 = vsel %vm623_vm12, %v619_v27, %v627_v28 }
 0x16d   :  { %v635_v31 = vmul.f32 1.4142135, %v631_v29 }
 0x16f   :  { %v808_v32 = vpack.c.bf16 %v635_v31, %v634_v30 }
 0x171   :  { %827 = vst [vmem:[%s1092_s6 + $0x8] sm:$0xff] %v808_v32  }

// kernel: gfpgan_forward.21
= control target key start
LH: loop header
LB: loop body
LE: loop exit
PB: predicated region body
PF: predicated region fallthrough
CT: control target
= control target key end

     0   :  { %s950_s21 = smov 0   ;;  %s1087_s0 = inlined_call_operand.vmem [shape: bf16[4,9,16,32], index: 0, kind: input, shape index: {}]   ;;  %s1088_s1 = inlined_call_operand.vmem [shape: bf16[32,256], index: 1, kind: input, shape index: {}]   ;;  %s1089_s2 = inlined_call_operand.vmem [shape: f32[1,32], index: 2, kind: input, shape index: {}]   ;;  %s1090_s3 = inlined_call_operand.vmem [shape: f32[16,1], index: 3, kind: input, shape index: {}]   ;;  %s1091_s4 = inlined_call_operand.vmem [shape: f32[16,1], index: 4, kind: input, shape index: {}]   ;;  %s1092_s5 = inlined_call_operand.vmem [shape: f32[4,1,128], index: 5, kind: input, shape index: {}]   ;;  %s1093_s6 = inlined_call_operand.vmem [shape: bf16[4,16,128], index: 6, kind: output, shape index: {}]  }
   0x1 LB: > { %s760_s22 = sadd.s32 4294967295, %s904_s21   ;;  %p764_p0 = scmp.ge.s32.totalorder %s904_s21, 1  ;;  %s904_s21 = sphi %s950_s21, %s16_s21  }
   0x2   : > { %p220_p1 = scmp.lt.s32.totalorder %s904_s21, 5 }
   0x4   : > { %p221_p2 = pnand %p764_p0, %p220_p1 }
   0x5   : > { %s906_s7 = smov (!%p221_p2), 127   ;;  %s907_s8 = smov (!%p221_p2), 126  }
   0x6   : > { %224 = sbr.rel (%p221_p2) target bundleno = 364 (0x16c), region = 44  ;;  %s908_s17 = smov (!%p221_p2), 118  }
   0x7   : > { %s909_s18 = smov (!%p221_p2), 117   ;;  %s910_s19 = smov (!%p221_p2), 108  }
   0x8   : > { %s911_s20 = smov (!%p221_p2), 107   ;;  %s912_s23 = smov (!%p221_p2), 116  }
   0x9   : > { %s913_s24 = smov (!%p221_p2), 106   ;;  %p253_p3 = scmp.lt.s32.totalorder (!%p221_p2), %s760_s22, 3 }
   0xb   : > { %v780_v0 = vld [vmem:[%s1088_s1 + $0x10] sm:$0xf]  ;;  %v825_v1 = vld [vmem:[%s1088_s1 + $0x14] sm:$0xf0]  ;;  %v772_v3 = vld [vmem:[%s1088_s1] sm:$0xf] }
   0xc   : > { %v781_v2 = vor.u32 %v825_v1, %v780_v0  ;;  %v823_v4 = vld [vmem:[%s1088_s1 + $0x4] sm:$0xf0]  ;;  %v824_v6 = vld [vmem:[%s1088_s1 + $0x14] sm:$0xf]  ;;  %v782_v7 = vld [vmem:[%s1088_s1 + $0x18] sm:$0xf0] }
   0xd   : > { %v773_v5 = vor.u32 %v823_v4, %v772_v3  ;;  %v822_v8 = vld [vmem:[%s1088_s1 + $0x4] sm:$0xf]  ;;  %v774_v9 = vld [vmem:[%s1088_s1 + $0x8] sm:$0xf0]  ;;  %v785_v10 = vor.u32 %v824_v6, %v782_v7  ;;  %vm386_vm0 = vcmask 1031168   ;;  %s1095_s22 = smov (!%p253_p3, %s760_s22), 3 }
   0xe   : > { %314 = vrot.lane.b32.xlu0 %v781_v2, %s906_s7  ;;  %382 = vrot.lane.b32.xlu2 %v781_v2, %s907_s8  ;;  %v777_v11 = vor.u32 %v822_v8, %v774_v9  ;;  %s875_s25 = smul.u32 72, %s1095_s22  ;;  %v999_v19 = vld [vmem:[%s1089_s2] ss:$0 sm:$0xff]  ;;  %v793_v21 = vld [vmem:[%s1088_s1 + $0x10] sm:$0xf]  ;;  %vm318_vm1 = vcmask 1039360   ;;  %s260_s27 = scalar_lea.vmem %s1092_s5, %s1095_s22 }
   0xf   : > { %310 = vrot.lane.b32.xlu1 %v773_v5, %s906_s7  ;;  %v821_v22 = vld [vmem:[%s1088_s1 + $0x14] sm:$0xf0]  ;;  %v789_v28 = vld [vmem:[%s1088_s1] sm:$0xf]  ;;  %v820_v29 = vld [vmem:[%s1088_s1 + $0x4] sm:$0xf0] }
  0x10   : > { %s993_s28 = scalar_lea.vmem %s1087_s0, %s875_s25  ;;  %v794_v24 = vor.u32 %v821_v22, %v793_v21  ;;  %v790_v34 = vor.u32 %v820_v29, %v789_v28  ;;  %vm323_vm2 = vcmask 261120   ;;  %vm426_vm3 = vcmask 965632   ;;  %v664_v29 = vld [vmem:[%s1091_s4] sm:$0xff]  ;;  %s819_s30 = sshll.u32 %s1095_s22, 3 }
  0x11   : > { %v867_v18 = vld [vmem:[%s993_s28 + $0x8] sm:$0xff]   ;;  %v827_v25 = vld [vmem:[%s993_s28] sm:$0xff]   ;;  %v868_v42 = vld [vmem:[%s993_s28 + $0x10] sm:$0xff]   ;;  %vm466_vm4 = vcmask 957440   ;;  %vm546_vm5 = vcmask 883712   ;;  %vm586_vm6 = vcmask 875520   ;;  %s265_s9 = scalar_lea.vmem %s1093_s6, %s819_s30 }
  0x12   : > { %v832_v20 = vunpack.c.l.bf16 %v867_v18  ;;  %v833_v23 = vunpack.c.h.bf16 %v867_v18  ;;  %362 = vmatpush.bf16.msra.mxu1 %v794_v24  ;;  %v828_v30 = vunpack.c.l.bf16 %v827_v25  ;;  %v829_v35 = vunpack.c.h.bf16 %v827_v25  ;;  %v869_v43 = vld [vmem:[%s993_s28 + $0x18] sm:$0xff]   ;;  %v870_v62 = vld [vmem:[%s993_s28 + $0x20] sm:$0xff]  }
  0x13   : > { %v836_v46 = vunpack.c.l.bf16 %v868_v42  ;;  %v837_v47 = vunpack.c.h.bf16 %v868_v42  ;;  %v840_v49 = vunpack.c.l.bf16 %v869_v43  ;;  %v841_v50 = vunpack.c.h.bf16 %v869_v43 }
  0x14   : > { %v287_v27 = vmul.f32 %v999_v19, %v832_v20  ;;  %v288_v33 = vmul.f32 %v999_v19, %v833_v23  ;;  %v275_v36 = vmul.f32 %v999_v19, %v828_v30  ;;  %v276_v38 = vmul.f32 %v999_v19, %v829_v35  ;;  %v651_v30 = vld [vmem:[%s1090_s3 + $0x8] sm:$0xff] }
  0x15   : > { %v375_v52 = vmul.f32 %v999_v19, %v836_v46  ;;  %v376_v53 = vmul.f32 %v999_v19, %v837_v47  ;;  %v415_v54 = vmul.f32 %v999_v19, %v840_v49  ;;  %v416_v55 = vmul.f32 %v999_v19, %v841_v50 }
  0x16   : > { %316 = vrot.lane.b32.xlu0 %v785_v10, %s906_s7  ;;  %384 = vrot.lane.b32.xlu2 %v785_v10, %s907_s8  ;;  %v289_v40 = vpack.c.bf16 %v288_v33, %v287_v27  ;;  %v277_v41 = vpack.c.bf16 %v276_v38, %v275_v36  ;;  %v845_v3 = vunpack.c.h.bf16 %v870_v62  ;;  %vm506_vm7 = vcmask 949248   ;;  %v650_v33 = vld [vmem:[%s1090_s3] sm:$0xff] }
  0x17   : > { %312 = vrot.lane.b32.xlu1 %v777_v11, %s906_s7  ;;  %363 = vmatpush.bf16.msra.mxu1 %v790_v34  ;;  %v377_v59 = vpack.c.bf16 %v376_v53, %v375_v52  ;;  %v417_v61 = vpack.c.bf16 %v416_v55, %v415_v54  ;;  %vm626_vm8 = vcmask 867328  }
  0x18   : > { %v456_v6 = vmul.f32 %v999_v19, %v845_v3 }
  0x1a   : > { %795 = vmatmul.msk.bf16.vlgmr.msra.gmra.mxu1 %vm323_vm2, %v277_v41 }
  0x1e   : > { %422 = vrot.lane.b32.xlu0 %v781_v2, %s908_s17  ;;  %378 = vrot.lane.b32.xlu2 %v773_v5, %s907_s8 }
  0x1f   : > { %424 = vrot.lane.b32.xlu1 %v785_v10, %s908_s17 }
  0x26   : > { %380 = vrot.lane.b32.xlu0 %v777_v11, %s907_s8  ;;  %420 = vrot.lane.b32.xlu2 %v777_v11, %s908_s17 }
  0x27   : > { %418 = vrot.lane.b32.xlu1 %v773_v5, %s908_s17 }
  0x2e   : > { %462 = vrot.lane.b32.xlu0 %v781_v2, %s909_s18  ;;  %458 = vrot.lane.b32.xlu2 %v773_v5, %s909_s18 }
  0x2f   : > { %464 = vrot.lane.b32.xlu1 %v785_v10, %s909_s18 }
  0x36   : > { %460 = vrot.lane.b32.xlu0 %v777_v11, %s909_s18  ;;  %544 = vrot.lane.b32.xlu2 %v785_v10, %s910_s19 }
  0x37   : > { %542 = vrot.lane.b32.xlu1 %v781_v2, %s910_s19 }
  0x3e   : > { %582 = vrot.lane.b32.xlu0 %v781_v2, %s911_s20  ;;  %502 = vrot.lane.b32.xlu2 %v781_v2, %s912_s23 }
  0x3f   : > { %584 = vrot.lane.b32.xlu1 %v785_v10, %s911_s20 }
  0x46   : > { %504 = vrot.lane.b32.xlu0 %v785_v10, %s912_s23  ;;  %540 = vrot.lane.b32.xlu2 %v777_v11, %s910_s19 }
  0x47   : > { %538 = vrot.lane.b32.xlu1 %v773_v5, %s910_s19 }
  0x4e   : > { %578 = vrot.lane.b32.xlu0 %v773_v5, %s911_s20  ;;  %498 = vrot.lane.b32.xlu2 %v773_v5, %s912_s23 }
  0x4f   : > { %580 = vrot.lane.b32.xlu1 %v777_v11, %s911_s20 }
  0x56   : > { %500 = vrot.lane.b32.xlu0 %v777_v11, %s912_s23  ;;  %624 = vrot.lane.b32.xlu2 %v785_v10, %s913_s24 }
  0x57   : > { %622 = vrot.lane.b32.xlu1 %v781_v2, %s913_s24  ;;  %v844_v2 = vunpack.c.l.bf16 %v870_v62 }
  0x5e   : > { %618 = vrot.lane.b32.xlu0 %v773_v5, %s913_s24  ;;  %v455_v5 = vmul.f32 %v999_v19, %v844_v2 }
  0x5f   : > { %620 = vrot.lane.b32.xlu1 %v777_v11, %s913_s24 }
  0x60   : > { %v457_v11 = vpack.c.bf16 %v456_v6, %v455_v5 }
  0x68   : > { %v383_v12 = vpop.permute.xlu2 %382 }
  0x70   : > { %v385_v13 = vpop.permute.xlu2 %384 }
  0x71   : > { %v388_v14 = vsel %vm386_vm0, %v383_v12, %v385_v13  ;;  %v872_v13 = vld [vmem:[%s993_s28 + $0x30] sm:$0xff]  }
  0x72   : > { %400 = vmatpush.bf16.msra.mxu2 %v388_v14  ;;  %v874_v14 = vld [vmem:[%s993_s28 + $0x40] sm:$0xff]   ;;  %v852_v20 = vunpack.c.l.bf16 %v872_v13  ;;  %v853_v22 = vunpack.c.h.bf16 %v872_v13 }
  0x74   : > { %v535_v27 = vmul.f32 %v999_v19, %v852_v20  ;;  %v536_v28 = vmul.f32 %v999_v19, %v853_v22 }
  0x76   : > { %v537_v38 = vpack.c.bf16 %v536_v28, %v535_v27 }
  0x78   : > { %v379_v17 = vpop.permute.xlu2 %378 }
  0x80   : > { %v315_v15 = vpop.permute.xlu0 %314  ;;  %v421_v37 = vpop.permute.xlu2 %420 }
  0x81   : > { %v311_v16 = vpop.permute.xlu1 %310 }
  0x88   : > { %v317_v26 = vpop.permute.xlu0 %316  ;;  %v459_v51 = vpop.permute.xlu2 %458 }
  0x89   : > { %v313_v31 = vpop.permute.xlu1 %312  ;;  %v320_v32 = vsel %vm318_vm1, %v315_v15, %v317_v26 }
  0x8a   : > { %333 = vmatpush.bf16.msra.mxu0 %v320_v32  ;;  %v319_v39 = vsel %vm318_vm1, %v311_v16, %v313_v31  ;;  %v860_v16 = vunpack.c.l.bf16 %v874_v14  ;;  %v873_v31 = vld [vmem:[%s993_s28 + $0x38] sm:$0xff]   ;;  %v914_v32 = vmov 0  }
  0x8b   : > { %895 = vset.pattern.permute.xlu1 %v914_v32  ;;  %894 = vset.pattern.permute.xlu0 %v914_v32 }
  0x8c   : > { %v615_v23 = vmul.f32 %v999_v19, %v860_v16  ;;  %668 = vperm.xlu1 %895, %v664_v29   ;;  %659 = vperm.xlu0 %894, %v651_v30  }
  0x8d   : > { %893 = vset.pattern.permute.xlu2 %v914_v32 }
  0x8e   : > { %334 = vmatpush.bf16.msra.mxu0 %v319_v39  ;;  %v856_v39 = vunpack.c.l.bf16 %v873_v31  ;;  %654 = vperm.xlu2 %893, %v650_v33   ;;  %v897_v33 = vld [vmem:[%s260_s27] ss:$0 sm:$0xff] }
  0x90   : > { %v423_v44 = vpop.permute.xlu0 %422  ;;  %v545_v63 = vpop.permute.xlu2 %544  ;;  %v575_v42 = vmul.f32 %v999_v19, %v856_v39 }
  0x91   : > { %v425_v45 = vpop.permute.xlu1 %424  ;;  %786 = vmatmul.msk.bf16.vlgmr.msra.gmra.mxu0 %vm323_vm2, %v289_v40  ;;  %v857_v40 = vunpack.c.h.bf16 %v873_v31 }
  0x92   : > { %v428_v48 = vsel %vm426_vm3, %v423_v44, %v425_v45  ;;  %v871_v44 = vld [vmem:[%s993_s28 + $0x28] sm:$0xff]  }
  0x93   : > { %440 = vmatpush.bf16.msra.mxu3 %v428_v48  ;;  %v576_v43 = vmul.f32 %v999_v19, %v857_v40  ;;  %v665_v45 = vld [vmem:[%s1091_s4 + $0x8] sm:$0xff]  ;;  %v848_v48 = vunpack.c.l.bf16 %v871_v44  ;;  %v849_v49 = vunpack.c.h.bf16 %v871_v44 }
  0x95   : > { %v495_v52 = vmul.f32 %v999_v19, %v848_v48  ;;  %v496_v53 = vmul.f32 %v999_v19, %v849_v49 }
  0x96   : > { %673 = vperm.xlu2 %893, %v665_v45  }
  0x98   : > { %v381_v56 = vpop.permute.xlu0 %380  ;;  %v503_v10 = vpop.permute.xlu2 %502 }
  0x99   : > { %v419_v57 = vpop.permute.xlu1 %418  ;;  %v387_v58 = vsel %vm386_vm0, %v379_v17, %v381_v56  ;;  %v861_v17 = vunpack.c.h.bf16 %v874_v14 }
  0x9a   : > { %401 = vmatpush.bf16.msra.mxu2 %v387_v58  ;;  %v427_v60 = vsel %vm426_vm3, %v419_v57, %v421_v37  ;;  %v497_v58 = vpack.c.bf16 %v496_v53, %v495_v52 }
  0x9b   : > { %441 = vmatpush.bf16.msra.mxu3 %v427_v60  ;;  %v616_v24 = vmul.f32 %v999_v19, %v861_v17 }
  0x9d   : > { %798 = vmatmul.msk.bf16.vlgmr.msra.gmra.mxu2 %vm323_vm2, %v377_v59  ;;  %v617_v26 = vpack.c.bf16 %v616_v24, %v615_v23 }
  0x9e   : > { %801 = vmatmul.msk.bf16.vlgmr.msra.gmra.mxu3 %vm323_vm2, %v417_v61 }
  0xa0   : > { %v463_v0 = vpop.permute.xlu0 %462  ;;  %v541_v25 = vpop.permute.xlu2 %540 }
  0xa1   : > { %v465_v1 = vpop.permute.xlu1 %464 }
  0xa2   : > { %v468_v4 = vsel %vm466_vm4, %v463_v0, %v465_v1  ;;  %v365_v0 = vpop.f32.mrf.mxu1 }
  0xa3   : > { %480 = vmatpush.bf16.msrb.mxu0 %v468_v4 }
  0xa8   : > { %v461_v7 = vpop.permute.xlu0 %460  ;;  %v499_v41 = vpop.permute.xlu2 %498 }
  0xa9   : > { %v543_v8 = vpop.permute.xlu1 %542  ;;  %v467_v9 = vsel %vm466_vm4, %v459_v51, %v461_v7  ;;  %v577_v51 = vpack.c.bf16 %v576_v43, %v575_v42 }
  0xaa   : > { %481 = vmatpush.bf16.msrb.mxu0 %v467_v9  ;;  %v548_v12 = vsel %vm546_vm5, %v543_v8, %v545_v63  ;;  %v367_v6 = vpop.f32.mrf.mxu1 }
  0xab   : > { %560 = vmatpush.bf16.msrb.mxu2 %v548_v12 }
  0xad   : > { %804 = vmatmul.msk.bf16.vlgmr.msrb.gmra.mxu0 %vm323_vm2, %v457_v11 }
  0xb0   : > { %v583_v15 = vpop.permute.xlu0 %582  ;;  %v625_v54 = vpop.permute.xlu2 %624 }
  0xb1   : > { %v585_v18 = vpop.permute.xlu1 %584 }
  0xb2   : > { %v588_v21 = vsel %vm586_vm6, %v583_v15, %v585_v18 }
  0xb3   : > { %600 = vmatpush.bf16.msrb.mxu3 %v588_v21 }
  0xb8   : > { %v505_v34 = vpop.permute.xlu0 %504 }
  0xb9   : > { %v539_v35 = vpop.permute.xlu1 %538  ;;  %v508_v36 = vsel %vm506_vm7, %v503_v10, %v505_v34 }
  0xba   : > { %520 = vmatpush.bf16.msrb.mxu1 %v508_v36  ;;  %v547_v37 = vsel %vm546_vm5, %v539_v35, %v541_v25 }
  0xbb   : > { %561 = vmatpush.bf16.msrb.mxu2 %v547_v37 }
  0xbe   : > { %810 = vmatmul.msk.bf16.vlgmr.msrb.gmra.mxu2 %vm323_vm2, %v537_v38 }
  0xc0   : > { %v579_v46 = vpop.permute.xlu0 %578 }
  0xc1   : > { %v581_v47 = vpop.permute.xlu1 %580 }
  0xc2   : > { %v587_v50 = vsel %vm586_vm6, %v579_v46, %v581_v47 }
  0xc3   : > { %601 = vmatpush.bf16.msrb.mxu3 %v587_v50 }
  0xc6   : > { %813 = vmatmul.msk.bf16.vlgmr.msrb.gmra.mxu3 %vm323_vm2, %v577_v51 }
  0xc8   : > { %v501_v55 = vpop.permute.xlu0 %500 }
  0xc9   : > { %v623_v56 = vpop.permute.xlu1 %622  ;;  %v507_v57 = vsel %vm506_vm7, %v499_v41, %v501_v55 }
  0xca   : > { %v628_v59 = vsel %vm626_vm8, %v623_v56, %v625_v54  ;;  %521 = vmatpush.bf16.msrb.mxu1 %v507_v57 }
  0xcb   : > { %640 = vmatpush.bf16.msra.mxu0 %v628_v59 }
  0xcd   : > { %807 = vmatmul.msk.bf16.vlgmr.msrb.gmra.mxu1 %vm323_vm2, %v497_v58 }
  0xd0   : > { %v619_v60 = vpop.permute.xlu0 %618 }
  0xd1   : > { %v621_v61 = vpop.permute.xlu1 %620 }
  0xd2   : > { %v627_v62 = vsel %vm626_vm8, %v619_v60, %v621_v61 }
  0xd3   : > { %641 = vmatpush.bf16.msra.mxu0 %v627_v62 }
  0xd6   : > { %816 = vmatmul.msk.bf16.vlgmr.msra.gmra.mxu0 %vm323_vm2, %v617_v26 }
  0xe8   : > { %v655_v27 = vpop.permute.xlu2 %654 }
  0xf0   : > { %v674_v41 = vpop.permute.xlu2 %673 }
  0xfe   : > { %v669_v29 = vpop.permute.xlu1 %668  ;;  %v660_v37 = vpop.permute.xlu0 %659 }
 0x10e   : > { %v336_v19 = vpop.f32.mrf.mxu0 }
 0x10f   : > { %v366_v2 = vadd.f32 %v365_v0, %v336_v19 }
 0x116   : > { %v338_v63 = vpop.f32.mrf.mxu0 }
 0x117   : > { %v368_v9 = vadd.f32 %v367_v6, %v338_v63 }
 0x120   : > { %v403_v1 = vpop.f32.mrf.mxu2 }
 0x121   : > { %v443_v3 = vpop.f32.mrf.mxu3  ;;  %v408_v4 = vadd.f32 %v403_v1, %v366_v2 }
 0x123   : > { %v448_v8 = vadd.f32 %v443_v3, %v408_v4 }
 0x128   : > { %v405_v7 = vpop.f32.mrf.mxu2 }
 0x129   : > { %v445_v10 = vpop.f32.mrf.mxu3  ;;  %v409_v12 = vadd.f32 %v405_v7, %v368_v9 }
 0x12a   : > { %v483_v5 = vpop.f32.mrf.mxu0 }
 0x12b   : > { %v488_v11 = vadd.f32 %v483_v5, %v448_v8  ;;  %v449_v17 = vadd.f32 %v445_v10, %v409_v12 }
 0x132   : > { %v485_v14 = vpop.f32.mrf.mxu0 }
 0x133   : > { %v489_v21 = vadd.f32 %v485_v14, %v449_v17 }
 0x141   : > { %v563_v16 = vpop.f32.mrf.mxu2 }
 0x149   : > { %v603_v20 = vpop.f32.mrf.mxu3  ;;  %v565_v28 = vpop.f32.mrf.mxu2 }
 0x14a   : > { %v523_v13 = vpop.f32.mrf.mxu1 }
 0x14b   : > { %v528_v15 = vadd.f32 %v523_v13, %v488_v11 }
 0x14d   : > { %v568_v18 = vadd.f32 %v563_v16, %v528_v15 }
 0x14f   : > { %v608_v22 = vadd.f32 %v603_v20, %v568_v18 }
 0x151   : > { %v605_v34 = vpop.f32.mrf.mxu3 }
 0x152   : > { %v525_v23 = vpop.f32.mrf.mxu1 }
 0x153   : > { %v529_v24 = vadd.f32 %v525_v23, %v489_v21  ;;  %v643_v25 = vpop.f32.mrf.mxu0 }
 0x154   : > { %v648_v26 = vadd.f32 %v643_v25, %v608_v22 }
 0x155   : > { %v569_v31 = vadd.f32 %v565_v28, %v529_v24 }
 0x156   : > { %v662_v30 = vmul.f32 %v655_v27, %v648_v26 }
 0x157   : > { %v609_v35 = vadd.f32 %v605_v34, %v569_v31 }
 0x158   : > { %v676_v32 = vadd.f32 %v669_v29, %v662_v30 }
 0x15a   : > { %v682_v38 = vadd.f32 %v897_v33, %v676_v32 }
 0x15b   : > { %v645_v36 = vpop.f32.mrf.mxu0 }
 0x15c   : > { %v649_v39 = vadd.f32 %v645_v36, %v609_v35  ;;  %v686_v42 = vmul.f32 0.2, %v682_v38  ;;  %vm684_vm9 = vcmp.ge.f32.partialorder %v682_v38, 0.0 }
 0x15e   : > { %v663_v40 = vmul.f32 %v660_v37, %v649_v39  ;;  %v688_v45 = vsel %vm684_vm9, %v682_v38, %v686_v42 }
 0x15f   : > { %v690_v48 = vmul.f32 1.4142135, %v688_v45 }
 0x160   : > { %v677_v43 = vadd.f32 %v674_v41, %v663_v40 }
 0x162   : > { %v683_v44 = vadd.f32 %v897_v33, %v677_v43 }
 0x164   : > { %vm685_vm10 = vcmp.ge.f32.partialorder %v683_v44, 0.0  ;;  %v687_v46 = vmul.f32 0.2, %v683_v44 }
 0x166   : > { %v689_v47 = vsel %vm685_vm10, %v683_v44, %v687_v46 }
 0x167   : > { %v691_v49 = vmul.f32 1.4142135, %v689_v47 }
 0x169   : > { %v865_v50 = vpack.c.bf16 %v691_v49, %v690_v48 }
 0x16b   : > { %866 = vst [vmem:[%s265_s9] sm:$0xff] %v865_v50  }
 0x16c PF: > { %s16_s21 = sadd.s32 1, %s904_s21  }
 0x16d   : > { %p13_p4 = scmp.ge.s32.totalorder %s16_s21, 6  }
 0x16f   :  { %15 = sbr.rel (!%p13_p4) target bundleno = 1 (0x1), region = 85 }

// kernel: gfpgan_forward.23
= control target key start
LH: loop header
LB: loop body
LE: loop exit
PB: predicated region body
PF: predicated region fallthrough
CT: control target
= control target key end

     0   :  { %v102_v3 = vmov 0   ;;  %vm47_vm0 = vcmask 130048   ;;  %s166_s1 = inlined_call_operand.vmem [shape: bf16[16,256], index: 1, kind: input, shape index: {}]   ;;  %s167_s0 = inlined_call_operand.vmem [shape: bf16[1,1,8,16], index: 0, kind: input, shape index: {}]   ;;  %s168_s2 = inlined_call_operand.vmem [shape: f32[1,16], index: 2, kind: input, shape index: {}]   ;;  %s169_s3 = inlined_call_operand.vmem [shape: f32[8,1], index: 3, kind: input, shape index: {}]   ;;  %s170_s4 = inlined_call_operand.vmem [shape: f32[8,256], index: 4, kind: input, shape index: {}]   ;;  %s171_s5 = inlined_call_operand.vmem [shape: f32[1,8,256], index: 5, kind: output, shape index: {}]  }
   0x1   :  { %v89_v0 = vld [vmem:[%s166_s1] sm:$0xf]  ;;  %v98_v1 = vld [vmem:[%s166_s1 + $0x4] sm:$0xf0]  ;;  %v97_v2 = vld [vmem:[%s166_s1 + $0x4] sm:$0xf]  ;;  %100 = vset.pattern.permute.xlu0 %v102_v3 }
   0x2   :  { %v90_v4 = vor.u32 %v98_v1, %v89_v0  ;;  %v91_v5 = vld [vmem:[%s166_s1 + $0x8] sm:$0xf0]  ;;  %v21_v6 = vld [vmem:[%s167_s0] sm:$0xf] }
   0x3   :  { %v94_v7 = vor.u32 %v97_v2, %v91_v5  ;;  %v22_v8 = vunpack.c.l.bf16 %v21_v6  ;;  %v101_v9 = vld [vmem:[%s168_s2] ss:$0 sm:$0xff]  ;;  %v78_v17 = vld [vmem:[%s170_s4 + $0x8] sm:$0xff] }
   0x4   :  { %v31_v10 = vld [vmem:[%s169_s3] sm:$0xff]  ;;  %58 = vmatpush.bf16.msra.mxu0 %v90_v4 }
   0x5   :  { %34 = vperm.xlu0 %100, %v31_v10   ;;  %71 = vmatpush.bf16.msra.mxu1 %v94_v7  ;;  %v27_v11 = vmul.f32 %v101_v9, %v22_v8  ;;  %v77_v15 = vld [vmem:[%s170_s4] sm:$0xff] }
   0x7   :  { %v28_v12 = vpack.c.bf16 %v27_v11, %v27_v11 }
   0x9   :  { %95 = vmatmul.msk.bf16.vlgmr.msra.gmra.mxu0 %vm47_vm0, %v28_v12  ;;  %96 = vmatmul.msk.bf16.vlgmr.msra.gmra.mxu1 %vm47_vm0, %v28_v12 }
  0x77   :  { %v35_v13 = vpop.permute.xlu0 %34 }
  0x86   :  { %v60_v14 = vpop.f32.mrf.mxu0  ;;  %v73_v16 = vpop.f32.mrf.mxu1 }
  0x87   :  { %v61_v18 = vadd.f32 %v60_v14, %v35_v13  ;;  %v74_v19 = vadd.f32 %v73_v16, %v35_v13 }
  0x89   :  { %v79_v20 = vadd.f32 %v77_v15, %v61_v18  ;;  %v80_v21 = vadd.f32 %v78_v17, %v74_v19 }
  0x8b   :  { %81 = vst [vmem:[%s171_s5] sm:$0xff] %v79_v20 }
  0x8c   :  { %82 = vst [vmem:[%s171_s5 + $0x8] sm:$0xff] %v80_v21 }
  0x8e   :  { %v62_v22 = vpop.f32.mrf.mxu0  ;;  %v75_v23 = vpop.f32.mrf.mxu1 }

// kernel: gfpgan_forward.22
= control target key start
LH: loop header
LB: loop body
LE: loop exit
PB: predicated region body
PF: predicated region fallthrough
CT: control target
= control target key end

     0   :  { %s928_s29 = smov 127   ;;  %s929_s10 = smov 126   ;;  %vm82_vm0 = vcmask 130048   ;;  %vm205_vm1 = vcmask 1031168   ;;  %vm75_vm2 = vcmask 1039360   ;;  %vm279_vm3 = vcmask 900096   ;;  %s1146_s1 = inlined_call_operand.vmem [shape: bf16[16,512], index: 1, kind: input, shape index: {}]   ;;  %s1147_s2 = inlined_call_operand.vmem [shape: f32[1,16], index: 2, kind: input, shape index: {}]   ;;  %s1148_s0 = inlined_call_operand.vmem [shape: bf16[1,9,16,16], index: 0, kind: input, shape index: {}]   ;;  %s1149_s4 = inlined_call_operand.vmem [shape: f32[16,1], index: 4, kind: input, shape index: {}]   ;;  %s1150_s3 = inlined_call_operand.vmem [shape: f32[16,1], index: 3, kind: input, shape index: {}]   ;;  %s1151_s5 = inlined_call_operand.vmem [shape: f32[1,1,384], index: 5, kind: input, shape index: {}]   ;;  %s1152_s6 = inlined_call_operand.vmem [shape: bf16[1,16,384], index: 6, kind: output, shape index: {}]  }
   0x1   :  { %v805_v0 = vld [vmem:[%s1146_s1 + $0x8] sm:$0xf]  ;;  %v870_v1 = vld [vmem:[%s1146_s1 + $0x14] sm:$0xf0]  ;;  %v797_v2 = vld [vmem:[%s1146_s1] sm:$0xf] }
   0x2   :  { %v806_v3 = vor.u32 %v870_v1, %v805_v0  ;;  %v869_v4 = vld [vmem:[%s1146_s1 + $0xc] sm:$0xf0]  ;;  %v868_v6 = vld [vmem:[%s1146_s1 + $0xc] sm:$0xf]  ;;  %v807_v7 = vld [vmem:[%s1146_s1 + $0x18] sm:$0xf0] }
   0x3   :  { %v798_v5 = vor.u32 %v869_v4, %v797_v2  ;;  %v867_v8 = vld [vmem:[%s1146_s1 + $0x4] sm:$0xf]  ;;  %v799_v9 = vld [vmem:[%s1146_s1 + $0x10] sm:$0xf0]  ;;  %v810_v10 = vor.u32 %v868_v6, %v807_v7  ;;  %s930_s15 = smov 110   ;;  %s931_s16 = smov 109  }
   0x4   :  { %71 = vrot.lane.b32.xlu0 %v806_v3, %s928_s29  ;;  %v802_v11 = vor.u32 %v867_v8, %v799_v9  ;;  %s932_s17 = smov 108   ;;  %s933_s18 = smov 92   ;;  %v816_v12 = vld [vmem:[%s1146_s1] sm:$0xf]  ;;  %v865_v13 = vld [vmem:[%s1146_s1 + $0xc] sm:$0xf0] }
   0x5   :  { %67 = vrot.lane.b32.xlu1 %v798_v5, %s928_s29  ;;  %197 = vrot.lane.b32.xlu2 %v798_v5, %s929_s10  ;;  %s934_s19 = smov 91   ;;  %s935_s20 = smov 90   ;;  %v872_v14 = vld [vmem:[%s1148_s0] sm:$0xff]   ;;  %v817_v15 = vor.u32 %v865_v13, %v816_v12  ;;  %v907_v24 = vld [vmem:[%s1148_s0 + $0x8] sm:$0xff]   ;;  %vm353_vm4 = vcmask 891904   ;;  %vm427_vm5 = vcmask 883712  }
   0x6   :  { %v873_v16 = vunpack.c.l.bf16 %v872_v14  ;;  %v874_v17 = vunpack.c.h.bf16 %v872_v14  ;;  %v1008_v18 = vld [vmem:[%s1147_s2] ss:$0 sm:$0xff]  ;;  %v877_v27 = vunpack.c.l.bf16 %v907_v24  ;;  %v878_v28 = vunpack.c.h.bf16 %v907_v24  ;;  %v864_v32 = vld [vmem:[%s1146_s1 + $0x4] sm:$0xf]  ;;  %v818_v33 = vld [vmem:[%s1146_s1 + $0x10] sm:$0xf0] }
   0x7   :  { %154 = vmatpush.bf16.msra.mxu3 %v817_v15  ;;  %v824_v34 = vld [vmem:[%s1146_s1 + $0x8] sm:$0xf]  ;;  %v866_v35 = vld [vmem:[%s1146_s1 + $0x14] sm:$0xf0]  ;;  %v908_v36 = vld [vmem:[%s1148_s0 + $0x10] sm:$0xff]   ;;  %v821_v40 = vor.u32 %v864_v32, %v818_v33  ;;  %vm501_vm6 = vcmask 752640  }
   0x8   :  { %v32_v19 = vmul.f32 %v1008_v18, %v873_v16  ;;  %v33_v20 = vmul.f32 %v1008_v18, %v874_v17  ;;  %v44_v30 = vmul.f32 %v1008_v18, %v877_v27  ;;  %v45_v31 = vmul.f32 %v1008_v18, %v878_v28  ;;  %v909_v58 = vld [vmem:[%s1148_s0 + $0x18] sm:$0xff]   ;;  %v911_v9 = vld [vmem:[%s1148_s0 + $0x28] sm:$0xff]  }
   0x9   :  { %v825_v43 = vor.u32 %v866_v35, %v824_v34  ;;  %v881_v44 = vunpack.c.l.bf16 %v908_v36  ;;  %v882_v45 = vunpack.c.h.bf16 %v908_v36  ;;  %v885_v62 = vunpack.c.l.bf16 %v909_v58 }
   0xa   :  { %v1012_v21 = vpack.c.bf16 %v33_v20, %v32_v19  ;;  %v46_v39 = vpack.c.bf16 %v45_v31, %v44_v30  ;;  %v886_v63 = vunpack.c.h.bf16 %v909_v58  ;;  %v893_v14 = vunpack.c.l.bf16 %v911_v9  ;;  %v912_v31 = vld [vmem:[%s1148_s0 + $0x30] sm:$0xff]   ;;  %v725_v58 = vld [vmem:[%s1149_s4] sm:$0xff] }
   0xb   :  { %v194_v49 = vmul.f32 %v1008_v18, %v881_v44  ;;  %v195_v50 = vmul.f32 %v1008_v18, %v882_v45  ;;  %v268_v1 = vmul.f32 %v1008_v18, %v885_v62  ;;  %v894_v15 = vunpack.c.h.bf16 %v911_v9  ;;  %v726_v9 = vld [vmem:[%s1149_s4 + $0x8] sm:$0xff] }
   0xc   :  { %73 = vrot.lane.b32.xlu0 %v810_v10, %s928_s29  ;;  %826 = vmatmul.msk.bf16.vlgmr.msra.gmra.mxu3 %vm82_vm0, %v1012_v21  ;;  %v269_v2 = vmul.f32 %v1008_v18, %v886_v63  ;;  %v416_v19 = vmul.f32 %v1008_v18, %v893_v14  ;;  %vm575_vm7 = vcmask 744448   ;;  %vm649_vm8 = vcmask 736256  }
   0xd   :  { %69 = vrot.lane.b32.xlu1 %v802_v11, %s928_s29  ;;  %199 = vrot.lane.b32.xlu2 %v802_v11, %s929_s10  ;;  %v196_v55 = vpack.c.bf16 %v195_v50, %v194_v49  ;;  %v417_v20 = vmul.f32 %v1008_v18, %v894_v15 }
   0xe   :  { %v270_v6 = vpack.c.bf16 %v269_v2, %v268_v1  ;;  %v914_v2 = vld [vmem:[%s1148_s0 + $0x40] sm:$0xff]  }
  0x14   :  { %201 = vrot.lane.b32.xlu0 %v806_v3, %s929_s10 }
  0x15   :  { %273 = vrot.lane.b32.xlu1 %v802_v11, %s930_s15  ;;  %275 = vrot.lane.b32.xlu2 %v806_v3, %s930_s15 }
  0x1c   :  { %203 = vrot.lane.b32.xlu0 %v810_v10, %s929_s10 }
  0x1d   :  { %271 = vrot.lane.b32.xlu1 %v798_v5, %s930_s15  ;;  %277 = vrot.lane.b32.xlu2 %v810_v10, %s930_s15 }
  0x24   :  { %349 = vrot.lane.b32.xlu0 %v806_v3, %s931_s16 }
  0x25   :  { %351 = vrot.lane.b32.xlu1 %v810_v10, %s931_s16  ;;  %345 = vrot.lane.b32.xlu2 %v798_v5, %s931_s16 }
  0x2c   :  { %347 = vrot.lane.b32.xlu0 %v802_v11, %s931_s16 }
  0x2d   :  { %419 = vrot.lane.b32.xlu1 %v798_v5, %s932_s17  ;;  %421 = vrot.lane.b32.xlu2 %v802_v11, %s932_s17 }
  0x34   :  { %493 = vrot.lane.b32.xlu0 %v798_v5, %s933_s18 }
  0x35   :  { %495 = vrot.lane.b32.xlu1 %v802_v11, %s933_s18  ;;  %423 = vrot.lane.b32.xlu2 %v806_v3, %s932_s17 }
  0x3c   :  { %425 = vrot.lane.b32.xlu0 %v810_v10, %s932_s17 }
  0x3d   :  { %497 = vrot.lane.b32.xlu1 %v806_v3, %s933_s18  ;;  %569 = vrot.lane.b32.xlu2 %v802_v11, %s934_s19 }
  0x44   :  { %571 = vrot.lane.b32.xlu0 %v806_v3, %s934_s19 }
  0x45   :  { %499 = vrot.lane.b32.xlu1 %v810_v10, %s933_s18  ;;  %567 = vrot.lane.b32.xlu2 %v798_v5, %s934_s19 }
  0x4c   :  { %573 = vrot.lane.b32.xlu0 %v810_v10, %s934_s19 }
  0x4d   :  { %645 = vrot.lane.b32.xlu1 %v806_v3, %s935_s20  ;;  %647 = vrot.lane.b32.xlu2 %v810_v10, %s935_s20 }
  0x54   :  { %641 = vrot.lane.b32.xlu0 %v798_v5, %s935_s20 }
  0x55   :  { %643 = vrot.lane.b32.xlu1 %v802_v11, %s935_s20 }
  0x5f   :  { %v198_v22 = vpop.permute.xlu2 %197 }
  0x67   :  { %v200_v23 = vpop.permute.xlu2 %199 }
  0x68   :  { %v206_v38 = vsel %vm205_vm1, %v198_v22, %v200_v23 }
  0x6f   :  { %v276_v25 = vpop.permute.xlu2 %275 }
  0x76   :  { %v72_v26 = vpop.permute.xlu0 %71 }
  0x77   :  { %v68_v29 = vpop.permute.xlu1 %67  ;;  %v278_v46 = vpop.permute.xlu2 %277 }
  0x78   :  { %v282_v52 = vsel %vm279_vm3, %v276_v25, %v278_v46 }
  0x7e   :  { %v74_v37 = vpop.permute.xlu0 %73 }
  0x7f   :  { %v70_v41 = vpop.permute.xlu1 %69  ;;  %v78_v42 = vsel %vm75_vm2, %v72_v26, %v74_v37  ;;  %v346_v57 = vpop.permute.xlu2 %345  ;;  %v897_v37 = vunpack.c.l.bf16 %v912_v31 }
  0x80   :  { %v76_v47 = vsel %vm75_vm2, %v68_v29, %v70_v41  ;;  %v77_v48 = vsel %vm75_vm2, %v70_v41, %v72_v26  ;;  %121 = vmatpush.bf16.msra.mxu2 %v78_v42 }
  0x81   :  { %93 = vmatpush.bf16.msra.mxu0 %v76_v47  ;;  %107 = vmatpush.bf16.msra.mxu1 %v77_v48  ;;  %v490_v41 = vmul.f32 %v1008_v18, %v897_v37  ;;  %v913_v48 = vld [vmem:[%s1148_s0 + $0x38] sm:$0xff]  }
  0x83   :  { %813 = vmatmul.msk.bf16.vlgmr.msra.gmra.mxu2 %vm82_vm0, %v46_v39 }
  0x84   :  { %222 = vmatpush.bf16.msrb.mxu2 %v206_v38  ;;  %811 = vmatmul.msk.bf16.vlgmr.msra.gmra.mxu0 %vm82_vm0, %v46_v39  ;;  %v898_v38 = vunpack.c.h.bf16 %v912_v31 }
  0x85   :  { %168 = vmatpush.bf16.msrb.mxu0 %v821_v40  ;;  %182 = vmatpush.bf16.msrb.mxu1 %v825_v43 }
  0x86   :  { %812 = vmatmul.msk.bf16.vlgmr.msra.gmra.mxu1 %vm82_vm0, %v46_v39  ;;  %v202_v51 = vpop.permute.xlu0 %201  ;;  %v491_v42 = vmul.f32 %v1008_v18, %v898_v38 }
  0x87   :  { %v274_v53 = vpop.permute.xlu1 %273  ;;  %v207_v54 = vsel %vm205_vm1, %v200_v23, %v202_v51  ;;  %v422_v3 = vpop.permute.xlu2 %421 }
  0x88   :  { %236 = vmatpush.bf16.msrb.mxu3 %v207_v54  ;;  %v281_v56 = vsel %vm279_vm3, %v274_v53, %v276_v25  ;;  %v418_v25 = vpack.c.bf16 %v417_v20, %v416_v19  ;;  %v492_v46 = vpack.c.bf16 %v491_v42, %v490_v41  ;;  %v902_v54 = vunpack.c.h.bf16 %v913_v48 }
  0x89   :  { %310 = vmatpush.bf16.msra.mxu2 %v281_v56 }
  0x8b   :  { %832 = vmatmul.msk.bf16.vlgmr.msrb.gmra.mxu3 %vm82_vm0, %v196_v55 }
  0x8c   :  { %324 = vmatpush.bf16.msra.mxu3 %v282_v52 }
  0x8e   :  { %v204_v59 = vpop.permute.xlu0 %203 }
  0x8f   :  { %v208_v60 = vsel %vm205_vm1, %v202_v51, %v204_v59  ;;  %v272_v61 = vpop.permute.xlu1 %271  ;;  %v424_v8 = vpop.permute.xlu2 %423  ;;  %v708_v59 = vld [vmem:[%s1150_s3 + $0x8] sm:$0xff] }
  0x90   :  { %v280_v0 = vsel %vm279_vm3, %v272_v61, %v274_v53  ;;  %250 = vmatpush.bf16.msra.mxu0 %v208_v60  ;;  %v429_v17 = vsel %vm427_vm5, %v422_v3, %v424_v8  ;;  %v901_v53 = vunpack.c.l.bf16 %v913_v48  ;;  %v936_v60 = vmov 0  }
  0x91   :  { %296 = vmatpush.bf16.msra.mxu1 %v280_v0  ;;  %926 = vset.pattern.permute.xlu1 %v936_v60 }
  0x92   :  { %v564_v56 = vmul.f32 %v1008_v18, %v901_v53  ;;  %729 = vperm.xlu1 %926, %v725_v58   ;;  %925 = vset.pattern.permute.xlu0 %v936_v60 }
  0x93   :  { %831 = vmatmul.msk.bf16.vlgmr.msrb.gmra.mxu2 %vm82_vm0, %v196_v55  ;;  %716 = vperm.xlu0 %925, %v708_v59  }
  0x94   :  { %827 = vmatmul.msk.bf16.vlgmr.msrb.gmra.mxu0 %vm82_vm0, %v1012_v21  ;;  %924 = vset.pattern.permute.xlu2 %v936_v60 }
  0x96   :  { %828 = vmatmul.msk.bf16.vlgmr.msrb.gmra.mxu1 %vm82_vm0, %v1012_v21  ;;  %v350_v4 = vpop.permute.xlu0 %349  ;;  %v910_v21 = vld [vmem:[%s1148_s0 + $0x20] sm:$0xff]  }
  0x97   :  { %v352_v5 = vpop.permute.xlu1 %351  ;;  %v570_v22 = vpop.permute.xlu2 %569  ;;  %v889_v26 = vunpack.c.l.bf16 %v910_v21  ;;  %v890_v27 = vunpack.c.h.bf16 %v910_v21 }
  0x98   :  { %v356_v7 = vsel %vm353_vm4, %v350_v4, %v352_v5 }
  0x99   :  { %398 = vmatpush.bf16.msrb.mxu2 %v356_v7  ;;  %v342_v29 = vmul.f32 %v1008_v18, %v889_v26  ;;  %v343_v30 = vmul.f32 %v1008_v18, %v890_v27 }
  0x9b   :  { %838 = vmatmul.msk.bf16.vlgmr.msra.gmra.mxu3 %vm82_vm0, %v270_v6  ;;  %v344_v35 = vpack.c.bf16 %v343_v30, %v342_v29 }
  0x9e   :  { %v348_v10 = vpop.permute.xlu0 %347 }
  0x9f   :  { %v355_v11 = vsel %vm353_vm4, %v348_v10, %v350_v4  ;;  %v354_v12 = vsel %vm353_vm4, %v346_v57, %v348_v10  ;;  %v420_v13 = vpop.permute.xlu1 %419  ;;  %v568_v36 = vpop.permute.xlu2 %567  ;;  %v565_v57 = vmul.f32 %v1008_v18, %v902_v54  ;;  %v906_v4 = vunpack.c.h.bf16 %v914_v2 }
  0xa0   :  { %384 = vmatpush.bf16.msrb.mxu1 %v355_v11  ;;  %v428_v16 = vsel %vm427_vm5, %v420_v13, %v422_v3  ;;  %370 = vmatpush.bf16.msrb.mxu0 %v354_v12  ;;  %v576_v40 = vsel %vm575_vm7, %v568_v36, %v570_v22  ;;  %v905_v3 = vunpack.c.l.bf16 %v914_v2  ;;  %v156_v10 = vpop.f32.mrf.mxu3 }
  0xa1   :  { %444 = vmatpush.bf16.msrb.mxu3 %v428_v16  ;;  %v566_v63 = vpack.c.bf16 %v565_v57, %v564_v56 }
  0xa2   :  { %v638_v5 = vmul.f32 %v1008_v18, %v905_v3 }
  0xa3   :  { %837 = vmatmul.msk.bf16.vlgmr.msra.gmra.mxu2 %vm82_vm0, %v270_v6 }
  0xa4   :  { %833 = vmatmul.msk.bf16.vlgmr.msra.gmra.mxu0 %vm82_vm0, %v196_v55 }
  0xa5   :  { %458 = vmatpush.bf16.msra.mxu0 %v429_v17 }
  0xa6   :  { %836 = vmatmul.msk.bf16.vlgmr.msra.gmra.mxu1 %vm82_vm0, %v270_v6  ;;  %v494_v23 = vpop.permute.xlu0 %493  ;;  %v639_v6 = vmul.f32 %v1008_v18, %v906_v4 }
  0xa7   :  { %v496_v24 = vpop.permute.xlu1 %495  ;;  %v648_v52 = vpop.permute.xlu2 %647 }
  0xa8   :  { %v502_v28 = vsel %vm501_vm6, %v494_v23, %v496_v24  ;;  %v640_v7 = vpack.c.bf16 %v639_v6, %v638_v5  ;;  %v158_v13 = vpop.f32.mrf.mxu3 }
  0xa9   :  { %518 = vmatpush.bf16.msra.mxu2 %v502_v28 }
  0xab   :  { %846 = vmatmul.msk.bf16.vlgmr.msrb.gmra.mxu3 %vm82_vm0, %v418_v25 }
  0xae   :  { %v426_v32 = vpop.permute.xlu0 %425 }
  0xaf   :  { %v430_v33 = vsel %vm427_vm5, %v424_v8, %v426_v32  ;;  %v498_v34 = vpop.permute.xlu1 %497  ;;  %v707_v8 = vld [vmem:[%s1150_s3] sm:$0xff] }
  0xb0   :  { %v503_v39 = vsel %vm501_vm6, %v496_v24, %v498_v34  ;;  %472 = vmatpush.bf16.msra.mxu1 %v430_v33  ;;  %711 = vperm.xlu2 %924, %v707_v8  }
  0xb1   :  { %532 = vmatpush.bf16.msra.mxu3 %v503_v39 }
  0xb3   :  { %843 = vmatmul.msk.bf16.vlgmr.msrb.gmra.mxu2 %vm82_vm0, %v344_v35 }
  0xb4   :  { %841 = vmatmul.msk.bf16.vlgmr.msrb.gmra.mxu0 %vm82_vm0, %v344_v35 }
  0xb6   :  { %842 = vmatmul.msk.bf16.vlgmr.msrb.gmra.mxu1 %vm82_vm0, %v344_v35  ;;  %v572_v43 = vpop.permute.xlu0 %571 }
  0xb7   :  { %592 = vmatpush.bf16.msrb.mxu1 %v576_v40  ;;  %v577_v44 = vsel %vm575_vm7, %v570_v22, %v572_v43  ;;  %v500_v45 = vpop.permute.xlu1 %499 }
  0xb8   :  { %v504_v47 = vsel %vm501_vm6, %v498_v34, %v500_v45  ;;  %606 = vmatpush.bf16.msrb.mxu2 %v577_v44  ;;  %734 = vperm.xlu2 %924, %v726_v9  }
  0xb9   :  { %546 = vmatpush.bf16.msrb.mxu0 %v504_v47 }
  0xbb   :  { %852 = vmatmul.msk.bf16.vlgmr.msra.gmra.mxu3 %vm82_vm0, %v492_v46 }
  0xbe   :  { %v574_v49 = vpop.permute.xlu0 %573 }
  0xbf   :  { %v578_v50 = vsel %vm575_vm7, %v572_v43, %v574_v49  ;;  %v646_v51 = vpop.permute.xlu1 %645 }
  0xc0   :  { %620 = vmatpush.bf16.msrb.mxu3 %v578_v50  ;;  %v652_v55 = vsel %vm649_vm8, %v646_v51, %v648_v52 }
  0xc3   :  { %851 = vmatmul.msk.bf16.vlgmr.msra.gmra.mxu2 %vm82_vm0, %v492_v46 }
  0xc4   :  { %847 = vmatmul.msk.bf16.vlgmr.msra.gmra.mxu0 %vm82_vm0, %v418_v25  ;;  %694 = vmatpush.bf16.msra.mxu2 %v652_v55 }
  0xc6   :  { %848 = vmatmul.msk.bf16.vlgmr.msra.gmra.mxu1 %vm82_vm0, %v418_v25  ;;  %v642_v61 = vpop.permute.xlu0 %641 }
  0xc7   :  { %v644_v62 = vpop.permute.xlu1 %643 }
  0xc8   :  { %v651_v0 = vsel %vm649_vm8, %v644_v62, %v646_v51  ;;  %v650_v1 = vsel %vm649_vm8, %v642_v61, %v644_v62 }
  0xc9   :  { %680 = vmatpush.bf16.msra.mxu1 %v651_v0  ;;  %666 = vmatpush.bf16.msra.mxu0 %v650_v1 }
  0xcb   :  { %858 = vmatmul.msk.bf16.vlgmr.msrb.gmra.mxu3 %vm82_vm0, %v566_v63 }
  0xd3   :  { %857 = vmatmul.msk.bf16.vlgmr.msrb.gmra.mxu2 %vm82_vm0, %v566_v63 }
  0xd4   :  { %853 = vmatmul.msk.bf16.vlgmr.msrb.gmra.mxu0 %vm82_vm0, %v492_v46 }
  0xd6   :  { %856 = vmatmul.msk.bf16.vlgmr.msrb.gmra.mxu1 %vm82_vm0, %v566_v63 }
  0xe3   :  { %863 = vmatmul.msk.bf16.vlgmr.msra.gmra.mxu2 %vm82_vm0, %v640_v7 }
  0xe4   :  { %861 = vmatmul.msk.bf16.vlgmr.msra.gmra.mxu0 %vm82_vm0, %v640_v7 }
  0xe6   :  { %862 = vmatmul.msk.bf16.vlgmr.msra.gmra.mxu1 %vm82_vm0, %v640_v7 }
 0x101   :  { %v95_v11 = vpop.f32.mrf.mxu0 }
 0x102   :  { %v157_v57 = vadd.f32 %v156_v10, %v95_v11 }
 0x103   :  { %v109_v18 = vpop.f32.mrf.mxu1 }
 0x106   :  { %v123_v12 = vpop.f32.mrf.mxu2 }
 0x109   :  { %v97_v14 = vpop.f32.mrf.mxu0 }
 0x10a   :  { %v159_v16 = vadd.f32 %v158_v13, %v97_v14 }
 0x10b   :  { %v111_v15 = vpop.f32.mrf.mxu1 }
 0x10e   :  { %v125_v17 = vpop.f32.mrf.mxu2  ;;  %v238_v19 = vpop.f32.mrf.mxu3 }
 0x111   :  { %v170_v20 = vpop.f32.mrf.mxu0 }
 0x112   :  { %v171_v22 = vadd.f32 %v170_v20, %v109_v18  ;;  %v712_v20 = vpop.permute.xlu2 %711 }
 0x113   :  { %v184_v21 = vpop.f32.mrf.mxu1 }
 0x114   :  { %v185_v23 = vadd.f32 %v184_v21, %v123_v12  ;;  %v258_v58 = vadd.f32 %v238_v19, %v171_v22 }
 0x116   :  { %v224_v24 = vpop.f32.mrf.mxu2  ;;  %v240_v29 = vpop.f32.mrf.mxu3 }
 0x117   :  { %v257_v59 = vadd.f32 %v224_v24, %v157_v57 }
 0x119   :  { %v172_v25 = vpop.f32.mrf.mxu0 }
 0x11a   :  { %v173_v27 = vadd.f32 %v172_v25, %v111_v15 }
 0x11b   :  { %v186_v26 = vpop.f32.mrf.mxu1 }
 0x11c   :  { %v187_v28 = vadd.f32 %v186_v26, %v125_v17  ;;  %v261_v8 = vadd.f32 %v240_v29, %v173_v27  ;;  %v1129_v26 = vld [vmem:[%s1151_s5] sm:$0x7] }
 0x11e   :  { %v226_v30 = vpop.f32.mrf.mxu2  ;;  %v326_v34 = vpop.f32.mrf.mxu3 }
 0x11f   :  { %v260_v31 = vadd.f32 %v226_v30, %v159_v16 }
 0x121   :  { %v252_v32 = vpop.f32.mrf.mxu0 }
 0x122   :  { %v259_v0 = vadd.f32 %v252_v32, %v185_v23 }
 0x123   :  { %v298_v33 = vpop.f32.mrf.mxu1 }
 0x124   :  { %v331_v60 = vadd.f32 %v298_v33, %v257_v59  ;;  %v333_v6 = vadd.f32 %v326_v34, %v259_v0  ;;  %v745_v34 = vperm.slane %v1129_v26, 0  ;;  %v717_v59 = vpop.permute.xlu0 %716 }
 0x126   :  { %v312_v35 = vpop.f32.mrf.mxu2  ;;  %v328_v38 = vpop.f32.mrf.mxu3 }
 0x127   :  { %v332_v61 = vadd.f32 %v312_v35, %v258_v58  ;;  %v746_v35 = vperm.slane %v1129_v26, 1 }
 0x129   :  { %v254_v36 = vpop.f32.mrf.mxu0 }
 0x12a   :  { %v262_v10 = vadd.f32 %v254_v36, %v187_v28 }
 0x12b   :  { %v300_v37 = vpop.f32.mrf.mxu1 }
 0x12c   :  { %v334_v11 = vadd.f32 %v300_v37, %v260_v31  ;;  %v336_v28 = vadd.f32 %v328_v38, %v262_v10  ;;  %v730_v31 = vpop.permute.xlu1 %729 }
 0x12e   :  { %v314_v39 = vpop.f32.mrf.mxu2  ;;  %v446_v43 = vpop.f32.mrf.mxu3 }
 0x12f   :  { %v335_v14 = vadd.f32 %v314_v39, %v261_v8 }
 0x131   :  { %v372_v40 = vpop.f32.mrf.mxu0 }
 0x132   :  { %v405_v1 = vadd.f32 %v372_v40, %v331_v60 }
 0x133   :  { %v386_v41 = vpop.f32.mrf.mxu1 }
 0x134   :  { %v406_v2 = vadd.f32 %v386_v41, %v332_v61  ;;  %v479_v7 = vadd.f32 %v446_v43, %v405_v1 }
 0x136   :  { %v400_v42 = vpop.f32.mrf.mxu2  ;;  %v448_v49 = vpop.f32.mrf.mxu3 }
 0x137   :  { %v407_v9 = vadd.f32 %v400_v42, %v333_v6  ;;  %v735_v6 = vpop.permute.xlu2 %734 }
 0x139   :  { %v374_v44 = vpop.f32.mrf.mxu0 }
 0x13a   :  { %v408_v21 = vadd.f32 %v374_v44, %v334_v11 }
 0x13b   :  { %v388_v45 = vpop.f32.mrf.mxu1 }
 0x13c   :  { %v409_v22 = vadd.f32 %v388_v45, %v335_v14  ;;  %v482_v36 = vadd.f32 %v448_v49, %v408_v21 }
 0x13e   :  { %v402_v46 = vpop.f32.mrf.mxu2  ;;  %v534_v53 = vpop.f32.mrf.mxu3 }
 0x13f   :  { %v410_v37 = vadd.f32 %v402_v46, %v336_v28 }
 0x141   :  { %v460_v47 = vpop.f32.mrf.mxu0 }
 0x142   :  { %v480_v5 = vadd.f32 %v460_v47, %v406_v2 }
 0x143   :  { %v474_v48 = vpop.f32.mrf.mxu1 }
 0x144   :  { %v554_v18 = vadd.f32 %v534_v53, %v480_v5  ;;  %v481_v15 = vadd.f32 %v474_v48, %v407_v9 }
 0x146   :  { %v520_v50 = vpop.f32.mrf.mxu2  ;;  %v536_v62 = vpop.f32.mrf.mxu3 }
 0x147   :  { %v553_v12 = vadd.f32 %v520_v50, %v479_v7  ;;  %v747_v50 = vperm.slane %v1129_v26, 2 }
 0x149   :  { %v462_v51 = vpop.f32.mrf.mxu0 }
 0x14a   :  { %v483_v30 = vadd.f32 %v462_v51, %v409_v22 }
 0x14b   :  { %v476_v52 = vpop.f32.mrf.mxu1 }
 0x14c   :  { %v484_v43 = vadd.f32 %v476_v52, %v410_v37  ;;  %v557_v44 = vadd.f32 %v536_v62, %v483_v30 }
 0x14e   :  { %v522_v54 = vpop.f32.mrf.mxu2  ;;  %v622_v17 = vpop.f32.mrf.mxu3 }
 0x14f   :  { %v556_v45 = vadd.f32 %v522_v54, %v482_v36 }
 0x151   :  { %v548_v55 = vpop.f32.mrf.mxu0 }
 0x152   :  { %v555_v23 = vadd.f32 %v548_v55, %v481_v15 }
 0x153   :  { %v594_v56 = vpop.f32.mrf.mxu1 }
 0x154   :  { %v627_v16 = vadd.f32 %v594_v56, %v553_v12  ;;  %v629_v39 = vadd.f32 %v622_v17, %v555_v23 }
 0x156   :  { %v608_v63 = vpop.f32.mrf.mxu2  ;;  %v624_v60 = vpop.f32.mrf.mxu3 }
 0x157   :  { %v628_v19 = vadd.f32 %v608_v63, %v554_v18 }
 0x159   :  { %v550_v3 = vpop.f32.mrf.mxu0 }
 0x15a   :  { %v558_v51 = vadd.f32 %v550_v3, %v484_v43 }
 0x15b   :  { %v596_v4 = vpop.f32.mrf.mxu1 }
 0x15c   :  { %v630_v53 = vadd.f32 %v596_v4, %v556_v45  ;;  %v632_v4 = vadd.f32 %v624_v60, %v558_v51 }
 0x15e   :  { %v610_v13 = vpop.f32.mrf.mxu2 }
 0x15f   :  { %v631_v55 = vadd.f32 %v610_v13, %v557_v44 }
 0x161   :  { %v668_v24 = vpop.f32.mrf.mxu0 }
 0x162   :  { %v701_v27 = vadd.f32 %v668_v24, %v627_v16 }
 0x163   :  { %v682_v25 = vpop.f32.mrf.mxu1 }
 0x164   :  { %v702_v29 = vadd.f32 %v682_v25, %v628_v19  ;;  %v719_v32 = vmul.f32 %v712_v20, %v701_v27 }
 0x166   :  { %v720_v33 = vmul.f32 %v712_v20, %v702_v29  ;;  %v737_v40 = vadd.f32 %v730_v31, %v719_v32  ;;  %v696_v42 = vpop.f32.mrf.mxu2 }
 0x167   :  { %v703_v47 = vadd.f32 %v696_v42, %v629_v39 }
 0x168   :  { %v738_v41 = vadd.f32 %v730_v31, %v720_v33  ;;  %v751_v48 = vadd.f32 %v745_v34, %v737_v40 }
 0x169   :  { %v721_v56 = vmul.f32 %v712_v20, %v703_v47  ;;  %v670_v57 = vpop.f32.mrf.mxu0 }
 0x16a   :  { %v752_v38 = vadd.f32 %v746_v35, %v738_v41  ;;  %vm757_vm9 = vcmp.ge.f32.partialorder %v751_v48, 0.0  ;;  %v763_v46 = vmul.f32 0.2, %v751_v48  ;;  %v704_v61 = vadd.f32 %v670_v57, %v630_v53 }
 0x16b   :  { %v684_v58 = vpop.f32.mrf.mxu1  ;;  %v739_v52 = vadd.f32 %v730_v31, %v721_v56 }
 0x16c   :  { %vm758_vm10 = vcmp.ge.f32.partialorder %v752_v38, 0.0  ;;  %v764_v49 = vmul.f32 0.2, %v752_v38  ;;  %v705_v54 = vadd.f32 %v684_v58, %v631_v55  ;;  %v769_v62 = vsel %vm757_vm9, %v751_v48, %v763_v46 }
 0x16d   :  { %v775_v0 = vmul.f32 1.4142135, %v769_v62  ;;  %v753_v2 = vadd.f32 %v747_v50, %v739_v52  ;;  %v722_v3 = vmul.f32 %v717_v59, %v704_v61 }
 0x16e   :  { %v770_v63 = vsel %vm758_vm10, %v752_v38, %v764_v49  ;;  %v723_v5 = vmul.f32 %v717_v59, %v705_v54  ;;  %v698_v7 = vpop.f32.mrf.mxu2 }
 0x16f   :  { %v776_v1 = vmul.f32 1.4142135, %v770_v63  ;;  %vm759_vm11 = vcmp.ge.f32.partialorder %v753_v2, 0.0  ;;  %v765_v9 = vmul.f32 0.2, %v753_v2  ;;  %v740_v18 = vadd.f32 %v735_v6, %v722_v3 }
 0x170   :  { %v741_v12 = vadd.f32 %v735_v6, %v723_v5  ;;  %v706_v13 = vadd.f32 %v698_v7, %v632_v4 }
 0x171   :  { %v781_v8 = vpack.c.bf16 %v776_v1, %v775_v0  ;;  %v771_v10 = vsel %vm759_vm11, %v753_v2, %v765_v9  ;;  %v754_v11 = vadd.f32 %v745_v34, %v740_v18 }
 0x172   :  { %v777_v14 = vmul.f32 1.4142135, %v771_v10  ;;  %v755_v15 = vadd.f32 %v746_v35, %v741_v12  ;;  %v724_v16 = vmul.f32 %v717_v59, %v706_v13 }
 0x173   :  { %785 = vst [vmem:[%s1152_s6] sm:$0xff] %v781_v8  ;;  %vm760_vm12 = vcmp.ge.f32.partialorder %v754_v11, 0.0  ;;  %v766_v17 = vmul.f32 0.2, %v754_v11 }
 0x174   :  { %v782_v19 = vpack.c.bf16 %v777_v14, %v777_v14  ;;  %vm761_vm13 = vcmp.ge.f32.partialorder %v755_v15, 0.0  ;;  %v767_v20 = vmul.f32 0.2, %v755_v15  ;;  %v742_v21 = vadd.f32 %v735_v6, %v724_v16 }
 0x175   :  { %v772_v22 = vsel %vm760_vm12, %v754_v11, %v766_v17 }
 0x176   :  { %786 = vst [vmem:[%s1152_s6 + $0x8] sm:$0xf] %v782_v19  ;;  %v773_v23 = vsel %vm761_vm13, %v755_v15, %v767_v20  ;;  %v778_v24 = vmul.f32 1.4142135, %v772_v22  ;;  %v756_v25 = vadd.f32 %v747_v50, %v742_v21 }
 0x177   :  { %v779_v26 = vmul.f32 1.4142135, %v773_v23 }
 0x178   :  { %vm762_vm14 = vcmp.ge.f32.partialorder %v756_v25, 0.0  ;;  %v768_v27 = vmul.f32 0.2, %v756_v25 }
 0x179   :  { %v783_v29 = vpack.c.bf16 %v779_v26, %v778_v24 }
 0x17a   :  { %v774_v28 = vsel %vm762_vm14, %v756_v25, %v768_v27 }
 0x17b   :  { %787 = vst [vmem:[%s1152_s6 + $0xc] sm:$0xff] %v783_v29  ;;  %v780_v30 = vmul.f32 1.4142135, %v774_v28 }
 0x17d   :  { %v784_v31 = vpack.c.bf16 %v780_v30, %v780_v30 }
 0x17f   :  { %788 = vst [vmem:[%s1152_s6 + $0x14] sm:$0xf] %v784_v31 }

</bundles_post_ra>
